<compile_context>
chip_gen: v5e
topology: v5e:2x2
jax: 0.10.0
libtpu: 0.0.40
codegen_flags: <defaults>
</compile_context>

<pallas_src>
import jax
import jax.numpy as jnp
from jax.experimental import pallas as pl
from jax.experimental.pallas import tpu as pltpu

# --- hyperparameters implied by the module -----------------------------------
D = 3        # d_model == input_size == 3
NHEAD = 3    # nhead=3  -> head_dim = 1, softmax scale = 1/sqrt(1) = 1
HID = 32     # dim_feedforward == hidden_size
L = 10       # num_layers
OUT = 3      # output_size
EPS = 1e-5   # layer_norm_eps (PyTorch default)


def _layernorm(t, w, b):
    # t: (B, S, D); w, b: (1, D)
    mu = jnp.mean(t, axis=-1, keepdims=True)
    var = jnp.mean(jnp.square(t - mu), axis=-1, keepdims=True)
    return (t - mu) * jax.lax.rsqrt(var + EPS) * w + b


def transformer_encoder_kernel(
    x_ref,                              # (B_BLK, S, D)
    w_in_ref, b_in_ref,                 # (L, D, 3D)  pre-transposed, (L, 1, 3D)
    ow_ref, ob_ref,                     # (L, D, D)   pre-transposed, (L, 1, D)
    n1w_ref, n1b_ref, n2w_ref, n2b_ref, # (L, 1, D) each
    l1w_ref, l1b_ref,                   # (L, D, HID) pre-transposed, (L, 1, HID)
    l2w_ref, l2b_ref,                   # (L, HID, D) pre-transposed, (L, 1, D)
    fcw_ref, fcb_ref,                   # (D, OUT)    pre-transposed, (1, OUT)
    o_ref,                              # (B_BLK, 1, OUT)
):
    x = x_ref[...].astype(jnp.float32)                      # (B, S, D)
    Bb, S, _ = x.shape

    for l in range(L):                                      # static unroll over layers
        # ---- fused Q/K/V projection: K=3 contraction as a 3-term VPU MAD ----
        w_in = w_in_ref[l]                                  # (D, 3D)
        qkv = (x[:, :, 0:1] * w_in[0:1, :]
               + x[:, :, 1:2] * w_in[1:2, :]
               + x[:, :, 2:3] * w_in[2:3, :]
               + b_in_ref[l])                               # (B, S, 3D)
        q = qkv[:, :, 0:D]                                  # (B, S, NHEAD)   head_dim = 1
        k = qkv[:, :, D:2 * D]
        v = qkv[:, :, 2 * D:3 * D]

        # one small minor-dim transpose each (seq -> lane axis) instead of per-head .T
        k_t = jnp.swapaxes(k, -1, -2)                       # (B, NHEAD, S)
        v_t = jnp.swapaxes(v, -1, -2)                       # (B, NHEAD, S)

        ow_t = ow_ref[l]                                    # (D, D): row h = out-proj col for head h
        attn = ob_ref[l]                                    # (1, D), broadcast
        for h in range(NHEAD):                              # NHEAD = 3, head_dim = 1, scale = 1
            qh = q[:, :, h:h + 1]                           # (B, S, 1)
            kh = k_t[:, h:h + 1, :]                         # (B, 1, S)
            vh = v_t[:, h:h + 1, :]                         # (B, 1, S)
            scores = qh * kh                                # (B, S, S) outer product
            m = jnp.max(scores, axis=-1, keepdims=True)
            p = jnp.exp(scores - m)
            denom = jnp.sum(p, axis=-1, keepdims=True)      # (B, S, 1)
            num = jnp.sum(p * vh, axis=-1, keepdims=True)   # (B, S, 1)  == p @ v_h
            head = num * pl.reciprocal(denom, approx=True)  # EUP vrcp
            attn = attn + head * ow_t[h:h + 1, :]           # (B,S,1)*(1,D) -> (B,S,D)

        # ---- residual + post-norm 1 ----
        x = _layernorm(x + attn, n1w_ref[l], n1b_ref[l])

        # ---- feed-forward: Linear(D->HID) -> ReLU -> Linear(HID->D) ----
        w1 = l1w_ref[l]                                     # (D, HID)
        h1 = (x[:, :, 0:1] * w1[0:1, :]
              + x[:, :, 1:2] * w1[1:2, :]
              + x[:, :, 2:3] * w1[2:3, :]
              + l1b_ref[l])                                 # (B, S, HID)
        h1 = jnp.maximum(h1, 0.0)
        # HID=32 contraction: keep this one on the MXU (single dot per layer)
        h2 = jnp.dot(h1.reshape(Bb * S, HID), l2w_ref[l],
                     preferred_element_type=jnp.float32).reshape(Bb, S, D)
        h2 = h2 + l2b_ref[l]

        # ---- residual + post-norm 2 ----
        x = _layernorm(x + h2, n2w_ref[l], n2b_ref[l])

    # ---- final Linear on the last sequence position (src[-1] after permute) ----
    last = x[:, S - 1:S, :]                                 # (B, 1, D)
    fcw = fcw_ref[...]                                      # (D, OUT)
    out = (last[:, :, 0:1] * fcw[0:1, :]
           + last[:, :, 1:2] * fcw[1:2, :]
           + last[:, :, 2:3] * fcw[2:3, :]
           + fcb_ref[...])                                  # (B, 1, OUT)
    o_ref[...] = out.astype(o_ref.dtype)


def transformer_encoder(src, params):
    """src: (B, S, D) float32.  Returns (B, OUT) float32."""
    (in_w, in_b, ow, ob, n1w, n1b, n2w, n2b,
     l1w, l1b, l2w, l2b, fcw, fcb) = params

    # --- layout plumbing (host side, free): pre-transpose so the kernel never does .T ---
    w_in_t = jnp.transpose(in_w, (0, 2, 1))   # (L, D, 3D)
    ow_t = jnp.transpose(ow, (0, 2, 1))       # (L, D, D)
    l1w_t = jnp.transpose(l1w, (0, 2, 1))     # (L, D, HID)
    l2w_t = jnp.transpose(l2w, (0, 2, 1))     # (L, HID, D)
    fcw_t = fcw.T                             # (D, OUT)
    kparams = (w_in_t, in_b, ow_t, ob, n1w, n1b, n2w, n2b,
               l1w_t, l1b, l2w_t, l2b, fcw_t, fcb)

    B, S, _ = src.shape
    B_BLK = min(B, 8)                         # batch elements packed per grid step
    nblk = pl.cdiv(B, B_BLK)
    B_pad = nblk * B_BLK
    if B_pad != B:
        src = jnp.concatenate(
            [src, jnp.zeros((B_pad - B, S, D), src.dtype)], axis=0)

    def full_spec(a):
        nd = a.ndim
        return pl.BlockSpec(a.shape, lambda b, nd=nd: (0,) * nd)

    in_specs = ([pl.BlockSpec((B_BLK, S, D), lambda b: (b, 0, 0))]
                + [full_spec(p) for p in kparams])
    out_specs = pl.BlockSpec((B_BLK, 1, OUT), lambda b: (b, 0, 0))

    # --- advisory cost estimate (scheduling hint only) ---
    per_layer_flops = (2 * S * D * 3 * D                # fused QKV projection
                       + NHEAD * (2 * S * S + 2 * S * S)  # scores + weighted sum
                       + 2 * S * D * D                  # out-projection
                       + 2 * S * D * HID                # FFN in
                       + 2 * S * HID * D)               # FFN out
    flops = B_pad * (L * per_layer_flops + 2 * D * OUT)
    transcendentals = B_pad * L * NHEAD * S * S
    bytes_accessed = (B_pad * S * D * 4
                      + sum(int(p.size) * 4 for p in kparams)
                      + B_pad * OUT * 4)
    cost = pl.CostEstimate(flops=flops, transcendentals=transcendentals,
                           bytes_accessed=bytes_accessed)

    out = pl.pallas_call(
        transformer_encoder_kernel,
        out_shape=jax.ShapeDtypeStruct((B_pad, 1, OUT), jnp.float32),
        grid=(nblk,),
        in_specs=in_specs,
        out_specs=out_specs,
        compiler_params=pltpu.CompilerParams(
            dimension_semantics=("parallel",)),       # batch blocks are independent
        cost_estimate=cost,
    )(src, *kparams)

    return out.reshape(B_pad, OUT)[:B]


# --- pure-JAX reference (same math, exact softmax) for a correctness check ----
def reference(src, params):
    (in_w, in_b, ow, ob, n1w, n1b, n2w, n2b, l1w, l1b, l2w, l2b, fcw, fcb) = params

    def ln(t, w, b):
        mu = t.mean(-1, keepdims=True)
        var = ((t - mu) ** 2).mean(-1, keepdims=True)
        return (t - mu) / jnp.sqrt(var + EPS) * w + b

    B = src.shape[0]
    outs = []
    for bi in range(B):
        x = src[bi]
        for l in range(L):
            q = x @ in_w[l, 0:D].T + in_b[l, 0, 0:D]
            k = x @ in_w[l, D:2 * D].T + in_b[l, 0, D:2 * D]
            v = x @ in_w[l, 2 * D:].T + in_b[l, 0, 2 * D:]
            heads = []
            for h in range(NHEAD):
                s = q[:, h:h + 1] * k[:, h:h + 1].T
                p = jax.nn.softmax(s, axis=-1)
                heads.append(p @ v[:, h:h + 1])
            attn = jnp.concatenate(heads, axis=1) @ ow[l].T + ob[l, 0]
            x = ln(x + attn, n1w[l, 0], n1b[l, 0])
            h1 = jnp.maximum(x @ l1w[l].T + l1b[l, 0], 0.0)
            h2 = h1 @ l2w[l].T + l2b[l, 0]
            x = ln(x + h2, n2w[l, 0], n2b[l, 0])
        outs.append(x[-1] @ fcw.T + fcb[0])
    return jnp.stack(outs)


def make_params(key):
    ks = jax.random.split(key, 10)
    s = 0.2  # small scale keeps 10 stacked layers numerically tame
    in_w = jax.random.normal(ks[0], (L, 3 * D, D), jnp.float32) * s
    in_b = jax.random.normal(ks[1], (L, 1, 3 * D), jnp.float32) * s
    ow   = jax.random.normal(ks[2], (L, D, D), jnp.float32) * s
    ob   = jax.random.normal(ks[3], (L, 1, D), jnp.float32) * s
    n1w  = jnp.ones((L, 1, D), jnp.float32)
    n1b  = jnp.zeros((L, 1, D), jnp.float32)
    n2w  = jnp.ones((L, 1, D), jnp.float32)
    n2b  = jnp.zeros((L, 1, D), jnp.float32)
    l1w  = jax.random.normal(ks[4], (L, HID, D), jnp.float32) * s
    l1b  = jax.random.normal(ks[5], (L, 1, HID), jnp.float32) * s
    l2w  = jax.random.normal(ks[6], (L, D, HID), jnp.float32) * s
    l2b  = jax.random.normal(ks[7], (L, 1, D), jnp.float32) * s
    fcw  = jax.random.normal(ks[8], (OUT, D), jnp.float32) * s
    fcb  = jax.random.normal(ks[9], (1, OUT), jnp.float32) * s
    return (in_w, in_b, ow, ob, n1w, n1b, n2w, n2b, l1w, l1b, l2w, l2b, fcw, fcb)


if __name__ == "__main__":
    key = jax.random.PRNGKey(0)
    k_src, k_par = jax.random.split(key)
    B, S = 2, 8
    src = jax.random.normal(k_src, (B, S, D), jnp.float32)   # (batch, seq, d_model)
    params = make_params(k_par)

    out = transformer_encoder(src, params)
    out = jax.block_until_ready(out)

    ref = reference(src, params)
    assert out.shape == (B, OUT)
    # tolerance loosened slightly vs 1e-4 because the kernel uses pl.reciprocal(approx=True)
    # for the softmax denominator (EUP approximation); reference softmax is exact.
    assert jnp.allclose(out, ref, atol=5e-3, rtol=5e-3), (out, ref)
    print("KERNEL_OK")
</pallas_src>

<mosaic_0001>
module attributes {stable_mosaic.version = 11 : i64} {
  func.func @transformer_encoder_kernel(%arg0: i32, %arg1: memref<2x8x3xf32, #tpu.memory_space<vmem>>, %arg2: memref<10x3x9xf32, #tpu.memory_space<vmem>>, %arg3: memref<10x1x9xf32, #tpu.memory_space<vmem>>, %arg4: memref<10x3x3xf32, #tpu.memory_space<vmem>>, %arg5: memref<10x1x3xf32, #tpu.memory_space<vmem>>, %arg6: memref<10x1x3xf32, #tpu.memory_space<vmem>>, %arg7: memref<10x1x3xf32, #tpu.memory_space<vmem>>, %arg8: memref<10x1x3xf32, #tpu.memory_space<vmem>>, %arg9: memref<10x1x3xf32, #tpu.memory_space<vmem>>, %arg10: memref<10x3x32xf32, #tpu.memory_space<vmem>>, %arg11: memref<10x1x32xf32, #tpu.memory_space<vmem>>, %arg12: memref<10x32x3xf32, #tpu.memory_space<vmem>>, %arg13: memref<10x1x3xf32, #tpu.memory_space<vmem>>, %arg14: memref<3x3xf32, #tpu.memory_space<vmem>>, %arg15: memref<1x3xf32, #tpu.memory_space<vmem>>, %arg16: memref<2x1x3xf32, #tpu.memory_space<vmem>>) attributes {dimension_semantics = [#tpu.dimension_semantics<parallel>], iteration_bounds = array<i64: 1>, scalar_prefetch = 0 : i64, scratch_operands = 0 : i64, tpu.core_type = #tpu.core_type<tc>, window_params = [{transform_indices = @transform_0, window_bounds = array<i64: 2, 8, 3>}, {pipeline_mode = #tpu.pipeline_mode<synchronous>, transform_indices = @transform_1, window_bounds = array<i64: 10, 3, 9>}, {pipeline_mode = #tpu.pipeline_mode<synchronous>, transform_indices = @transform_2, window_bounds = array<i64: 10, 1, 9>}, {pipeline_mode = #tpu.pipeline_mode<synchronous>, transform_indices = @transform_3, window_bounds = array<i64: 10, 3, 3>}, {pipeline_mode = #tpu.pipeline_mode<synchronous>, transform_indices = @transform_4, window_bounds = array<i64: 10, 1, 3>}, {pipeline_mode = #tpu.pipeline_mode<synchronous>, transform_indices = @transform_5, window_bounds = array<i64: 10, 1, 3>}, {pipeline_mode = #tpu.pipeline_mode<synchronous>, transform_indices = @transform_6, window_bounds = array<i64: 10, 1, 3>}, {pipeline_mode = #tpu.pipeline_mode<synchronous>, transform_indices = @transform_7, window_bounds = array<i64: 10, 1, 3>}, {pipeline_mode = #tpu.pipeline_mode<synchronous>, transform_indices = @transform_8, window_bounds = array<i64: 10, 1, 3>}, {pipeline_mode = #tpu.pipeline_mode<synchronous>, transform_indices = @transform_9, window_bounds = array<i64: 10, 3, 32>}, {pipeline_mode = #tpu.pipeline_mode<synchronous>, transform_indices = @transform_10, window_bounds = array<i64: 10, 1, 32>}, {pipeline_mode = #tpu.pipeline_mode<synchronous>, transform_indices = @transform_11, window_bounds = array<i64: 10, 32, 3>}, {pipeline_mode = #tpu.pipeline_mode<synchronous>, transform_indices = @transform_12, window_bounds = array<i64: 10, 1, 3>}, {pipeline_mode = #tpu.pipeline_mode<synchronous>, transform_indices = @transform_13, window_bounds = array<i64: 3, 3>}, {pipeline_mode = #tpu.pipeline_mode<synchronous>, transform_indices = @transform_14, window_bounds = array<i64: 1, 3>}, {transform_indices = @transform_15, window_bounds = array<i64: 2, 1, 3>}]} {
    %c0 = arith.constant 0 : index
    %c0_0 = arith.constant 0 : index
    %c0_1 = arith.constant 0 : index
    %0 = vector.load %arg1[%c0, %c0_0, %c0_1] : memref<2x8x3xf32, #tpu.memory_space<vmem>>, vector<2x8x3xf32>
    %c0_2 = arith.constant 0 : index
    %c0_3 = arith.constant 0 : index
    %c0_4 = arith.constant 0 : index
    %1 = vector.load %arg2[%c0_2, %c0_3, %c0_4] : memref<10x3x9xf32, #tpu.memory_space<vmem>>, vector<1x3x9xf32>
    %2 = vector.shape_cast %1 : vector<1x3x9xf32> to vector<3x9xf32>
    %3 = vector.extract_strided_slice %0 {offsets = [0, 0, 0], sizes = [2, 8, 1], strides = [1, 1, 1]} : vector<2x8x3xf32> to vector<2x8x1xf32>
    %4 = vector.extract_strided_slice %2 {offsets = [0, 0], sizes = [1, 9], strides = [1, 1]} : vector<3x9xf32> to vector<1x9xf32>
    %5 = vector.shape_cast %4 : vector<1x9xf32> to vector<1x1x9xf32>
    %6 = vector.broadcast %3 : vector<2x8x1xf32> to vector<2x8x9xf32>
    %7 = vector.broadcast %5 : vector<1x1x9xf32> to vector<2x8x9xf32>
    %8 = arith.mulf %6, %7 : vector<2x8x9xf32>
    %9 = vector.extract_strided_slice %0 {offsets = [0, 0, 1], sizes = [2, 8, 1], strides = [1, 1, 1]} : vector<2x8x3xf32> to vector<2x8x1xf32>
    %10 = vector.extract_strided_slice %2 {offsets = [1, 0], sizes = [1, 9], strides = [1, 1]} : vector<3x9xf32> to vector<1x9xf32>
    %11 = vector.shape_cast %10 : vector<1x9xf32> to vector<1x1x9xf32>
    %12 = vector.broadcast %9 : vector<2x8x1xf32> to vector<2x8x9xf32>
    %13 = vector.broadcast %11 : vector<1x1x9xf32> to vector<2x8x9xf32>
    %14 = arith.mulf %12, %13 : vector<2x8x9xf32>
    %15 = arith.addf %8, %14 : vector<2x8x9xf32>
    %16 = vector.extract_strided_slice %0 {offsets = [0, 0, 2], sizes = [2, 8, 1], strides = [1, 1, 1]} : vector<2x8x3xf32> to vector<2x8x1xf32>
    %17 = vector.extract_strided_slice %2 {offsets = [2, 0], sizes = [1, 9], strides = [1, 1]} : vector<3x9xf32> to vector<1x9xf32>
    %18 = vector.shape_cast %17 : vector<1x9xf32> to vector<1x1x9xf32>
    %19 = vector.broadcast %16 : vector<2x8x1xf32> to vector<2x8x9xf32>
    %20 = vector.broadcast %18 : vector<1x1x9xf32> to vector<2x8x9xf32>
    %21 = arith.mulf %19, %20 : vector<2x8x9xf32>
    %22 = arith.addf %15, %21 : vector<2x8x9xf32>
    %c0_5 = arith.constant 0 : index
    %c0_6 = arith.constant 0 : index
    %c0_7 = arith.constant 0 : index
    %23 = vector.load %arg3[%c0_5, %c0_6, %c0_7] : memref<10x1x9xf32, #tpu.memory_space<vmem>>, vector<1x1x9xf32>
    %24 = vector.shape_cast %23 : vector<1x1x9xf32> to vector<1x9xf32>
    %25 = vector.shape_cast %24 : vector<1x9xf32> to vector<1x1x9xf32>
    %26 = vector.broadcast %25 : vector<1x1x9xf32> to vector<2x8x9xf32>
    %27 = arith.addf %22, %26 : vector<2x8x9xf32>
    %28 = vector.extract_strided_slice %27 {offsets = [0, 0, 0], sizes = [2, 8, 3], strides = [1, 1, 1]} : vector<2x8x9xf32> to vector<2x8x3xf32>
    %29 = vector.extract_strided_slice %27 {offsets = [0, 0, 3], sizes = [2, 8, 3], strides = [1, 1, 1]} : vector<2x8x9xf32> to vector<2x8x3xf32>
    %30 = vector.extract_strided_slice %27 {offsets = [0, 0, 6], sizes = [2, 8, 3], strides = [1, 1, 1]} : vector<2x8x9xf32> to vector<2x8x3xf32>
    %31 = tpu.transpose %29, [0, 2, 1] : vector<2x8x3xf32> -> vector<2x3x8xf32>
    %32 = tpu.transpose %30, [0, 2, 1] : vector<2x8x3xf32> -> vector<2x3x8xf32>
    %c0_8 = arith.constant 0 : index
    %c0_9 = arith.constant 0 : index
    %c0_10 = arith.constant 0 : index
    %33 = vector.load %arg4[%c0_8, %c0_9, %c0_10] : memref<10x3x3xf32, #tpu.memory_space<vmem>>, vector<1x3x3xf32>
    %34 = vector.shape_cast %33 : vector<1x3x3xf32> to vector<3x3xf32>
    %c0_11 = arith.constant 0 : index
    %c0_12 = arith.constant 0 : index
    %c0_13 = arith.constant 0 : index
    %35 = vector.load %arg5[%c0_11, %c0_12, %c0_13] : memref<10x1x3xf32, #tpu.memory_space<vmem>>, vector<1x1x3xf32>
    %36 = vector.shape_cast %35 : vector<1x1x3xf32> to vector<1x3xf32>
    %37 = vector.extract_strided_slice %28 {offsets = [0, 0, 0], sizes = [2, 8, 1], strides = [1, 1, 1]} : vector<2x8x3xf32> to vector<2x8x1xf32>
    %38 = vector.extract_strided_slice %31 {offsets = [0, 0, 0], sizes = [2, 1, 8], strides = [1, 1, 1]} : vector<2x3x8xf32> to vector<2x1x8xf32>
    %39 = vector.extract_strided_slice %32 {offsets = [0, 0, 0], sizes = [2, 1, 8], strides = [1, 1, 1]} : vector<2x3x8xf32> to vector<2x1x8xf32>
    %40 = vector.broadcast %37 : vector<2x8x1xf32> to vector<2x8x8xf32>
    %41 = vector.broadcast %38 : vector<2x1x8xf32> to vector<2x8x8xf32>
    %42 = arith.mulf %40, %41 : vector<2x8x8xf32>
    %cst = arith.constant dense<0xFF800000> : vector<2x8xf32>
    %43 = vector.multi_reduction <maximumf>, %42, %cst [2] : vector<2x8x8xf32> to vector<2x8xf32>
    %44 = vector.shape_cast %43 : vector<2x8xf32> to vector<2x8x1xf32>
    %45 = vector.broadcast %44 : vector<2x8x1xf32> to vector<2x8x8xf32>
    %46 = arith.subf %42, %45 : vector<2x8x8xf32>
    %47 = math.exp %46 : vector<2x8x8xf32>
    %cst_14 = arith.constant dense<0.000000e+00> : vector<2x8xf32>
    %48 = vector.multi_reduction <add>, %47, %cst_14 [2] : vector<2x8x8xf32> to vector<2x8xf32>
    %49 = vector.shape_cast %48 : vector<2x8xf32> to vector<2x8x1xf32>
    %50 = vector.broadcast %39 : vector<2x1x8xf32> to vector<2x8x8xf32>
    %51 = arith.mulf %47, %50 : vector<2x8x8xf32>
    %cst_15 = arith.constant dense<0.000000e+00> : vector<2x8xf32>
    %52 = vector.multi_reduction <add>, %51, %cst_15 [2] : vector<2x8x8xf32> to vector<2x8xf32>
    %53 = vector.shape_cast %52 : vector<2x8xf32> to vector<2x8x1xf32>
    %54 = tpu.reciprocal %49 {approx = true} : vector<2x8x1xf32> -> vector<2x8x1xf32>
    %55 = arith.mulf %53, %54 : vector<2x8x1xf32>
    %56 = vector.extract_strided_slice %34 {offsets = [0, 0], sizes = [1, 3], strides = [1, 1]} : vector<3x3xf32> to vector<1x3xf32>
    %57 = vector.shape_cast %56 : vector<1x3xf32> to vector<1x1x3xf32>
    %58 = vector.broadcast %55 : vector<2x8x1xf32> to vector<2x8x3xf32>
    %59 = vector.broadcast %57 : vector<1x1x3xf32> to vector<2x8x3xf32>
    %60 = arith.mulf %58, %59 : vector<2x8x3xf32>
    %61 = vector.shape_cast %36 : vector<1x3xf32> to vector<1x1x3xf32>
    %62 = vector.broadcast %61 : vector<1x1x3xf32> to vector<2x8x3xf32>
    %63 = arith.addf %62, %60 : vector<2x8x3xf32>
    %64 = vector.extract_strided_slice %28 {offsets = [0, 0, 1], sizes = [2, 8, 1], strides = [1, 1, 1]} : vector<2x8x3xf32> to vector<2x8x1xf32>
    %65 = vector.extract_strided_slice %31 {offsets = [0, 1, 0], sizes = [2, 1, 8], strides = [1, 1, 1]} : vector<2x3x8xf32> to vector<2x1x8xf32>
    %66 = vector.extract_strided_slice %32 {offsets = [0, 1, 0], sizes = [2, 1, 8], strides = [1, 1, 1]} : vector<2x3x8xf32> to vector<2x1x8xf32>
    %67 = vector.broadcast %64 : vector<2x8x1xf32> to vector<2x8x8xf32>
    %68 = vector.broadcast %65 : vector<2x1x8xf32> to vector<2x8x8xf32>
    %69 = arith.mulf %67, %68 : vector<2x8x8xf32>
    %cst_16 = arith.constant dense<0xFF800000> : vector<2x8xf32>
    %70 = vector.multi_reduction <maximumf>, %69, %cst_16 [2] : vector<2x8x8xf32> to vector<2x8xf32>
    %71 = vector.shape_cast %70 : vector<2x8xf32> to vector<2x8x1xf32>
    %72 = vector.broadcast %71 : vector<2x8x1xf32> to vector<2x8x8xf32>
    %73 = arith.subf %69, %72 : vector<2x8x8xf32>
    %74 = math.exp %73 : vector<2x8x8xf32>
    %cst_17 = arith.constant dense<0.000000e+00> : vector<2x8xf32>
    %75 = vector.multi_reduction <add>, %74, %cst_17 [2] : vector<2x8x8xf32> to vector<2x8xf32>
    %76 = vector.shape_cast %75 : vector<2x8xf32> to vector<2x8x1xf32>
    %77 = vector.broadcast %66 : vector<2x1x8xf32> to vector<2x8x8xf32>
    %78 = arith.mulf %74, %77 : vector<2x8x8xf32>
    %cst_18 = arith.constant dense<0.000000e+00> : vector<2x8xf32>
    %79 = vector.multi_reduction <add>, %78, %cst_18 [2] : vector<2x8x8xf32> to vector<2x8xf32>
    %80 = vector.shape_cast %79 : vector<2x8xf32> to vector<2x8x1xf32>
    %81 = tpu.reciprocal %76 {approx = true} : vector<2x8x1xf32> -> vector<2x8x1xf32>
    %82 = arith.mulf %80, %81 : vector<2x8x1xf32>
    %83 = vector.extract_strided_slice %34 {offsets = [1, 0], sizes = [1, 3], strides = [1, 1]} : vector<3x3xf32> to vector<1x3xf32>
    %84 = vector.shape_cast %83 : vector<1x3xf32> to vector<1x1x3xf32>
    %85 = vector.broadcast %82 : vector<2x8x1xf32> to vector<2x8x3xf32>
    %86 = vector.broadcast %84 : vector<1x1x3xf32> to vector<2x8x3xf32>
    %87 = arith.mulf %85, %86 : vector<2x8x3xf32>
    %88 = arith.addf %63, %87 : vector<2x8x3xf32>
    %89 = vector.extract_strided_slice %28 {offsets = [0, 0, 2], sizes = [2, 8, 1], strides = [1, 1, 1]} : vector<2x8x3xf32> to vector<2x8x1xf32>
    %90 = vector.extract_strided_slice %31 {offsets = [0, 2, 0], sizes = [2, 1, 8], strides = [1, 1, 1]} : vector<2x3x8xf32> to vector<2x1x8xf32>
    %91 = vector.extract_strided_slice %32 {offsets = [0, 2, 0], sizes = [2, 1, 8], strides = [1, 1, 1]} : vector<2x3x8xf32> to vector<2x1x8xf32>
    %92 = vector.broadcast %89 : vector<2x8x1xf32> to vector<2x8x8xf32>
    %93 = vector.broadcast %90 : vector<2x1x8xf32> to vector<2x8x8xf32>
    %94 = arith.mulf %92, %93 : vector<2x8x8xf32>
    %cst_19 = arith.constant dense<0xFF800000> : vector<2x8xf32>
    %95 = vector.multi_reduction <maximumf>, %94, %cst_19 [2] : vector<2x8x8xf32> to vector<2x8xf32>
    %96 = vector.shape_cast %95 : vector<2x8xf32> to vector<2x8x1xf32>
    %97 = vector.broadcast %96 : vector<2x8x1xf32> to vector<2x8x8xf32>
    %98 = arith.subf %94, %97 : vector<2x8x8xf32>
    %99 = math.exp %98 : vector<2x8x8xf32>
    %cst_20 = arith.constant dense<0.000000e+00> : vector<2x8xf32>
    %100 = vector.multi_reduction <add>, %99, %cst_20 [2] : vector<2x8x8xf32> to vector<2x8xf32>
    %101 = vector.shape_cast %100 : vector<2x8xf32> to vector<2x8x1xf32>
    %102 = vector.broadcast %91 : vector<2x1x8xf32> to vector<2x8x8xf32>
    %103 = arith.mulf %99, %102 : vector<2x8x8xf32>
    %cst_21 = arith.constant dense<0.000000e+00> : vector<2x8xf32>
    %104 = vector.multi_reduction <add>, %103, %cst_21 [2] : vector<2x8x8xf32> to vector<2x8xf32>
    %105 = vector.shape_cast %104 : vector<2x8xf32> to vector<2x8x1xf32>
    %106 = tpu.reciprocal %101 {approx = true} : vector<2x8x1xf32> -> vector<2x8x1xf32>
    %107 = arith.mulf %105, %106 : vector<2x8x1xf32>
    %108 = vector.extract_strided_slice %34 {offsets = [2, 0], sizes = [1, 3], strides = [1, 1]} : vector<3x3xf32> to vector<1x3xf32>
    %109 = vector.shape_cast %108 : vector<1x3xf32> to vector<1x1x3xf32>
    %110 = vector.broadcast %107 : vector<2x8x1xf32> to vector<2x8x3xf32>
    %111 = vector.broadcast %109 : vector<1x1x3xf32> to vector<2x8x3xf32>
    %112 = arith.mulf %110, %111 : vector<2x8x3xf32>
    %113 = arith.addf %88, %112 : vector<2x8x3xf32>
    %114 = arith.addf %0, %113 : vector<2x8x3xf32>
    %c0_22 = arith.constant 0 : index
    %c0_23 = arith.constant 0 : index
    %c0_24 = arith.constant 0 : index
    %115 = vector.load %arg6[%c0_22, %c0_23, %c0_24] : memref<10x1x3xf32, #tpu.memory_space<vmem>>, vector<1x1x3xf32>
    %116 = vector.shape_cast %115 : vector<1x1x3xf32> to vector<1x3xf32>
    %c0_25 = arith.constant 0 : index
    %c0_26 = arith.constant 0 : index
    %c0_27 = arith.constant 0 : index
    %117 = vector.load %arg7[%c0_25, %c0_26, %c0_27] : memref<10x1x3xf32, #tpu.memory_space<vmem>>, vector<1x1x3xf32>
    %118 = vector.shape_cast %117 : vector<1x1x3xf32> to vector<1x3xf32>
    %cst_28 = arith.constant dense<0.000000e+00> : vector<2x8xf32>
    %119 = vector.multi_reduction <add>, %114, %cst_28 [2] : vector<2x8x3xf32> to vector<2x8xf32>
    %120 = vector.shape_cast %119 : vector<2x8xf32> to vector<2x8x1xf32>
    %cst_29 = arith.constant 3.000000e+00 : f32
    %121 = vector.broadcast %cst_29 : f32 to vector<2x8x1xf32>
    %122 = arith.divf %120, %121 : vector<2x8x1xf32>
    %123 = vector.broadcast %122 : vector<2x8x1xf32> to vector<2x8x3xf32>
    %124 = arith.subf %114, %123 : vector<2x8x3xf32>
    %125 = arith.mulf %124, %124 : vector<2x8x3xf32>
    %cst_30 = arith.constant dense<0.000000e+00> : vector<2x8xf32>
    %126 = vector.multi_reduction <add>, %125, %cst_30 [2] : vector<2x8x3xf32> to vector<2x8xf32>
    %127 = vector.shape_cast %126 : vector<2x8xf32> to vector<2x8x1xf32>
    %cst_31 = arith.constant 3.000000e+00 : f32
    %128 = vector.broadcast %cst_31 : f32 to vector<2x8x1xf32>
    %129 = arith.divf %127, %128 : vector<2x8x1xf32>
    %130 = vector.broadcast %122 : vector<2x8x1xf32> to vector<2x8x3xf32>
    %131 = arith.subf %114, %130 : vector<2x8x3xf32>
    %cst_32 = arith.constant 9.99999974E-6 : f32
    %132 = vector.broadcast %cst_32 : f32 to vector<2x8x1xf32>
    %133 = arith.addf %129, %132 : vector<2x8x1xf32>
    %134 = math.rsqrt %133 : vector<2x8x1xf32>
    %135 = vector.broadcast %134 : vector<2x8x1xf32> to vector<2x8x3xf32>
    %136 = arith.mulf %131, %135 : vector<2x8x3xf32>
    %137 = vector.shape_cast %116 : vector<1x3xf32> to vector<1x1x3xf32>
    %138 = vector.broadcast %137 : vector<1x1x3xf32> to vector<2x8x3xf32>
    %139 = arith.mulf %136, %138 : vector<2x8x3xf32>
    %140 = vector.shape_cast %118 : vector<1x3xf32> to vector<1x1x3xf32>
    %141 = vector.broadcast %140 : vector<1x1x3xf32> to vector<2x8x3xf32>
    %142 = arith.addf %139, %141 : vector<2x8x3xf32>
    %c0_33 = arith.constant 0 : index
    %c0_34 = arith.constant 0 : index
    %c0_35 = arith.constant 0 : index
    %143 = vector.load %arg10[%c0_33, %c0_34, %c0_35] : memref<10x3x32xf32, #tpu.memory_space<vmem>>, vector<1x3x32xf32>
    %144 = vector.shape_cast %143 : vector<1x3x32xf32> to vector<3x32xf32>
    %145 = vector.extract_strided_slice %142 {offsets = [0, 0, 0], sizes = [2, 8, 1], strides = [1, 1, 1]} : vector<2x8x3xf32> to vector<2x8x1xf32>
    %146 = vector.extract_strided_slice %144 {offsets = [0, 0], sizes = [1, 32], strides = [1, 1]} : vector<3x32xf32> to vector<1x32xf32>
    %147 = vector.shape_cast %146 : vector<1x32xf32> to vector<1x1x32xf32>
    %148 = vector.broadcast %145 : vector<2x8x1xf32> to vector<2x8x32xf32>
    %149 = vector.broadcast %147 : vector<1x1x32xf32> to vector<2x8x32xf32>
    %150 = arith.mulf %148, %149 : vector<2x8x32xf32>
    %151 = vector.extract_strided_slice %142 {offsets = [0, 0, 1], sizes = [2, 8, 1], strides = [1, 1, 1]} : vector<2x8x3xf32> to vector<2x8x1xf32>
    %152 = vector.extract_strided_slice %144 {offsets = [1, 0], sizes = [1, 32], strides = [1, 1]} : vector<3x32xf32> to vector<1x32xf32>
    %153 = vector.shape_cast %152 : vector<1x32xf32> to vector<1x1x32xf32>
    %154 = vector.broadcast %151 : vector<2x8x1xf32> to vector<2x8x32xf32>
    %155 = vector.broadcast %153 : vector<1x1x32xf32> to vector<2x8x32xf32>
    %156 = arith.mulf %154, %155 : vector<2x8x32xf32>
    %157 = arith.addf %150, %156 : vector<2x8x32xf32>
    %158 = vector.extract_strided_slice %142 {offsets = [0, 0, 2], sizes = [2, 8, 1], strides = [1, 1, 1]} : vector<2x8x3xf32> to vector<2x8x1xf32>
    %159 = vector.extract_strided_slice %144 {offsets = [2, 0], sizes = [1, 32], strides = [1, 1]} : vector<3x32xf32> to vector<1x32xf32>
    %160 = vector.shape_cast %159 : vector<1x32xf32> to vector<1x1x32xf32>
    %161 = vector.broadcast %158 : vector<2x8x1xf32> to vector<2x8x32xf32>
    %162 = vector.broadcast %160 : vector<1x1x32xf32> to vector<2x8x32xf32>
    %163 = arith.mulf %161, %162 : vector<2x8x32xf32>
    %164 = arith.addf %157, %163 : vector<2x8x32xf32>
    %c0_36 = arith.constant 0 : index
    %c0_37 = arith.constant 0 : index
    %c0_38 = arith.constant 0 : index
    %165 = vector.load %arg11[%c0_36, %c0_37, %c0_38] : memref<10x1x32xf32, #tpu.memory_space<vmem>>, vector<1x1x32xf32>
    %166 = vector.shape_cast %165 : vector<1x1x32xf32> to vector<1x32xf32>
    %167 = vector.shape_cast %166 : vector<1x32xf32> to vector<1x1x32xf32>
    %168 = vector.broadcast %167 : vector<1x1x32xf32> to vector<2x8x32xf32>
    %169 = arith.addf %164, %168 : vector<2x8x32xf32>
    %cst_39 = arith.constant 0.000000e+00 : f32
    %170 = vector.broadcast %cst_39 : f32 to vector<2x8x32xf32>
    %171 = arith.maximumf %169, %170 : vector<2x8x32xf32>
    %172 = vector.shape_cast %171 : vector<2x8x32xf32> to vector<16x32xf32>
    %c0_40 = arith.constant 0 : index
    %c0_41 = arith.constant 0 : index
    %c0_42 = arith.constant 0 : index
    %173 = vector.load %arg12[%c0_40, %c0_41, %c0_42] : memref<10x32x3xf32, #tpu.memory_space<vmem>>, vector<1x32x3xf32>
    %174 = vector.shape_cast %173 : vector<1x32x3xf32> to vector<32x3xf32>
    %cst_43 = arith.constant dense<0.000000e+00> : vector<16x3xf32>
    %175 = tpu.matmul %172, %174, %cst_43 {dimension_numbers = #tpu.dot_dimension_numbers<[1], [0], [0], [1], [0, 0, 1, 1], [], []>} : vector<16x32xf32>, vector<32x3xf32>, vector<16x3xf32> -> vector<16x3xf32>
    %176 = vector.shape_cast %175 : vector<16x3xf32> to vector<2x8x3xf32>
    %c0_44 = arith.constant 0 : index
    %c0_45 = arith.constant 0 : index
    %c0_46 = arith.constant 0 : index
    %177 = vector.load %arg13[%c0_44, %c0_45, %c0_46] : memref<10x1x3xf32, #tpu.memory_space<vmem>>, vector<1x1x3xf32>
    %178 = vector.shape_cast %177 : vector<1x1x3xf32> to vector<1x3xf32>
    %179 = vector.shape_cast %178 : vector<1x3xf32> to vector<1x1x3xf32>
    %180 = vector.broadcast %179 : vector<1x1x3xf32> to vector<2x8x3xf32>
    %181 = arith.addf %176, %180 : vector<2x8x3xf32>
    %182 = arith.addf %142, %181 : vector<2x8x3xf32>
    %c0_47 = arith.constant 0 : index
    %c0_48 = arith.constant 0 : index
    %c0_49 = arith.constant 0 : index
    %183 = vector.load %arg8[%c0_47, %c0_48, %c0_49] : memref<10x1x3xf32, #tpu.memory_space<vmem>>, vector<1x1x3xf32>
    %184 = vector.shape_cast %183 : vector<1x1x3xf32> to vector<1x3xf32>
    %c0_50 = arith.constant 0 : index
    %c0_51 = arith.constant 0 : index
    %c0_52 = arith.constant 0 : index
    %185 = vector.load %arg9[%c0_50, %c0_51, %c0_52] : memref<10x1x3xf32, #tpu.memory_space<vmem>>, vector<1x1x3xf32>
    %186 = vector.shape_cast %185 : vector<1x1x3xf32> to vector<1x3xf32>
    %cst_53 = arith.constant dense<0.000000e+00> : vector<2x8xf32>
    %187 = vector.multi_reduction <add>, %182, %cst_53 [2] : vector<2x8x3xf32> to vector<2x8xf32>
    %188 = vector.shape_cast %187 : vector<2x8xf32> to vector<2x8x1xf32>
    %cst_54 = arith.constant 3.000000e+00 : f32
    %189 = vector.broadcast %cst_54 : f32 to vector<2x8x1xf32>
    %190 = arith.divf %188, %189 : vector<2x8x1xf32>
    %191 = vector.broadcast %190 : vector<2x8x1xf32> to vector<2x8x3xf32>
    %192 = arith.subf %182, %191 : vector<2x8x3xf32>
    %193 = arith.mulf %192, %192 : vector<2x8x3xf32>
    %cst_55 = arith.constant dense<0.000000e+00> : vector<2x8xf32>
    %194 = vector.multi_reduction <add>, %193, %cst_55 [2] : vector<2x8x3xf32> to vector<2x8xf32>
    %195 = vector.shape_cast %194 : vector<2x8xf32> to vector<2x8x1xf32>
    %cst_56 = arith.constant 3.000000e+00 : f32
    %196 = vector.broadcast %cst_56 : f32 to vector<2x8x1xf32>
    %197 = arith.divf %195, %196 : vector<2x8x1xf32>
    %198 = vector.broadcast %190 : vector<2x8x1xf32> to vector<2x8x3xf32>
    %199 = arith.subf %182, %198 : vector<2x8x3xf32>
    %cst_57 = arith.constant 9.99999974E-6 : f32
    %200 = vector.broadcast %cst_57 : f32 to vector<2x8x1xf32>
    %201 = arith.addf %197, %200 : vector<2x8x1xf32>
    %202 = math.rsqrt %201 : vector<2x8x1xf32>
    %203 = vector.broadcast %202 : vector<2x8x1xf32> to vector<2x8x3xf32>
    %204 = arith.mulf %199, %203 : vector<2x8x3xf32>
    %205 = vector.shape_cast %184 : vector<1x3xf32> to vector<1x1x3xf32>
    %206 = vector.broadcast %205 : vector<1x1x3xf32> to vector<2x8x3xf32>
    %207 = arith.mulf %204, %206 : vector<2x8x3xf32>
    %208 = vector.shape_cast %186 : vector<1x3xf32> to vector<1x1x3xf32>
    %209 = vector.broadcast %208 : vector<1x1x3xf32> to vector<2x8x3xf32>
    %210 = arith.addf %207, %209 : vector<2x8x3xf32>
    %c1 = arith.constant 1 : index
    %c0_58 = arith.constant 0 : index
    %c0_59 = arith.constant 0 : index
    %211 = vector.load %arg2[%c1, %c0_58, %c0_59] : memref<10x3x9xf32, #tpu.memory_space<vmem>>, vector<1x3x9xf32>
    %212 = vector.shape_cast %211 : vector<1x3x9xf32> to vector<3x9xf32>
    %213 = vector.extract_strided_slice %210 {offsets = [0, 0, 0], sizes = [2, 8, 1], strides = [1, 1, 1]} : vector<2x8x3xf32> to vector<2x8x1xf32>
    %214 = vector.extract_strided_slice %212 {offsets = [0, 0], sizes = [1, 9], strides = [1, 1]} : vector<3x9xf32> to vector<1x9xf32>
    %215 = vector.shape_cast %214 : vector<1x9xf32> to vector<1x1x9xf32>
    %216 = vector.broadcast %213 : vector<2x8x1xf32> to vector<2x8x9xf32>
    %217 = vector.broadcast %215 : vector<1x1x9xf32> to vector<2x8x9xf32>
    %218 = arith.mulf %216, %217 : vector<2x8x9xf32>
    %219 = vector.extract_strided_slice %210 {offsets = [0, 0, 1], sizes = [2, 8, 1], strides = [1, 1, 1]} : vector<2x8x3xf32> to vector<2x8x1xf32>
    %220 = vector.extract_strided_slice %212 {offsets = [1, 0], sizes = [1, 9], strides = [1, 1]} : vector<3x9xf32> to vector<1x9xf32>
    %221 = vector.shape_cast %220 : vector<1x9xf32> to vector<1x1x9xf32>
    %222 = vector.broadcast %219 : vector<2x8x1xf32> to vector<2x8x9xf32>
    %223 = vector.broadcast %221 : vector<1x1x9xf32> to vector<2x8x9xf32>
    %224 = arith.mulf %222, %223 : vector<2x8x9xf32>
    %225 = arith.addf %218, %224 : vector<2x8x9xf32>
    %226 = vector.extract_strided_slice %210 {offsets = [0, 0, 2], sizes = [2, 8, 1], strides = [1, 1, 1]} : vector<2x8x3xf32> to vector<2x8x1xf32>
    %227 = vector.extract_strided_slice %212 {offsets = [2, 0], sizes = [1, 9], strides = [1, 1]} : vector<3x9xf32> to vector<1x9xf32>
    %228 = vector.shape_cast %227 : vector<1x9xf32> to vector<1x1x9xf32>
    %229 = vector.broadcast %226 : vector<2x8x1xf32> to vector<2x8x9xf32>
    %230 = vector.broadcast %228 : vector<1x1x9xf32> to vector<2x8x9xf32>
    %231 = arith.mulf %229, %230 : vector<2x8x9xf32>
    %232 = arith.addf %225, %231 : vector<2x8x9xf32>
    %c1_60 = arith.constant 1 : index
    %c0_61 = arith.constant 0 : index
    %c0_62 = arith.constant 0 : index
    %233 = vector.load %arg3[%c1_60, %c0_61, %c0_62] : memref<10x1x9xf32, #tpu.memory_space<vmem>>, vector<1x1x9xf32>
    %234 = vector.shape_cast %233 : vector<1x1x9xf32> to vector<1x9xf32>
    %235 = vector.shape_cast %234 : vector<1x9xf32> to vector<1x1x9xf32>
    %236 = vector.broadcast %235 : vector<1x1x9xf32> to vector<2x8x9xf32>
    %237 = arith.addf %232, %236 : vector<2x8x9xf32>
    %238 = vector.extract_strided_slice %237 {offsets = [0, 0, 0], sizes = [2, 8, 3], strides = [1, 1, 1]} : vector<2x8x9xf32> to vector<2x8x3xf32>
    %239 = vector.extract_strided_slice %237 {offsets = [0, 0, 3], sizes = [2, 8, 3], strides = [1, 1, 1]} : vector<2x8x9xf32> to vector<2x8x3xf32>
    %240 = vector.extract_strided_slice %237 {offsets = [0, 0, 6], sizes = [2, 8, 3], strides = [1, 1, 1]} : vector<2x8x9xf32> to vector<2x8x3xf32>
    %241 = tpu.transpose %239, [0, 2, 1] : vector<2x8x3xf32> -> vector<2x3x8xf32>
    %242 = tpu.transpose %240, [0, 2, 1] : vector<2x8x3xf32> -> vector<2x3x8xf32>
    %c1_63 = arith.constant 1 : index
    %c0_64 = arith.constant 0 : index
    %c0_65 = arith.constant 0 : index
    %243 = vector.load %arg4[%c1_63, %c0_64, %c0_65] : memref<10x3x3xf32, #tpu.memory_space<vmem>>, vector<1x3x3xf32>
    %244 = vector.shape_cast %243 : vector<1x3x3xf32> to vector<3x3xf32>
    %c1_66 = arith.constant 1 : index
    %c0_67 = arith.constant 0 : index
    %c0_68 = arith.constant 0 : index
    %245 = vector.load %arg5[%c1_66, %c0_67, %c0_68] : memref<10x1x3xf32, #tpu.memory_space<vmem>>, vector<1x1x3xf32>
    %246 = vector.shape_cast %245 : vector<1x1x3xf32> to vector<1x3xf32>
    %247 = vector.extract_strided_slice %238 {offsets = [0, 0, 0], sizes = [2, 8, 1], strides = [1, 1, 1]} : vector<2x8x3xf32> to vector<2x8x1xf32>
    %248 = vector.extract_strided_slice %241 {offsets = [0, 0, 0], sizes = [2, 1, 8], strides = [1, 1, 1]} : vector<2x3x8xf32> to vector<2x1x8xf32>
    %249 = vector.extract_strided_slice %242 {offsets = [0, 0, 0], sizes = [2, 1, 8], strides = [1, 1, 1]} : vector<2x3x8xf32> to vector<2x1x8xf32>
    %250 = vector.broadcast %247 : vector<2x8x1xf32> to vector<2x8x8xf32>
    %251 = vector.broadcast %248 : vector<2x1x8xf32> to vector<2x8x8xf32>
    %252 = arith.mulf %250, %251 : vector<2x8x8xf32>
    %cst_69 = arith.constant dense<0xFF800000> : vector<2x8xf32>
    %253 = vector.multi_reduction <maximumf>, %252, %cst_69 [2] : vector<2x8x8xf32> to vector<2x8xf32>
    %254 = vector.shape_cast %253 : vector<2x8xf32> to vector<2x8x1xf32>
    %255 = vector.broadcast %254 : vector<2x8x1xf32> to vector<2x8x8xf32>
    %256 = arith.subf %252, %255 : vector<2x8x8xf32>
    %257 = math.exp %256 : vector<2x8x8xf32>
    %cst_70 = arith.constant dense<0.000000e+00> : vector<2x8xf32>
    %258 = vector.multi_reduction <add>, %257, %cst_70 [2] : vector<2x8x8xf32> to vector<2x8xf32>
    %259 = vector.shape_cast %258 : vector<2x8xf32> to vector<2x8x1xf32>
    %260 = vector.broadcast %249 : vector<2x1x8xf32> to vector<2x8x8xf32>
    %261 = arith.mulf %257, %260 : vector<2x8x8xf32>
    %cst_71 = arith.constant dense<0.000000e+00> : vector<2x8xf32>
    %262 = vector.multi_reduction <add>, %261, %cst_71 [2] : vector<2x8x8xf32> to vector<2x8xf32>
    %263 = vector.shape_cast %262 : vector<2x8xf32> to vector<2x8x1xf32>
    %264 = tpu.reciprocal %259 {approx = true} : vector<2x8x1xf32> -> vector<2x8x1xf32>
    %265 = arith.mulf %263, %264 : vector<2x8x1xf32>
    %266 = vector.extract_strided_slice %244 {offsets = [0, 0], sizes = [1, 3], strides = [1, 1]} : vector<3x3xf32> to vector<1x3xf32>
    %267 = vector.shape_cast %266 : vector<1x3xf32> to vector<1x1x3xf32>
    %268 = vector.broadcast %265 : vector<2x8x1xf32> to vector<2x8x3xf32>
    %269 = vector.broadcast %267 : vector<1x1x3xf32> to vector<2x8x3xf32>
    %270 = arith.mulf %268, %269 : vector<2x8x3xf32>
    %271 = vector.shape_cast %246 : vector<1x3xf32> to vector<1x1x3xf32>
    %272 = vector.broadcast %271 : vector<1x1x3xf32> to vector<2x8x3xf32>
    %273 = arith.addf %272, %270 : vector<2x8x3xf32>
    %274 = vector.extract_strided_slice %238 {offsets = [0, 0, 1], sizes = [2, 8, 1], strides = [1, 1, 1]} : vector<2x8x3xf32> to vector<2x8x1xf32>
    %275 = vector.extract_strided_slice %241 {offsets = [0, 1, 0], sizes = [2, 1, 8], strides = [1, 1, 1]} : vector<2x3x8xf32> to vector<2x1x8xf32>
    %276 = vector.extract_strided_slice %242 {offsets = [0, 1, 0], sizes = [2, 1, 8], strides = [1, 1, 1]} : vector<2x3x8xf32> to vector<2x1x8xf32>
    %277 = vector.broadcast %274 : vector<2x8x1xf32> to vector<2x8x8xf32>
    %278 = vector.broadcast %275 : vector<2x1x8xf32> to vector<2x8x8xf32>
    %279 = arith.mulf %277, %278 : vector<2x8x8xf32>
    %cst_72 = arith.constant dense<0xFF800000> : vector<2x8xf32>
    %280 = vector.multi_reduction <maximumf>, %279, %cst_72 [2] : vector<2x8x8xf32> to vector<2x8xf32>
    %281 = vector.shape_cast %280 : vector<2x8xf32> to vector<2x8x1xf32>
    %282 = vector.broadcast %281 : vector<2x8x1xf32> to vector<2x8x8xf32>
    %283 = arith.subf %279, %282 : vector<2x8x8xf32>
    %284 = math.exp %283 : vector<2x8x8xf32>
    %cst_73 = arith.constant dense<0.000000e+00> : vector<2x8xf32>
    %285 = vector.multi_reduction <add>, %284, %cst_73 [2] : vector<2x8x8xf32> to vector<2x8xf32>
    %286 = vector.shape_cast %285 : vector<2x8xf32> to vector<2x8x1xf32>
    %287 = vector.broadcast %276 : vector<2x1x8xf32> to vector<2x8x8xf32>
    %288 = arith.mulf %284, %287 : vector<2x8x8xf32>
    %cst_74 = arith.constant dense<0.000000e+00> : vector<2x8xf32>
    %289 = vector.multi_reduction <add>, %288, %cst_74 [2] : vector<2x8x8xf32> to vector<2x8xf32>
    %290 = vector.shape_cast %289 : vector<2x8xf32> to vector<2x8x1xf32>
    %291 = tpu.reciprocal %286 {approx = true} : vector<2x8x1xf32> -> vector<2x8x1xf32>
    %292 = arith.mulf %290, %291 : vector<2x8x1xf32>
    %293 = vector.extract_strided_slice %244 {offsets = [1, 0], sizes = [1, 3], strides = [1, 1]} : vector<3x3xf32> to vector<1x3xf32>
    %294 = vector.shape_cast %293 : vector<1x3xf32> to vector<1x1x3xf32>
    %295 = vector.broadcast %292 : vector<2x8x1xf32> to vector<2x8x3xf32>
    %296 = vector.broadcast %294 : vector<1x1x3xf32> to vector<2x8x3xf32>
    %297 = arith.mulf %295, %296 : vector<2x8x3xf32>
    %298 = arith.addf %273, %297 : vector<2x8x3xf32>
    %299 = vector.extract_strided_slice %238 {offsets = [0, 0, 2], sizes = [2, 8, 1], strides = [1, 1, 1]} : vector<2x8x3xf32> to vector<2x8x1xf32>
    %300 = vector.extract_strided_slice %241 {offsets = [0, 2, 0], sizes = [2, 1, 8], strides = [1, 1, 1]} : vector<2x3x8xf32> to vector<2x1x8xf32>
    %301 = vector.extract_strided_slice %242 {offsets = [0, 2, 0], sizes = [2, 1, 8], strides = [1, 1, 1]} : vector<2x3x8xf32> to vector<2x1x8xf32>
    %302 = vector.broadcast %299 : vector<2x8x1xf32> to vector<2x8x8xf32>
    %303 = vector.broadcast %300 : vector<2x1x8xf32> to vector<2x8x8xf32>
    %304 = arith.mulf %302, %303 : vector<2x8x8xf32>
    %cst_75 = arith.constant dense<0xFF800000> : vector<2x8xf32>
    %305 = vector.multi_reduction <maximumf>, %304, %cst_75 [2] : vector<2x8x8xf32> to vector<2x8xf32>
    %306 = vector.shape_cast %305 : vector<2x8xf32> to vector<2x8x1xf32>
    %307 = vector.broadcast %306 : vector<2x8x1xf32> to vector<2x8x8xf32>
    %308 = arith.subf %304, %307 : vector<2x8x8xf32>
    %309 = math.exp %308 : vector<2x8x8xf32>
    %cst_76 = arith.constant dense<0.000000e+00> : vector<2x8xf32>
    %310 = vector.multi_reduction <add>, %309, %cst_76 [2] : vector<2x8x8xf32> to vector<2x8xf32>
    %311 = vector.shape_cast %310 : vector<2x8xf32> to vector<2x8x1xf32>
    %312 = vector.broadcast %301 : vector<2x1x8xf32> to vector<2x8x8xf32>
    %313 = arith.mulf %309, %312 : vector<2x8x8xf32>
    %cst_77 = arith.constant dense<0.000000e+00> : vector<2x8xf32>
    %314 = vector.multi_reduction <add>, %313, %cst_77 [2] : vector<2x8x8xf32> to vector<2x8xf32>
    %315 = vector.shape_cast %314 : vector<2x8xf32> to vector<2x8x1xf32>
    %316 = tpu.reciprocal %311 {approx = true} : vector<2x8x1xf32> -> vector<2x8x1xf32>
    %317 = arith.mulf %315, %316 : vector<2x8x1xf32>
    %318 = vector.extract_strided_slice %244 {offsets = [2, 0], sizes = [1, 3], strides = [1, 1]} : vector<3x3xf32> to vector<1x3xf32>
    %319 = vector.shape_cast %318 : vector<1x3xf32> to vector<1x1x3xf32>
    %320 = vector.broadcast %317 : vector<2x8x1xf32> to vector<2x8x3xf32>
    %321 = vector.broadcast %319 : vector<1x1x3xf32> to vector<2x8x3xf32>
    %322 = arith.mulf %320, %321 : vector<2x8x3xf32>
    %323 = arith.addf %298, %322 : vector<2x8x3xf32>
    %324 = arith.addf %210, %323 : vector<2x8x3xf32>
    %c1_78 = arith.constant 1 : index
    %c0_79 = arith.constant 0 : index
    %c0_80 = arith.constant 0 : index
    %325 = vector.load %arg6[%c1_78, %c0_79, %c0_80] : memref<10x1x3xf32, #tpu.memory_space<vmem>>, vector<1x1x3xf32>
    %326 = vector.shape_cast %325 : vector<1x1x3xf32> to vector<1x3xf32>
    %c1_81 = arith.constant 1 : index
    %c0_82 = arith.constant 0 : index
    %c0_83 = arith.constant 0 : index
    %327 = vector.load %arg7[%c1_81, %c0_82, %c0_83] : memref<10x1x3xf32, #tpu.memory_space<vmem>>, vector<1x1x3xf32>
    %328 = vector.shape_cast %327 : vector<1x1x3xf32> to vector<1x3xf32>
    %cst_84 = arith.constant dense<0.000000e+00> : vector<2x8xf32>
    %329 = vector.multi_reduction <add>, %324, %cst_84 [2] : vector<2x8x3xf32> to vector<2x8xf32>
    %330 = vector.shape_cast %329 : vector<2x8xf32> to vector<2x8x1xf32>
    %cst_85 = arith.constant 3.000000e+00 : f32
    %331 = vector.broadcast %cst_85 : f32 to vector<2x8x1xf32>
    %332 = arith.divf %330, %331 : vector<2x8x1xf32>
    %333 = vector.broadcast %332 : vector<2x8x1xf32> to vector<2x8x3xf32>
    %334 = arith.subf %324, %333 : vector<2x8x3xf32>
    %335 = arith.mulf %334, %334 : vector<2x8x3xf32>
    %cst_86 = arith.constant dense<0.000000e+00> : vector<2x8xf32>
    %336 = vector.multi_reduction <add>, %335, %cst_86 [2] : vector<2x8x3xf32> to vector<2x8xf32>
    %337 = vector.shape_cast %336 : vector<2x8xf32> to vector<2x8x1xf32>
    %cst_87 = arith.constant 3.000000e+00 : f32
    %338 = vector.broadcast %cst_87 : f32 to vector<2x8x1xf32>
    %339 = arith.divf %337, %338 : vector<2x8x1xf32>
    %340 = vector.broadcast %332 : vector<2x8x1xf32> to vector<2x8x3xf32>
    %341 = arith.subf %324, %340 : vector<2x8x3xf32>
    %cst_88 = arith.constant 9.99999974E-6 : f32
    %342 = vector.broadcast %cst_88 : f32 to vector<2x8x1xf32>
    %343 = arith.addf %339, %342 : vector<2x8x1xf32>
    %344 = math.rsqrt %343 : vector<2x8x1xf32>
    %345 = vector.broadcast %344 : vector<2x8x1xf32> to vector<2x8x3xf32>
    %346 = arith.mulf %341, %345 : vector<2x8x3xf32>
    %347 = vector.shape_cast %326 : vector<1x3xf32> to vector<1x1x3xf32>
    %348 = vector.broadcast %347 : vector<1x1x3xf32> to vector<2x8x3xf32>
    %349 = arith.mulf %346, %348 : vector<2x8x3xf32>
    %350 = vector.shape_cast %328 : vector<1x3xf32> to vector<1x1x3xf32>
    %351 = vector.broadcast %350 : vector<1x1x3xf32> to vector<2x8x3xf32>
    %352 = arith.addf %349, %351 : vector<2x8x3xf32>
    %c1_89 = arith.constant 1 : index
    %c0_90 = arith.constant 0 : index
    %c0_91 = arith.constant 0 : index
    %353 = vector.load %arg10[%c1_89, %c0_90, %c0_91] : memref<10x3x32xf32, #tpu.memory_space<vmem>>, vector<1x3x32xf32>
    %354 = vector.shape_cast %353 : vector<1x3x32xf32> to vector<3x32xf32>
    %355 = vector.extract_strided_slice %352 {offsets = [0, 0, 0], sizes = [2, 8, 1], strides = [1, 1, 1]} : vector<2x8x3xf32> to vector<2x8x1xf32>
    %356 = vector.extract_strided_slice %354 {offsets = [0, 0], sizes = [1, 32], strides = [1, 1]} : vector<3x32xf32> to vector<1x32xf32>
    %357 = vector.shape_cast %356 : vector<1x32xf32> to vector<1x1x32xf32>
    %358 = vector.broadcast %355 : vector<2x8x1xf32> to vector<2x8x32xf32>
    %359 = vector.broadcast %357 : vector<1x1x32xf32> to vector<2x8x32xf32>
    %360 = arith.mulf %358, %359 : vector<2x8x32xf32>
    %361 = vector.extract_strided_slice %352 {offsets = [0, 0, 1], sizes = [2, 8, 1], strides = [1, 1, 1]} : vector<2x8x3xf32> to vector<2x8x1xf32>
    %362 = vector.extract_strided_slice %354 {offsets = [1, 0], sizes = [1, 32], strides = [1, 1]} : vector<3x32xf32> to vector<1x32xf32>
    %363 = vector.shape_cast %362 : vector<1x32xf32> to vector<1x1x32xf32>
    %364 = vector.broadcast %361 : vector<2x8x1xf32> to vector<2x8x32xf32>
    %365 = vector.broadcast %363 : vector<1x1x32xf32> to vector<2x8x32xf32>
    %366 = arith.mulf %364, %365 : vector<2x8x32xf32>
    %367 = arith.addf %360, %366 : vector<2x8x32xf32>
    %368 = vector.extract_strided_slice %352 {offsets = [0, 0, 2], sizes = [2, 8, 1], strides = [1, 1, 1]} : vector<2x8x3xf32> to vector<2x8x1xf32>
    %369 = vector.extract_strided_slice %354 {offsets = [2, 0], sizes = [1, 32], strides = [1, 1]} : vector<3x32xf32> to vector<1x32xf32>
    %370 = vector.shape_cast %369 : vector<1x32xf32> to vector<1x1x32xf32>
    %371 = vector.broadcast %368 : vector<2x8x1xf32> to vector<2x8x32xf32>
    %372 = vector.broadcast %370 : vector<1x1x32xf32> to vector<2x8x32xf32>
    %373 = arith.mulf %371, %372 : vector<2x8x32xf32>
    %374 = arith.addf %367, %373 : vector<2x8x32xf32>
    %c1_92 = arith.constant 1 : index
    %c0_93 = arith.constant 0 : index
    %c0_94 = arith.constant 0 : index
    %375 = vector.load %arg11[%c1_92, %c0_93, %c0_94] : memref<10x1x32xf32, #tpu.memory_space<vmem>>, vector<1x1x32xf32>
    %376 = vector.shape_cast %375 : vector<1x1x32xf32> to vector<1x32xf32>
    %377 = vector.shape_cast %376 : vector<1x32xf32> to vector<1x1x32xf32>
    %378 = vector.broadcast %377 : vector<1x1x32xf32> to vector<2x8x32xf32>
    %379 = arith.addf %374, %378 : vector<2x8x32xf32>
    %cst_95 = arith.constant 0.000000e+00 : f32
    %380 = vector.broadcast %cst_95 : f32 to vector<2x8x32xf32>
    %381 = arith.maximumf %379, %380 : vector<2x8x32xf32>
    %382 = vector.shape_cast %381 : vector<2x8x32xf32> to vector<16x32xf32>
    %c1_96 = arith.constant 1 : index
    %c0_97 = arith.constant 0 : index
    %c0_98 = arith.constant 0 : index
    %383 = vector.load %arg12[%c1_96, %c0_97, %c0_98] : memref<10x32x3xf32, #tpu.memory_space<vmem>>, vector<1x32x3xf32>
    %384 = vector.shape_cast %383 : vector<1x32x3xf32> to vector<32x3xf32>
    %cst_99 = arith.constant dense<0.000000e+00> : vector<16x3xf32>
    %385 = tpu.matmul %382, %384, %cst_99 {dimension_numbers = #tpu.dot_dimension_numbers<[1], [0], [0], [1], [0, 0, 1, 1], [], []>} : vector<16x32xf32>, vector<32x3xf32>, vector<16x3xf32> -> vector<16x3xf32>
    %386 = vector.shape_cast %385 : vector<16x3xf32> to vector<2x8x3xf32>
    %c1_100 = arith.constant 1 : index
    %c0_101 = arith.constant 0 : index
    %c0_102 = arith.constant 0 : index
    %387 = vector.load %arg13[%c1_100, %c0_101, %c0_102] : memref<10x1x3xf32, #tpu.memory_space<vmem>>, vector<1x1x3xf32>
    %388 = vector.shape_cast %387 : vector<1x1x3xf32> to vector<1x3xf32>
    %389 = vector.shape_cast %388 : vector<1x3xf32> to vector<1x1x3xf32>
    %390 = vector.broadcast %389 : vector<1x1x3xf32> to vector<2x8x3xf32>
    %391 = arith.addf %386, %390 : vector<2x8x3xf32>
    %392 = arith.addf %352, %391 : vector<2x8x3xf32>
    %c1_103 = arith.constant 1 : index
    %c0_104 = arith.constant 0 : index
    %c0_105 = arith.constant 0 : index
    %393 = vector.load %arg8[%c1_103, %c0_104, %c0_105] : memref<10x1x3xf32, #tpu.memory_space<vmem>>, vector<1x1x3xf32>
    %394 = vector.shape_cast %393 : vector<1x1x3xf32> to vector<1x3xf32>
    %c1_106 = arith.constant 1 : index
    %c0_107 = arith.constant 0 : index
    %c0_108 = arith.constant 0 : index
    %395 = vector.load %arg9[%c1_106, %c0_107, %c0_108] : memref<10x1x3xf32, #tpu.memory_space<vmem>>, vector<1x1x3xf32>
    %396 = vector.shape_cast %395 : vector<1x1x3xf32> to vector<1x3xf32>
    %cst_109 = arith.constant dense<0.000000e+00> : vector<2x8xf32>
    %397 = vector.multi_reduction <add>, %392, %cst_109 [2] : vector<2x8x3xf32> to vector<2x8xf32>
    %398 = vector.shape_cast %397 : vector<2x8xf32> to vector<2x8x1xf32>
    %cst_110 = arith.constant 3.000000e+00 : f32
    %399 = vector.broadcast %cst_110 : f32 to vector<2x8x1xf32>
    %400 = arith.divf %398, %399 : vector<2x8x1xf32>
    %401 = vector.broadcast %400 : vector<2x8x1xf32> to vector<2x8x3xf32>
    %402 = arith.subf %392, %401 : vector<2x8x3xf32>
    %403 = arith.mulf %402, %402 : vector<2x8x3xf32>
    %cst_111 = arith.constant dense<0.000000e+00> : vector<2x8xf32>
    %404 = vector.multi_reduction <add>, %403, %cst_111 [2] : vector<2x8x3xf32> to vector<2x8xf32>
    %405 = vector.shape_cast %404 : vector<2x8xf32> to vector<2x8x1xf32>
    %cst_112 = arith.constant 3.000000e+00 : f32
    %406 = vector.broadcast %cst_112 : f32 to vector<2x8x1xf32>
    %407 = arith.divf %405, %406 : vector<2x8x1xf32>
    %408 = vector.broadcast %400 : vector<2x8x1xf32> to vector<2x8x3xf32>
    %409 = arith.subf %392, %408 : vector<2x8x3xf32>
    %cst_113 = arith.constant 9.99999974E-6 : f32
    %410 = vector.broadcast %cst_113 : f32 to vector<2x8x1xf32>
    %411 = arith.addf %407, %410 : vector<2x8x1xf32>
    %412 = math.rsqrt %411 : vector<2x8x1xf32>
    %413 = vector.broadcast %412 : vector<2x8x1xf32> to vector<2x8x3xf32>
    %414 = arith.mulf %409, %413 : vector<2x8x3xf32>
    %415 = vector.shape_cast %394 : vector<1x3xf32> to vector<1x1x3xf32>
    %416 = vector.broadcast %415 : vector<1x1x3xf32> to vector<2x8x3xf32>
    %417 = arith.mulf %414, %416 : vector<2x8x3xf32>
    %418 = vector.shape_cast %396 : vector<1x3xf32> to vector<1x1x3xf32>
    %419 = vector.broadcast %418 : vector<1x1x3xf32> to vector<2x8x3xf32>
    %420 = arith.addf %417, %419 : vector<2x8x3xf32>
    %c2 = arith.constant 2 : index
    %c0_114 = arith.constant 0 : index
    %c0_115 = arith.constant 0 : index
    %421 = vector.load %arg2[%c2, %c0_114, %c0_115] : memref<10x3x9xf32, #tpu.memory_space<vmem>>, vector<1x3x9xf32>
    %422 = vector.shape_cast %421 : vector<1x3x9xf32> to vector<3x9xf32>
    %423 = vector.extract_strided_slice %420 {offsets = [0, 0, 0], sizes = [2, 8, 1], strides = [1, 1, 1]} : vector<2x8x3xf32> to vector<2x8x1xf32>
    %424 = vector.extract_strided_slice %422 {offsets = [0, 0], sizes = [1, 9], strides = [1, 1]} : vector<3x9xf32> to vector<1x9xf32>
    %425 = vector.shape_cast %424 : vector<1x9xf32> to vector<1x1x9xf32>
    %426 = vector.broadcast %423 : vector<2x8x1xf32> to vector<2x8x9xf32>
    %427 = vector.broadcast %425 : vector<1x1x9xf32> to vector<2x8x9xf32>
    %428 = arith.mulf %426, %427 : vector<2x8x9xf32>
    %429 = vector.extract_strided_slice %420 {offsets = [0, 0, 1], sizes = [2, 8, 1], strides = [1, 1, 1]} : vector<2x8x3xf32> to vector<2x8x1xf32>
    %430 = vector.extract_strided_slice %422 {offsets = [1, 0], sizes = [1, 9], strides = [1, 1]} : vector<3x9xf32> to vector<1x9xf32>
    %431 = vector.shape_cast %430 : vector<1x9xf32> to vector<1x1x9xf32>
    %432 = vector.broadcast %429 : vector<2x8x1xf32> to vector<2x8x9xf32>
    %433 = vector.broadcast %431 : vector<1x1x9xf32> to vector<2x8x9xf32>
    %434 = arith.mulf %432, %433 : vector<2x8x9xf32>
    %435 = arith.addf %428, %434 : vector<2x8x9xf32>
    %436 = vector.extract_strided_slice %420 {offsets = [0, 0, 2], sizes = [2, 8, 1], strides = [1, 1, 1]} : vector<2x8x3xf32> to vector<2x8x1xf32>
    %437 = vector.extract_strided_slice %422 {offsets = [2, 0], sizes = [1, 9], strides = [1, 1]} : vector<3x9xf32> to vector<1x9xf32>
    %438 = vector.shape_cast %437 : vector<1x9xf32> to vector<1x1x9xf32>
    %439 = vector.broadcast %436 : vector<2x8x1xf32> to vector<2x8x9xf32>
    %440 = vector.broadcast %438 : vector<1x1x9xf32> to vector<2x8x9xf32>
    %441 = arith.mulf %439, %440 : vector<2x8x9xf32>
    %442 = arith.addf %435, %441 : vector<2x8x9xf32>
    %c2_116 = arith.constant 2 : index
    %c0_117 = arith.constant 0 : index
    %c0_118 = arith.constant 0 : index
    %443 = vector.load %arg3[%c2_116, %c0_117, %c0_118] : memref<10x1x9xf32, #tpu.memory_space<vmem>>, vector<1x1x9xf32>
    %444 = vector.shape_cast %443 : vector<1x1x9xf32> to vector<1x9xf32>
    %445 = vector.shape_cast %444 : vector<1x9xf32> to vector<1x1x9xf32>
    %446 = vector.broadcast %445 : vector<1x1x9xf32> to vector<2x8x9xf32>
    %447 = arith.addf %442, %446 : vector<2x8x9xf32>
    %448 = vector.extract_strided_slice %447 {offsets = [0, 0, 0], sizes = [2, 8, 3], strides = [1, 1, 1]} : vector<2x8x9xf32> to vector<2x8x3xf32>
    %449 = vector.extract_strided_slice %447 {offsets = [0, 0, 3], sizes = [2, 8, 3], strides = [1, 1, 1]} : vector<2x8x9xf32> to vector<2x8x3xf32>
    %450 = vector.extract_strided_slice %447 {offsets = [0, 0, 6], sizes = [2, 8, 3], strides = [1, 1, 1]} : vector<2x8x9xf32> to vector<2x8x3xf32>
    %451 = tpu.transpose %449, [0, 2, 1] : vector<2x8x3xf32> -> vector<2x3x8xf32>
    %452 = tpu.transpose %450, [0, 2, 1] : vector<2x8x3xf32> -> vector<2x3x8xf32>
    %c2_119 = arith.constant 2 : index
    %c0_120 = arith.constant 0 : index
    %c0_121 = arith.constant 0 : index
    %453 = vector.load %arg4[%c2_119, %c0_120, %c0_121] : memref<10x3x3xf32, #tpu.memory_space<vmem>>, vector<1x3x3xf32>
    %454 = vector.shape_cast %453 : vector<1x3x3xf32> to vector<3x3xf32>
    %c2_122 = arith.constant 2 : index
    %c0_123 = arith.constant 0 : index
    %c0_124 = arith.constant 0 : index
    %455 = vector.load %arg5[%c2_122, %c0_123, %c0_124] : memref<10x1x3xf32, #tpu.memory_space<vmem>>, vector<1x1x3xf32>
    %456 = vector.shape_cast %455 : vector<1x1x3xf32> to vector<1x3xf32>
    %457 = vector.extract_strided_slice %448 {offsets = [0, 0, 0], sizes = [2, 8, 1], strides = [1, 1, 1]} : vector<2x8x3xf32> to vector<2x8x1xf32>
    %458 = vector.extract_strided_slice %451 {offsets = [0, 0, 0], sizes = [2, 1, 8], strides = [1, 1, 1]} : vector<2x3x8xf32> to vector<2x1x8xf32>
    %459 = vector.extract_strided_slice %452 {offsets = [0, 0, 0], sizes = [2, 1, 8], strides = [1, 1, 1]} : vector<2x3x8xf32> to vector<2x1x8xf32>
    %460 = vector.broadcast %457 : vector<2x8x1xf32> to vector<2x8x8xf32>
    %461 = vector.broadcast %458 : vector<2x1x8xf32> to vector<2x8x8xf32>
    %462 = arith.mulf %460, %461 : vector<2x8x8xf32>
    %cst_125 = arith.constant dense<0xFF800000> : vector<2x8xf32>
    %463 = vector.multi_reduction <maximumf>, %462, %cst_125 [2] : vector<2x8x8xf32> to vector<2x8xf32>
    %464 = vector.shape_cast %463 : vector<2x8xf32> to vector<2x8x1xf32>
    %465 = vector.broadcast %464 : vector<2x8x1xf32> to vector<2x8x8xf32>
    %466 = arith.subf %462, %465 : vector<2x8x8xf32>
    %467 = math.exp %466 : vector<2x8x8xf32>
    %cst_126 = arith.constant dense<0.000000e+00> : vector<2x8xf32>
    %468 = vector.multi_reduction <add>, %467, %cst_126 [2] : vector<2x8x8xf32> to vector<2x8xf32>
    %469 = vector.shape_cast %468 : vector<2x8xf32> to vector<2x8x1xf32>
    %470 = vector.broadcast %459 : vector<2x1x8xf32> to vector<2x8x8xf32>
    %471 = arith.mulf %467, %470 : vector<2x8x8xf32>
    %cst_127 = arith.constant dense<0.000000e+00> : vector<2x8xf32>
    %472 = vector.multi_reduction <add>, %471, %cst_127 [2] : vector<2x8x8xf32> to vector<2x8xf32>
    %473 = vector.shape_cast %472 : vector<2x8xf32> to vector<2x8x1xf32>
    %474 = tpu.reciprocal %469 {approx = true} : vector<2x8x1xf32> -> vector<2x8x1xf32>
    %475 = arith.mulf %473, %474 : vector<2x8x1xf32>
    %476 = vector.extract_strided_slice %454 {offsets = [0, 0], sizes = [1, 3], strides = [1, 1]} : vector<3x3xf32> to vector<1x3xf32>
    %477 = vector.shape_cast %476 : vector<1x3xf32> to vector<1x1x3xf32>
    %478 = vector.broadcast %475 : vector<2x8x1xf32> to vector<2x8x3xf32>
    %479 = vector.broadcast %477 : vector<1x1x3xf32> to vector<2x8x3xf32>
    %480 = arith.mulf %478, %479 : vector<2x8x3xf32>
    %481 = vector.shape_cast %456 : vector<1x3xf32> to vector<1x1x3xf32>
    %482 = vector.broadcast %481 : vector<1x1x3xf32> to vector<2x8x3xf32>
    %483 = arith.addf %482, %480 : vector<2x8x3xf32>
    %484 = vector.extract_strided_slice %448 {offsets = [0, 0, 1], sizes = [2, 8, 1], strides = [1, 1, 1]} : vector<2x8x3xf32> to vector<2x8x1xf32>
    %485 = vector.extract_strided_slice %451 {offsets = [0, 1, 0], sizes = [2, 1, 8], strides = [1, 1, 1]} : vector<2x3x8xf32> to vector<2x1x8xf32>
    %486 = vector.extract_strided_slice %452 {offsets = [0, 1, 0], sizes = [2, 1, 8], strides = [1, 1, 1]} : vector<2x3x8xf32> to vector<2x1x8xf32>
    %487 = vector.broadcast %484 : vector<2x8x1xf32> to vector<2x8x8xf32>
    %488 = vector.broadcast %485 : vector<2x1x8xf32> to vector<2x8x8xf32>
    %489 = arith.mulf %487, %488 : vector<2x8x8xf32>
    %cst_128 = arith.constant dense<0xFF800000> : vector<2x8xf32>
    %490 = vector.multi_reduction <maximumf>, %489, %cst_128 [2] : vector<2x8x8xf32> to vector<2x8xf32>
    %491 = vector.shape_cast %490 : vector<2x8xf32> to vector<2x8x1xf32>
    %492 = vector.broadcast %491 : vector<2x8x1xf32> to vector<2x8x8xf32>
    %493 = arith.subf %489, %492 : vector<2x8x8xf32>
    %494 = math.exp %493 : vector<2x8x8xf32>
    %cst_129 = arith.constant dense<0.000000e+00> : vector<2x8xf32>
    %495 = vector.multi_reduction <add>, %494, %cst_129 [2] : vector<2x8x8xf32> to vector<2x8xf32>
    %496 = vector.shape_cast %495 : vector<2x8xf32> to vector<2x8x1xf32>
    %497 = vector.broadcast %486 : vector<2x1x8xf32> to vector<2x8x8xf32>
    %498 = arith.mulf %494, %497 : vector<2x8x8xf32>
    %cst_130 = arith.constant dense<0.000000e+00> : vector<2x8xf32>
    %499 = vector.multi_reduction <add>, %498, %cst_130 [2] : vector<2x8x8xf32> to vector<2x8xf32>
    %500 = vector.shape_cast %499 : vector<2x8xf32> to vector<2x8x1xf32>
    %501 = tpu.reciprocal %496 {approx = true} : vector<2x8x1xf32> -> vector<2x8x1xf32>
    %502 = arith.mulf %500, %501 : vector<2x8x1xf32>
    %503 = vector.extract_strided_slice %454 {offsets = [1, 0], sizes = [1, 3], strides = [1, 1]} : vector<3x3xf32> to vector<1x3xf32>
    %504 = vector.shape_cast %503 : vector<1x3xf32> to vector<1x1x3xf32>
    %505 = vector.broadcast %502 : vector<2x8x1xf32> to vector<2x8x3xf32>
    %506 = vector.broadcast %504 : vector<1x1x3xf32> to vector<2x8x3xf32>
    %507 = arith.mulf %505, %506 : vector<2x8x3xf32>
    %508 = arith.addf %483, %507 : vector<2x8x3xf32>
    %509 = vector.extract_strided_slice %448 {offsets = [0, 0, 2], sizes = [2, 8, 1], strides = [1, 1, 1]} : vector<2x8x3xf32> to vector<2x8x1xf32>
    %510 = vector.extract_strided_slice %451 {offsets = [0, 2, 0], sizes = [2, 1, 8], strides = [1, 1, 1]} : vector<2x3x8xf32> to vector<2x1x8xf32>
    %511 = vector.extract_strided_slice %452 {offsets = [0, 2, 0], sizes = [2, 1, 8], strides = [1, 1, 1]} : vector<2x3x8xf32> to vector<2x1x8xf32>
    %512 = vector.broadcast %509 : vector<2x8x1xf32> to vector<2x8x8xf32>
    %513 = vector.broadcast %510 : vector<2x1x8xf32> to vector<2x8x8xf32>
    %514 = arith.mulf %512, %513 : vector<2x8x8xf32>
    %cst_131 = arith.constant dense<0xFF800000> : vector<2x8xf32>
    %515 = vector.multi_reduction <maximumf>, %514, %cst_131 [2] : vector<2x8x8xf32> to vector<2x8xf32>
    %516 = vector.shape_cast %515 : vector<2x8xf32> to vector<2x8x1xf32>
    %517 = vector.broadcast %516 : vector<2x8x1xf32> to vector<2x8x8xf32>
    %518 = arith.subf %514, %517 : vector<2x8x8xf32>
    %519 = math.exp %518 : vector<2x8x8xf32>
    %cst_132 = arith.constant dense<0.000000e+00> : vector<2x8xf32>
    %520 = vector.multi_reduction <add>, %519, %cst_132 [2] : vector<2x8x8xf32> to vector<2x8xf32>
    %521 = vector.shape_cast %520 : vector<2x8xf32> to vector<2x8x1xf32>
    %522 = vector.broadcast %511 : vector<2x1x8xf32> to vector<2x8x8xf32>
    %523 = arith.mulf %519, %522 : vector<2x8x8xf32>
    %cst_133 = arith.constant dense<0.000000e+00> : vector<2x8xf32>
    %524 = vector.multi_reduction <add>, %523, %cst_133 [2] : vector<2x8x8xf32> to vector<2x8xf32>
    %525 = vector.shape_cast %524 : vector<2x8xf32> to vector<2x8x1xf32>
    %526 = tpu.reciprocal %521 {approx = true} : vector<2x8x1xf32> -> vector<2x8x1xf32>
    %527 = arith.mulf %525, %526 : vector<2x8x1xf32>
    %528 = vector.extract_strided_slice %454 {offsets = [2, 0], sizes = [1, 3], strides = [1, 1]} : vector<3x3xf32> to vector<1x3xf32>
    %529 = vector.shape_cast %528 : vector<1x3xf32> to vector<1x1x3xf32>
    %530 = vector.broadcast %527 : vector<2x8x1xf32> to vector<2x8x3xf32>
    %531 = vector.broadcast %529 : vector<1x1x3xf32> to vector<2x8x3xf32>
    %532 = arith.mulf %530, %531 : vector<2x8x3xf32>
    %533 = arith.addf %508, %532 : vector<2x8x3xf32>
    %534 = arith.addf %420, %533 : vector<2x8x3xf32>
    %c2_134 = arith.constant 2 : index
    %c0_135 = arith.constant 0 : index
    %c0_136 = arith.constant 0 : index
    %535 = vector.load %arg6[%c2_134, %c0_135, %c0_136] : memref<10x1x3xf32, #tpu.memory_space<vmem>>, vector<1x1x3xf32>
    %536 = vector.shape_cast %535 : vector<1x1x3xf32> to vector<1x3xf32>
    %c2_137 = arith.constant 2 : index
    %c0_138 = arith.constant 0 : index
    %c0_139 = arith.constant 0 : index
    %537 = vector.load %arg7[%c2_137, %c0_138, %c0_139] : memref<10x1x3xf32, #tpu.memory_space<vmem>>, vector<1x1x3xf32>
    %538 = vector.shape_cast %537 : vector<1x1x3xf32> to vector<1x3xf32>
    %cst_140 = arith.constant dense<0.000000e+00> : vector<2x8xf32>
    %539 = vector.multi_reduction <add>, %534, %cst_140 [2] : vector<2x8x3xf32> to vector<2x8xf32>
    %540 = vector.shape_cast %539 : vector<2x8xf32> to vector<2x8x1xf32>
    %cst_141 = arith.constant 3.000000e+00 : f32
    %541 = vector.broadcast %cst_141 : f32 to vector<2x8x1xf32>
    %542 = arith.divf %540, %541 : vector<2x8x1xf32>
    %543 = vector.broadcast %542 : vector<2x8x1xf32> to vector<2x8x3xf32>
    %544 = arith.subf %534, %543 : vector<2x8x3xf32>
    %545 = arith.mulf %544, %544 : vector<2x8x3xf32>
    %cst_142 = arith.constant dense<0.000000e+00> : vector<2x8xf32>
    %546 = vector.multi_reduction <add>, %545, %cst_142 [2] : vector<2x8x3xf32> to vector<2x8xf32>
    %547 = vector.shape_cast %546 : vector<2x8xf32> to vector<2x8x1xf32>
    %cst_143 = arith.constant 3.000000e+00 : f32
    %548 = vector.broadcast %cst_143 : f32 to vector<2x8x1xf32>
    %549 = arith.divf %547, %548 : vector<2x8x1xf32>
    %550 = vector.broadcast %542 : vector<2x8x1xf32> to vector<2x8x3xf32>
    %551 = arith.subf %534, %550 : vector<2x8x3xf32>
    %cst_144 = arith.constant 9.99999974E-6 : f32
    %552 = vector.broadcast %cst_144 : f32 to vector<2x8x1xf32>
    %553 = arith.addf %549, %552 : vector<2x8x1xf32>
    %554 = math.rsqrt %553 : vector<2x8x1xf32>
    %555 = vector.broadcast %554 : vector<2x8x1xf32> to vector<2x8x3xf32>
    %556 = arith.mulf %551, %555 : vector<2x8x3xf32>
    %557 = vector.shape_cast %536 : vector<1x3xf32> to vector<1x1x3xf32>
    %558 = vector.broadcast %557 : vector<1x1x3xf32> to vector<2x8x3xf32>
    %559 = arith.mulf %556, %558 : vector<2x8x3xf32>
    %560 = vector.shape_cast %538 : vector<1x3xf32> to vector<1x1x3xf32>
    %561 = vector.broadcast %560 : vector<1x1x3xf32> to vector<2x8x3xf32>
    %562 = arith.addf %559, %561 : vector<2x8x3xf32>
    %c2_145 = arith.constant 2 : index
    %c0_146 = arith.constant 0 : index
    %c0_147 = arith.constant 0 : index
    %563 = vector.load %arg10[%c2_145, %c0_146, %c0_147] : memref<10x3x32xf32, #tpu.memory_space<vmem>>, vector<1x3x32xf32>
    %564 = vector.shape_cast %563 : vector<1x3x32xf32> to vector<3x32xf32>
    %565 = vector.extract_strided_slice %562 {offsets = [0, 0, 0], sizes = [2, 8, 1], strides = [1, 1, 1]} : vector<2x8x3xf32> to vector<2x8x1xf32>
    %566 = vector.extract_strided_slice %564 {offsets = [0, 0], sizes = [1, 32], strides = [1, 1]} : vector<3x32xf32> to vector<1x32xf32>
    %567 = vector.shape_cast %566 : vector<1x32xf32> to vector<1x1x32xf32>
    %568 = vector.broadcast %565 : vector<2x8x1xf32> to vector<2x8x32xf32>
    %569 = vector.broadcast %567 : vector<1x1x32xf32> to vector<2x8x32xf32>
    %570 = arith.mulf %568, %569 : vector<2x8x32xf32>
    %571 = vector.extract_strided_slice %562 {offsets = [0, 0, 1], sizes = [2, 8, 1], strides = [1, 1, 1]} : vector<2x8x3xf32> to vector<2x8x1xf32>
    %572 = vector.extract_strided_slice %564 {offsets = [1, 0], sizes = [1, 32], strides = [1, 1]} : vector<3x32xf32> to vector<1x32xf32>
    %573 = vector.shape_cast %572 : vector<1x32xf32> to vector<1x1x32xf32>
    %574 = vector.broadcast %571 : vector<2x8x1xf32> to vector<2x8x32xf32>
    %575 = vector.broadcast %573 : vector<1x1x32xf32> to vector<2x8x32xf32>
    %576 = arith.mulf %574, %575 : vector<2x8x32xf32>
    %577 = arith.addf %570, %576 : vector<2x8x32xf32>
    %578 = vector.extract_strided_slice %562 {offsets = [0, 0, 2], sizes = [2, 8, 1], strides = [1, 1, 1]} : vector<2x8x3xf32> to vector<2x8x1xf32>
    %579 = vector.extract_strided_slice %564 {offsets = [2, 0], sizes = [1, 32], strides = [1, 1]} : vector<3x32xf32> to vector<1x32xf32>
    %580 = vector.shape_cast %579 : vector<1x32xf32> to vector<1x1x32xf32>
    %581 = vector.broadcast %578 : vector<2x8x1xf32> to vector<2x8x32xf32>
    %582 = vector.broadcast %580 : vector<1x1x32xf32> to vector<2x8x32xf32>
    %583 = arith.mulf %581, %582 : vector<2x8x32xf32>
    %584 = arith.addf %577, %583 : vector<2x8x32xf32>
    %c2_148 = arith.constant 2 : index
    %c0_149 = arith.constant 0 : index
    %c0_150 = arith.constant 0 : index
    %585 = vector.load %arg11[%c2_148, %c0_149, %c0_150] : memref<10x1x32xf32, #tpu.memory_space<vmem>>, vector<1x1x32xf32>
    %586 = vector.shape_cast %585 : vector<1x1x32xf32> to vector<1x32xf32>
    %587 = vector.shape_cast %586 : vector<1x32xf32> to vector<1x1x32xf32>
    %588 = vector.broadcast %587 : vector<1x1x32xf32> to vector<2x8x32xf32>
    %589 = arith.addf %584, %588 : vector<2x8x32xf32>
    %cst_151 = arith.constant 0.000000e+00 : f32
    %590 = vector.broadcast %cst_151 : f32 to vector<2x8x32xf32>
    %591 = arith.maximumf %589, %590 : vector<2x8x32xf32>
    %592 = vector.shape_cast %591 : vector<2x8x32xf32> to vector<16x32xf32>
    %c2_152 = arith.constant 2 : index
    %c0_153 = arith.constant 0 : index
    %c0_154 = arith.constant 0 : index
    %593 = vector.load %arg12[%c2_152, %c0_153, %c0_154] : memref<10x32x3xf32, #tpu.memory_space<vmem>>, vector<1x32x3xf32>
    %594 = vector.shape_cast %593 : vector<1x32x3xf32> to vector<32x3xf32>
    %cst_155 = arith.constant dense<0.000000e+00> : vector<16x3xf32>
    %595 = tpu.matmul %592, %594, %cst_155 {dimension_numbers = #tpu.dot_dimension_numbers<[1], [0], [0], [1], [0, 0, 1, 1], [], []>} : vector<16x32xf32>, vector<32x3xf32>, vector<16x3xf32> -> vector<16x3xf32>
    %596 = vector.shape_cast %595 : vector<16x3xf32> to vector<2x8x3xf32>
    %c2_156 = arith.constant 2 : index
    %c0_157 = arith.constant 0 : index
    %c0_158 = arith.constant 0 : index
    %597 = vector.load %arg13[%c2_156, %c0_157, %c0_158] : memref<10x1x3xf32, #tpu.memory_space<vmem>>, vector<1x1x3xf32>
    %598 = vector.shape_cast %597 : vector<1x1x3xf32> to vector<1x3xf32>
    %599 = vector.shape_cast %598 : vector<1x3xf32> to vector<1x1x3xf32>
    %600 = vector.broadcast %599 : vector<1x1x3xf32> to vector<2x8x3xf32>
    %601 = arith.addf %596, %600 : vector<2x8x3xf32>
    %602 = arith.addf %562, %601 : vector<2x8x3xf32>
    %c2_159 = arith.constant 2 : index
    %c0_160 = arith.constant 0 : index
    %c0_161 = arith.constant 0 : index
    %603 = vector.load %arg8[%c2_159, %c0_160, %c0_161] : memref<10x1x3xf32, #tpu.memory_space<vmem>>, vector<1x1x3xf32>
    %604 = vector.shape_cast %603 : vector<1x1x3xf32> to vector<1x3xf32>
    %c2_162 = arith.constant 2 : index
    %c0_163 = arith.constant 0 : index
    %c0_164 = arith.constant 0 : index
    %605 = vector.load %arg9[%c2_162, %c0_163, %c0_164] : memref<10x1x3xf32, #tpu.memory_space<vmem>>, vector<1x1x3xf32>
    %606 = vector.shape_cast %605 : vector<1x1x3xf32> to vector<1x3xf32>
    %cst_165 = arith.constant dense<0.000000e+00> : vector<2x8xf32>
    %607 = vector.multi_reduction <add>, %602, %cst_165 [2] : vector<2x8x3xf32> to vector<2x8xf32>
    %608 = vector.shape_cast %607 : vector<2x8xf32> to vector<2x8x1xf32>
    %cst_166 = arith.constant 3.000000e+00 : f32
    %609 = vector.broadcast %cst_166 : f32 to vector<2x8x1xf32>
    %610 = arith.divf %608, %609 : vector<2x8x1xf32>
    %611 = vector.broadcast %610 : vector<2x8x1xf32> to vector<2x8x3xf32>
    %612 = arith.subf %602, %611 : vector<2x8x3xf32>
    %613 = arith.mulf %612, %612 : vector<2x8x3xf32>
    %cst_167 = arith.constant dense<0.000000e+00> : vector<2x8xf32>
    %614 = vector.multi_reduction <add>, %613, %cst_167 [2] : vector<2x8x3xf32> to vector<2x8xf32>
    %615 = vector.shape_cast %614 : vector<2x8xf32> to vector<2x8x1xf32>
    %cst_168 = arith.constant 3.000000e+00 : f32
    %616 = vector.broadcast %cst_168 : f32 to vector<2x8x1xf32>
    %617 = arith.divf %615, %616 : vector<2x8x1xf32>
    %618 = vector.broadcast %610 : vector<2x8x1xf32> to vector<2x8x3xf32>
    %619 = arith.subf %602, %618 : vector<2x8x3xf32>
    %cst_169 = arith.constant 9.99999974E-6 : f32
    %620 = vector.broadcast %cst_169 : f32 to vector<2x8x1xf32>
    %621 = arith.addf %617, %620 : vector<2x8x1xf32>
    %622 = math.rsqrt %621 : vector<2x8x1xf32>
    %623 = vector.broadcast %622 : vector<2x8x1xf32> to vector<2x8x3xf32>
    %624 = arith.mulf %619, %623 : vector<2x8x3xf32>
    %625 = vector.shape_cast %604 : vector<1x3xf32> to vector<1x1x3xf32>
    %626 = vector.broadcast %625 : vector<1x1x3xf32> to vector<2x8x3xf32>
    %627 = arith.mulf %624, %626 : vector<2x8x3xf32>
    %628 = vector.shape_cast %606 : vector<1x3xf32> to vector<1x1x3xf32>
    %629 = vector.broadcast %628 : vector<1x1x3xf32> to vector<2x8x3xf32>
    %630 = arith.addf %627, %629 : vector<2x8x3xf32>
    %c3 = arith.constant 3 : index
    %c0_170 = arith.constant 0 : index
    %c0_171 = arith.constant 0 : index
    %631 = vector.load %arg2[%c3, %c0_170, %c0_171] : memref<10x3x9xf32, #tpu.memory_space<vmem>>, vector<1x3x9xf32>
    %632 = vector.shape_cast %631 : vector<1x3x9xf32> to vector<3x9xf32>
    %633 = vector.extract_strided_slice %630 {offsets = [0, 0, 0], sizes = [2, 8, 1], strides = [1, 1, 1]} : vector<2x8x3xf32> to vector<2x8x1xf32>
    %634 = vector.extract_strided_slice %632 {offsets = [0, 0], sizes = [1, 9], strides = [1, 1]} : vector<3x9xf32> to vector<1x9xf32>
    %635 = vector.shape_cast %634 : vector<1x9xf32> to vector<1x1x9xf32>
    %636 = vector.broadcast %633 : vector<2x8x1xf32> to vector<2x8x9xf32>
    %637 = vector.broadcast %635 : vector<1x1x9xf32> to vector<2x8x9xf32>
    %638 = arith.mulf %636, %637 : vector<2x8x9xf32>
    %639 = vector.extract_strided_slice %630 {offsets = [0, 0, 1], sizes = [2, 8, 1], strides = [1, 1, 1]} : vector<2x8x3xf32> to vector<2x8x1xf32>
    %640 = vector.extract_strided_slice %632 {offsets = [1, 0], sizes = [1, 9], strides = [1, 1]} : vector<3x9xf32> to vector<1x9xf32>
    %641 = vector.shape_cast %640 : vector<1x9xf32> to vector<1x1x9xf32>
    %642 = vector.broadcast %639 : vector<2x8x1xf32> to vector<2x8x9xf32>
    %643 = vector.broadcast %641 : vector<1x1x9xf32> to vector<2x8x9xf32>
    %644 = arith.mulf %642, %643 : vector<2x8x9xf32>
    %645 = arith.addf %638, %644 : vector<2x8x9xf32>
    %646 = vector.extract_strided_slice %630 {offsets = [0, 0, 2], sizes = [2, 8, 1], strides = [1, 1, 1]} : vector<2x8x3xf32> to vector<2x8x1xf32>
    %647 = vector.extract_strided_slice %632 {offsets = [2, 0], sizes = [1, 9], strides = [1, 1]} : vector<3x9xf32> to vector<1x9xf32>
    %648 = vector.shape_cast %647 : vector<1x9xf32> to vector<1x1x9xf32>
    %649 = vector.broadcast %646 : vector<2x8x1xf32> to vector<2x8x9xf32>
    %650 = vector.broadcast %648 : vector<1x1x9xf32> to vector<2x8x9xf32>
    %651 = arith.mulf %649, %650 : vector<2x8x9xf32>
    %652 = arith.addf %645, %651 : vector<2x8x9xf32>
    %c3_172 = arith.constant 3 : index
    %c0_173 = arith.constant 0 : index
    %c0_174 = arith.constant 0 : index
    %653 = vector.load %arg3[%c3_172, %c0_173, %c0_174] : memref<10x1x9xf32, #tpu.memory_space<vmem>>, vector<1x1x9xf32>
    %654 = vector.shape_cast %653 : vector<1x1x9xf32> to vector<1x9xf32>
    %655 = vector.shape_cast %654 : vector<1x9xf32> to vector<1x1x9xf32>
    %656 = vector.broadcast %655 : vector<1x1x9xf32> to vector<2x8x9xf32>
    %657 = arith.addf %652, %656 : vector<2x8x9xf32>
    %658 = vector.extract_strided_slice %657 {offsets = [0, 0, 0], sizes = [2, 8, 3], strides = [1, 1, 1]} : vector<2x8x9xf32> to vector<2x8x3xf32>
    %659 = vector.extract_strided_slice %657 {offsets = [0, 0, 3], sizes = [2, 8, 3], strides = [1, 1, 1]} : vector<2x8x9xf32> to vector<2x8x3xf32>
    %660 = vector.extract_strided_slice %657 {offsets = [0, 0, 6], sizes = [2, 8, 3], strides = [1, 1, 1]} : vector<2x8x9xf32> to vector<2x8x3xf32>
    %661 = tpu.transpose %659, [0, 2, 1] : vector<2x8x3xf32> -> vector<2x3x8xf32>
    %662 = tpu.transpose %660, [0, 2, 1] : vector<2x8x3xf32> -> vector<2x3x8xf32>
    %c3_175 = arith.constant 3 : index
    %c0_176 = arith.constant 0 : index
    %c0_177 = arith.constant 0 : index
    %663 = vector.load %arg4[%c3_175, %c0_176, %c0_177] : memref<10x3x3xf32, #tpu.memory_space<vmem>>, vector<1x3x3xf32>
    %664 = vector.shape_cast %663 : vector<1x3x3xf32> to vector<3x3xf32>
    %c3_178 = arith.constant 3 : index
    %c0_179 = arith.constant 0 : index
    %c0_180 = arith.constant 0 : index
    %665 = vector.load %arg5[%c3_178, %c0_179, %c0_180] : memref<10x1x3xf32, #tpu.memory_space<vmem>>, vector<1x1x3xf32>
    %666 = vector.shape_cast %665 : vector<1x1x3xf32> to vector<1x3xf32>
    %667 = vector.extract_strided_slice %658 {offsets = [0, 0, 0], sizes = [2, 8, 1], strides = [1, 1, 1]} : vector<2x8x3xf32> to vector<2x8x1xf32>
    %668 = vector.extract_strided_slice %661 {offsets = [0, 0, 0], sizes = [2, 1, 8], strides = [1, 1, 1]} : vector<2x3x8xf32> to vector<2x1x8xf32>
    %669 = vector.extract_strided_slice %662 {offsets = [0, 0, 0], sizes = [2, 1, 8], strides = [1, 1, 1]} : vector<2x3x8xf32> to vector<2x1x8xf32>
    %670 = vector.broadcast %667 : vector<2x8x1xf32> to vector<2x8x8xf32>
    %671 = vector.broadcast %668 : vector<2x1x8xf32> to vector<2x8x8xf32>
    %672 = arith.mulf %670, %671 : vector<2x8x8xf32>
    %cst_181 = arith.constant dense<0xFF800000> : vector<2x8xf32>
    %673 = vector.multi_reduction <maximumf>, %672, %cst_181 [2] : vector<2x8x8xf32> to vector<2x8xf32>
    %674 = vector.shape_cast %673 : vector<2x8xf32> to vector<2x8x1xf32>
    %675 = vector.broadcast %674 : vector<2x8x1xf32> to vector<2x8x8xf32>
    %676 = arith.subf %672, %675 : vector<2x8x8xf32>
    %677 = math.exp %676 : vector<2x8x8xf32>
    %cst_182 = arith.constant dense<0.000000e+00> : vector<2x8xf32>
    %678 = vector.multi_reduction <add>, %677, %cst_182 [2] : vector<2x8x8xf32> to vector<2x8xf32>
    %679 = vector.shape_cast %678 : vector<2x8xf32> to vector<2x8x1xf32>
    %680 = vector.broadcast %669 : vector<2x1x8xf32> to vector<2x8x8xf32>
    %681 = arith.mulf %677, %680 : vector<2x8x8xf32>
    %cst_183 = arith.constant dense<0.000000e+00> : vector<2x8xf32>
    %682 = vector.multi_reduction <add>, %681, %cst_183 [2] : vector<2x8x8xf32> to vector<2x8xf32>
    %683 = vector.shape_cast %682 : vector<2x8xf32> to vector<2x8x1xf32>
    %684 = tpu.reciprocal %679 {approx = true} : vector<2x8x1xf32> -> vector<2x8x1xf32>
    %685 = arith.mulf %683, %684 : vector<2x8x1xf32>
    %686 = vector.extract_strided_slice %664 {offsets = [0, 0], sizes = [1, 3], strides = [1, 1]} : vector<3x3xf32> to vector<1x3xf32>
    %687 = vector.shape_cast %686 : vector<1x3xf32> to vector<1x1x3xf32>
    %688 = vector.broadcast %685 : vector<2x8x1xf32> to vector<2x8x3xf32>
    %689 = vector.broadcast %687 : vector<1x1x3xf32> to vector<2x8x3xf32>
    %690 = arith.mulf %688, %689 : vector<2x8x3xf32>
    %691 = vector.shape_cast %666 : vector<1x3xf32> to vector<1x1x3xf32>
    %692 = vector.broadcast %691 : vector<1x1x3xf32> to vector<2x8x3xf32>
    %693 = arith.addf %692, %690 : vector<2x8x3xf32>
    %694 = vector.extract_strided_slice %658 {offsets = [0, 0, 1], sizes = [2, 8, 1], strides = [1, 1, 1]} : vector<2x8x3xf32> to vector<2x8x1xf32>
    %695 = vector.extract_strided_slice %661 {offsets = [0, 1, 0], sizes = [2, 1, 8], strides = [1, 1, 1]} : vector<2x3x8xf32> to vector<2x1x8xf32>
    %696 = vector.extract_strided_slice %662 {offsets = [0, 1, 0], sizes = [2, 1, 8], strides = [1, 1, 1]} : vector<2x3x8xf32> to vector<2x1x8xf32>
    %697 = vector.broadcast %694 : vector<2x8x1xf32> to vector<2x8x8xf32>
    %698 = vector.broadcast %695 : vector<2x1x8xf32> to vector<2x8x8xf32>
    %699 = arith.mulf %697, %698 : vector<2x8x8xf32>
    %cst_184 = arith.constant dense<0xFF800000> : vector<2x8xf32>
    %700 = vector.multi_reduction <maximumf>, %699, %cst_184 [2] : vector<2x8x8xf32> to vector<2x8xf32>
    %701 = vector.shape_cast %700 : vector<2x8xf32> to vector<2x8x1xf32>
    %702 = vector.broadcast %701 : vector<2x8x1xf32> to vector<2x8x8xf32>
    %703 = arith.subf %699, %702 : vector<2x8x8xf32>
    %704 = math.exp %703 : vector<2x8x8xf32>
    %cst_185 = arith.constant dense<0.000000e+00> : vector<2x8xf32>
    %705 = vector.multi_reduction <add>, %704, %cst_185 [2] : vector<2x8x8xf32> to vector<2x8xf32>
    %706 = vector.shape_cast %705 : vector<2x8xf32> to vector<2x8x1xf32>
    %707 = vector.broadcast %696 : vector<2x1x8xf32> to vector<2x8x8xf32>
    %708 = arith.mulf %704, %707 : vector<2x8x8xf32>
    %cst_186 = arith.constant dense<0.000000e+00> : vector<2x8xf32>
    %709 = vector.multi_reduction <add>, %708, %cst_186 [2] : vector<2x8x8xf32> to vector<2x8xf32>
    %710 = vector.shape_cast %709 : vector<2x8xf32> to vector<2x8x1xf32>
    %711 = tpu.reciprocal %706 {approx = true} : vector<2x8x1xf32> -> vector<2x8x1xf32>
    %712 = arith.mulf %710, %711 : vector<2x8x1xf32>
    %713 = vector.extract_strided_slice %664 {offsets = [1, 0], sizes = [1, 3], strides = [1, 1]} : vector<3x3xf32> to vector<1x3xf32>
    %714 = vector.shape_cast %713 : vector<1x3xf32> to vector<1x1x3xf32>
    %715 = vector.broadcast %712 : vector<2x8x1xf32> to vector<2x8x3xf32>
    %716 = vector.broadcast %714 : vector<1x1x3xf32> to vector<2x8x3xf32>
    %717 = arith.mulf %715, %716 : vector<2x8x3xf32>
    %718 = arith.addf %693, %717 : vector<2x8x3xf32>
    %719 = vector.extract_strided_slice %658 {offsets = [0, 0, 2], sizes = [2, 8, 1], strides = [1, 1, 1]} : vector<2x8x3xf32> to vector<2x8x1xf32>
    %720 = vector.extract_strided_slice %661 {offsets = [0, 2, 0], sizes = [2, 1, 8], strides = [1, 1, 1]} : vector<2x3x8xf32> to vector<2x1x8xf32>
    %721 = vector.extract_strided_slice %662 {offsets = [0, 2, 0], sizes = [2, 1, 8], strides = [1, 1, 1]} : vector<2x3x8xf32> to vector<2x1x8xf32>
    %722 = vector.broadcast %719 : vector<2x8x1xf32> to vector<2x8x8xf32>
    %723 = vector.broadcast %720 : vector<2x1x8xf32> to vector<2x8x8xf32>
    %724 = arith.mulf %722, %723 : vector<2x8x8xf32>
    %cst_187 = arith.constant dense<0xFF800000> : vector<2x8xf32>
    %725 = vector.multi_reduction <maximumf>, %724, %cst_187 [2] : vector<2x8x8xf32> to vector<2x8xf32>
    %726 = vector.shape_cast %725 : vector<2x8xf32> to vector<2x8x1xf32>
    %727 = vector.broadcast %726 : vector<2x8x1xf32> to vector<2x8x8xf32>
    %728 = arith.subf %724, %727 : vector<2x8x8xf32>
    %729 = math.exp %728 : vector<2x8x8xf32>
    %cst_188 = arith.constant dense<0.000000e+00> : vector<2x8xf32>
    %730 = vector.multi_reduction <add>, %729, %cst_188 [2] : vector<2x8x8xf32> to vector<2x8xf32>
    %731 = vector.shape_cast %730 : vector<2x8xf32> to vector<2x8x1xf32>
    %732 = vector.broadcast %721 : vector<2x1x8xf32> to vector<2x8x8xf32>
    %733 = arith.mulf %729, %732 : vector<2x8x8xf32>
    %cst_189 = arith.constant dense<0.000000e+00> : vector<2x8xf32>
    %734 = vector.multi_reduction <add>, %733, %cst_189 [2] : vector<2x8x8xf32> to vector<2x8xf32>
    %735 = vector.shape_cast %734 : vector<2x8xf32> to vector<2x8x1xf32>
    %736 = tpu.reciprocal %731 {approx = true} : vector<2x8x1xf32> -> vector<2x8x1xf32>
    %737 = arith.mulf %735, %736 : vector<2x8x1xf32>
    %738 = vector.extract_strided_slice %664 {offsets = [2, 0], sizes = [1, 3], strides = [1, 1]} : vector<3x3xf32> to vector<1x3xf32>
    %739 = vector.shape_cast %738 : vector<1x3xf32> to vector<1x1x3xf32>
    %740 = vector.broadcast %737 : vector<2x8x1xf32> to vector<2x8x3xf32>
    %741 = vector.broadcast %739 : vector<1x1x3xf32> to vector<2x8x3xf32>
    %742 = arith.mulf %740, %741 : vector<2x8x3xf32>
    %743 = arith.addf %718, %742 : vector<2x8x3xf32>
    %744 = arith.addf %630, %743 : vector<2x8x3xf32>
    %c3_190 = arith.constant 3 : index
    %c0_191 = arith.constant 0 : index
    %c0_192 = arith.constant 0 : index
    %745 = vector.load %arg6[%c3_190, %c0_191, %c0_192] : memref<10x1x3xf32, #tpu.memory_space<vmem>>, vector<1x1x3xf32>
    %746 = vector.shape_cast %745 : vector<1x1x3xf32> to vector<1x3xf32>
    %c3_193 = arith.constant 3 : index
    %c0_194 = arith.constant 0 : index
    %c0_195 = arith.constant 0 : index
    %747 = vector.load %arg7[%c3_193, %c0_194, %c0_195] : memref<10x1x3xf32, #tpu.memory_space<vmem>>, vector<1x1x3xf32>
    %748 = vector.shape_cast %747 : vector<1x1x3xf32> to vector<1x3xf32>
    %cst_196 = arith.constant dense<0.000000e+00> : vector<2x8xf32>
    %749 = vector.multi_reduction <add>, %744, %cst_196 [2] : vector<2x8x3xf32> to vector<2x8xf32>
    %750 = vector.shape_cast %749 : vector<2x8xf32> to vector<2x8x1xf32>
    %cst_197 = arith.constant 3.000000e+00 : f32
    %751 = vector.broadcast %cst_197 : f32 to vector<2x8x1xf32>
    %752 = arith.divf %750, %751 : vector<2x8x1xf32>
    %753 = vector.broadcast %752 : vector<2x8x1xf32> to vector<2x8x3xf32>
    %754 = arith.subf %744, %753 : vector<2x8x3xf32>
    %755 = arith.mulf %754, %754 : vector<2x8x3xf32>
    %cst_198 = arith.constant dense<0.000000e+00> : vector<2x8xf32>
    %756 = vector.multi_reduction <add>, %755, %cst_198 [2] : vector<2x8x3xf32> to vector<2x8xf32>
    %757 = vector.shape_cast %756 : vector<2x8xf32> to vector<2x8x1xf32>
    %cst_199 = arith.constant 3.000000e+00 : f32
    %758 = vector.broadcast %cst_199 : f32 to vector<2x8x1xf32>
    %759 = arith.divf %757, %758 : vector<2x8x1xf32>
    %760 = vector.broadcast %752 : vector<2x8x1xf32> to vector<2x8x3xf32>
    %761 = arith.subf %744, %760 : vector<2x8x3xf32>
    %cst_200 = arith.constant 9.99999974E-6 : f32
    %762 = vector.broadcast %cst_200 : f32 to vector<2x8x1xf32>
    %763 = arith.addf %759, %762 : vector<2x8x1xf32>
    %764 = math.rsqrt %763 : vector<2x8x1xf32>
    %765 = vector.broadcast %764 : vector<2x8x1xf32> to vector<2x8x3xf32>
    %766 = arith.mulf %761, %765 : vector<2x8x3xf32>
    %767 = vector.shape_cast %746 : vector<1x3xf32> to vector<1x1x3xf32>
    %768 = vector.broadcast %767 : vector<1x1x3xf32> to vector<2x8x3xf32>
    %769 = arith.mulf %766, %768 : vector<2x8x3xf32>
    %770 = vector.shape_cast %748 : vector<1x3xf32> to vector<1x1x3xf32>
    %771 = vector.broadcast %770 : vector<1x1x3xf32> to vector<2x8x3xf32>
    %772 = arith.addf %769, %771 : vector<2x8x3xf32>
    %c3_201 = arith.constant 3 : index
    %c0_202 = arith.constant 0 : index
    %c0_203 = arith.constant 0 : index
    %773 = vector.load %arg10[%c3_201, %c0_202, %c0_203] : memref<10x3x32xf32, #tpu.memory_space<vmem>>, vector<1x3x32xf32>
    %774 = vector.shape_cast %773 : vector<1x3x32xf32> to vector<3x32xf32>
    %775 = vector.extract_strided_slice %772 {offsets = [0, 0, 0], sizes = [2, 8, 1], strides = [1, 1, 1]} : vector<2x8x3xf32> to vector<2x8x1xf32>
    %776 = vector.extract_strided_slice %774 {offsets = [0, 0], sizes = [1, 32], strides = [1, 1]} : vector<3x32xf32> to vector<1x32xf32>
    %777 = vector.shape_cast %776 : vector<1x32xf32> to vector<1x1x32xf32>
    %778 = vector.broadcast %775 : vector<2x8x1xf32> to vector<2x8x32xf32>
    %779 = vector.broadcast %777 : vector<1x1x32xf32> to vector<2x8x32xf32>
    %780 = arith.mulf %778, %779 : vector<2x8x32xf32>
    %781 = vector.extract_strided_slice %772 {offsets = [0, 0, 1], sizes = [2, 8, 1], strides = [1, 1, 1]} : vector<2x8x3xf32> to vector<2x8x1xf32>
    %782 = vector.extract_strided_slice %774 {offsets = [1, 0], sizes = [1, 32], strides = [1, 1]} : vector<3x32xf32> to vector<1x32xf32>
    %783 = vector.shape_cast %782 : vector<1x32xf32> to vector<1x1x32xf32>
    %784 = vector.broadcast %781 : vector<2x8x1xf32> to vector<2x8x32xf32>
    %785 = vector.broadcast %783 : vector<1x1x32xf32> to vector<2x8x32xf32>
    %786 = arith.mulf %784, %785 : vector<2x8x32xf32>
    %787 = arith.addf %780, %786 : vector<2x8x32xf32>
    %788 = vector.extract_strided_slice %772 {offsets = [0, 0, 2], sizes = [2, 8, 1], strides = [1, 1, 1]} : vector<2x8x3xf32> to vector<2x8x1xf32>
    %789 = vector.extract_strided_slice %774 {offsets = [2, 0], sizes = [1, 32], strides = [1, 1]} : vector<3x32xf32> to vector<1x32xf32>
    %790 = vector.shape_cast %789 : vector<1x32xf32> to vector<1x1x32xf32>
    %791 = vector.broadcast %788 : vector<2x8x1xf32> to vector<2x8x32xf32>
    %792 = vector.broadcast %790 : vector<1x1x32xf32> to vector<2x8x32xf32>
    %793 = arith.mulf %791, %792 : vector<2x8x32xf32>
    %794 = arith.addf %787, %793 : vector<2x8x32xf32>
    %c3_204 = arith.constant 3 : index
    %c0_205 = arith.constant 0 : index
    %c0_206 = arith.constant 0 : index
    %795 = vector.load %arg11[%c3_204, %c0_205, %c0_206] : memref<10x1x32xf32, #tpu.memory_space<vmem>>, vector<1x1x32xf32>
    %796 = vector.shape_cast %795 : vector<1x1x32xf32> to vector<1x32xf32>
    %797 = vector.shape_cast %796 : vector<1x32xf32> to vector<1x1x32xf32>
    %798 = vector.broadcast %797 : vector<1x1x32xf32> to vector<2x8x32xf32>
    %799 = arith.addf %794, %798 : vector<2x8x32xf32>
    %cst_207 = arith.constant 0.000000e+00 : f32
    %800 = vector.broadcast %cst_207 : f32 to vector<2x8x32xf32>
    %801 = arith.maximumf %799, %800 : vector<2x8x32xf32>
    %802 = vector.shape_cast %801 : vector<2x8x32xf32> to vector<16x32xf32>
    %c3_208 = arith.constant 3 : index
    %c0_209 = arith.constant 0 : index
    %c0_210 = arith.constant 0 : index
    %803 = vector.load %arg12[%c3_208, %c0_209, %c0_210] : memref<10x32x3xf32, #tpu.memory_space<vmem>>, vector<1x32x3xf32>
    %804 = vector.shape_cast %803 : vector<1x32x3xf32> to vector<32x3xf32>
    %cst_211 = arith.constant dense<0.000000e+00> : vector<16x3xf32>
    %805 = tpu.matmul %802, %804, %cst_211 {dimension_numbers = #tpu.dot_dimension_numbers<[1], [0], [0], [1], [0, 0, 1, 1], [], []>} : vector<16x32xf32>, vector<32x3xf32>, vector<16x3xf32> -> vector<16x3xf32>
    %806 = vector.shape_cast %805 : vector<16x3xf32> to vector<2x8x3xf32>
    %c3_212 = arith.constant 3 : index
    %c0_213 = arith.constant 0 : index
    %c0_214 = arith.constant 0 : index
    %807 = vector.load %arg13[%c3_212, %c0_213, %c0_214] : memref<10x1x3xf32, #tpu.memory_space<vmem>>, vector<1x1x3xf32>
    %808 = vector.shape_cast %807 : vector<1x1x3xf32> to vector<1x3xf32>
    %809 = vector.shape_cast %808 : vector<1x3xf32> to vector<1x1x3xf32>
    %810 = vector.broadcast %809 : vector<1x1x3xf32> to vector<2x8x3xf32>
    %811 = arith.addf %806, %810 : vector<2x8x3xf32>
    %812 = arith.addf %772, %811 : vector<2x8x3xf32>
    %c3_215 = arith.constant 3 : index
    %c0_216 = arith.constant 0 : index
    %c0_217 = arith.constant 0 : index
    %813 = vector.load %arg8[%c3_215, %c0_216, %c0_217] : memref<10x1x3xf32, #tpu.memory_space<vmem>>, vector<1x1x3xf32>
    %814 = vector.shape_cast %813 : vector<1x1x3xf32> to vector<1x3xf32>
    %c3_218 = arith.constant 3 : index
    %c0_219 = arith.constant 0 : index
    %c0_220 = arith.constant 0 : index
    %815 = vector.load %arg9[%c3_218, %c0_219, %c0_220] : memref<10x1x3xf32, #tpu.memory_space<vmem>>, vector<1x1x3xf32>
    %816 = vector.shape_cast %815 : vector<1x1x3xf32> to vector<1x3xf32>
    %cst_221 = arith.constant dense<0.000000e+00> : vector<2x8xf32>
    %817 = vector.multi_reduction <add>, %812, %cst_221 [2] : vector<2x8x3xf32> to vector<2x8xf32>
    %818 = vector.shape_cast %817 : vector<2x8xf32> to vector<2x8x1xf32>
    %cst_222 = arith.constant 3.000000e+00 : f32
    %819 = vector.broadcast %cst_222 : f32 to vector<2x8x1xf32>
    %820 = arith.divf %818, %819 : vector<2x8x1xf32>
    %821 = vector.broadcast %820 : vector<2x8x1xf32> to vector<2x8x3xf32>
    %822 = arith.subf %812, %821 : vector<2x8x3xf32>
    %823 = arith.mulf %822, %822 : vector<2x8x3xf32>
    %cst_223 = arith.constant dense<0.000000e+00> : vector<2x8xf32>
    %824 = vector.multi_reduction <add>, %823, %cst_223 [2] : vector<2x8x3xf32> to vector<2x8xf32>
    %825 = vector.shape_cast %824 : vector<2x8xf32> to vector<2x8x1xf32>
    %cst_224 = arith.constant 3.000000e+00 : f32
    %826 = vector.broadcast %cst_224 : f32 to vector<2x8x1xf32>
    %827 = arith.divf %825, %826 : vector<2x8x1xf32>
    %828 = vector.broadcast %820 : vector<2x8x1xf32> to vector<2x8x3xf32>
    %829 = arith.subf %812, %828 : vector<2x8x3xf32>
    %cst_225 = arith.constant 9.99999974E-6 : f32
    %830 = vector.broadcast %cst_225 : f32 to vector<2x8x1xf32>
    %831 = arith.addf %827, %830 : vector<2x8x1xf32>
    %832 = math.rsqrt %831 : vector<2x8x1xf32>
    %833 = vector.broadcast %832 : vector<2x8x1xf32> to vector<2x8x3xf32>
    %834 = arith.mulf %829, %833 : vector<2x8x3xf32>
    %835 = vector.shape_cast %814 : vector<1x3xf32> to vector<1x1x3xf32>
    %836 = vector.broadcast %835 : vector<1x1x3xf32> to vector<2x8x3xf32>
    %837 = arith.mulf %834, %836 : vector<2x8x3xf32>
    %838 = vector.shape_cast %816 : vector<1x3xf32> to vector<1x1x3xf32>
    %839 = vector.broadcast %838 : vector<1x1x3xf32> to vector<2x8x3xf32>
    %840 = arith.addf %837, %839 : vector<2x8x3xf32>
    %c4 = arith.constant 4 : index
    %c0_226 = arith.constant 0 : index
    %c0_227 = arith.constant 0 : index
    %841 = vector.load %arg2[%c4, %c0_226, %c0_227] : memref<10x3x9xf32, #tpu.memory_space<vmem>>, vector<1x3x9xf32>
    %842 = vector.shape_cast %841 : vector<1x3x9xf32> to vector<3x9xf32>
    %843 = vector.extract_strided_slice %840 {offsets = [0, 0, 0], sizes = [2, 8, 1], strides = [1, 1, 1]} : vector<2x8x3xf32> to vector<2x8x1xf32>
    %844 = vector.extract_strided_slice %842 {offsets = [0, 0], sizes = [1, 9], strides = [1, 1]} : vector<3x9xf32> to vector<1x9xf32>
    %845 = vector.shape_cast %844 : vector<1x9xf32> to vector<1x1x9xf32>
    %846 = vector.broadcast %843 : vector<2x8x1xf32> to vector<2x8x9xf32>
    %847 = vector.broadcast %845 : vector<1x1x9xf32> to vector<2x8x9xf32>
    %848 = arith.mulf %846, %847 : vector<2x8x9xf32>
    %849 = vector.extract_strided_slice %840 {offsets = [0, 0, 1], sizes = [2, 8, 1], strides = [1, 1, 1]} : vector<2x8x3xf32> to vector<2x8x1xf32>
    %850 = vector.extract_strided_slice %842 {offsets = [1, 0], sizes = [1, 9], strides = [1, 1]} : vector<3x9xf32> to vector<1x9xf32>
    %851 = vector.shape_cast %850 : vector<1x9xf32> to vector<1x1x9xf32>
    %852 = vector.broadcast %849 : vector<2x8x1xf32> to vector<2x8x9xf32>
    %853 = vector.broadcast %851 : vector<1x1x9xf32> to vector<2x8x9xf32>
    %854 = arith.mulf %852, %853 : vector<2x8x9xf32>
    %855 = arith.addf %848, %854 : vector<2x8x9xf32>
    %856 = vector.extract_strided_slice %840 {offsets = [0, 0, 2], sizes = [2, 8, 1], strides = [1, 1, 1]} : vector<2x8x3xf32> to vector<2x8x1xf32>
    %857 = vector.extract_strided_slice %842 {offsets = [2, 0], sizes = [1, 9], strides = [1, 1]} : vector<3x9xf32> to vector<1x9xf32>
    %858 = vector.shape_cast %857 : vector<1x9xf32> to vector<1x1x9xf32>
    %859 = vector.broadcast %856 : vector<2x8x1xf32> to vector<2x8x9xf32>
    %860 = vector.broadcast %858 : vector<1x1x9xf32> to vector<2x8x9xf32>
    %861 = arith.mulf %859, %860 : vector<2x8x9xf32>
    %862 = arith.addf %855, %861 : vector<2x8x9xf32>
    %c4_228 = arith.constant 4 : index
    %c0_229 = arith.constant 0 : index
    %c0_230 = arith.constant 0 : index
    %863 = vector.load %arg3[%c4_228, %c0_229, %c0_230] : memref<10x1x9xf32, #tpu.memory_space<vmem>>, vector<1x1x9xf32>
    %864 = vector.shape_cast %863 : vector<1x1x9xf32> to vector<1x9xf32>
    %865 = vector.shape_cast %864 : vector<1x9xf32> to vector<1x1x9xf32>
    %866 = vector.broadcast %865 : vector<1x1x9xf32> to vector<2x8x9xf32>
    %867 = arith.addf %862, %866 : vector<2x8x9xf32>
    %868 = vector.extract_strided_slice %867 {offsets = [0, 0, 0], sizes = [2, 8, 3], strides = [1, 1, 1]} : vector<2x8x9xf32> to vector<2x8x3xf32>
    %869 = vector.extract_strided_slice %867 {offsets = [0, 0, 3], sizes = [2, 8, 3], strides = [1, 1, 1]} : vector<2x8x9xf32> to vector<2x8x3xf32>
    %870 = vector.extract_strided_slice %867 {offsets = [0, 0, 6], sizes = [2, 8, 3], strides = [1, 1, 1]} : vector<2x8x9xf32> to vector<2x8x3xf32>
    %871 = tpu.transpose %869, [0, 2, 1] : vector<2x8x3xf32> -> vector<2x3x8xf32>
    %872 = tpu.transpose %870, [0, 2, 1] : vector<2x8x3xf32> -> vector<2x3x8xf32>
    %c4_231 = arith.constant 4 : index
    %c0_232 = arith.constant 0 : index
    %c0_233 = arith.constant 0 : index
    %873 = vector.load %arg4[%c4_231, %c0_232, %c0_233] : memref<10x3x3xf32, #tpu.memory_space<vmem>>, vector<1x3x3xf32>
    %874 = vector.shape_cast %873 : vector<1x3x3xf32> to vector<3x3xf32>
    %c4_234 = arith.constant 4 : index
    %c0_235 = arith.constant 0 : index
    %c0_236 = arith.constant 0 : index
    %875 = vector.load %arg5[%c4_234, %c0_235, %c0_236] : memref<10x1x3xf32, #tpu.memory_space<vmem>>, vector<1x1x3xf32>
    %876 = vector.shape_cast %875 : vector<1x1x3xf32> to vector<1x3xf32>
    %877 = vector.extract_strided_slice %868 {offsets = [0, 0, 0], sizes = [2, 8, 1], strides = [1, 1, 1]} : vector<2x8x3xf32> to vector<2x8x1xf32>
    %878 = vector.extract_strided_slice %871 {offsets = [0, 0, 0], sizes = [2, 1, 8], strides = [1, 1, 1]} : vector<2x3x8xf32> to vector<2x1x8xf32>
    %879 = vector.extract_strided_slice %872 {offsets = [0, 0, 0], sizes = [2, 1, 8], strides = [1, 1, 1]} : vector<2x3x8xf32> to vector<2x1x8xf32>
    %880 = vector.broadcast %877 : vector<2x8x1xf32> to vector<2x8x8xf32>
    %881 = vector.broadcast %878 : vector<2x1x8xf32> to vector<2x8x8xf32>
    %882 = arith.mulf %880, %881 : vector<2x8x8xf32>
    %cst_237 = arith.constant dense<0xFF800000> : vector<2x8xf32>
    %883 = vector.multi_reduction <maximumf>, %882, %cst_237 [2] : vector<2x8x8xf32> to vector<2x8xf32>
    %884 = vector.shape_cast %883 : vector<2x8xf32> to vector<2x8x1xf32>
    %885 = vector.broadcast %884 : vector<2x8x1xf32> to vector<2x8x8xf32>
    %886 = arith.subf %882, %885 : vector<2x8x8xf32>
    %887 = math.exp %886 : vector<2x8x8xf32>
    %cst_238 = arith.constant dense<0.000000e+00> : vector<2x8xf32>
    %888 = vector.multi_reduction <add>, %887, %cst_238 [2] : vector<2x8x8xf32> to vector<2x8xf32>
    %889 = vector.shape_cast %888 : vector<2x8xf32> to vector<2x8x1xf32>
    %890 = vector.broadcast %879 : vector<2x1x8xf32> to vector<2x8x8xf32>
    %891 = arith.mulf %887, %890 : vector<2x8x8xf32>
    %cst_239 = arith.constant dense<0.000000e+00> : vector<2x8xf32>
    %892 = vector.multi_reduction <add>, %891, %cst_239 [2] : vector<2x8x8xf32> to vector<2x8xf32>
    %893 = vector.shape_cast %892 : vector<2x8xf32> to vector<2x8x1xf32>
    %894 = tpu.reciprocal %889 {approx = true} : vector<2x8x1xf32> -> vector<2x8x1xf32>
    %895 = arith.mulf %893, %894 : vector<2x8x1xf32>
    %896 = vector.extract_strided_slice %874 {offsets = [0, 0], sizes = [1, 3], strides = [1, 1]} : vector<3x3xf32> to vector<1x3xf32>
    %897 = vector.shape_cast %896 : vector<1x3xf32> to vector<1x1x3xf32>
    %898 = vector.broadcast %895 : vector<2x8x1xf32> to vector<2x8x3xf32>
    %899 = vector.broadcast %897 : vector<1x1x3xf32> to vector<2x8x3xf32>
    %900 = arith.mulf %898, %899 : vector<2x8x3xf32>
    %901 = vector.shape_cast %876 : vector<1x3xf32> to vector<1x1x3xf32>
    %902 = vector.broadcast %901 : vector<1x1x3xf32> to vector<2x8x3xf32>
    %903 = arith.addf %902, %900 : vector<2x8x3xf32>
    %904 = vector.extract_strided_slice %868 {offsets = [0, 0, 1], sizes = [2, 8, 1], strides = [1, 1, 1]} : vector<2x8x3xf32> to vector<2x8x1xf32>
    %905 = vector.extract_strided_slice %871 {offsets = [0, 1, 0], sizes = [2, 1, 8], strides = [1, 1, 1]} : vector<2x3x8xf32> to vector<2x1x8xf32>
    %906 = vector.extract_strided_slice %872 {offsets = [0, 1, 0], sizes = [2, 1, 8], strides = [1, 1, 1]} : vector<2x3x8xf32> to vector<2x1x8xf32>
    %907 = vector.broadcast %904 : vector<2x8x1xf32> to vector<2x8x8xf32>
    %908 = vector.broadcast %905 : vector<2x1x8xf32> to vector<2x8x8xf32>
    %909 = arith.mulf %907, %908 : vector<2x8x8xf32>
    %cst_240 = arith.constant dense<0xFF800000> : vector<2x8xf32>
    %910 = vector.multi_reduction <maximumf>, %909, %cst_240 [2] : vector<2x8x8xf32> to vector<2x8xf32>
    %911 = vector.shape_cast %910 : vector<2x8xf32> to vector<2x8x1xf32>
    %912 = vector.broadcast %911 : vector<2x8x1xf32> to vector<2x8x8xf32>
    %913 = arith.subf %909, %912 : vector<2x8x8xf32>
    %914 = math.exp %913 : vector<2x8x8xf32>
    %cst_241 = arith.constant dense<0.000000e+00> : vector<2x8xf32>
    %915 = vector.multi_reduction <add>, %914, %cst_241 [2] : vector<2x8x8xf32> to vector<2x8xf32>
    %916 = vector.shape_cast %915 : vector<2x8xf32> to vector<2x8x1xf32>
    %917 = vector.broadcast %906 : vector<2x1x8xf32> to vector<2x8x8xf32>
    %918 = arith.mulf %914, %917 : vector<2x8x8xf32>
    %cst_242 = arith.constant dense<0.000000e+00> : vector<2x8xf32>
    %919 = vector.multi_reduction <add>, %918, %cst_242 [2] : vector<2x8x8xf32> to vector<2x8xf32>
    %920 = vector.shape_cast %919 : vector<2x8xf32> to vector<2x8x1xf32>
    %921 = tpu.reciprocal %916 {approx = true} : vector<2x8x1xf32> -> vector<2x8x1xf32>
    %922 = arith.mulf %920, %921 : vector<2x8x1xf32>
    %923 = vector.extract_strided_slice %874 {offsets = [1, 0], sizes = [1, 3], strides = [1, 1]} : vector<3x3xf32> to vector<1x3xf32>
    %924 = vector.shape_cast %923 : vector<1x3xf32> to vector<1x1x3xf32>
    %925 = vector.broadcast %922 : vector<2x8x1xf32> to vector<2x8x3xf32>
    %926 = vector.broadcast %924 : vector<1x1x3xf32> to vector<2x8x3xf32>
    %927 = arith.mulf %925, %926 : vector<2x8x3xf32>
    %928 = arith.addf %903, %927 : vector<2x8x3xf32>
    %929 = vector.extract_strided_slice %868 {offsets = [0, 0, 2], sizes = [2, 8, 1], strides = [1, 1, 1]} : vector<2x8x3xf32> to vector<2x8x1xf32>
    %930 = vector.extract_strided_slice %871 {offsets = [0, 2, 0], sizes = [2, 1, 8], strides = [1, 1, 1]} : vector<2x3x8xf32> to vector<2x1x8xf32>
    %931 = vector.extract_strided_slice %872 {offsets = [0, 2, 0], sizes = [2, 1, 8], strides = [1, 1, 1]} : vector<2x3x8xf32> to vector<2x1x8xf32>
    %932 = vector.broadcast %929 : vector<2x8x1xf32> to vector<2x8x8xf32>
    %933 = vector.broadcast %930 : vector<2x1x8xf32> to vector<2x8x8xf32>
    %934 = arith.mulf %932, %933 : vector<2x8x8xf32>
    %cst_243 = arith.constant dense<0xFF800000> : vector<2x8xf32>
    %935 = vector.multi_reduction <maximumf>, %934, %cst_243 [2] : vector<2x8x8xf32> to vector<2x8xf32>
    %936 = vector.shape_cast %935 : vector<2x8xf32> to vector<2x8x1xf32>
    %937 = vector.broadcast %936 : vector<2x8x1xf32> to vector<2x8x8xf32>
    %938 = arith.subf %934, %937 : vector<2x8x8xf32>
    %939 = math.exp %938 : vector<2x8x8xf32>
    %cst_244 = arith.constant dense<0.000000e+00> : vector<2x8xf32>
    %940 = vector.multi_reduction <add>, %939, %cst_244 [2] : vector<2x8x8xf32> to vector<2x8xf32>
    %941 = vector.shape_cast %940 : vector<2x8xf32> to vector<2x8x1xf32>
    %942 = vector.broadcast %931 : vector<2x1x8xf32> to vector<2x8x8xf32>
    %943 = arith.mulf %939, %942 : vector<2x8x8xf32>
    %cst_245 = arith.constant dense<0.000000e+00> : vector<2x8xf32>
    %944 = vector.multi_reduction <add>, %943, %cst_245 [2] : vector<2x8x8xf32> to vector<2x8xf32>
    %945 = vector.shape_cast %944 : vector<2x8xf32> to vector<2x8x1xf32>
    %946 = tpu.reciprocal %941 {approx = true} : vector<2x8x1xf32> -> vector<2x8x1xf32>
    %947 = arith.mulf %945, %946 : vector<2x8x1xf32>
    %948 = vector.extract_strided_slice %874 {offsets = [2, 0], sizes = [1, 3], strides = [1, 1]} : vector<3x3xf32> to vector<1x3xf32>
    %949 = vector.shape_cast %948 : vector<1x3xf32> to vector<1x1x3xf32>
    %950 = vector.broadcast %947 : vector<2x8x1xf32> to vector<2x8x3xf32>
    %951 = vector.broadcast %949 : vector<1x1x3xf32> to vector<2x8x3xf32>
    %952 = arith.mulf %950, %951 : vector<2x8x3xf32>
    %953 = arith.addf %928, %952 : vector<2x8x3xf32>
    %954 = arith.addf %840, %953 : vector<2x8x3xf32>
    %c4_246 = arith.constant 4 : index
    %c0_247 = arith.constant 0 : index
    %c0_248 = arith.constant 0 : index
    %955 = vector.load %arg6[%c4_246, %c0_247, %c0_248] : memref<10x1x3xf32, #tpu.memory_space<vmem>>, vector<1x1x3xf32>
    %956 = vector.shape_cast %955 : vector<1x1x3xf32> to vector<1x3xf32>
    %c4_249 = arith.constant 4 : index
    %c0_250 = arith.constant 0 : index
    %c0_251 = arith.constant 0 : index
    %957 = vector.load %arg7[%c4_249, %c0_250, %c0_251] : memref<10x1x3xf32, #tpu.memory_space<vmem>>, vector<1x1x3xf32>
    %958 = vector.shape_cast %957 : vector<1x1x3xf32> to vector<1x3xf32>
    %cst_252 = arith.constant dense<0.000000e+00> : vector<2x8xf32>
    %959 = vector.multi_reduction <add>, %954, %cst_252 [2] : vector<2x8x3xf32> to vector<2x8xf32>
    %960 = vector.shape_cast %959 : vector<2x8xf32> to vector<2x8x1xf32>
    %cst_253 = arith.constant 3.000000e+00 : f32
    %961 = vector.broadcast %cst_253 : f32 to vector<2x8x1xf32>
    %962 = arith.divf %960, %961 : vector<2x8x1xf32>
    %963 = vector.broadcast %962 : vector<2x8x1xf32> to vector<2x8x3xf32>
    %964 = arith.subf %954, %963 : vector<2x8x3xf32>
    %965 = arith.mulf %964, %964 : vector<2x8x3xf32>
    %cst_254 = arith.constant dense<0.000000e+00> : vector<2x8xf32>
    %966 = vector.multi_reduction <add>, %965, %cst_254 [2] : vector<2x8x3xf32> to vector<2x8xf32>
    %967 = vector.shape_cast %966 : vector<2x8xf32> to vector<2x8x1xf32>
    %cst_255 = arith.constant 3.000000e+00 : f32
    %968 = vector.broadcast %cst_255 : f32 to vector<2x8x1xf32>
    %969 = arith.divf %967, %968 : vector<2x8x1xf32>
    %970 = vector.broadcast %962 : vector<2x8x1xf32> to vector<2x8x3xf32>
    %971 = arith.subf %954, %970 : vector<2x8x3xf32>
    %cst_256 = arith.constant 9.99999974E-6 : f32
    %972 = vector.broadcast %cst_256 : f32 to vector<2x8x1xf32>
    %973 = arith.addf %969, %972 : vector<2x8x1xf32>
    %974 = math.rsqrt %973 : vector<2x8x1xf32>
    %975 = vector.broadcast %974 : vector<2x8x1xf32> to vector<2x8x3xf32>
    %976 = arith.mulf %971, %975 : vector<2x8x3xf32>
    %977 = vector.shape_cast %956 : vector<1x3xf32> to vector<1x1x3xf32>
    %978 = vector.broadcast %977 : vector<1x1x3xf32> to vector<2x8x3xf32>
    %979 = arith.mulf %976, %978 : vector<2x8x3xf32>
    %980 = vector.shape_cast %958 : vector<1x3xf32> to vector<1x1x3xf32>
    %981 = vector.broadcast %980 : vector<1x1x3xf32> to vector<2x8x3xf32>
    %982 = arith.addf %979, %981 : vector<2x8x3xf32>
    %c4_257 = arith.constant 4 : index
    %c0_258 = arith.constant 0 : index
    %c0_259 = arith.constant 0 : index
    %983 = vector.load %arg10[%c4_257, %c0_258, %c0_259] : memref<10x3x32xf32, #tpu.memory_space<vmem>>, vector<1x3x32xf32>
    %984 = vector.shape_cast %983 : vector<1x3x32xf32> to vector<3x32xf32>
    %985 = vector.extract_strided_slice %982 {offsets = [0, 0, 0], sizes = [2, 8, 1], strides = [1, 1, 1]} : vector<2x8x3xf32> to vector<2x8x1xf32>
    %986 = vector.extract_strided_slice %984 {offsets = [0, 0], sizes = [1, 32], strides = [1, 1]} : vector<3x32xf32> to vector<1x32xf32>
    %987 = vector.shape_cast %986 : vector<1x32xf32> to vector<1x1x32xf32>
    %988 = vector.broadcast %985 : vector<2x8x1xf32> to vector<2x8x32xf32>
    %989 = vector.broadcast %987 : vector<1x1x32xf32> to vector<2x8x32xf32>
    %990 = arith.mulf %988, %989 : vector<2x8x32xf32>
    %991 = vector.extract_strided_slice %982 {offsets = [0, 0, 1], sizes = [2, 8, 1], strides = [1, 1, 1]} : vector<2x8x3xf32> to vector<2x8x1xf32>
    %992 = vector.extract_strided_slice %984 {offsets = [1, 0], sizes = [1, 32], strides = [1, 1]} : vector<3x32xf32> to vector<1x32xf32>
    %993 = vector.shape_cast %992 : vector<1x32xf32> to vector<1x1x32xf32>
    %994 = vector.broadcast %991 : vector<2x8x1xf32> to vector<2x8x32xf32>
    %995 = vector.broadcast %993 : vector<1x1x32xf32> to vector<2x8x32xf32>
    %996 = arith.mulf %994, %995 : vector<2x8x32xf32>
    %997 = arith.addf %990, %996 : vector<2x8x32xf32>
    %998 = vector.extract_strided_slice %982 {offsets = [0, 0, 2], sizes = [2, 8, 1], strides = [1, 1, 1]} : vector<2x8x3xf32> to vector<2x8x1xf32>
    %999 = vector.extract_strided_slice %984 {offsets = [2, 0], sizes = [1, 32], strides = [1, 1]} : vector<3x32xf32> to vector<1x32xf32>
    %1000 = vector.shape_cast %999 : vector<1x32xf32> to vector<1x1x32xf32>
    %1001 = vector.broadcast %998 : vector<2x8x1xf32> to vector<2x8x32xf32>
    %1002 = vector.broadcast %1000 : vector<1x1x32xf32> to vector<2x8x32xf32>
    %1003 = arith.mulf %1001, %1002 : vector<2x8x32xf32>
    %1004 = arith.addf %997, %1003 : vector<2x8x32xf32>
    %c4_260 = arith.constant 4 : index
    %c0_261 = arith.constant 0 : index
    %c0_262 = arith.constant 0 : index
    %1005 = vector.load %arg11[%c4_260, %c0_261, %c0_262] : memref<10x1x32xf32, #tpu.memory_space<vmem>>, vector<1x1x32xf32>
    %1006 = vector.shape_cast %1005 : vector<1x1x32xf32> to vector<1x32xf32>
    %1007 = vector.shape_cast %1006 : vector<1x32xf32> to vector<1x1x32xf32>
    %1008 = vector.broadcast %1007 : vector<1x1x32xf32> to vector<2x8x32xf32>
    %1009 = arith.addf %1004, %1008 : vector<2x8x32xf32>
    %cst_263 = arith.constant 0.000000e+00 : f32
    %1010 = vector.broadcast %cst_263 : f32 to vector<2x8x32xf32>
    %1011 = arith.maximumf %1009, %1010 : vector<2x8x32xf32>
    %1012 = vector.shape_cast %1011 : vector<2x8x32xf32> to vector<16x32xf32>
    %c4_264 = arith.constant 4 : index
    %c0_265 = arith.constant 0 : index
    %c0_266 = arith.constant 0 : index
    %1013 = vector.load %arg12[%c4_264, %c0_265, %c0_266] : memref<10x32x3xf32, #tpu.memory_space<vmem>>, vector<1x32x3xf32>
    %1014 = vector.shape_cast %1013 : vector<1x32x3xf32> to vector<32x3xf32>
    %cst_267 = arith.constant dense<0.000000e+00> : vector<16x3xf32>
    %1015 = tpu.matmul %1012, %1014, %cst_267 {dimension_numbers = #tpu.dot_dimension_numbers<[1], [0], [0], [1], [0, 0, 1, 1], [], []>} : vector<16x32xf32>, vector<32x3xf32>, vector<16x3xf32> -> vector<16x3xf32>
    %1016 = vector.shape_cast %1015 : vector<16x3xf32> to vector<2x8x3xf32>
    %c4_268 = arith.constant 4 : index
    %c0_269 = arith.constant 0 : index
    %c0_270 = arith.constant 0 : index
    %1017 = vector.load %arg13[%c4_268, %c0_269, %c0_270] : memref<10x1x3xf32, #tpu.memory_space<vmem>>, vector<1x1x3xf32>
    %1018 = vector.shape_cast %1017 : vector<1x1x3xf32> to vector<1x3xf32>
    %1019 = vector.shape_cast %1018 : vector<1x3xf32> to vector<1x1x3xf32>
    %1020 = vector.broadcast %1019 : vector<1x1x3xf32> to vector<2x8x3xf32>
    %1021 = arith.addf %1016, %1020 : vector<2x8x3xf32>
    %1022 = arith.addf %982, %1021 : vector<2x8x3xf32>
    %c4_271 = arith.constant 4 : index
    %c0_272 = arith.constant 0 : index
    %c0_273 = arith.constant 0 : index
    %1023 = vector.load %arg8[%c4_271, %c0_272, %c0_273] : memref<10x1x3xf32, #tpu.memory_space<vmem>>, vector<1x1x3xf32>
    %1024 = vector.shape_cast %1023 : vector<1x1x3xf32> to vector<1x3xf32>
    %c4_274 = arith.constant 4 : index
    %c0_275 = arith.constant 0 : index
    %c0_276 = arith.constant 0 : index
    %1025 = vector.load %arg9[%c4_274, %c0_275, %c0_276] : memref<10x1x3xf32, #tpu.memory_space<vmem>>, vector<1x1x3xf32>
    %1026 = vector.shape_cast %1025 : vector<1x1x3xf32> to vector<1x3xf32>
    %cst_277 = arith.constant dense<0.000000e+00> : vector<2x8xf32>
    %1027 = vector.multi_reduction <add>, %1022, %cst_277 [2] : vector<2x8x3xf32> to vector<2x8xf32>
    %1028 = vector.shape_cast %1027 : vector<2x8xf32> to vector<2x8x1xf32>
    %cst_278 = arith.constant 3.000000e+00 : f32
    %1029 = vector.broadcast %cst_278 : f32 to vector<2x8x1xf32>
    %1030 = arith.divf %1028, %1029 : vector<2x8x1xf32>
    %1031 = vector.broadcast %1030 : vector<2x8x1xf32> to vector<2x8x3xf32>
    %1032 = arith.subf %1022, %1031 : vector<2x8x3xf32>
    %1033 = arith.mulf %1032, %1032 : vector<2x8x3xf32>
    %cst_279 = arith.constant dense<0.000000e+00> : vector<2x8xf32>
    %1034 = vector.multi_reduction <add>, %1033, %cst_279 [2] : vector<2x8x3xf32> to vector<2x8xf32>
    %1035 = vector.shape_cast %1034 : vector<2x8xf32> to vector<2x8x1xf32>
    %cst_280 = arith.constant 3.000000e+00 : f32
    %1036 = vector.broadcast %cst_280 : f32 to vector<2x8x1xf32>
    %1037 = arith.divf %1035, %1036 : vector<2x8x1xf32>
    %1038 = vector.broadcast %1030 : vector<2x8x1xf32> to vector<2x8x3xf32>
    %1039 = arith.subf %1022, %1038 : vector<2x8x3xf32>
    %cst_281 = arith.constant 9.99999974E-6 : f32
    %1040 = vector.broadcast %cst_281 : f32 to vector<2x8x1xf32>
    %1041 = arith.addf %1037, %1040 : vector<2x8x1xf32>
    %1042 = math.rsqrt %1041 : vector<2x8x1xf32>
    %1043 = vector.broadcast %1042 : vector<2x8x1xf32> to vector<2x8x3xf32>
    %1044 = arith.mulf %1039, %1043 : vector<2x8x3xf32>
    %1045 = vector.shape_cast %1024 : vector<1x3xf32> to vector<1x1x3xf32>
    %1046 = vector.broadcast %1045 : vector<1x1x3xf32> to vector<2x8x3xf32>
    %1047 = arith.mulf %1044, %1046 : vector<2x8x3xf32>
    %1048 = vector.shape_cast %1026 : vector<1x3xf32> to vector<1x1x3xf32>
    %1049 = vector.broadcast %1048 : vector<1x1x3xf32> to vector<2x8x3xf32>
    %1050 = arith.addf %1047, %1049 : vector<2x8x3xf32>
    %c5 = arith.constant 5 : index
    %c0_282 = arith.constant 0 : index
    %c0_283 = arith.constant 0 : index
    %1051 = vector.load %arg2[%c5, %c0_282, %c0_283] : memref<10x3x9xf32, #tpu.memory_space<vmem>>, vector<1x3x9xf32>
    %1052 = vector.shape_cast %1051 : vector<1x3x9xf32> to vector<3x9xf32>
    %1053 = vector.extract_strided_slice %1050 {offsets = [0, 0, 0], sizes = [2, 8, 1], strides = [1, 1, 1]} : vector<2x8x3xf32> to vector<2x8x1xf32>
    %1054 = vector.extract_strided_slice %1052 {offsets = [0, 0], sizes = [1, 9], strides = [1, 1]} : vector<3x9xf32> to vector<1x9xf32>
    %1055 = vector.shape_cast %1054 : vector<1x9xf32> to vector<1x1x9xf32>
    %1056 = vector.broadcast %1053 : vector<2x8x1xf32> to vector<2x8x9xf32>
    %1057 = vector.broadcast %1055 : vector<1x1x9xf32> to vector<2x8x9xf32>
    %1058 = arith.mulf %1056, %1057 : vector<2x8x9xf32>
    %1059 = vector.extract_strided_slice %1050 {offsets = [0, 0, 1], sizes = [2, 8, 1], strides = [1, 1, 1]} : vector<2x8x3xf32> to vector<2x8x1xf32>
    %1060 = vector.extract_strided_slice %1052 {offsets = [1, 0], sizes = [1, 9], strides = [1, 1]} : vector<3x9xf32> to vector<1x9xf32>
    %1061 = vector.shape_cast %1060 : vector<1x9xf32> to vector<1x1x9xf32>
    %1062 = vector.broadcast %1059 : vector<2x8x1xf32> to vector<2x8x9xf32>
    %1063 = vector.broadcast %1061 : vector<1x1x9xf32> to vector<2x8x9xf32>
    %1064 = arith.mulf %1062, %1063 : vector<2x8x9xf32>
    %1065 = arith.addf %1058, %1064 : vector<2x8x9xf32>
    %1066 = vector.extract_strided_slice %1050 {offsets = [0, 0, 2], sizes = [2, 8, 1], strides = [1, 1, 1]} : vector<2x8x3xf32> to vector<2x8x1xf32>
    %1067 = vector.extract_strided_slice %1052 {offsets = [2, 0], sizes = [1, 9], strides = [1, 1]} : vector<3x9xf32> to vector<1x9xf32>
    %1068 = vector.shape_cast %1067 : vector<1x9xf32> to vector<1x1x9xf32>
    %1069 = vector.broadcast %1066 : vector<2x8x1xf32> to vector<2x8x9xf32>
    %1070 = vector.broadcast %1068 : vector<1x1x9xf32> to vector<2x8x9xf32>
    %1071 = arith.mulf %1069, %1070 : vector<2x8x9xf32>
    %1072 = arith.addf %1065, %1071 : vector<2x8x9xf32>
    %c5_284 = arith.constant 5 : index
    %c0_285 = arith.constant 0 : index
    %c0_286 = arith.constant 0 : index
    %1073 = vector.load %arg3[%c5_284, %c0_285, %c0_286] : memref<10x1x9xf32, #tpu.memory_space<vmem>>, vector<1x1x9xf32>
    %1074 = vector.shape_cast %1073 : vector<1x1x9xf32> to vector<1x9xf32>
    %1075 = vector.shape_cast %1074 : vector<1x9xf32> to vector<1x1x9xf32>
    %1076 = vector.broadcast %1075 : vector<1x1x9xf32> to vector<2x8x9xf32>
    %1077 = arith.addf %1072, %1076 : vector<2x8x9xf32>
    %1078 = vector.extract_strided_slice %1077 {offsets = [0, 0, 0], sizes = [2, 8, 3], strides = [1, 1, 1]} : vector<2x8x9xf32> to vector<2x8x3xf32>
    %1079 = vector.extract_strided_slice %1077 {offsets = [0, 0, 3], sizes = [2, 8, 3], strides = [1, 1, 1]} : vector<2x8x9xf32> to vector<2x8x3xf32>
    %1080 = vector.extract_strided_slice %1077 {offsets = [0, 0, 6], sizes = [2, 8, 3], strides = [1, 1, 1]} : vector<2x8x9xf32> to vector<2x8x3xf32>
    %1081 = tpu.transpose %1079, [0, 2, 1] : vector<2x8x3xf32> -> vector<2x3x8xf32>
    %1082 = tpu.transpose %1080, [0, 2, 1] : vector<2x8x3xf32> -> vector<2x3x8xf32>
    %c5_287 = arith.constant 5 : index
    %c0_288 = arith.constant 0 : index
    %c0_289 = arith.constant 0 : index
    %1083 = vector.load %arg4[%c5_287, %c0_288, %c0_289] : memref<10x3x3xf32, #tpu.memory_space<vmem>>, vector<1x3x3xf32>
    %1084 = vector.shape_cast %1083 : vector<1x3x3xf32> to vector<3x3xf32>
    %c5_290 = arith.constant 5 : index
    %c0_291 = arith.constant 0 : index
    %c0_292 = arith.constant 0 : index
    %1085 = vector.load %arg5[%c5_290, %c0_291, %c0_292] : memref<10x1x3xf32, #tpu.memory_space<vmem>>, vector<1x1x3xf32>
    %1086 = vector.shape_cast %1085 : vector<1x1x3xf32> to vector<1x3xf32>
    %1087 = vector.extract_strided_slice %1078 {offsets = [0, 0, 0], sizes = [2, 8, 1], strides = [1, 1, 1]} : vector<2x8x3xf32> to vector<2x8x1xf32>
    %1088 = vector.extract_strided_slice %1081 {offsets = [0, 0, 0], sizes = [2, 1, 8], strides = [1, 1, 1]} : vector<2x3x8xf32> to vector<2x1x8xf32>
    %1089 = vector.extract_strided_slice %1082 {offsets = [0, 0, 0], sizes = [2, 1, 8], strides = [1, 1, 1]} : vector<2x3x8xf32> to vector<2x1x8xf32>
    %1090 = vector.broadcast %1087 : vector<2x8x1xf32> to vector<2x8x8xf32>
    %1091 = vector.broadcast %1088 : vector<2x1x8xf32> to vector<2x8x8xf32>
    %1092 = arith.mulf %1090, %1091 : vector<2x8x8xf32>
    %cst_293 = arith.constant dense<0xFF800000> : vector<2x8xf32>
    %1093 = vector.multi_reduction <maximumf>, %1092, %cst_293 [2] : vector<2x8x8xf32> to vector<2x8xf32>
    %1094 = vector.shape_cast %1093 : vector<2x8xf32> to vector<2x8x1xf32>
    %1095 = vector.broadcast %1094 : vector<2x8x1xf32> to vector<2x8x8xf32>
    %1096 = arith.subf %1092, %1095 : vector<2x8x8xf32>
    %1097 = math.exp %1096 : vector<2x8x8xf32>
    %cst_294 = arith.constant dense<0.000000e+00> : vector<2x8xf32>
    %1098 = vector.multi_reduction <add>, %1097, %cst_294 [2] : vector<2x8x8xf32> to vector<2x8xf32>
    %1099 = vector.shape_cast %1098 : vector<2x8xf32> to vector<2x8x1xf32>
    %1100 = vector.broadcast %1089 : vector<2x1x8xf32> to vector<2x8x8xf32>
    %1101 = arith.mulf %1097, %1100 : vector<2x8x8xf32>
    %cst_295 = arith.constant dense<0.000000e+00> : vector<2x8xf32>
    %1102 = vector.multi_reduction <add>, %1101, %cst_295 [2] : vector<2x8x8xf32> to vector<2x8xf32>
    %1103 = vector.shape_cast %1102 : vector<2x8xf32> to vector<2x8x1xf32>
    %1104 = tpu.reciprocal %1099 {approx = true} : vector<2x8x1xf32> -> vector<2x8x1xf32>
    %1105 = arith.mulf %1103, %1104 : vector<2x8x1xf32>
    %1106 = vector.extract_strided_slice %1084 {offsets = [0, 0], sizes = [1, 3], strides = [1, 1]} : vector<3x3xf32> to vector<1x3xf32>
    %1107 = vector.shape_cast %1106 : vector<1x3xf32> to vector<1x1x3xf32>
    %1108 = vector.broadcast %1105 : vector<2x8x1xf32> to vector<2x8x3xf32>
    %1109 = vector.broadcast %1107 : vector<1x1x3xf32> to vector<2x8x3xf32>
    %1110 = arith.mulf %1108, %1109 : vector<2x8x3xf32>
    %1111 = vector.shape_cast %1086 : vector<1x3xf32> to vector<1x1x3xf32>
    %1112 = vector.broadcast %1111 : vector<1x1x3xf32> to vector<2x8x3xf32>
    %1113 = arith.addf %1112, %1110 : vector<2x8x3xf32>
    %1114 = vector.extract_strided_slice %1078 {offsets = [0, 0, 1], sizes = [2, 8, 1], strides = [1, 1, 1]} : vector<2x8x3xf32> to vector<2x8x1xf32>
    %1115 = vector.extract_strided_slice %1081 {offsets = [0, 1, 0], sizes = [2, 1, 8], strides = [1, 1, 1]} : vector<2x3x8xf32> to vector<2x1x8xf32>
    %1116 = vector.extract_strided_slice %1082 {offsets = [0, 1, 0], sizes = [2, 1, 8], strides = [1, 1, 1]} : vector<2x3x8xf32> to vector<2x1x8xf32>
    %1117 = vector.broadcast %1114 : vector<2x8x1xf32> to vector<2x8x8xf32>
    %1118 = vector.broadcast %1115 : vector<2x1x8xf32> to vector<2x8x8xf32>
    %1119 = arith.mulf %1117, %1118 : vector<2x8x8xf32>
    %cst_296 = arith.constant dense<0xFF800000> : vector<2x8xf32>
    %1120 = vector.multi_reduction <maximumf>, %1119, %cst_296 [2] : vector<2x8x8xf32> to vector<2x8xf32>
    %1121 = vector.shape_cast %1120 : vector<2x8xf32> to vector<2x8x1xf32>
    %1122 = vector.broadcast %1121 : vector<2x8x1xf32> to vector<2x8x8xf32>
    %1123 = arith.subf %1119, %1122 : vector<2x8x8xf32>
    %1124 = math.exp %1123 : vector<2x8x8xf32>
    %cst_297 = arith.constant dense<0.000000e+00> : vector<2x8xf32>
    %1125 = vector.multi_reduction <add>, %1124, %cst_297 [2] : vector<2x8x8xf32> to vector<2x8xf32>
    %1126 = vector.shape_cast %1125 : vector<2x8xf32> to vector<2x8x1xf32>
    %1127 = vector.broadcast %1116 : vector<2x1x8xf32> to vector<2x8x8xf32>
    %1128 = arith.mulf %1124, %1127 : vector<2x8x8xf32>
    %cst_298 = arith.constant dense<0.000000e+00> : vector<2x8xf32>
    %1129 = vector.multi_reduction <add>, %1128, %cst_298 [2] : vector<2x8x8xf32> to vector<2x8xf32>
    %1130 = vector.shape_cast %1129 : vector<2x8xf32> to vector<2x8x1xf32>
    %1131 = tpu.reciprocal %1126 {approx = true} : vector<2x8x1xf32> -> vector<2x8x1xf32>
    %1132 = arith.mulf %1130, %1131 : vector<2x8x1xf32>
    %1133 = vector.extract_strided_slice %1084 {offsets = [1, 0], sizes = [1, 3], strides = [1, 1]} : vector<3x3xf32> to vector<1x3xf32>
    %1134 = vector.shape_cast %1133 : vector<1x3xf32> to vector<1x1x3xf32>
    %1135 = vector.broadcast %1132 : vector<2x8x1xf32> to vector<2x8x3xf32>
    %1136 = vector.broadcast %1134 : vector<1x1x3xf32> to vector<2x8x3xf32>
    %1137 = arith.mulf %1135, %1136 : vector<2x8x3xf32>
    %1138 = arith.addf %1113, %1137 : vector<2x8x3xf32>
    %1139 = vector.extract_strided_slice %1078 {offsets = [0, 0, 2], sizes = [2, 8, 1], strides = [1, 1, 1]} : vector<2x8x3xf32> to vector<2x8x1xf32>
    %1140 = vector.extract_strided_slice %1081 {offsets = [0, 2, 0], sizes = [2, 1, 8], strides = [1, 1, 1]} : vector<2x3x8xf32> to vector<2x1x8xf32>
    %1141 = vector.extract_strided_slice %1082 {offsets = [0, 2, 0], sizes = [2, 1, 8], strides = [1, 1, 1]} : vector<2x3x8xf32> to vector<2x1x8xf32>
    %1142 = vector.broadcast %1139 : vector<2x8x1xf32> to vector<2x8x8xf32>
    %1143 = vector.broadcast %1140 : vector<2x1x8xf32> to vector<2x8x8xf32>
    %1144 = arith.mulf %1142, %1143 : vector<2x8x8xf32>
    %cst_299 = arith.constant dense<0xFF800000> : vector<2x8xf32>
    %1145 = vector.multi_reduction <maximumf>, %1144, %cst_299 [2] : vector<2x8x8xf32> to vector<2x8xf32>
    %1146 = vector.shape_cast %1145 : vector<2x8xf32> to vector<2x8x1xf32>
    %1147 = vector.broadcast %1146 : vector<2x8x1xf32> to vector<2x8x8xf32>
    %1148 = arith.subf %1144, %1147 : vector<2x8x8xf32>
    %1149 = math.exp %1148 : vector<2x8x8xf32>
    %cst_300 = arith.constant dense<0.000000e+00> : vector<2x8xf32>
    %1150 = vector.multi_reduction <add>, %1149, %cst_300 [2] : vector<2x8x8xf32> to vector<2x8xf32>
    %1151 = vector.shape_cast %1150 : vector<2x8xf32> to vector<2x8x1xf32>
    %1152 = vector.broadcast %1141 : vector<2x1x8xf32> to vector<2x8x8xf32>
    %1153 = arith.mulf %1149, %1152 : vector<2x8x8xf32>
    %cst_301 = arith.constant dense<0.000000e+00> : vector<2x8xf32>
    %1154 = vector.multi_reduction <add>, %1153, %cst_301 [2] : vector<2x8x8xf32> to vector<2x8xf32>
    %1155 = vector.shape_cast %1154 : vector<2x8xf32> to vector<2x8x1xf32>
    %1156 = tpu.reciprocal %1151 {approx = true} : vector<2x8x1xf32> -> vector<2x8x1xf32>
    %1157 = arith.mulf %1155, %1156 : vector<2x8x1xf32>
    %1158 = vector.extract_strided_slice %1084 {offsets = [2, 0], sizes = [1, 3], strides = [1, 1]} : vector<3x3xf32> to vector<1x3xf32>
    %1159 = vector.shape_cast %1158 : vector<1x3xf32> to vector<1x1x3xf32>
    %1160 = vector.broadcast %1157 : vector<2x8x1xf32> to vector<2x8x3xf32>
    %1161 = vector.broadcast %1159 : vector<1x1x3xf32> to vector<2x8x3xf32>
    %1162 = arith.mulf %1160, %1161 : vector<2x8x3xf32>
    %1163 = arith.addf %1138, %1162 : vector<2x8x3xf32>
    %1164 = arith.addf %1050, %1163 : vector<2x8x3xf32>
    %c5_302 = arith.constant 5 : index
    %c0_303 = arith.constant 0 : index
    %c0_304 = arith.constant 0 : index
    %1165 = vector.load %arg6[%c5_302, %c0_303, %c0_304] : memref<10x1x3xf32, #tpu.memory_space<vmem>>, vector<1x1x3xf32>
    %1166 = vector.shape_cast %1165 : vector<1x1x3xf32> to vector<1x3xf32>
    %c5_305 = arith.constant 5 : index
    %c0_306 = arith.constant 0 : index
    %c0_307 = arith.constant 0 : index
    %1167 = vector.load %arg7[%c5_305, %c0_306, %c0_307] : memref<10x1x3xf32, #tpu.memory_space<vmem>>, vector<1x1x3xf32>
    %1168 = vector.shape_cast %1167 : vector<1x1x3xf32> to vector<1x3xf32>
    %cst_308 = arith.constant dense<0.000000e+00> : vector<2x8xf32>
    %1169 = vector.multi_reduction <add>, %1164, %cst_308 [2] : vector<2x8x3xf32> to vector<2x8xf32>
    %1170 = vector.shape_cast %1169 : vector<2x8xf32> to vector<2x8x1xf32>
    %cst_309 = arith.constant 3.000000e+00 : f32
    %1171 = vector.broadcast %cst_309 : f32 to vector<2x8x1xf32>
    %1172 = arith.divf %1170, %1171 : vector<2x8x1xf32>
    %1173 = vector.broadcast %1172 : vector<2x8x1xf32> to vector<2x8x3xf32>
    %1174 = arith.subf %1164, %1173 : vector<2x8x3xf32>
    %1175 = arith.mulf %1174, %1174 : vector<2x8x3xf32>
    %cst_310 = arith.constant dense<0.000000e+00> : vector<2x8xf32>
    %1176 = vector.multi_reduction <add>, %1175, %cst_310 [2] : vector<2x8x3xf32> to vector<2x8xf32>
    %1177 = vector.shape_cast %1176 : vector<2x8xf32> to vector<2x8x1xf32>
    %cst_311 = arith.constant 3.000000e+00 : f32
    %1178 = vector.broadcast %cst_311 : f32 to vector<2x8x1xf32>
    %1179 = arith.divf %1177, %1178 : vector<2x8x1xf32>
    %1180 = vector.broadcast %1172 : vector<2x8x1xf32> to vector<2x8x3xf32>
    %1181 = arith.subf %1164, %1180 : vector<2x8x3xf32>
    %cst_312 = arith.constant 9.99999974E-6 : f32
    %1182 = vector.broadcast %cst_312 : f32 to vector<2x8x1xf32>
    %1183 = arith.addf %1179, %1182 : vector<2x8x1xf32>
    %1184 = math.rsqrt %1183 : vector<2x8x1xf32>
    %1185 = vector.broadcast %1184 : vector<2x8x1xf32> to vector<2x8x3xf32>
    %1186 = arith.mulf %1181, %1185 : vector<2x8x3xf32>
    %1187 = vector.shape_cast %1166 : vector<1x3xf32> to vector<1x1x3xf32>
    %1188 = vector.broadcast %1187 : vector<1x1x3xf32> to vector<2x8x3xf32>
    %1189 = arith.mulf %1186, %1188 : vector<2x8x3xf32>
    %1190 = vector.shape_cast %1168 : vector<1x3xf32> to vector<1x1x3xf32>
    %1191 = vector.broadcast %1190 : vector<1x1x3xf32> to vector<2x8x3xf32>
    %1192 = arith.addf %1189, %1191 : vector<2x8x3xf32>
    %c5_313 = arith.constant 5 : index
    %c0_314 = arith.constant 0 : index
    %c0_315 = arith.constant 0 : index
    %1193 = vector.load %arg10[%c5_313, %c0_314, %c0_315] : memref<10x3x32xf32, #tpu.memory_space<vmem>>, vector<1x3x32xf32>
    %1194 = vector.shape_cast %1193 : vector<1x3x32xf32> to vector<3x32xf32>
    %1195 = vector.extract_strided_slice %1192 {offsets = [0, 0, 0], sizes = [2, 8, 1], strides = [1, 1, 1]} : vector<2x8x3xf32> to vector<2x8x1xf32>
    %1196 = vector.extract_strided_slice %1194 {offsets = [0, 0], sizes = [1, 32], strides = [1, 1]} : vector<3x32xf32> to vector<1x32xf32>
    %1197 = vector.shape_cast %1196 : vector<1x32xf32> to vector<1x1x32xf32>
    %1198 = vector.broadcast %1195 : vector<2x8x1xf32> to vector<2x8x32xf32>
    %1199 = vector.broadcast %1197 : vector<1x1x32xf32> to vector<2x8x32xf32>
    %1200 = arith.mulf %1198, %1199 : vector<2x8x32xf32>
    %1201 = vector.extract_strided_slice %1192 {offsets = [0, 0, 1], sizes = [2, 8, 1], strides = [1, 1, 1]} : vector<2x8x3xf32> to vector<2x8x1xf32>
    %1202 = vector.extract_strided_slice %1194 {offsets = [1, 0], sizes = [1, 32], strides = [1, 1]} : vector<3x32xf32> to vector<1x32xf32>
    %1203 = vector.shape_cast %1202 : vector<1x32xf32> to vector<1x1x32xf32>
    %1204 = vector.broadcast %1201 : vector<2x8x1xf32> to vector<2x8x32xf32>
    %1205 = vector.broadcast %1203 : vector<1x1x32xf32> to vector<2x8x32xf32>
    %1206 = arith.mulf %1204, %1205 : vector<2x8x32xf32>
    %1207 = arith.addf %1200, %1206 : vector<2x8x32xf32>
    %1208 = vector.extract_strided_slice %1192 {offsets = [0, 0, 2], sizes = [2, 8, 1], strides = [1, 1, 1]} : vector<2x8x3xf32> to vector<2x8x1xf32>
    %1209 = vector.extract_strided_slice %1194 {offsets = [2, 0], sizes = [1, 32], strides = [1, 1]} : vector<3x32xf32> to vector<1x32xf32>
    %1210 = vector.shape_cast %1209 : vector<1x32xf32> to vector<1x1x32xf32>
    %1211 = vector.broadcast %1208 : vector<2x8x1xf32> to vector<2x8x32xf32>
    %1212 = vector.broadcast %1210 : vector<1x1x32xf32> to vector<2x8x32xf32>
    %1213 = arith.mulf %1211, %1212 : vector<2x8x32xf32>
    %1214 = arith.addf %1207, %1213 : vector<2x8x32xf32>
    %c5_316 = arith.constant 5 : index
    %c0_317 = arith.constant 0 : index
    %c0_318 = arith.constant 0 : index
    %1215 = vector.load %arg11[%c5_316, %c0_317, %c0_318] : memref<10x1x32xf32, #tpu.memory_space<vmem>>, vector<1x1x32xf32>
    %1216 = vector.shape_cast %1215 : vector<1x1x32xf32> to vector<1x32xf32>
    %1217 = vector.shape_cast %1216 : vector<1x32xf32> to vector<1x1x32xf32>
    %1218 = vector.broadcast %1217 : vector<1x1x32xf32> to vector<2x8x32xf32>
    %1219 = arith.addf %1214, %1218 : vector<2x8x32xf32>
    %cst_319 = arith.constant 0.000000e+00 : f32
    %1220 = vector.broadcast %cst_319 : f32 to vector<2x8x32xf32>
    %1221 = arith.maximumf %1219, %1220 : vector<2x8x32xf32>
    %1222 = vector.shape_cast %1221 : vector<2x8x32xf32> to vector<16x32xf32>
    %c5_320 = arith.constant 5 : index
    %c0_321 = arith.constant 0 : index
    %c0_322 = arith.constant 0 : index
    %1223 = vector.load %arg12[%c5_320, %c0_321, %c0_322] : memref<10x32x3xf32, #tpu.memory_space<vmem>>, vector<1x32x3xf32>
    %1224 = vector.shape_cast %1223 : vector<1x32x3xf32> to vector<32x3xf32>
    %cst_323 = arith.constant dense<0.000000e+00> : vector<16x3xf32>
    %1225 = tpu.matmul %1222, %1224, %cst_323 {dimension_numbers = #tpu.dot_dimension_numbers<[1], [0], [0], [1], [0, 0, 1, 1], [], []>} : vector<16x32xf32>, vector<32x3xf32>, vector<16x3xf32> -> vector<16x3xf32>
    %1226 = vector.shape_cast %1225 : vector<16x3xf32> to vector<2x8x3xf32>
    %c5_324 = arith.constant 5 : index
    %c0_325 = arith.constant 0 : index
    %c0_326 = arith.constant 0 : index
    %1227 = vector.load %arg13[%c5_324, %c0_325, %c0_326] : memref<10x1x3xf32, #tpu.memory_space<vmem>>, vector<1x1x3xf32>
    %1228 = vector.shape_cast %1227 : vector<1x1x3xf32> to vector<1x3xf32>
    %1229 = vector.shape_cast %1228 : vector<1x3xf32> to vector<1x1x3xf32>
    %1230 = vector.broadcast %1229 : vector<1x1x3xf32> to vector<2x8x3xf32>
    %1231 = arith.addf %1226, %1230 : vector<2x8x3xf32>
    %1232 = arith.addf %1192, %1231 : vector<2x8x3xf32>
    %c5_327 = arith.constant 5 : index
    %c0_328 = arith.constant 0 : index
    %c0_329 = arith.constant 0 : index
    %1233 = vector.load %arg8[%c5_327, %c0_328, %c0_329] : memref<10x1x3xf32, #tpu.memory_space<vmem>>, vector<1x1x3xf32>
    %1234 = vector.shape_cast %1233 : vector<1x1x3xf32> to vector<1x3xf32>
    %c5_330 = arith.constant 5 : index
    %c0_331 = arith.constant 0 : index
    %c0_332 = arith.constant 0 : index
    %1235 = vector.load %arg9[%c5_330, %c0_331, %c0_332] : memref<10x1x3xf32, #tpu.memory_space<vmem>>, vector<1x1x3xf32>
    %1236 = vector.shape_cast %1235 : vector<1x1x3xf32> to vector<1x3xf32>
    %cst_333 = arith.constant dense<0.000000e+00> : vector<2x8xf32>
    %1237 = vector.multi_reduction <add>, %1232, %cst_333 [2] : vector<2x8x3xf32> to vector<2x8xf32>
    %1238 = vector.shape_cast %1237 : vector<2x8xf32> to vector<2x8x1xf32>
    %cst_334 = arith.constant 3.000000e+00 : f32
    %1239 = vector.broadcast %cst_334 : f32 to vector<2x8x1xf32>
    %1240 = arith.divf %1238, %1239 : vector<2x8x1xf32>
    %1241 = vector.broadcast %1240 : vector<2x8x1xf32> to vector<2x8x3xf32>
    %1242 = arith.subf %1232, %1241 : vector<2x8x3xf32>
    %1243 = arith.mulf %1242, %1242 : vector<2x8x3xf32>
    %cst_335 = arith.constant dense<0.000000e+00> : vector<2x8xf32>
    %1244 = vector.multi_reduction <add>, %1243, %cst_335 [2] : vector<2x8x3xf32> to vector<2x8xf32>
    %1245 = vector.shape_cast %1244 : vector<2x8xf32> to vector<2x8x1xf32>
    %cst_336 = arith.constant 3.000000e+00 : f32
    %1246 = vector.broadcast %cst_336 : f32 to vector<2x8x1xf32>
    %1247 = arith.divf %1245, %1246 : vector<2x8x1xf32>
    %1248 = vector.broadcast %1240 : vector<2x8x1xf32> to vector<2x8x3xf32>
    %1249 = arith.subf %1232, %1248 : vector<2x8x3xf32>
    %cst_337 = arith.constant 9.99999974E-6 : f32
    %1250 = vector.broadcast %cst_337 : f32 to vector<2x8x1xf32>
    %1251 = arith.addf %1247, %1250 : vector<2x8x1xf32>
    %1252 = math.rsqrt %1251 : vector<2x8x1xf32>
    %1253 = vector.broadcast %1252 : vector<2x8x1xf32> to vector<2x8x3xf32>
    %1254 = arith.mulf %1249, %1253 : vector<2x8x3xf32>
    %1255 = vector.shape_cast %1234 : vector<1x3xf32> to vector<1x1x3xf32>
    %1256 = vector.broadcast %1255 : vector<1x1x3xf32> to vector<2x8x3xf32>
    %1257 = arith.mulf %1254, %1256 : vector<2x8x3xf32>
    %1258 = vector.shape_cast %1236 : vector<1x3xf32> to vector<1x1x3xf32>
    %1259 = vector.broadcast %1258 : vector<1x1x3xf32> to vector<2x8x3xf32>
    %1260 = arith.addf %1257, %1259 : vector<2x8x3xf32>
    %c6 = arith.constant 6 : index
    %c0_338 = arith.constant 0 : index
    %c0_339 = arith.constant 0 : index
    %1261 = vector.load %arg2[%c6, %c0_338, %c0_339] : memref<10x3x9xf32, #tpu.memory_space<vmem>>, vector<1x3x9xf32>
    %1262 = vector.shape_cast %1261 : vector<1x3x9xf32> to vector<3x9xf32>
    %1263 = vector.extract_strided_slice %1260 {offsets = [0, 0, 0], sizes = [2, 8, 1], strides = [1, 1, 1]} : vector<2x8x3xf32> to vector<2x8x1xf32>
    %1264 = vector.extract_strided_slice %1262 {offsets = [0, 0], sizes = [1, 9], strides = [1, 1]} : vector<3x9xf32> to vector<1x9xf32>
    %1265 = vector.shape_cast %1264 : vector<1x9xf32> to vector<1x1x9xf32>
    %1266 = vector.broadcast %1263 : vector<2x8x1xf32> to vector<2x8x9xf32>
    %1267 = vector.broadcast %1265 : vector<1x1x9xf32> to vector<2x8x9xf32>
    %1268 = arith.mulf %1266, %1267 : vector<2x8x9xf32>
    %1269 = vector.extract_strided_slice %1260 {offsets = [0, 0, 1], sizes = [2, 8, 1], strides = [1, 1, 1]} : vector<2x8x3xf32> to vector<2x8x1xf32>
    %1270 = vector.extract_strided_slice %1262 {offsets = [1, 0], sizes = [1, 9], strides = [1, 1]} : vector<3x9xf32> to vector<1x9xf32>
    %1271 = vector.shape_cast %1270 : vector<1x9xf32> to vector<1x1x9xf32>
    %1272 = vector.broadcast %1269 : vector<2x8x1xf32> to vector<2x8x9xf32>
    %1273 = vector.broadcast %1271 : vector<1x1x9xf32> to vector<2x8x9xf32>
    %1274 = arith.mulf %1272, %1273 : vector<2x8x9xf32>
    %1275 = arith.addf %1268, %1274 : vector<2x8x9xf32>
    %1276 = vector.extract_strided_slice %1260 {offsets = [0, 0, 2], sizes = [2, 8, 1], strides = [1, 1, 1]} : vector<2x8x3xf32> to vector<2x8x1xf32>
    %1277 = vector.extract_strided_slice %1262 {offsets = [2, 0], sizes = [1, 9], strides = [1, 1]} : vector<3x9xf32> to vector<1x9xf32>
    %1278 = vector.shape_cast %1277 : vector<1x9xf32> to vector<1x1x9xf32>
    %1279 = vector.broadcast %1276 : vector<2x8x1xf32> to vector<2x8x9xf32>
    %1280 = vector.broadcast %1278 : vector<1x1x9xf32> to vector<2x8x9xf32>
    %1281 = arith.mulf %1279, %1280 : vector<2x8x9xf32>
    %1282 = arith.addf %1275, %1281 : vector<2x8x9xf32>
    %c6_340 = arith.constant 6 : index
    %c0_341 = arith.constant 0 : index
    %c0_342 = arith.constant 0 : index
    %1283 = vector.load %arg3[%c6_340, %c0_341, %c0_342] : memref<10x1x9xf32, #tpu.memory_space<vmem>>, vector<1x1x9xf32>
    %1284 = vector.shape_cast %1283 : vector<1x1x9xf32> to vector<1x9xf32>
    %1285 = vector.shape_cast %1284 : vector<1x9xf32> to vector<1x1x9xf32>
    %1286 = vector.broadcast %1285 : vector<1x1x9xf32> to vector<2x8x9xf32>
    %1287 = arith.addf %1282, %1286 : vector<2x8x9xf32>
    %1288 = vector.extract_strided_slice %1287 {offsets = [0, 0, 0], sizes = [2, 8, 3], strides = [1, 1, 1]} : vector<2x8x9xf32> to vector<2x8x3xf32>
    %1289 = vector.extract_strided_slice %1287 {offsets = [0, 0, 3], sizes = [2, 8, 3], strides = [1, 1, 1]} : vector<2x8x9xf32> to vector<2x8x3xf32>
    %1290 = vector.extract_strided_slice %1287 {offsets = [0, 0, 6], sizes = [2, 8, 3], strides = [1, 1, 1]} : vector<2x8x9xf32> to vector<2x8x3xf32>
    %1291 = tpu.transpose %1289, [0, 2, 1] : vector<2x8x3xf32> -> vector<2x3x8xf32>
    %1292 = tpu.transpose %1290, [0, 2, 1] : vector<2x8x3xf32> -> vector<2x3x8xf32>
    %c6_343 = arith.constant 6 : index
    %c0_344 = arith.constant 0 : index
    %c0_345 = arith.constant 0 : index
    %1293 = vector.load %arg4[%c6_343, %c0_344, %c0_345] : memref<10x3x3xf32, #tpu.memory_space<vmem>>, vector<1x3x3xf32>
    %1294 = vector.shape_cast %1293 : vector<1x3x3xf32> to vector<3x3xf32>
    %c6_346 = arith.constant 6 : index
    %c0_347 = arith.constant 0 : index
    %c0_348 = arith.constant 0 : index
    %1295 = vector.load %arg5[%c6_346, %c0_347, %c0_348] : memref<10x1x3xf32, #tpu.memory_space<vmem>>, vector<1x1x3xf32>
    %1296 = vector.shape_cast %1295 : vector<1x1x3xf32> to vector<1x3xf32>
    %1297 = vector.extract_strided_slice %1288 {offsets = [0, 0, 0], sizes = [2, 8, 1], strides = [1, 1, 1]} : vector<2x8x3xf32> to vector<2x8x1xf32>
    %1298 = vector.extract_strided_slice %1291 {offsets = [0, 0, 0], sizes = [2, 1, 8], strides = [1, 1, 1]} : vector<2x3x8xf32> to vector<2x1x8xf32>
    %1299 = vector.extract_strided_slice %1292 {offsets = [0, 0, 0], sizes = [2, 1, 8], strides = [1, 1, 1]} : vector<2x3x8xf32> to vector<2x1x8xf32>
    %1300 = vector.broadcast %1297 : vector<2x8x1xf32> to vector<2x8x8xf32>
    %1301 = vector.broadcast %1298 : vector<2x1x8xf32> to vector<2x8x8xf32>
    %1302 = arith.mulf %1300, %1301 : vector<2x8x8xf32>
    %cst_349 = arith.constant dense<0xFF800000> : vector<2x8xf32>
    %1303 = vector.multi_reduction <maximumf>, %1302, %cst_349 [2] : vector<2x8x8xf32> to vector<2x8xf32>
    %1304 = vector.shape_cast %1303 : vector<2x8xf32> to vector<2x8x1xf32>
    %1305 = vector.broadcast %1304 : vector<2x8x1xf32> to vector<2x8x8xf32>
    %1306 = arith.subf %1302, %1305 : vector<2x8x8xf32>
    %1307 = math.exp %1306 : vector<2x8x8xf32>
    %cst_350 = arith.constant dense<0.000000e+00> : vector<2x8xf32>
    %1308 = vector.multi_reduction <add>, %1307, %cst_350 [2] : vector<2x8x8xf32> to vector<2x8xf32>
    %1309 = vector.shape_cast %1308 : vector<2x8xf32> to vector<2x8x1xf32>
    %1310 = vector.broadcast %1299 : vector<2x1x8xf32> to vector<2x8x8xf32>
    %1311 = arith.mulf %1307, %1310 : vector<2x8x8xf32>
    %cst_351 = arith.constant dense<0.000000e+00> : vector<2x8xf32>
    %1312 = vector.multi_reduction <add>, %1311, %cst_351 [2] : vector<2x8x8xf32> to vector<2x8xf32>
    %1313 = vector.shape_cast %1312 : vector<2x8xf32> to vector<2x8x1xf32>
    %1314 = tpu.reciprocal %1309 {approx = true} : vector<2x8x1xf32> -> vector<2x8x1xf32>
    %1315 = arith.mulf %1313, %1314 : vector<2x8x1xf32>
    %1316 = vector.extract_strided_slice %1294 {offsets = [0, 0], sizes = [1, 3], strides = [1, 1]} : vector<3x3xf32> to vector<1x3xf32>
    %1317 = vector.shape_cast %1316 : vector<1x3xf32> to vector<1x1x3xf32>
    %1318 = vector.broadcast %1315 : vector<2x8x1xf32> to vector<2x8x3xf32>
    %1319 = vector.broadcast %1317 : vector<1x1x3xf32> to vector<2x8x3xf32>
    %1320 = arith.mulf %1318, %1319 : vector<2x8x3xf32>
    %1321 = vector.shape_cast %1296 : vector<1x3xf32> to vector<1x1x3xf32>
    %1322 = vector.broadcast %1321 : vector<1x1x3xf32> to vector<2x8x3xf32>
    %1323 = arith.addf %1322, %1320 : vector<2x8x3xf32>
    %1324 = vector.extract_strided_slice %1288 {offsets = [0, 0, 1], sizes = [2, 8, 1], strides = [1, 1, 1]} : vector<2x8x3xf32> to vector<2x8x1xf32>
    %1325 = vector.extract_strided_slice %1291 {offsets = [0, 1, 0], sizes = [2, 1, 8], strides = [1, 1, 1]} : vector<2x3x8xf32> to vector<2x1x8xf32>
    %1326 = vector.extract_strided_slice %1292 {offsets = [0, 1, 0], sizes = [2, 1, 8], strides = [1, 1, 1]} : vector<2x3x8xf32> to vector<2x1x8xf32>
    %1327 = vector.broadcast %1324 : vector<2x8x1xf32> to vector<2x8x8xf32>
    %1328 = vector.broadcast %1325 : vector<2x1x8xf32> to vector<2x8x8xf32>
    %1329 = arith.mulf %1327, %1328 : vector<2x8x8xf32>
    %cst_352 = arith.constant dense<0xFF800000> : vector<2x8xf32>
    %1330 = vector.multi_reduction <maximumf>, %1329, %cst_352 [2] : vector<2x8x8xf32> to vector<2x8xf32>
    %1331 = vector.shape_cast %1330 : vector<2x8xf32> to vector<2x8x1xf32>
    %1332 = vector.broadcast %1331 : vector<2x8x1xf32> to vector<2x8x8xf32>
    %1333 = arith.subf %1329, %1332 : vector<2x8x8xf32>
    %1334 = math.exp %1333 : vector<2x8x8xf32>
    %cst_353 = arith.constant dense<0.000000e+00> : vector<2x8xf32>
    %1335 = vector.multi_reduction <add>, %1334, %cst_353 [2] : vector<2x8x8xf32> to vector<2x8xf32>
    %1336 = vector.shape_cast %1335 : vector<2x8xf32> to vector<2x8x1xf32>
    %1337 = vector.broadcast %1326 : vector<2x1x8xf32> to vector<2x8x8xf32>
    %1338 = arith.mulf %1334, %1337 : vector<2x8x8xf32>
    %cst_354 = arith.constant dense<0.000000e+00> : vector<2x8xf32>
    %1339 = vector.multi_reduction <add>, %1338, %cst_354 [2] : vector<2x8x8xf32> to vector<2x8xf32>
    %1340 = vector.shape_cast %1339 : vector<2x8xf32> to vector<2x8x1xf32>
    %1341 = tpu.reciprocal %1336 {approx = true} : vector<2x8x1xf32> -> vector<2x8x1xf32>
    %1342 = arith.mulf %1340, %1341 : vector<2x8x1xf32>
    %1343 = vector.extract_strided_slice %1294 {offsets = [1, 0], sizes = [1, 3], strides = [1, 1]} : vector<3x3xf32> to vector<1x3xf32>
    %1344 = vector.shape_cast %1343 : vector<1x3xf32> to vector<1x1x3xf32>
    %1345 = vector.broadcast %1342 : vector<2x8x1xf32> to vector<2x8x3xf32>
    %1346 = vector.broadcast %1344 : vector<1x1x3xf32> to vector<2x8x3xf32>
    %1347 = arith.mulf %1345, %1346 : vector<2x8x3xf32>
    %1348 = arith.addf %1323, %1347 : vector<2x8x3xf32>
    %1349 = vector.extract_strided_slice %1288 {offsets = [0, 0, 2], sizes = [2, 8, 1], strides = [1, 1, 1]} : vector<2x8x3xf32> to vector<2x8x1xf32>
    %1350 = vector.extract_strided_slice %1291 {offsets = [0, 2, 0], sizes = [2, 1, 8], strides = [1, 1, 1]} : vector<2x3x8xf32> to vector<2x1x8xf32>
    %1351 = vector.extract_strided_slice %1292 {offsets = [0, 2, 0], sizes = [2, 1, 8], strides = [1, 1, 1]} : vector<2x3x8xf32> to vector<2x1x8xf32>
    %1352 = vector.broadcast %1349 : vector<2x8x1xf32> to vector<2x8x8xf32>
    %1353 = vector.broadcast %1350 : vector<2x1x8xf32> to vector<2x8x8xf32>
    %1354 = arith.mulf %1352, %1353 : vector<2x8x8xf32>
    %cst_355 = arith.constant dense<0xFF800000> : vector<2x8xf32>
    %1355 = vector.multi_reduction <maximumf>, %1354, %cst_355 [2] : vector<2x8x8xf32> to vector<2x8xf32>
    %1356 = vector.shape_cast %1355 : vector<2x8xf32> to vector<2x8x1xf32>
    %1357 = vector.broadcast %1356 : vector<2x8x1xf32> to vector<2x8x8xf32>
    %1358 = arith.subf %1354, %1357 : vector<2x8x8xf32>
    %1359 = math.exp %1358 : vector<2x8x8xf32>
    %cst_356 = arith.constant dense<0.000000e+00> : vector<2x8xf32>
    %1360 = vector.multi_reduction <add>, %1359, %cst_356 [2] : vector<2x8x8xf32> to vector<2x8xf32>
    %1361 = vector.shape_cast %1360 : vector<2x8xf32> to vector<2x8x1xf32>
    %1362 = vector.broadcast %1351 : vector<2x1x8xf32> to vector<2x8x8xf32>
    %1363 = arith.mulf %1359, %1362 : vector<2x8x8xf32>
    %cst_357 = arith.constant dense<0.000000e+00> : vector<2x8xf32>
    %1364 = vector.multi_reduction <add>, %1363, %cst_357 [2] : vector<2x8x8xf32> to vector<2x8xf32>
    %1365 = vector.shape_cast %1364 : vector<2x8xf32> to vector<2x8x1xf32>
    %1366 = tpu.reciprocal %1361 {approx = true} : vector<2x8x1xf32> -> vector<2x8x1xf32>
    %1367 = arith.mulf %1365, %1366 : vector<2x8x1xf32>
    %1368 = vector.extract_strided_slice %1294 {offsets = [2, 0], sizes = [1, 3], strides = [1, 1]} : vector<3x3xf32> to vector<1x3xf32>
    %1369 = vector.shape_cast %1368 : vector<1x3xf32> to vector<1x1x3xf32>
    %1370 = vector.broadcast %1367 : vector<2x8x1xf32> to vector<2x8x3xf32>
    %1371 = vector.broadcast %1369 : vector<1x1x3xf32> to vector<2x8x3xf32>
    %1372 = arith.mulf %1370, %1371 : vector<2x8x3xf32>
    %1373 = arith.addf %1348, %1372 : vector<2x8x3xf32>
    %1374 = arith.addf %1260, %1373 : vector<2x8x3xf32>
    %c6_358 = arith.constant 6 : index
    %c0_359 = arith.constant 0 : index
    %c0_360 = arith.constant 0 : index
    %1375 = vector.load %arg6[%c6_358, %c0_359, %c0_360] : memref<10x1x3xf32, #tpu.memory_space<vmem>>, vector<1x1x3xf32>
    %1376 = vector.shape_cast %1375 : vector<1x1x3xf32> to vector<1x3xf32>
    %c6_361 = arith.constant 6 : index
    %c0_362 = arith.constant 0 : index
    %c0_363 = arith.constant 0 : index
    %1377 = vector.load %arg7[%c6_361, %c0_362, %c0_363] : memref<10x1x3xf32, #tpu.memory_space<vmem>>, vector<1x1x3xf32>
    %1378 = vector.shape_cast %1377 : vector<1x1x3xf32> to vector<1x3xf32>
    %cst_364 = arith.constant dense<0.000000e+00> : vector<2x8xf32>
    %1379 = vector.multi_reduction <add>, %1374, %cst_364 [2] : vector<2x8x3xf32> to vector<2x8xf32>
    %1380 = vector.shape_cast %1379 : vector<2x8xf32> to vector<2x8x1xf32>
    %cst_365 = arith.constant 3.000000e+00 : f32
    %1381 = vector.broadcast %cst_365 : f32 to vector<2x8x1xf32>
    %1382 = arith.divf %1380, %1381 : vector<2x8x1xf32>
    %1383 = vector.broadcast %1382 : vector<2x8x1xf32> to vector<2x8x3xf32>
    %1384 = arith.subf %1374, %1383 : vector<2x8x3xf32>
    %1385 = arith.mulf %1384, %1384 : vector<2x8x3xf32>
    %cst_366 = arith.constant dense<0.000000e+00> : vector<2x8xf32>
    %1386 = vector.multi_reduction <add>, %1385, %cst_366 [2] : vector<2x8x3xf32> to vector<2x8xf32>
    %1387 = vector.shape_cast %1386 : vector<2x8xf32> to vector<2x8x1xf32>
    %cst_367 = arith.constant 3.000000e+00 : f32
    %1388 = vector.broadcast %cst_367 : f32 to vector<2x8x1xf32>
    %1389 = arith.divf %1387, %1388 : vector<2x8x1xf32>
    %1390 = vector.broadcast %1382 : vector<2x8x1xf32> to vector<2x8x3xf32>
    %1391 = arith.subf %1374, %1390 : vector<2x8x3xf32>
    %cst_368 = arith.constant 9.99999974E-6 : f32
    %1392 = vector.broadcast %cst_368 : f32 to vector<2x8x1xf32>
    %1393 = arith.addf %1389, %1392 : vector<2x8x1xf32>
    %1394 = math.rsqrt %1393 : vector<2x8x1xf32>
    %1395 = vector.broadcast %1394 : vector<2x8x1xf32> to vector<2x8x3xf32>
    %1396 = arith.mulf %1391, %1395 : vector<2x8x3xf32>
    %1397 = vector.shape_cast %1376 : vector<1x3xf32> to vector<1x1x3xf32>
    %1398 = vector.broadcast %1397 : vector<1x1x3xf32> to vector<2x8x3xf32>
    %1399 = arith.mulf %1396, %1398 : vector<2x8x3xf32>
    %1400 = vector.shape_cast %1378 : vector<1x3xf32> to vector<1x1x3xf32>
    %1401 = vector.broadcast %1400 : vector<1x1x3xf32> to vector<2x8x3xf32>
    %1402 = arith.addf %1399, %1401 : vector<2x8x3xf32>
    %c6_369 = arith.constant 6 : index
    %c0_370 = arith.constant 0 : index
    %c0_371 = arith.constant 0 : index
    %1403 = vector.load %arg10[%c6_369, %c0_370, %c0_371] : memref<10x3x32xf32, #tpu.memory_space<vmem>>, vector<1x3x32xf32>
    %1404 = vector.shape_cast %1403 : vector<1x3x32xf32> to vector<3x32xf32>
    %1405 = vector.extract_strided_slice %1402 {offsets = [0, 0, 0], sizes = [2, 8, 1], strides = [1, 1, 1]} : vector<2x8x3xf32> to vector<2x8x1xf32>
    %1406 = vector.extract_strided_slice %1404 {offsets = [0, 0], sizes = [1, 32], strides = [1, 1]} : vector<3x32xf32> to vector<1x32xf32>
    %1407 = vector.shape_cast %1406 : vector<1x32xf32> to vector<1x1x32xf32>
    %1408 = vector.broadcast %1405 : vector<2x8x1xf32> to vector<2x8x32xf32>
    %1409 = vector.broadcast %1407 : vector<1x1x32xf32> to vector<2x8x32xf32>
    %1410 = arith.mulf %1408, %1409 : vector<2x8x32xf32>
    %1411 = vector.extract_strided_slice %1402 {offsets = [0, 0, 1], sizes = [2, 8, 1], strides = [1, 1, 1]} : vector<2x8x3xf32> to vector<2x8x1xf32>
    %1412 = vector.extract_strided_slice %1404 {offsets = [1, 0], sizes = [1, 32], strides = [1, 1]} : vector<3x32xf32> to vector<1x32xf32>
    %1413 = vector.shape_cast %1412 : vector<1x32xf32> to vector<1x1x32xf32>
    %1414 = vector.broadcast %1411 : vector<2x8x1xf32> to vector<2x8x32xf32>
    %1415 = vector.broadcast %1413 : vector<1x1x32xf32> to vector<2x8x32xf32>
    %1416 = arith.mulf %1414, %1415 : vector<2x8x32xf32>
    %1417 = arith.addf %1410, %1416 : vector<2x8x32xf32>
    %1418 = vector.extract_strided_slice %1402 {offsets = [0, 0, 2], sizes = [2, 8, 1], strides = [1, 1, 1]} : vector<2x8x3xf32> to vector<2x8x1xf32>
    %1419 = vector.extract_strided_slice %1404 {offsets = [2, 0], sizes = [1, 32], strides = [1, 1]} : vector<3x32xf32> to vector<1x32xf32>
    %1420 = vector.shape_cast %1419 : vector<1x32xf32> to vector<1x1x32xf32>
    %1421 = vector.broadcast %1418 : vector<2x8x1xf32> to vector<2x8x32xf32>
    %1422 = vector.broadcast %1420 : vector<1x1x32xf32> to vector<2x8x32xf32>
    %1423 = arith.mulf %1421, %1422 : vector<2x8x32xf32>
    %1424 = arith.addf %1417, %1423 : vector<2x8x32xf32>
    %c6_372 = arith.constant 6 : index
    %c0_373 = arith.constant 0 : index
    %c0_374 = arith.constant 0 : index
    %1425 = vector.load %arg11[%c6_372, %c0_373, %c0_374] : memref<10x1x32xf32, #tpu.memory_space<vmem>>, vector<1x1x32xf32>
    %1426 = vector.shape_cast %1425 : vector<1x1x32xf32> to vector<1x32xf32>
    %1427 = vector.shape_cast %1426 : vector<1x32xf32> to vector<1x1x32xf32>
    %1428 = vector.broadcast %1427 : vector<1x1x32xf32> to vector<2x8x32xf32>
    %1429 = arith.addf %1424, %1428 : vector<2x8x32xf32>
    %cst_375 = arith.constant 0.000000e+00 : f32
    %1430 = vector.broadcast %cst_375 : f32 to vector<2x8x32xf32>
    %1431 = arith.maximumf %1429, %1430 : vector<2x8x32xf32>
    %1432 = vector.shape_cast %1431 : vector<2x8x32xf32> to vector<16x32xf32>
    %c6_376 = arith.constant 6 : index
    %c0_377 = arith.constant 0 : index
    %c0_378 = arith.constant 0 : index
    %1433 = vector.load %arg12[%c6_376, %c0_377, %c0_378] : memref<10x32x3xf32, #tpu.memory_space<vmem>>, vector<1x32x3xf32>
    %1434 = vector.shape_cast %1433 : vector<1x32x3xf32> to vector<32x3xf32>
    %cst_379 = arith.constant dense<0.000000e+00> : vector<16x3xf32>
    %1435 = tpu.matmul %1432, %1434, %cst_379 {dimension_numbers = #tpu.dot_dimension_numbers<[1], [0], [0], [1], [0, 0, 1, 1], [], []>} : vector<16x32xf32>, vector<32x3xf32>, vector<16x3xf32> -> vector<16x3xf32>
    %1436 = vector.shape_cast %1435 : vector<16x3xf32> to vector<2x8x3xf32>
    %c6_380 = arith.constant 6 : index
    %c0_381 = arith.constant 0 : index
    %c0_382 = arith.constant 0 : index
    %1437 = vector.load %arg13[%c6_380, %c0_381, %c0_382] : memref<10x1x3xf32, #tpu.memory_space<vmem>>, vector<1x1x3xf32>
    %1438 = vector.shape_cast %1437 : vector<1x1x3xf32> to vector<1x3xf32>
    %1439 = vector.shape_cast %1438 : vector<1x3xf32> to vector<1x1x3xf32>
    %1440 = vector.broadcast %1439 : vector<1x1x3xf32> to vector<2x8x3xf32>
    %1441 = arith.addf %1436, %1440 : vector<2x8x3xf32>
    %1442 = arith.addf %1402, %1441 : vector<2x8x3xf32>
    %c6_383 = arith.constant 6 : index
    %c0_384 = arith.constant 0 : index
    %c0_385 = arith.constant 0 : index
    %1443 = vector.load %arg8[%c6_383, %c0_384, %c0_385] : memref<10x1x3xf32, #tpu.memory_space<vmem>>, vector<1x1x3xf32>
    %1444 = vector.shape_cast %1443 : vector<1x1x3xf32> to vector<1x3xf32>
    %c6_386 = arith.constant 6 : index
    %c0_387 = arith.constant 0 : index
    %c0_388 = arith.constant 0 : index
    %1445 = vector.load %arg9[%c6_386, %c0_387, %c0_388] : memref<10x1x3xf32, #tpu.memory_space<vmem>>, vector<1x1x3xf32>
    %1446 = vector.shape_cast %1445 : vector<1x1x3xf32> to vector<1x3xf32>
    %cst_389 = arith.constant dense<0.000000e+00> : vector<2x8xf32>
    %1447 = vector.multi_reduction <add>, %1442, %cst_389 [2] : vector<2x8x3xf32> to vector<2x8xf32>
    %1448 = vector.shape_cast %1447 : vector<2x8xf32> to vector<2x8x1xf32>
    %cst_390 = arith.constant 3.000000e+00 : f32
    %1449 = vector.broadcast %cst_390 : f32 to vector<2x8x1xf32>
    %1450 = arith.divf %1448, %1449 : vector<2x8x1xf32>
    %1451 = vector.broadcast %1450 : vector<2x8x1xf32> to vector<2x8x3xf32>
    %1452 = arith.subf %1442, %1451 : vector<2x8x3xf32>
    %1453 = arith.mulf %1452, %1452 : vector<2x8x3xf32>
    %cst_391 = arith.constant dense<0.000000e+00> : vector<2x8xf32>
    %1454 = vector.multi_reduction <add>, %1453, %cst_391 [2] : vector<2x8x3xf32> to vector<2x8xf32>
    %1455 = vector.shape_cast %1454 : vector<2x8xf32> to vector<2x8x1xf32>
    %cst_392 = arith.constant 3.000000e+00 : f32
    %1456 = vector.broadcast %cst_392 : f32 to vector<2x8x1xf32>
    %1457 = arith.divf %1455, %1456 : vector<2x8x1xf32>
    %1458 = vector.broadcast %1450 : vector<2x8x1xf32> to vector<2x8x3xf32>
    %1459 = arith.subf %1442, %1458 : vector<2x8x3xf32>
    %cst_393 = arith.constant 9.99999974E-6 : f32
    %1460 = vector.broadcast %cst_393 : f32 to vector<2x8x1xf32>
    %1461 = arith.addf %1457, %1460 : vector<2x8x1xf32>
    %1462 = math.rsqrt %1461 : vector<2x8x1xf32>
    %1463 = vector.broadcast %1462 : vector<2x8x1xf32> to vector<2x8x3xf32>
    %1464 = arith.mulf %1459, %1463 : vector<2x8x3xf32>
    %1465 = vector.shape_cast %1444 : vector<1x3xf32> to vector<1x1x3xf32>
    %1466 = vector.broadcast %1465 : vector<1x1x3xf32> to vector<2x8x3xf32>
    %1467 = arith.mulf %1464, %1466 : vector<2x8x3xf32>
    %1468 = vector.shape_cast %1446 : vector<1x3xf32> to vector<1x1x3xf32>
    %1469 = vector.broadcast %1468 : vector<1x1x3xf32> to vector<2x8x3xf32>
    %1470 = arith.addf %1467, %1469 : vector<2x8x3xf32>
    %c7 = arith.constant 7 : index
    %c0_394 = arith.constant 0 : index
    %c0_395 = arith.constant 0 : index
    %1471 = vector.load %arg2[%c7, %c0_394, %c0_395] : memref<10x3x9xf32, #tpu.memory_space<vmem>>, vector<1x3x9xf32>
    %1472 = vector.shape_cast %1471 : vector<1x3x9xf32> to vector<3x9xf32>
    %1473 = vector.extract_strided_slice %1470 {offsets = [0, 0, 0], sizes = [2, 8, 1], strides = [1, 1, 1]} : vector<2x8x3xf32> to vector<2x8x1xf32>
    %1474 = vector.extract_strided_slice %1472 {offsets = [0, 0], sizes = [1, 9], strides = [1, 1]} : vector<3x9xf32> to vector<1x9xf32>
    %1475 = vector.shape_cast %1474 : vector<1x9xf32> to vector<1x1x9xf32>
    %1476 = vector.broadcast %1473 : vector<2x8x1xf32> to vector<2x8x9xf32>
    %1477 = vector.broadcast %1475 : vector<1x1x9xf32> to vector<2x8x9xf32>
    %1478 = arith.mulf %1476, %1477 : vector<2x8x9xf32>
    %1479 = vector.extract_strided_slice %1470 {offsets = [0, 0, 1], sizes = [2, 8, 1], strides = [1, 1, 1]} : vector<2x8x3xf32> to vector<2x8x1xf32>
    %1480 = vector.extract_strided_slice %1472 {offsets = [1, 0], sizes = [1, 9], strides = [1, 1]} : vector<3x9xf32> to vector<1x9xf32>
    %1481 = vector.shape_cast %1480 : vector<1x9xf32> to vector<1x1x9xf32>
    %1482 = vector.broadcast %1479 : vector<2x8x1xf32> to vector<2x8x9xf32>
    %1483 = vector.broadcast %1481 : vector<1x1x9xf32> to vector<2x8x9xf32>
    %1484 = arith.mulf %1482, %1483 : vector<2x8x9xf32>
    %1485 = arith.addf %1478, %1484 : vector<2x8x9xf32>
    %1486 = vector.extract_strided_slice %1470 {offsets = [0, 0, 2], sizes = [2, 8, 1], strides = [1, 1, 1]} : vector<2x8x3xf32> to vector<2x8x1xf32>
    %1487 = vector.extract_strided_slice %1472 {offsets = [2, 0], sizes = [1, 9], strides = [1, 1]} : vector<3x9xf32> to vector<1x9xf32>
    %1488 = vector.shape_cast %1487 : vector<1x9xf32> to vector<1x1x9xf32>
    %1489 = vector.broadcast %1486 : vector<2x8x1xf32> to vector<2x8x9xf32>
    %1490 = vector.broadcast %1488 : vector<1x1x9xf32> to vector<2x8x9xf32>
    %1491 = arith.mulf %1489, %1490 : vector<2x8x9xf32>
    %1492 = arith.addf %1485, %1491 : vector<2x8x9xf32>
    %c7_396 = arith.constant 7 : index
    %c0_397 = arith.constant 0 : index
    %c0_398 = arith.constant 0 : index
    %1493 = vector.load %arg3[%c7_396, %c0_397, %c0_398] : memref<10x1x9xf32, #tpu.memory_space<vmem>>, vector<1x1x9xf32>
    %1494 = vector.shape_cast %1493 : vector<1x1x9xf32> to vector<1x9xf32>
    %1495 = vector.shape_cast %1494 : vector<1x9xf32> to vector<1x1x9xf32>
    %1496 = vector.broadcast %1495 : vector<1x1x9xf32> to vector<2x8x9xf32>
    %1497 = arith.addf %1492, %1496 : vector<2x8x9xf32>
    %1498 = vector.extract_strided_slice %1497 {offsets = [0, 0, 0], sizes = [2, 8, 3], strides = [1, 1, 1]} : vector<2x8x9xf32> to vector<2x8x3xf32>
    %1499 = vector.extract_strided_slice %1497 {offsets = [0, 0, 3], sizes = [2, 8, 3], strides = [1, 1, 1]} : vector<2x8x9xf32> to vector<2x8x3xf32>
    %1500 = vector.extract_strided_slice %1497 {offsets = [0, 0, 6], sizes = [2, 8, 3], strides = [1, 1, 1]} : vector<2x8x9xf32> to vector<2x8x3xf32>
    %1501 = tpu.transpose %1499, [0, 2, 1] : vector<2x8x3xf32> -> vector<2x3x8xf32>
    %1502 = tpu.transpose %1500, [0, 2, 1] : vector<2x8x3xf32> -> vector<2x3x8xf32>
    %c7_399 = arith.constant 7 : index
    %c0_400 = arith.constant 0 : index
    %c0_401 = arith.constant 0 : index
    %1503 = vector.load %arg4[%c7_399, %c0_400, %c0_401] : memref<10x3x3xf32, #tpu.memory_space<vmem>>, vector<1x3x3xf32>
    %1504 = vector.shape_cast %1503 : vector<1x3x3xf32> to vector<3x3xf32>
    %c7_402 = arith.constant 7 : index
    %c0_403 = arith.constant 0 : index
    %c0_404 = arith.constant 0 : index
    %1505 = vector.load %arg5[%c7_402, %c0_403, %c0_404] : memref<10x1x3xf32, #tpu.memory_space<vmem>>, vector<1x1x3xf32>
    %1506 = vector.shape_cast %1505 : vector<1x1x3xf32> to vector<1x3xf32>
    %1507 = vector.extract_strided_slice %1498 {offsets = [0, 0, 0], sizes = [2, 8, 1], strides = [1, 1, 1]} : vector<2x8x3xf32> to vector<2x8x1xf32>
    %1508 = vector.extract_strided_slice %1501 {offsets = [0, 0, 0], sizes = [2, 1, 8], strides = [1, 1, 1]} : vector<2x3x8xf32> to vector<2x1x8xf32>
    %1509 = vector.extract_strided_slice %1502 {offsets = [0, 0, 0], sizes = [2, 1, 8], strides = [1, 1, 1]} : vector<2x3x8xf32> to vector<2x1x8xf32>
    %1510 = vector.broadcast %1507 : vector<2x8x1xf32> to vector<2x8x8xf32>
    %1511 = vector.broadcast %1508 : vector<2x1x8xf32> to vector<2x8x8xf32>
    %1512 = arith.mulf %1510, %1511 : vector<2x8x8xf32>
    %cst_405 = arith.constant dense<0xFF800000> : vector<2x8xf32>
    %1513 = vector.multi_reduction <maximumf>, %1512, %cst_405 [2] : vector<2x8x8xf32> to vector<2x8xf32>
    %1514 = vector.shape_cast %1513 : vector<2x8xf32> to vector<2x8x1xf32>
    %1515 = vector.broadcast %1514 : vector<2x8x1xf32> to vector<2x8x8xf32>
    %1516 = arith.subf %1512, %1515 : vector<2x8x8xf32>
    %1517 = math.exp %1516 : vector<2x8x8xf32>
    %cst_406 = arith.constant dense<0.000000e+00> : vector<2x8xf32>
    %1518 = vector.multi_reduction <add>, %1517, %cst_406 [2] : vector<2x8x8xf32> to vector<2x8xf32>
    %1519 = vector.shape_cast %1518 : vector<2x8xf32> to vector<2x8x1xf32>
    %1520 = vector.broadcast %1509 : vector<2x1x8xf32> to vector<2x8x8xf32>
    %1521 = arith.mulf %1517, %1520 : vector<2x8x8xf32>
    %cst_407 = arith.constant dense<0.000000e+00> : vector<2x8xf32>
    %1522 = vector.multi_reduction <add>, %1521, %cst_407 [2] : vector<2x8x8xf32> to vector<2x8xf32>
    %1523 = vector.shape_cast %1522 : vector<2x8xf32> to vector<2x8x1xf32>
    %1524 = tpu.reciprocal %1519 {approx = true} : vector<2x8x1xf32> -> vector<2x8x1xf32>
    %1525 = arith.mulf %1523, %1524 : vector<2x8x1xf32>
    %1526 = vector.extract_strided_slice %1504 {offsets = [0, 0], sizes = [1, 3], strides = [1, 1]} : vector<3x3xf32> to vector<1x3xf32>
    %1527 = vector.shape_cast %1526 : vector<1x3xf32> to vector<1x1x3xf32>
    %1528 = vector.broadcast %1525 : vector<2x8x1xf32> to vector<2x8x3xf32>
    %1529 = vector.broadcast %1527 : vector<1x1x3xf32> to vector<2x8x3xf32>
    %1530 = arith.mulf %1528, %1529 : vector<2x8x3xf32>
    %1531 = vector.shape_cast %1506 : vector<1x3xf32> to vector<1x1x3xf32>
    %1532 = vector.broadcast %1531 : vector<1x1x3xf32> to vector<2x8x3xf32>
    %1533 = arith.addf %1532, %1530 : vector<2x8x3xf32>
    %1534 = vector.extract_strided_slice %1498 {offsets = [0, 0, 1], sizes = [2, 8, 1], strides = [1, 1, 1]} : vector<2x8x3xf32> to vector<2x8x1xf32>
    %1535 = vector.extract_strided_slice %1501 {offsets = [0, 1, 0], sizes = [2, 1, 8], strides = [1, 1, 1]} : vector<2x3x8xf32> to vector<2x1x8xf32>
    %1536 = vector.extract_strided_slice %1502 {offsets = [0, 1, 0], sizes = [2, 1, 8], strides = [1, 1, 1]} : vector<2x3x8xf32> to vector<2x1x8xf32>
    %1537 = vector.broadcast %1534 : vector<2x8x1xf32> to vector<2x8x8xf32>
    %1538 = vector.broadcast %1535 : vector<2x1x8xf32> to vector<2x8x8xf32>
    %1539 = arith.mulf %1537, %1538 : vector<2x8x8xf32>
    %cst_408 = arith.constant dense<0xFF800000> : vector<2x8xf32>
    %1540 = vector.multi_reduction <maximumf>, %1539, %cst_408 [2] : vector<2x8x8xf32> to vector<2x8xf32>
    %1541 = vector.shape_cast %1540 : vector<2x8xf32> to vector<2x8x1xf32>
    %1542 = vector.broadcast %1541 : vector<2x8x1xf32> to vector<2x8x8xf32>
    %1543 = arith.subf %1539, %1542 : vector<2x8x8xf32>
    %1544 = math.exp %1543 : vector<2x8x8xf32>
    %cst_409 = arith.constant dense<0.000000e+00> : vector<2x8xf32>
    %1545 = vector.multi_reduction <add>, %1544, %cst_409 [2] : vector<2x8x8xf32> to vector<2x8xf32>
    %1546 = vector.shape_cast %1545 : vector<2x8xf32> to vector<2x8x1xf32>
    %1547 = vector.broadcast %1536 : vector<2x1x8xf32> to vector<2x8x8xf32>
    %1548 = arith.mulf %1544, %1547 : vector<2x8x8xf32>
    %cst_410 = arith.constant dense<0.000000e+00> : vector<2x8xf32>
    %1549 = vector.multi_reduction <add>, %1548, %cst_410 [2] : vector<2x8x8xf32> to vector<2x8xf32>
    %1550 = vector.shape_cast %1549 : vector<2x8xf32> to vector<2x8x1xf32>
    %1551 = tpu.reciprocal %1546 {approx = true} : vector<2x8x1xf32> -> vector<2x8x1xf32>
    %1552 = arith.mulf %1550, %1551 : vector<2x8x1xf32>
    %1553 = vector.extract_strided_slice %1504 {offsets = [1, 0], sizes = [1, 3], strides = [1, 1]} : vector<3x3xf32> to vector<1x3xf32>
    %1554 = vector.shape_cast %1553 : vector<1x3xf32> to vector<1x1x3xf32>
    %1555 = vector.broadcast %1552 : vector<2x8x1xf32> to vector<2x8x3xf32>
    %1556 = vector.broadcast %1554 : vector<1x1x3xf32> to vector<2x8x3xf32>
    %1557 = arith.mulf %1555, %1556 : vector<2x8x3xf32>
    %1558 = arith.addf %1533, %1557 : vector<2x8x3xf32>
    %1559 = vector.extract_strided_slice %1498 {offsets = [0, 0, 2], sizes = [2, 8, 1], strides = [1, 1, 1]} : vector<2x8x3xf32> to vector<2x8x1xf32>
    %1560 = vector.extract_strided_slice %1501 {offsets = [0, 2, 0], sizes = [2, 1, 8], strides = [1, 1, 1]} : vector<2x3x8xf32> to vector<2x1x8xf32>
    %1561 = vector.extract_strided_slice %1502 {offsets = [0, 2, 0], sizes = [2, 1, 8], strides = [1, 1, 1]} : vector<2x3x8xf32> to vector<2x1x8xf32>
    %1562 = vector.broadcast %1559 : vector<2x8x1xf32> to vector<2x8x8xf32>
    %1563 = vector.broadcast %1560 : vector<2x1x8xf32> to vector<2x8x8xf32>
    %1564 = arith.mulf %1562, %1563 : vector<2x8x8xf32>
    %cst_411 = arith.constant dense<0xFF800000> : vector<2x8xf32>
    %1565 = vector.multi_reduction <maximumf>, %1564, %cst_411 [2] : vector<2x8x8xf32> to vector<2x8xf32>
    %1566 = vector.shape_cast %1565 : vector<2x8xf32> to vector<2x8x1xf32>
    %1567 = vector.broadcast %1566 : vector<2x8x1xf32> to vector<2x8x8xf32>
    %1568 = arith.subf %1564, %1567 : vector<2x8x8xf32>
    %1569 = math.exp %1568 : vector<2x8x8xf32>
    %cst_412 = arith.constant dense<0.000000e+00> : vector<2x8xf32>
    %1570 = vector.multi_reduction <add>, %1569, %cst_412 [2] : vector<2x8x8xf32> to vector<2x8xf32>
    %1571 = vector.shape_cast %1570 : vector<2x8xf32> to vector<2x8x1xf32>
    %1572 = vector.broadcast %1561 : vector<2x1x8xf32> to vector<2x8x8xf32>
    %1573 = arith.mulf %1569, %1572 : vector<2x8x8xf32>
    %cst_413 = arith.constant dense<0.000000e+00> : vector<2x8xf32>
    %1574 = vector.multi_reduction <add>, %1573, %cst_413 [2] : vector<2x8x8xf32> to vector<2x8xf32>
    %1575 = vector.shape_cast %1574 : vector<2x8xf32> to vector<2x8x1xf32>
    %1576 = tpu.reciprocal %1571 {approx = true} : vector<2x8x1xf32> -> vector<2x8x1xf32>
    %1577 = arith.mulf %1575, %1576 : vector<2x8x1xf32>
    %1578 = vector.extract_strided_slice %1504 {offsets = [2, 0], sizes = [1, 3], strides = [1, 1]} : vector<3x3xf32> to vector<1x3xf32>
    %1579 = vector.shape_cast %1578 : vector<1x3xf32> to vector<1x1x3xf32>
    %1580 = vector.broadcast %1577 : vector<2x8x1xf32> to vector<2x8x3xf32>
    %1581 = vector.broadcast %1579 : vector<1x1x3xf32> to vector<2x8x3xf32>
    %1582 = arith.mulf %1580, %1581 : vector<2x8x3xf32>
    %1583 = arith.addf %1558, %1582 : vector<2x8x3xf32>
    %1584 = arith.addf %1470, %1583 : vector<2x8x3xf32>
    %c7_414 = arith.constant 7 : index
    %c0_415 = arith.constant 0 : index
    %c0_416 = arith.constant 0 : index
    %1585 = vector.load %arg6[%c7_414, %c0_415, %c0_416] : memref<10x1x3xf32, #tpu.memory_space<vmem>>, vector<1x1x3xf32>
    %1586 = vector.shape_cast %1585 : vector<1x1x3xf32> to vector<1x3xf32>
    %c7_417 = arith.constant 7 : index
    %c0_418 = arith.constant 0 : index
    %c0_419 = arith.constant 0 : index
    %1587 = vector.load %arg7[%c7_417, %c0_418, %c0_419] : memref<10x1x3xf32, #tpu.memory_space<vmem>>, vector<1x1x3xf32>
    %1588 = vector.shape_cast %1587 : vector<1x1x3xf32> to vector<1x3xf32>
    %cst_420 = arith.constant dense<0.000000e+00> : vector<2x8xf32>
    %1589 = vector.multi_reduction <add>, %1584, %cst_420 [2] : vector<2x8x3xf32> to vector<2x8xf32>
    %1590 = vector.shape_cast %1589 : vector<2x8xf32> to vector<2x8x1xf32>
    %cst_421 = arith.constant 3.000000e+00 : f32
    %1591 = vector.broadcast %cst_421 : f32 to vector<2x8x1xf32>
    %1592 = arith.divf %1590, %1591 : vector<2x8x1xf32>
    %1593 = vector.broadcast %1592 : vector<2x8x1xf32> to vector<2x8x3xf32>
    %1594 = arith.subf %1584, %1593 : vector<2x8x3xf32>
    %1595 = arith.mulf %1594, %1594 : vector<2x8x3xf32>
    %cst_422 = arith.constant dense<0.000000e+00> : vector<2x8xf32>
    %1596 = vector.multi_reduction <add>, %1595, %cst_422 [2] : vector<2x8x3xf32> to vector<2x8xf32>
    %1597 = vector.shape_cast %1596 : vector<2x8xf32> to vector<2x8x1xf32>
    %cst_423 = arith.constant 3.000000e+00 : f32
    %1598 = vector.broadcast %cst_423 : f32 to vector<2x8x1xf32>
    %1599 = arith.divf %1597, %1598 : vector<2x8x1xf32>
    %1600 = vector.broadcast %1592 : vector<2x8x1xf32> to vector<2x8x3xf32>
    %1601 = arith.subf %1584, %1600 : vector<2x8x3xf32>
    %cst_424 = arith.constant 9.99999974E-6 : f32
    %1602 = vector.broadcast %cst_424 : f32 to vector<2x8x1xf32>
    %1603 = arith.addf %1599, %1602 : vector<2x8x1xf32>
    %1604 = math.rsqrt %1603 : vector<2x8x1xf32>
    %1605 = vector.broadcast %1604 : vector<2x8x1xf32> to vector<2x8x3xf32>
    %1606 = arith.mulf %1601, %1605 : vector<2x8x3xf32>
    %1607 = vector.shape_cast %1586 : vector<1x3xf32> to vector<1x1x3xf32>
    %1608 = vector.broadcast %1607 : vector<1x1x3xf32> to vector<2x8x3xf32>
    %1609 = arith.mulf %1606, %1608 : vector<2x8x3xf32>
    %1610 = vector.shape_cast %1588 : vector<1x3xf32> to vector<1x1x3xf32>
    %1611 = vector.broadcast %1610 : vector<1x1x3xf32> to vector<2x8x3xf32>
    %1612 = arith.addf %1609, %1611 : vector<2x8x3xf32>
    %c7_425 = arith.constant 7 : index
    %c0_426 = arith.constant 0 : index
    %c0_427 = arith.constant 0 : index
    %1613 = vector.load %arg10[%c7_425, %c0_426, %c0_427] : memref<10x3x32xf32, #tpu.memory_space<vmem>>, vector<1x3x32xf32>
    %1614 = vector.shape_cast %1613 : vector<1x3x32xf32> to vector<3x32xf32>
    %1615 = vector.extract_strided_slice %1612 {offsets = [0, 0, 0], sizes = [2, 8, 1], strides = [1, 1, 1]} : vector<2x8x3xf32> to vector<2x8x1xf32>
    %1616 = vector.extract_strided_slice %1614 {offsets = [0, 0], sizes = [1, 32], strides = [1, 1]} : vector<3x32xf32> to vector<1x32xf32>
    %1617 = vector.shape_cast %1616 : vector<1x32xf32> to vector<1x1x32xf32>
    %1618 = vector.broadcast %1615 : vector<2x8x1xf32> to vector<2x8x32xf32>
    %1619 = vector.broadcast %1617 : vector<1x1x32xf32> to vector<2x8x32xf32>
    %1620 = arith.mulf %1618, %1619 : vector<2x8x32xf32>
    %1621 = vector.extract_strided_slice %1612 {offsets = [0, 0, 1], sizes = [2, 8, 1], strides = [1, 1, 1]} : vector<2x8x3xf32> to vector<2x8x1xf32>
    %1622 = vector.extract_strided_slice %1614 {offsets = [1, 0], sizes = [1, 32], strides = [1, 1]} : vector<3x32xf32> to vector<1x32xf32>
    %1623 = vector.shape_cast %1622 : vector<1x32xf32> to vector<1x1x32xf32>
    %1624 = vector.broadcast %1621 : vector<2x8x1xf32> to vector<2x8x32xf32>
    %1625 = vector.broadcast %1623 : vector<1x1x32xf32> to vector<2x8x32xf32>
    %1626 = arith.mulf %1624, %1625 : vector<2x8x32xf32>
    %1627 = arith.addf %1620, %1626 : vector<2x8x32xf32>
    %1628 = vector.extract_strided_slice %1612 {offsets = [0, 0, 2], sizes = [2, 8, 1], strides = [1, 1, 1]} : vector<2x8x3xf32> to vector<2x8x1xf32>
    %1629 = vector.extract_strided_slice %1614 {offsets = [2, 0], sizes = [1, 32], strides = [1, 1]} : vector<3x32xf32> to vector<1x32xf32>
    %1630 = vector.shape_cast %1629 : vector<1x32xf32> to vector<1x1x32xf32>
    %1631 = vector.broadcast %1628 : vector<2x8x1xf32> to vector<2x8x32xf32>
    %1632 = vector.broadcast %1630 : vector<1x1x32xf32> to vector<2x8x32xf32>
    %1633 = arith.mulf %1631, %1632 : vector<2x8x32xf32>
    %1634 = arith.addf %1627, %1633 : vector<2x8x32xf32>
    %c7_428 = arith.constant 7 : index
    %c0_429 = arith.constant 0 : index
    %c0_430 = arith.constant 0 : index
    %1635 = vector.load %arg11[%c7_428, %c0_429, %c0_430] : memref<10x1x32xf32, #tpu.memory_space<vmem>>, vector<1x1x32xf32>
    %1636 = vector.shape_cast %1635 : vector<1x1x32xf32> to vector<1x32xf32>
    %1637 = vector.shape_cast %1636 : vector<1x32xf32> to vector<1x1x32xf32>
    %1638 = vector.broadcast %1637 : vector<1x1x32xf32> to vector<2x8x32xf32>
    %1639 = arith.addf %1634, %1638 : vector<2x8x32xf32>
    %cst_431 = arith.constant 0.000000e+00 : f32
    %1640 = vector.broadcast %cst_431 : f32 to vector<2x8x32xf32>
    %1641 = arith.maximumf %1639, %1640 : vector<2x8x32xf32>
    %1642 = vector.shape_cast %1641 : vector<2x8x32xf32> to vector<16x32xf32>
    %c7_432 = arith.constant 7 : index
    %c0_433 = arith.constant 0 : index
    %c0_434 = arith.constant 0 : index
    %1643 = vector.load %arg12[%c7_432, %c0_433, %c0_434] : memref<10x32x3xf32, #tpu.memory_space<vmem>>, vector<1x32x3xf32>
    %1644 = vector.shape_cast %1643 : vector<1x32x3xf32> to vector<32x3xf32>
    %cst_435 = arith.constant dense<0.000000e+00> : vector<16x3xf32>
    %1645 = tpu.matmul %1642, %1644, %cst_435 {dimension_numbers = #tpu.dot_dimension_numbers<[1], [0], [0], [1], [0, 0, 1, 1], [], []>} : vector<16x32xf32>, vector<32x3xf32>, vector<16x3xf32> -> vector<16x3xf32>
    %1646 = vector.shape_cast %1645 : vector<16x3xf32> to vector<2x8x3xf32>
    %c7_436 = arith.constant 7 : index
    %c0_437 = arith.constant 0 : index
    %c0_438 = arith.constant 0 : index
    %1647 = vector.load %arg13[%c7_436, %c0_437, %c0_438] : memref<10x1x3xf32, #tpu.memory_space<vmem>>, vector<1x1x3xf32>
    %1648 = vector.shape_cast %1647 : vector<1x1x3xf32> to vector<1x3xf32>
    %1649 = vector.shape_cast %1648 : vector<1x3xf32> to vector<1x1x3xf32>
    %1650 = vector.broadcast %1649 : vector<1x1x3xf32> to vector<2x8x3xf32>
    %1651 = arith.addf %1646, %1650 : vector<2x8x3xf32>
    %1652 = arith.addf %1612, %1651 : vector<2x8x3xf32>
    %c7_439 = arith.constant 7 : index
    %c0_440 = arith.constant 0 : index
    %c0_441 = arith.constant 0 : index
    %1653 = vector.load %arg8[%c7_439, %c0_440, %c0_441] : memref<10x1x3xf32, #tpu.memory_space<vmem>>, vector<1x1x3xf32>
    %1654 = vector.shape_cast %1653 : vector<1x1x3xf32> to vector<1x3xf32>
    %c7_442 = arith.constant 7 : index
    %c0_443 = arith.constant 0 : index
    %c0_444 = arith.constant 0 : index
    %1655 = vector.load %arg9[%c7_442, %c0_443, %c0_444] : memref<10x1x3xf32, #tpu.memory_space<vmem>>, vector<1x1x3xf32>
    %1656 = vector.shape_cast %1655 : vector<1x1x3xf32> to vector<1x3xf32>
    %cst_445 = arith.constant dense<0.000000e+00> : vector<2x8xf32>
    %1657 = vector.multi_reduction <add>, %1652, %cst_445 [2] : vector<2x8x3xf32> to vector<2x8xf32>
    %1658 = vector.shape_cast %1657 : vector<2x8xf32> to vector<2x8x1xf32>
    %cst_446 = arith.constant 3.000000e+00 : f32
    %1659 = vector.broadcast %cst_446 : f32 to vector<2x8x1xf32>
    %1660 = arith.divf %1658, %1659 : vector<2x8x1xf32>
    %1661 = vector.broadcast %1660 : vector<2x8x1xf32> to vector<2x8x3xf32>
    %1662 = arith.subf %1652, %1661 : vector<2x8x3xf32>
    %1663 = arith.mulf %1662, %1662 : vector<2x8x3xf32>
    %cst_447 = arith.constant dense<0.000000e+00> : vector<2x8xf32>
    %1664 = vector.multi_reduction <add>, %1663, %cst_447 [2] : vector<2x8x3xf32> to vector<2x8xf32>
    %1665 = vector.shape_cast %1664 : vector<2x8xf32> to vector<2x8x1xf32>
    %cst_448 = arith.constant 3.000000e+00 : f32
    %1666 = vector.broadcast %cst_448 : f32 to vector<2x8x1xf32>
    %1667 = arith.divf %1665, %1666 : vector<2x8x1xf32>
    %1668 = vector.broadcast %1660 : vector<2x8x1xf32> to vector<2x8x3xf32>
    %1669 = arith.subf %1652, %1668 : vector<2x8x3xf32>
    %cst_449 = arith.constant 9.99999974E-6 : f32
    %1670 = vector.broadcast %cst_449 : f32 to vector<2x8x1xf32>
    %1671 = arith.addf %1667, %1670 : vector<2x8x1xf32>
    %1672 = math.rsqrt %1671 : vector<2x8x1xf32>
    %1673 = vector.broadcast %1672 : vector<2x8x1xf32> to vector<2x8x3xf32>
    %1674 = arith.mulf %1669, %1673 : vector<2x8x3xf32>
    %1675 = vector.shape_cast %1654 : vector<1x3xf32> to vector<1x1x3xf32>
    %1676 = vector.broadcast %1675 : vector<1x1x3xf32> to vector<2x8x3xf32>
    %1677 = arith.mulf %1674, %1676 : vector<2x8x3xf32>
    %1678 = vector.shape_cast %1656 : vector<1x3xf32> to vector<1x1x3xf32>
    %1679 = vector.broadcast %1678 : vector<1x1x3xf32> to vector<2x8x3xf32>
    %1680 = arith.addf %1677, %1679 : vector<2x8x3xf32>
    %c8 = arith.constant 8 : index
    %c0_450 = arith.constant 0 : index
    %c0_451 = arith.constant 0 : index
    %1681 = vector.load %arg2[%c8, %c0_450, %c0_451] : memref<10x3x9xf32, #tpu.memory_space<vmem>>, vector<1x3x9xf32>
    %1682 = vector.shape_cast %1681 : vector<1x3x9xf32> to vector<3x9xf32>
    %1683 = vector.extract_strided_slice %1680 {offsets = [0, 0, 0], sizes = [2, 8, 1], strides = [1, 1, 1]} : vector<2x8x3xf32> to vector<2x8x1xf32>
    %1684 = vector.extract_strided_slice %1682 {offsets = [0, 0], sizes = [1, 9], strides = [1, 1]} : vector<3x9xf32> to vector<1x9xf32>
    %1685 = vector.shape_cast %1684 : vector<1x9xf32> to vector<1x1x9xf32>
    %1686 = vector.broadcast %1683 : vector<2x8x1xf32> to vector<2x8x9xf32>
    %1687 = vector.broadcast %1685 : vector<1x1x9xf32> to vector<2x8x9xf32>
    %1688 = arith.mulf %1686, %1687 : vector<2x8x9xf32>
    %1689 = vector.extract_strided_slice %1680 {offsets = [0, 0, 1], sizes = [2, 8, 1], strides = [1, 1, 1]} : vector<2x8x3xf32> to vector<2x8x1xf32>
    %1690 = vector.extract_strided_slice %1682 {offsets = [1, 0], sizes = [1, 9], strides = [1, 1]} : vector<3x9xf32> to vector<1x9xf32>
    %1691 = vector.shape_cast %1690 : vector<1x9xf32> to vector<1x1x9xf32>
    %1692 = vector.broadcast %1689 : vector<2x8x1xf32> to vector<2x8x9xf32>
    %1693 = vector.broadcast %1691 : vector<1x1x9xf32> to vector<2x8x9xf32>
    %1694 = arith.mulf %1692, %1693 : vector<2x8x9xf32>
    %1695 = arith.addf %1688, %1694 : vector<2x8x9xf32>
    %1696 = vector.extract_strided_slice %1680 {offsets = [0, 0, 2], sizes = [2, 8, 1], strides = [1, 1, 1]} : vector<2x8x3xf32> to vector<2x8x1xf32>
    %1697 = vector.extract_strided_slice %1682 {offsets = [2, 0], sizes = [1, 9], strides = [1, 1]} : vector<3x9xf32> to vector<1x9xf32>
    %1698 = vector.shape_cast %1697 : vector<1x9xf32> to vector<1x1x9xf32>
    %1699 = vector.broadcast %1696 : vector<2x8x1xf32> to vector<2x8x9xf32>
    %1700 = vector.broadcast %1698 : vector<1x1x9xf32> to vector<2x8x9xf32>
    %1701 = arith.mulf %1699, %1700 : vector<2x8x9xf32>
    %1702 = arith.addf %1695, %1701 : vector<2x8x9xf32>
    %c8_452 = arith.constant 8 : index
    %c0_453 = arith.constant 0 : index
    %c0_454 = arith.constant 0 : index
    %1703 = vector.load %arg3[%c8_452, %c0_453, %c0_454] : memref<10x1x9xf32, #tpu.memory_space<vmem>>, vector<1x1x9xf32>
    %1704 = vector.shape_cast %1703 : vector<1x1x9xf32> to vector<1x9xf32>
    %1705 = vector.shape_cast %1704 : vector<1x9xf32> to vector<1x1x9xf32>
    %1706 = vector.broadcast %1705 : vector<1x1x9xf32> to vector<2x8x9xf32>
    %1707 = arith.addf %1702, %1706 : vector<2x8x9xf32>
    %1708 = vector.extract_strided_slice %1707 {offsets = [0, 0, 0], sizes = [2, 8, 3], strides = [1, 1, 1]} : vector<2x8x9xf32> to vector<2x8x3xf32>
    %1709 = vector.extract_strided_slice %1707 {offsets = [0, 0, 3], sizes = [2, 8, 3], strides = [1, 1, 1]} : vector<2x8x9xf32> to vector<2x8x3xf32>
    %1710 = vector.extract_strided_slice %1707 {offsets = [0, 0, 6], sizes = [2, 8, 3], strides = [1, 1, 1]} : vector<2x8x9xf32> to vector<2x8x3xf32>
    %1711 = tpu.transpose %1709, [0, 2, 1] : vector<2x8x3xf32> -> vector<2x3x8xf32>
    %1712 = tpu.transpose %1710, [0, 2, 1] : vector<2x8x3xf32> -> vector<2x3x8xf32>
    %c8_455 = arith.constant 8 : index
    %c0_456 = arith.constant 0 : index
    %c0_457 = arith.constant 0 : index
    %1713 = vector.load %arg4[%c8_455, %c0_456, %c0_457] : memref<10x3x3xf32, #tpu.memory_space<vmem>>, vector<1x3x3xf32>
    %1714 = vector.shape_cast %1713 : vector<1x3x3xf32> to vector<3x3xf32>
    %c8_458 = arith.constant 8 : index
    %c0_459 = arith.constant 0 : index
    %c0_460 = arith.constant 0 : index
    %1715 = vector.load %arg5[%c8_458, %c0_459, %c0_460] : memref<10x1x3xf32, #tpu.memory_space<vmem>>, vector<1x1x3xf32>
    %1716 = vector.shape_cast %1715 : vector<1x1x3xf32> to vector<1x3xf32>
    %1717 = vector.extract_strided_slice %1708 {offsets = [0, 0, 0], sizes = [2, 8, 1], strides = [1, 1, 1]} : vector<2x8x3xf32> to vector<2x8x1xf32>
    %1718 = vector.extract_strided_slice %1711 {offsets = [0, 0, 0], sizes = [2, 1, 8], strides = [1, 1, 1]} : vector<2x3x8xf32> to vector<2x1x8xf32>
    %1719 = vector.extract_strided_slice %1712 {offsets = [0, 0, 0], sizes = [2, 1, 8], strides = [1, 1, 1]} : vector<2x3x8xf32> to vector<2x1x8xf32>
    %1720 = vector.broadcast %1717 : vector<2x8x1xf32> to vector<2x8x8xf32>
    %1721 = vector.broadcast %1718 : vector<2x1x8xf32> to vector<2x8x8xf32>
    %1722 = arith.mulf %1720, %1721 : vector<2x8x8xf32>
    %cst_461 = arith.constant dense<0xFF800000> : vector<2x8xf32>
    %1723 = vector.multi_reduction <maximumf>, %1722, %cst_461 [2] : vector<2x8x8xf32> to vector<2x8xf32>
    %1724 = vector.shape_cast %1723 : vector<2x8xf32> to vector<2x8x1xf32>
    %1725 = vector.broadcast %1724 : vector<2x8x1xf32> to vector<2x8x8xf32>
    %1726 = arith.subf %1722, %1725 : vector<2x8x8xf32>
    %1727 = math.exp %1726 : vector<2x8x8xf32>
    %cst_462 = arith.constant dense<0.000000e+00> : vector<2x8xf32>
    %1728 = vector.multi_reduction <add>, %1727, %cst_462 [2] : vector<2x8x8xf32> to vector<2x8xf32>
    %1729 = vector.shape_cast %1728 : vector<2x8xf32> to vector<2x8x1xf32>
    %1730 = vector.broadcast %1719 : vector<2x1x8xf32> to vector<2x8x8xf32>
    %1731 = arith.mulf %1727, %1730 : vector<2x8x8xf32>
    %cst_463 = arith.constant dense<0.000000e+00> : vector<2x8xf32>
    %1732 = vector.multi_reduction <add>, %1731, %cst_463 [2] : vector<2x8x8xf32> to vector<2x8xf32>
    %1733 = vector.shape_cast %1732 : vector<2x8xf32> to vector<2x8x1xf32>
    %1734 = tpu.reciprocal %1729 {approx = true} : vector<2x8x1xf32> -> vector<2x8x1xf32>
    %1735 = arith.mulf %1733, %1734 : vector<2x8x1xf32>
    %1736 = vector.extract_strided_slice %1714 {offsets = [0, 0], sizes = [1, 3], strides = [1, 1]} : vector<3x3xf32> to vector<1x3xf32>
    %1737 = vector.shape_cast %1736 : vector<1x3xf32> to vector<1x1x3xf32>
    %1738 = vector.broadcast %1735 : vector<2x8x1xf32> to vector<2x8x3xf32>
    %1739 = vector.broadcast %1737 : vector<1x1x3xf32> to vector<2x8x3xf32>
    %1740 = arith.mulf %1738, %1739 : vector<2x8x3xf32>
    %1741 = vector.shape_cast %1716 : vector<1x3xf32> to vector<1x1x3xf32>
    %1742 = vector.broadcast %1741 : vector<1x1x3xf32> to vector<2x8x3xf32>
    %1743 = arith.addf %1742, %1740 : vector<2x8x3xf32>
    %1744 = vector.extract_strided_slice %1708 {offsets = [0, 0, 1], sizes = [2, 8, 1], strides = [1, 1, 1]} : vector<2x8x3xf32> to vector<2x8x1xf32>
    %1745 = vector.extract_strided_slice %1711 {offsets = [0, 1, 0], sizes = [2, 1, 8], strides = [1, 1, 1]} : vector<2x3x8xf32> to vector<2x1x8xf32>
    %1746 = vector.extract_strided_slice %1712 {offsets = [0, 1, 0], sizes = [2, 1, 8], strides = [1, 1, 1]} : vector<2x3x8xf32> to vector<2x1x8xf32>
    %1747 = vector.broadcast %1744 : vector<2x8x1xf32> to vector<2x8x8xf32>
    %1748 = vector.broadcast %1745 : vector<2x1x8xf32> to vector<2x8x8xf32>
    %1749 = arith.mulf %1747, %1748 : vector<2x8x8xf32>
    %cst_464 = arith.constant dense<0xFF800000> : vector<2x8xf32>
    %1750 = vector.multi_reduction <maximumf>, %1749, %cst_464 [2] : vector<2x8x8xf32> to vector<2x8xf32>
    %1751 = vector.shape_cast %1750 : vector<2x8xf32> to vector<2x8x1xf32>
    %1752 = vector.broadcast %1751 : vector<2x8x1xf32> to vector<2x8x8xf32>
    %1753 = arith.subf %1749, %1752 : vector<2x8x8xf32>
    %1754 = math.exp %1753 : vector<2x8x8xf32>
    %cst_465 = arith.constant dense<0.000000e+00> : vector<2x8xf32>
    %1755 = vector.multi_reduction <add>, %1754, %cst_465 [2] : vector<2x8x8xf32> to vector<2x8xf32>
    %1756 = vector.shape_cast %1755 : vector<2x8xf32> to vector<2x8x1xf32>
    %1757 = vector.broadcast %1746 : vector<2x1x8xf32> to vector<2x8x8xf32>
    %1758 = arith.mulf %1754, %1757 : vector<2x8x8xf32>
    %cst_466 = arith.constant dense<0.000000e+00> : vector<2x8xf32>
    %1759 = vector.multi_reduction <add>, %1758, %cst_466 [2] : vector<2x8x8xf32> to vector<2x8xf32>
    %1760 = vector.shape_cast %1759 : vector<2x8xf32> to vector<2x8x1xf32>
    %1761 = tpu.reciprocal %1756 {approx = true} : vector<2x8x1xf32> -> vector<2x8x1xf32>
    %1762 = arith.mulf %1760, %1761 : vector<2x8x1xf32>
    %1763 = vector.extract_strided_slice %1714 {offsets = [1, 0], sizes = [1, 3], strides = [1, 1]} : vector<3x3xf32> to vector<1x3xf32>
    %1764 = vector.shape_cast %1763 : vector<1x3xf32> to vector<1x1x3xf32>
    %1765 = vector.broadcast %1762 : vector<2x8x1xf32> to vector<2x8x3xf32>
    %1766 = vector.broadcast %1764 : vector<1x1x3xf32> to vector<2x8x3xf32>
    %1767 = arith.mulf %1765, %1766 : vector<2x8x3xf32>
    %1768 = arith.addf %1743, %1767 : vector<2x8x3xf32>
    %1769 = vector.extract_strided_slice %1708 {offsets = [0, 0, 2], sizes = [2, 8, 1], strides = [1, 1, 1]} : vector<2x8x3xf32> to vector<2x8x1xf32>
    %1770 = vector.extract_strided_slice %1711 {offsets = [0, 2, 0], sizes = [2, 1, 8], strides = [1, 1, 1]} : vector<2x3x8xf32> to vector<2x1x8xf32>
    %1771 = vector.extract_strided_slice %1712 {offsets = [0, 2, 0], sizes = [2, 1, 8], strides = [1, 1, 1]} : vector<2x3x8xf32> to vector<2x1x8xf32>
    %1772 = vector.broadcast %1769 : vector<2x8x1xf32> to vector<2x8x8xf32>
    %1773 = vector.broadcast %1770 : vector<2x1x8xf32> to vector<2x8x8xf32>
    %1774 = arith.mulf %1772, %1773 : vector<2x8x8xf32>
    %cst_467 = arith.constant dense<0xFF800000> : vector<2x8xf32>
    %1775 = vector.multi_reduction <maximumf>, %1774, %cst_467 [2] : vector<2x8x8xf32> to vector<2x8xf32>
    %1776 = vector.shape_cast %1775 : vector<2x8xf32> to vector<2x8x1xf32>
    %1777 = vector.broadcast %1776 : vector<2x8x1xf32> to vector<2x8x8xf32>
    %1778 = arith.subf %1774, %1777 : vector<2x8x8xf32>
    %1779 = math.exp %1778 : vector<2x8x8xf32>
    %cst_468 = arith.constant dense<0.000000e+00> : vector<2x8xf32>
    %1780 = vector.multi_reduction <add>, %1779, %cst_468 [2] : vector<2x8x8xf32> to vector<2x8xf32>
    %1781 = vector.shape_cast %1780 : vector<2x8xf32> to vector<2x8x1xf32>
    %1782 = vector.broadcast %1771 : vector<2x1x8xf32> to vector<2x8x8xf32>
    %1783 = arith.mulf %1779, %1782 : vector<2x8x8xf32>
    %cst_469 = arith.constant dense<0.000000e+00> : vector<2x8xf32>
    %1784 = vector.multi_reduction <add>, %1783, %cst_469 [2] : vector<2x8x8xf32> to vector<2x8xf32>
    %1785 = vector.shape_cast %1784 : vector<2x8xf32> to vector<2x8x1xf32>
    %1786 = tpu.reciprocal %1781 {approx = true} : vector<2x8x1xf32> -> vector<2x8x1xf32>
    %1787 = arith.mulf %1785, %1786 : vector<2x8x1xf32>
    %1788 = vector.extract_strided_slice %1714 {offsets = [2, 0], sizes = [1, 3], strides = [1, 1]} : vector<3x3xf32> to vector<1x3xf32>
    %1789 = vector.shape_cast %1788 : vector<1x3xf32> to vector<1x1x3xf32>
    %1790 = vector.broadcast %1787 : vector<2x8x1xf32> to vector<2x8x3xf32>
    %1791 = vector.broadcast %1789 : vector<1x1x3xf32> to vector<2x8x3xf32>
    %1792 = arith.mulf %1790, %1791 : vector<2x8x3xf32>
    %1793 = arith.addf %1768, %1792 : vector<2x8x3xf32>
    %1794 = arith.addf %1680, %1793 : vector<2x8x3xf32>
    %c8_470 = arith.constant 8 : index
    %c0_471 = arith.constant 0 : index
    %c0_472 = arith.constant 0 : index
    %1795 = vector.load %arg6[%c8_470, %c0_471, %c0_472] : memref<10x1x3xf32, #tpu.memory_space<vmem>>, vector<1x1x3xf32>
    %1796 = vector.shape_cast %1795 : vector<1x1x3xf32> to vector<1x3xf32>
    %c8_473 = arith.constant 8 : index
    %c0_474 = arith.constant 0 : index
    %c0_475 = arith.constant 0 : index
    %1797 = vector.load %arg7[%c8_473, %c0_474, %c0_475] : memref<10x1x3xf32, #tpu.memory_space<vmem>>, vector<1x1x3xf32>
    %1798 = vector.shape_cast %1797 : vector<1x1x3xf32> to vector<1x3xf32>
    %cst_476 = arith.constant dense<0.000000e+00> : vector<2x8xf32>
    %1799 = vector.multi_reduction <add>, %1794, %cst_476 [2] : vector<2x8x3xf32> to vector<2x8xf32>
    %1800 = vector.shape_cast %1799 : vector<2x8xf32> to vector<2x8x1xf32>
    %cst_477 = arith.constant 3.000000e+00 : f32
    %1801 = vector.broadcast %cst_477 : f32 to vector<2x8x1xf32>
    %1802 = arith.divf %1800, %1801 : vector<2x8x1xf32>
    %1803 = vector.broadcast %1802 : vector<2x8x1xf32> to vector<2x8x3xf32>
    %1804 = arith.subf %1794, %1803 : vector<2x8x3xf32>
    %1805 = arith.mulf %1804, %1804 : vector<2x8x3xf32>
    %cst_478 = arith.constant dense<0.000000e+00> : vector<2x8xf32>
    %1806 = vector.multi_reduction <add>, %1805, %cst_478 [2] : vector<2x8x3xf32> to vector<2x8xf32>
    %1807 = vector.shape_cast %1806 : vector<2x8xf32> to vector<2x8x1xf32>
    %cst_479 = arith.constant 3.000000e+00 : f32
    %1808 = vector.broadcast %cst_479 : f32 to vector<2x8x1xf32>
    %1809 = arith.divf %1807, %1808 : vector<2x8x1xf32>
    %1810 = vector.broadcast %1802 : vector<2x8x1xf32> to vector<2x8x3xf32>
    %1811 = arith.subf %1794, %1810 : vector<2x8x3xf32>
    %cst_480 = arith.constant 9.99999974E-6 : f32
    %1812 = vector.broadcast %cst_480 : f32 to vector<2x8x1xf32>
    %1813 = arith.addf %1809, %1812 : vector<2x8x1xf32>
    %1814 = math.rsqrt %1813 : vector<2x8x1xf32>
    %1815 = vector.broadcast %1814 : vector<2x8x1xf32> to vector<2x8x3xf32>
    %1816 = arith.mulf %1811, %1815 : vector<2x8x3xf32>
    %1817 = vector.shape_cast %1796 : vector<1x3xf32> to vector<1x1x3xf32>
    %1818 = vector.broadcast %1817 : vector<1x1x3xf32> to vector<2x8x3xf32>
    %1819 = arith.mulf %1816, %1818 : vector<2x8x3xf32>
    %1820 = vector.shape_cast %1798 : vector<1x3xf32> to vector<1x1x3xf32>
    %1821 = vector.broadcast %1820 : vector<1x1x3xf32> to vector<2x8x3xf32>
    %1822 = arith.addf %1819, %1821 : vector<2x8x3xf32>
    %c8_481 = arith.constant 8 : index
    %c0_482 = arith.constant 0 : index
    %c0_483 = arith.constant 0 : index
    %1823 = vector.load %arg10[%c8_481, %c0_482, %c0_483] : memref<10x3x32xf32, #tpu.memory_space<vmem>>, vector<1x3x32xf32>
    %1824 = vector.shape_cast %1823 : vector<1x3x32xf32> to vector<3x32xf32>
    %1825 = vector.extract_strided_slice %1822 {offsets = [0, 0, 0], sizes = [2, 8, 1], strides = [1, 1, 1]} : vector<2x8x3xf32> to vector<2x8x1xf32>
    %1826 = vector.extract_strided_slice %1824 {offsets = [0, 0], sizes = [1, 32], strides = [1, 1]} : vector<3x32xf32> to vector<1x32xf32>
    %1827 = vector.shape_cast %1826 : vector<1x32xf32> to vector<1x1x32xf32>
    %1828 = vector.broadcast %1825 : vector<2x8x1xf32> to vector<2x8x32xf32>
    %1829 = vector.broadcast %1827 : vector<1x1x32xf32> to vector<2x8x32xf32>
    %1830 = arith.mulf %1828, %1829 : vector<2x8x32xf32>
    %1831 = vector.extract_strided_slice %1822 {offsets = [0, 0, 1], sizes = [2, 8, 1], strides = [1, 1, 1]} : vector<2x8x3xf32> to vector<2x8x1xf32>
    %1832 = vector.extract_strided_slice %1824 {offsets = [1, 0], sizes = [1, 32], strides = [1, 1]} : vector<3x32xf32> to vector<1x32xf32>
    %1833 = vector.shape_cast %1832 : vector<1x32xf32> to vector<1x1x32xf32>
    %1834 = vector.broadcast %1831 : vector<2x8x1xf32> to vector<2x8x32xf32>
    %1835 = vector.broadcast %1833 : vector<1x1x32xf32> to vector<2x8x32xf32>
    %1836 = arith.mulf %1834, %1835 : vector<2x8x32xf32>
    %1837 = arith.addf %1830, %1836 : vector<2x8x32xf32>
    %1838 = vector.extract_strided_slice %1822 {offsets = [0, 0, 2], sizes = [2, 8, 1], strides = [1, 1, 1]} : vector<2x8x3xf32> to vector<2x8x1xf32>
    %1839 = vector.extract_strided_slice %1824 {offsets = [2, 0], sizes = [1, 32], strides = [1, 1]} : vector<3x32xf32> to vector<1x32xf32>
    %1840 = vector.shape_cast %1839 : vector<1x32xf32> to vector<1x1x32xf32>
    %1841 = vector.broadcast %1838 : vector<2x8x1xf32> to vector<2x8x32xf32>
    %1842 = vector.broadcast %1840 : vector<1x1x32xf32> to vector<2x8x32xf32>
    %1843 = arith.mulf %1841, %1842 : vector<2x8x32xf32>
    %1844 = arith.addf %1837, %1843 : vector<2x8x32xf32>
    %c8_484 = arith.constant 8 : index
    %c0_485 = arith.constant 0 : index
    %c0_486 = arith.constant 0 : index
    %1845 = vector.load %arg11[%c8_484, %c0_485, %c0_486] : memref<10x1x32xf32, #tpu.memory_space<vmem>>, vector<1x1x32xf32>
    %1846 = vector.shape_cast %1845 : vector<1x1x32xf32> to vector<1x32xf32>
    %1847 = vector.shape_cast %1846 : vector<1x32xf32> to vector<1x1x32xf32>
    %1848 = vector.broadcast %1847 : vector<1x1x32xf32> to vector<2x8x32xf32>
    %1849 = arith.addf %1844, %1848 : vector<2x8x32xf32>
    %cst_487 = arith.constant 0.000000e+00 : f32
    %1850 = vector.broadcast %cst_487 : f32 to vector<2x8x32xf32>
    %1851 = arith.maximumf %1849, %1850 : vector<2x8x32xf32>
    %1852 = vector.shape_cast %1851 : vector<2x8x32xf32> to vector<16x32xf32>
    %c8_488 = arith.constant 8 : index
    %c0_489 = arith.constant 0 : index
    %c0_490 = arith.constant 0 : index
    %1853 = vector.load %arg12[%c8_488, %c0_489, %c0_490] : memref<10x32x3xf32, #tpu.memory_space<vmem>>, vector<1x32x3xf32>
    %1854 = vector.shape_cast %1853 : vector<1x32x3xf32> to vector<32x3xf32>
    %cst_491 = arith.constant dense<0.000000e+00> : vector<16x3xf32>
    %1855 = tpu.matmul %1852, %1854, %cst_491 {dimension_numbers = #tpu.dot_dimension_numbers<[1], [0], [0], [1], [0, 0, 1, 1], [], []>} : vector<16x32xf32>, vector<32x3xf32>, vector<16x3xf32> -> vector<16x3xf32>
    %1856 = vector.shape_cast %1855 : vector<16x3xf32> to vector<2x8x3xf32>
    %c8_492 = arith.constant 8 : index
    %c0_493 = arith.constant 0 : index
    %c0_494 = arith.constant 0 : index
    %1857 = vector.load %arg13[%c8_492, %c0_493, %c0_494] : memref<10x1x3xf32, #tpu.memory_space<vmem>>, vector<1x1x3xf32>
    %1858 = vector.shape_cast %1857 : vector<1x1x3xf32> to vector<1x3xf32>
    %1859 = vector.shape_cast %1858 : vector<1x3xf32> to vector<1x1x3xf32>
    %1860 = vector.broadcast %1859 : vector<1x1x3xf32> to vector<2x8x3xf32>
    %1861 = arith.addf %1856, %1860 : vector<2x8x3xf32>
    %1862 = arith.addf %1822, %1861 : vector<2x8x3xf32>
    %c8_495 = arith.constant 8 : index
    %c0_496 = arith.constant 0 : index
    %c0_497 = arith.constant 0 : index
    %1863 = vector.load %arg8[%c8_495, %c0_496, %c0_497] : memref<10x1x3xf32, #tpu.memory_space<vmem>>, vector<1x1x3xf32>
    %1864 = vector.shape_cast %1863 : vector<1x1x3xf32> to vector<1x3xf32>
    %c8_498 = arith.constant 8 : index
    %c0_499 = arith.constant 0 : index
    %c0_500 = arith.constant 0 : index
    %1865 = vector.load %arg9[%c8_498, %c0_499, %c0_500] : memref<10x1x3xf32, #tpu.memory_space<vmem>>, vector<1x1x3xf32>
    %1866 = vector.shape_cast %1865 : vector<1x1x3xf32> to vector<1x3xf32>
    %cst_501 = arith.constant dense<0.000000e+00> : vector<2x8xf32>
    %1867 = vector.multi_reduction <add>, %1862, %cst_501 [2] : vector<2x8x3xf32> to vector<2x8xf32>
    %1868 = vector.shape_cast %1867 : vector<2x8xf32> to vector<2x8x1xf32>
    %cst_502 = arith.constant 3.000000e+00 : f32
    %1869 = vector.broadcast %cst_502 : f32 to vector<2x8x1xf32>
    %1870 = arith.divf %1868, %1869 : vector<2x8x1xf32>
    %1871 = vector.broadcast %1870 : vector<2x8x1xf32> to vector<2x8x3xf32>
    %1872 = arith.subf %1862, %1871 : vector<2x8x3xf32>
    %1873 = arith.mulf %1872, %1872 : vector<2x8x3xf32>
    %cst_503 = arith.constant dense<0.000000e+00> : vector<2x8xf32>
    %1874 = vector.multi_reduction <add>, %1873, %cst_503 [2] : vector<2x8x3xf32> to vector<2x8xf32>
    %1875 = vector.shape_cast %1874 : vector<2x8xf32> to vector<2x8x1xf32>
    %cst_504 = arith.constant 3.000000e+00 : f32
    %1876 = vector.broadcast %cst_504 : f32 to vector<2x8x1xf32>
    %1877 = arith.divf %1875, %1876 : vector<2x8x1xf32>
    %1878 = vector.broadcast %1870 : vector<2x8x1xf32> to vector<2x8x3xf32>
    %1879 = arith.subf %1862, %1878 : vector<2x8x3xf32>
    %cst_505 = arith.constant 9.99999974E-6 : f32
    %1880 = vector.broadcast %cst_505 : f32 to vector<2x8x1xf32>
    %1881 = arith.addf %1877, %1880 : vector<2x8x1xf32>
    %1882 = math.rsqrt %1881 : vector<2x8x1xf32>
    %1883 = vector.broadcast %1882 : vector<2x8x1xf32> to vector<2x8x3xf32>
    %1884 = arith.mulf %1879, %1883 : vector<2x8x3xf32>
    %1885 = vector.shape_cast %1864 : vector<1x3xf32> to vector<1x1x3xf32>
    %1886 = vector.broadcast %1885 : vector<1x1x3xf32> to vector<2x8x3xf32>
    %1887 = arith.mulf %1884, %1886 : vector<2x8x3xf32>
    %1888 = vector.shape_cast %1866 : vector<1x3xf32> to vector<1x1x3xf32>
    %1889 = vector.broadcast %1888 : vector<1x1x3xf32> to vector<2x8x3xf32>
    %1890 = arith.addf %1887, %1889 : vector<2x8x3xf32>
    %c9 = arith.constant 9 : index
    %c0_506 = arith.constant 0 : index
    %c0_507 = arith.constant 0 : index
    %1891 = vector.load %arg2[%c9, %c0_506, %c0_507] : memref<10x3x9xf32, #tpu.memory_space<vmem>>, vector<1x3x9xf32>
    %1892 = vector.shape_cast %1891 : vector<1x3x9xf32> to vector<3x9xf32>
    %1893 = vector.extract_strided_slice %1890 {offsets = [0, 0, 0], sizes = [2, 8, 1], strides = [1, 1, 1]} : vector<2x8x3xf32> to vector<2x8x1xf32>
    %1894 = vector.extract_strided_slice %1892 {offsets = [0, 0], sizes = [1, 9], strides = [1, 1]} : vector<3x9xf32> to vector<1x9xf32>
    %1895 = vector.shape_cast %1894 : vector<1x9xf32> to vector<1x1x9xf32>
    %1896 = vector.broadcast %1893 : vector<2x8x1xf32> to vector<2x8x9xf32>
    %1897 = vector.broadcast %1895 : vector<1x1x9xf32> to vector<2x8x9xf32>
    %1898 = arith.mulf %1896, %1897 : vector<2x8x9xf32>
    %1899 = vector.extract_strided_slice %1890 {offsets = [0, 0, 1], sizes = [2, 8, 1], strides = [1, 1, 1]} : vector<2x8x3xf32> to vector<2x8x1xf32>
    %1900 = vector.extract_strided_slice %1892 {offsets = [1, 0], sizes = [1, 9], strides = [1, 1]} : vector<3x9xf32> to vector<1x9xf32>
    %1901 = vector.shape_cast %1900 : vector<1x9xf32> to vector<1x1x9xf32>
    %1902 = vector.broadcast %1899 : vector<2x8x1xf32> to vector<2x8x9xf32>
    %1903 = vector.broadcast %1901 : vector<1x1x9xf32> to vector<2x8x9xf32>
    %1904 = arith.mulf %1902, %1903 : vector<2x8x9xf32>
    %1905 = arith.addf %1898, %1904 : vector<2x8x9xf32>
    %1906 = vector.extract_strided_slice %1890 {offsets = [0, 0, 2], sizes = [2, 8, 1], strides = [1, 1, 1]} : vector<2x8x3xf32> to vector<2x8x1xf32>
    %1907 = vector.extract_strided_slice %1892 {offsets = [2, 0], sizes = [1, 9], strides = [1, 1]} : vector<3x9xf32> to vector<1x9xf32>
    %1908 = vector.shape_cast %1907 : vector<1x9xf32> to vector<1x1x9xf32>
    %1909 = vector.broadcast %1906 : vector<2x8x1xf32> to vector<2x8x9xf32>
    %1910 = vector.broadcast %1908 : vector<1x1x9xf32> to vector<2x8x9xf32>
    %1911 = arith.mulf %1909, %1910 : vector<2x8x9xf32>
    %1912 = arith.addf %1905, %1911 : vector<2x8x9xf32>
    %c9_508 = arith.constant 9 : index
    %c0_509 = arith.constant 0 : index
    %c0_510 = arith.constant 0 : index
    %1913 = vector.load %arg3[%c9_508, %c0_509, %c0_510] : memref<10x1x9xf32, #tpu.memory_space<vmem>>, vector<1x1x9xf32>
    %1914 = vector.shape_cast %1913 : vector<1x1x9xf32> to vector<1x9xf32>
    %1915 = vector.shape_cast %1914 : vector<1x9xf32> to vector<1x1x9xf32>
    %1916 = vector.broadcast %1915 : vector<1x1x9xf32> to vector<2x8x9xf32>
    %1917 = arith.addf %1912, %1916 : vector<2x8x9xf32>
    %1918 = vector.extract_strided_slice %1917 {offsets = [0, 0, 0], sizes = [2, 8, 3], strides = [1, 1, 1]} : vector<2x8x9xf32> to vector<2x8x3xf32>
    %1919 = vector.extract_strided_slice %1917 {offsets = [0, 0, 3], sizes = [2, 8, 3], strides = [1, 1, 1]} : vector<2x8x9xf32> to vector<2x8x3xf32>
    %1920 = vector.extract_strided_slice %1917 {offsets = [0, 0, 6], sizes = [2, 8, 3], strides = [1, 1, 1]} : vector<2x8x9xf32> to vector<2x8x3xf32>
    %1921 = tpu.transpose %1919, [0, 2, 1] : vector<2x8x3xf32> -> vector<2x3x8xf32>
    %1922 = tpu.transpose %1920, [0, 2, 1] : vector<2x8x3xf32> -> vector<2x3x8xf32>
    %c9_511 = arith.constant 9 : index
    %c0_512 = arith.constant 0 : index
    %c0_513 = arith.constant 0 : index
    %1923 = vector.load %arg4[%c9_511, %c0_512, %c0_513] : memref<10x3x3xf32, #tpu.memory_space<vmem>>, vector<1x3x3xf32>
    %1924 = vector.shape_cast %1923 : vector<1x3x3xf32> to vector<3x3xf32>
    %c9_514 = arith.constant 9 : index
    %c0_515 = arith.constant 0 : index
    %c0_516 = arith.constant 0 : index
    %1925 = vector.load %arg5[%c9_514, %c0_515, %c0_516] : memref<10x1x3xf32, #tpu.memory_space<vmem>>, vector<1x1x3xf32>
    %1926 = vector.shape_cast %1925 : vector<1x1x3xf32> to vector<1x3xf32>
    %1927 = vector.extract_strided_slice %1918 {offsets = [0, 0, 0], sizes = [2, 8, 1], strides = [1, 1, 1]} : vector<2x8x3xf32> to vector<2x8x1xf32>
    %1928 = vector.extract_strided_slice %1921 {offsets = [0, 0, 0], sizes = [2, 1, 8], strides = [1, 1, 1]} : vector<2x3x8xf32> to vector<2x1x8xf32>
    %1929 = vector.extract_strided_slice %1922 {offsets = [0, 0, 0], sizes = [2, 1, 8], strides = [1, 1, 1]} : vector<2x3x8xf32> to vector<2x1x8xf32>
    %1930 = vector.broadcast %1927 : vector<2x8x1xf32> to vector<2x8x8xf32>
    %1931 = vector.broadcast %1928 : vector<2x1x8xf32> to vector<2x8x8xf32>
    %1932 = arith.mulf %1930, %1931 : vector<2x8x8xf32>
    %cst_517 = arith.constant dense<0xFF800000> : vector<2x8xf32>
    %1933 = vector.multi_reduction <maximumf>, %1932, %cst_517 [2] : vector<2x8x8xf32> to vector<2x8xf32>
    %1934 = vector.shape_cast %1933 : vector<2x8xf32> to vector<2x8x1xf32>
    %1935 = vector.broadcast %1934 : vector<2x8x1xf32> to vector<2x8x8xf32>
    %1936 = arith.subf %1932, %1935 : vector<2x8x8xf32>
    %1937 = math.exp %1936 : vector<2x8x8xf32>
    %cst_518 = arith.constant dense<0.000000e+00> : vector<2x8xf32>
    %1938 = vector.multi_reduction <add>, %1937, %cst_518 [2] : vector<2x8x8xf32> to vector<2x8xf32>
    %1939 = vector.shape_cast %1938 : vector<2x8xf32> to vector<2x8x1xf32>
    %1940 = vector.broadcast %1929 : vector<2x1x8xf32> to vector<2x8x8xf32>
    %1941 = arith.mulf %1937, %1940 : vector<2x8x8xf32>
    %cst_519 = arith.constant dense<0.000000e+00> : vector<2x8xf32>
    %1942 = vector.multi_reduction <add>, %1941, %cst_519 [2] : vector<2x8x8xf32> to vector<2x8xf32>
    %1943 = vector.shape_cast %1942 : vector<2x8xf32> to vector<2x8x1xf32>
    %1944 = tpu.reciprocal %1939 {approx = true} : vector<2x8x1xf32> -> vector<2x8x1xf32>
    %1945 = arith.mulf %1943, %1944 : vector<2x8x1xf32>
    %1946 = vector.extract_strided_slice %1924 {offsets = [0, 0], sizes = [1, 3], strides = [1, 1]} : vector<3x3xf32> to vector<1x3xf32>
    %1947 = vector.shape_cast %1946 : vector<1x3xf32> to vector<1x1x3xf32>
    %1948 = vector.broadcast %1945 : vector<2x8x1xf32> to vector<2x8x3xf32>
    %1949 = vector.broadcast %1947 : vector<1x1x3xf32> to vector<2x8x3xf32>
    %1950 = arith.mulf %1948, %1949 : vector<2x8x3xf32>
    %1951 = vector.shape_cast %1926 : vector<1x3xf32> to vector<1x1x3xf32>
    %1952 = vector.broadcast %1951 : vector<1x1x3xf32> to vector<2x8x3xf32>
    %1953 = arith.addf %1952, %1950 : vector<2x8x3xf32>
    %1954 = vector.extract_strided_slice %1918 {offsets = [0, 0, 1], sizes = [2, 8, 1], strides = [1, 1, 1]} : vector<2x8x3xf32> to vector<2x8x1xf32>
    %1955 = vector.extract_strided_slice %1921 {offsets = [0, 1, 0], sizes = [2, 1, 8], strides = [1, 1, 1]} : vector<2x3x8xf32> to vector<2x1x8xf32>
    %1956 = vector.extract_strided_slice %1922 {offsets = [0, 1, 0], sizes = [2, 1, 8], strides = [1, 1, 1]} : vector<2x3x8xf32> to vector<2x1x8xf32>
    %1957 = vector.broadcast %1954 : vector<2x8x1xf32> to vector<2x8x8xf32>
    %1958 = vector.broadcast %1955 : vector<2x1x8xf32> to vector<2x8x8xf32>
    %1959 = arith.mulf %1957, %1958 : vector<2x8x8xf32>
    %cst_520 = arith.constant dense<0xFF800000> : vector<2x8xf32>
    %1960 = vector.multi_reduction <maximumf>, %1959, %cst_520 [2] : vector<2x8x8xf32> to vector<2x8xf32>
    %1961 = vector.shape_cast %1960 : vector<2x8xf32> to vector<2x8x1xf32>
    %1962 = vector.broadcast %1961 : vector<2x8x1xf32> to vector<2x8x8xf32>
    %1963 = arith.subf %1959, %1962 : vector<2x8x8xf32>
    %1964 = math.exp %1963 : vector<2x8x8xf32>
    %cst_521 = arith.constant dense<0.000000e+00> : vector<2x8xf32>
    %1965 = vector.multi_reduction <add>, %1964, %cst_521 [2] : vector<2x8x8xf32> to vector<2x8xf32>
    %1966 = vector.shape_cast %1965 : vector<2x8xf32> to vector<2x8x1xf32>
    %1967 = vector.broadcast %1956 : vector<2x1x8xf32> to vector<2x8x8xf32>
    %1968 = arith.mulf %1964, %1967 : vector<2x8x8xf32>
    %cst_522 = arith.constant dense<0.000000e+00> : vector<2x8xf32>
    %1969 = vector.multi_reduction <add>, %1968, %cst_522 [2] : vector<2x8x8xf32> to vector<2x8xf32>
    %1970 = vector.shape_cast %1969 : vector<2x8xf32> to vector<2x8x1xf32>
    %1971 = tpu.reciprocal %1966 {approx = true} : vector<2x8x1xf32> -> vector<2x8x1xf32>
    %1972 = arith.mulf %1970, %1971 : vector<2x8x1xf32>
    %1973 = vector.extract_strided_slice %1924 {offsets = [1, 0], sizes = [1, 3], strides = [1, 1]} : vector<3x3xf32> to vector<1x3xf32>
    %1974 = vector.shape_cast %1973 : vector<1x3xf32> to vector<1x1x3xf32>
    %1975 = vector.broadcast %1972 : vector<2x8x1xf32> to vector<2x8x3xf32>
    %1976 = vector.broadcast %1974 : vector<1x1x3xf32> to vector<2x8x3xf32>
    %1977 = arith.mulf %1975, %1976 : vector<2x8x3xf32>
    %1978 = arith.addf %1953, %1977 : vector<2x8x3xf32>
    %1979 = vector.extract_strided_slice %1918 {offsets = [0, 0, 2], sizes = [2, 8, 1], strides = [1, 1, 1]} : vector<2x8x3xf32> to vector<2x8x1xf32>
    %1980 = vector.extract_strided_slice %1921 {offsets = [0, 2, 0], sizes = [2, 1, 8], strides = [1, 1, 1]} : vector<2x3x8xf32> to vector<2x1x8xf32>
    %1981 = vector.extract_strided_slice %1922 {offsets = [0, 2, 0], sizes = [2, 1, 8], strides = [1, 1, 1]} : vector<2x3x8xf32> to vector<2x1x8xf32>
    %1982 = vector.broadcast %1979 : vector<2x8x1xf32> to vector<2x8x8xf32>
    %1983 = vector.broadcast %1980 : vector<2x1x8xf32> to vector<2x8x8xf32>
    %1984 = arith.mulf %1982, %1983 : vector<2x8x8xf32>
    %cst_523 = arith.constant dense<0xFF800000> : vector<2x8xf32>
    %1985 = vector.multi_reduction <maximumf>, %1984, %cst_523 [2] : vector<2x8x8xf32> to vector<2x8xf32>
    %1986 = vector.shape_cast %1985 : vector<2x8xf32> to vector<2x8x1xf32>
    %1987 = vector.broadcast %1986 : vector<2x8x1xf32> to vector<2x8x8xf32>
    %1988 = arith.subf %1984, %1987 : vector<2x8x8xf32>
    %1989 = math.exp %1988 : vector<2x8x8xf32>
    %cst_524 = arith.constant dense<0.000000e+00> : vector<2x8xf32>
    %1990 = vector.multi_reduction <add>, %1989, %cst_524 [2] : vector<2x8x8xf32> to vector<2x8xf32>
    %1991 = vector.shape_cast %1990 : vector<2x8xf32> to vector<2x8x1xf32>
    %1992 = vector.broadcast %1981 : vector<2x1x8xf32> to vector<2x8x8xf32>
    %1993 = arith.mulf %1989, %1992 : vector<2x8x8xf32>
    %cst_525 = arith.constant dense<0.000000e+00> : vector<2x8xf32>
    %1994 = vector.multi_reduction <add>, %1993, %cst_525 [2] : vector<2x8x8xf32> to vector<2x8xf32>
    %1995 = vector.shape_cast %1994 : vector<2x8xf32> to vector<2x8x1xf32>
    %1996 = tpu.reciprocal %1991 {approx = true} : vector<2x8x1xf32> -> vector<2x8x1xf32>
    %1997 = arith.mulf %1995, %1996 : vector<2x8x1xf32>
    %1998 = vector.extract_strided_slice %1924 {offsets = [2, 0], sizes = [1, 3], strides = [1, 1]} : vector<3x3xf32> to vector<1x3xf32>
    %1999 = vector.shape_cast %1998 : vector<1x3xf32> to vector<1x1x3xf32>
    %2000 = vector.broadcast %1997 : vector<2x8x1xf32> to vector<2x8x3xf32>
    %2001 = vector.broadcast %1999 : vector<1x1x3xf32> to vector<2x8x3xf32>
    %2002 = arith.mulf %2000, %2001 : vector<2x8x3xf32>
    %2003 = arith.addf %1978, %2002 : vector<2x8x3xf32>
    %2004 = arith.addf %1890, %2003 : vector<2x8x3xf32>
    %c9_526 = arith.constant 9 : index
    %c0_527 = arith.constant 0 : index
    %c0_528 = arith.constant 0 : index
    %2005 = vector.load %arg6[%c9_526, %c0_527, %c0_528] : memref<10x1x3xf32, #tpu.memory_space<vmem>>, vector<1x1x3xf32>
    %2006 = vector.shape_cast %2005 : vector<1x1x3xf32> to vector<1x3xf32>
    %c9_529 = arith.constant 9 : index
    %c0_530 = arith.constant 0 : index
    %c0_531 = arith.constant 0 : index
    %2007 = vector.load %arg7[%c9_529, %c0_530, %c0_531] : memref<10x1x3xf32, #tpu.memory_space<vmem>>, vector<1x1x3xf32>
    %2008 = vector.shape_cast %2007 : vector<1x1x3xf32> to vector<1x3xf32>
    %cst_532 = arith.constant dense<0.000000e+00> : vector<2x8xf32>
    %2009 = vector.multi_reduction <add>, %2004, %cst_532 [2] : vector<2x8x3xf32> to vector<2x8xf32>
    %2010 = vector.shape_cast %2009 : vector<2x8xf32> to vector<2x8x1xf32>
    %cst_533 = arith.constant 3.000000e+00 : f32
    %2011 = vector.broadcast %cst_533 : f32 to vector<2x8x1xf32>
    %2012 = arith.divf %2010, %2011 : vector<2x8x1xf32>
    %2013 = vector.broadcast %2012 : vector<2x8x1xf32> to vector<2x8x3xf32>
    %2014 = arith.subf %2004, %2013 : vector<2x8x3xf32>
    %2015 = arith.mulf %2014, %2014 : vector<2x8x3xf32>
    %cst_534 = arith.constant dense<0.000000e+00> : vector<2x8xf32>
    %2016 = vector.multi_reduction <add>, %2015, %cst_534 [2] : vector<2x8x3xf32> to vector<2x8xf32>
    %2017 = vector.shape_cast %2016 : vector<2x8xf32> to vector<2x8x1xf32>
    %cst_535 = arith.constant 3.000000e+00 : f32
    %2018 = vector.broadcast %cst_535 : f32 to vector<2x8x1xf32>
    %2019 = arith.divf %2017, %2018 : vector<2x8x1xf32>
    %2020 = vector.broadcast %2012 : vector<2x8x1xf32> to vector<2x8x3xf32>
    %2021 = arith.subf %2004, %2020 : vector<2x8x3xf32>
    %cst_536 = arith.constant 9.99999974E-6 : f32
    %2022 = vector.broadcast %cst_536 : f32 to vector<2x8x1xf32>
    %2023 = arith.addf %2019, %2022 : vector<2x8x1xf32>
    %2024 = math.rsqrt %2023 : vector<2x8x1xf32>
    %2025 = vector.broadcast %2024 : vector<2x8x1xf32> to vector<2x8x3xf32>
    %2026 = arith.mulf %2021, %2025 : vector<2x8x3xf32>
    %2027 = vector.shape_cast %2006 : vector<1x3xf32> to vector<1x1x3xf32>
    %2028 = vector.broadcast %2027 : vector<1x1x3xf32> to vector<2x8x3xf32>
    %2029 = arith.mulf %2026, %2028 : vector<2x8x3xf32>
    %2030 = vector.shape_cast %2008 : vector<1x3xf32> to vector<1x1x3xf32>
    %2031 = vector.broadcast %2030 : vector<1x1x3xf32> to vector<2x8x3xf32>
    %2032 = arith.addf %2029, %2031 : vector<2x8x3xf32>
    %c9_537 = arith.constant 9 : index
    %c0_538 = arith.constant 0 : index
    %c0_539 = arith.constant 0 : index
    %2033 = vector.load %arg10[%c9_537, %c0_538, %c0_539] : memref<10x3x32xf32, #tpu.memory_space<vmem>>, vector<1x3x32xf32>
    %2034 = vector.shape_cast %2033 : vector<1x3x32xf32> to vector<3x32xf32>
    %2035 = vector.extract_strided_slice %2032 {offsets = [0, 0, 0], sizes = [2, 8, 1], strides = [1, 1, 1]} : vector<2x8x3xf32> to vector<2x8x1xf32>
    %2036 = vector.extract_strided_slice %2034 {offsets = [0, 0], sizes = [1, 32], strides = [1, 1]} : vector<3x32xf32> to vector<1x32xf32>
    %2037 = vector.shape_cast %2036 : vector<1x32xf32> to vector<1x1x32xf32>
    %2038 = vector.broadcast %2035 : vector<2x8x1xf32> to vector<2x8x32xf32>
    %2039 = vector.broadcast %2037 : vector<1x1x32xf32> to vector<2x8x32xf32>
    %2040 = arith.mulf %2038, %2039 : vector<2x8x32xf32>
    %2041 = vector.extract_strided_slice %2032 {offsets = [0, 0, 1], sizes = [2, 8, 1], strides = [1, 1, 1]} : vector<2x8x3xf32> to vector<2x8x1xf32>
    %2042 = vector.extract_strided_slice %2034 {offsets = [1, 0], sizes = [1, 32], strides = [1, 1]} : vector<3x32xf32> to vector<1x32xf32>
    %2043 = vector.shape_cast %2042 : vector<1x32xf32> to vector<1x1x32xf32>
    %2044 = vector.broadcast %2041 : vector<2x8x1xf32> to vector<2x8x32xf32>
    %2045 = vector.broadcast %2043 : vector<1x1x32xf32> to vector<2x8x32xf32>
    %2046 = arith.mulf %2044, %2045 : vector<2x8x32xf32>
    %2047 = arith.addf %2040, %2046 : vector<2x8x32xf32>
    %2048 = vector.extract_strided_slice %2032 {offsets = [0, 0, 2], sizes = [2, 8, 1], strides = [1, 1, 1]} : vector<2x8x3xf32> to vector<2x8x1xf32>
    %2049 = vector.extract_strided_slice %2034 {offsets = [2, 0], sizes = [1, 32], strides = [1, 1]} : vector<3x32xf32> to vector<1x32xf32>
    %2050 = vector.shape_cast %2049 : vector<1x32xf32> to vector<1x1x32xf32>
    %2051 = vector.broadcast %2048 : vector<2x8x1xf32> to vector<2x8x32xf32>
    %2052 = vector.broadcast %2050 : vector<1x1x32xf32> to vector<2x8x32xf32>
    %2053 = arith.mulf %2051, %2052 : vector<2x8x32xf32>
    %2054 = arith.addf %2047, %2053 : vector<2x8x32xf32>
    %c9_540 = arith.constant 9 : index
    %c0_541 = arith.constant 0 : index
    %c0_542 = arith.constant 0 : index
    %2055 = vector.load %arg11[%c9_540, %c0_541, %c0_542] : memref<10x1x32xf32, #tpu.memory_space<vmem>>, vector<1x1x32xf32>
    %2056 = vector.shape_cast %2055 : vector<1x1x32xf32> to vector<1x32xf32>
    %2057 = vector.shape_cast %2056 : vector<1x32xf32> to vector<1x1x32xf32>
    %2058 = vector.broadcast %2057 : vector<1x1x32xf32> to vector<2x8x32xf32>
    %2059 = arith.addf %2054, %2058 : vector<2x8x32xf32>
    %cst_543 = arith.constant 0.000000e+00 : f32
    %2060 = vector.broadcast %cst_543 : f32 to vector<2x8x32xf32>
    %2061 = arith.maximumf %2059, %2060 : vector<2x8x32xf32>
    %2062 = vector.shape_cast %2061 : vector<2x8x32xf32> to vector<16x32xf32>
    %c9_544 = arith.constant 9 : index
    %c0_545 = arith.constant 0 : index
    %c0_546 = arith.constant 0 : index
    %2063 = vector.load %arg12[%c9_544, %c0_545, %c0_546] : memref<10x32x3xf32, #tpu.memory_space<vmem>>, vector<1x32x3xf32>
    %2064 = vector.shape_cast %2063 : vector<1x32x3xf32> to vector<32x3xf32>
    %cst_547 = arith.constant dense<0.000000e+00> : vector<16x3xf32>
    %2065 = tpu.matmul %2062, %2064, %cst_547 {dimension_numbers = #tpu.dot_dimension_numbers<[1], [0], [0], [1], [0, 0, 1, 1], [], []>} : vector<16x32xf32>, vector<32x3xf32>, vector<16x3xf32> -> vector<16x3xf32>
    %2066 = vector.shape_cast %2065 : vector<16x3xf32> to vector<2x8x3xf32>
    %c9_548 = arith.constant 9 : index
    %c0_549 = arith.constant 0 : index
    %c0_550 = arith.constant 0 : index
    %2067 = vector.load %arg13[%c9_548, %c0_549, %c0_550] : memref<10x1x3xf32, #tpu.memory_space<vmem>>, vector<1x1x3xf32>
    %2068 = vector.shape_cast %2067 : vector<1x1x3xf32> to vector<1x3xf32>
    %2069 = vector.shape_cast %2068 : vector<1x3xf32> to vector<1x1x3xf32>
    %2070 = vector.broadcast %2069 : vector<1x1x3xf32> to vector<2x8x3xf32>
    %2071 = arith.addf %2066, %2070 : vector<2x8x3xf32>
    %2072 = arith.addf %2032, %2071 : vector<2x8x3xf32>
    %c9_551 = arith.constant 9 : index
    %c0_552 = arith.constant 0 : index
    %c0_553 = arith.constant 0 : index
    %2073 = vector.load %arg8[%c9_551, %c0_552, %c0_553] : memref<10x1x3xf32, #tpu.memory_space<vmem>>, vector<1x1x3xf32>
    %2074 = vector.shape_cast %2073 : vector<1x1x3xf32> to vector<1x3xf32>
    %c9_554 = arith.constant 9 : index
    %c0_555 = arith.constant 0 : index
    %c0_556 = arith.constant 0 : index
    %2075 = vector.load %arg9[%c9_554, %c0_555, %c0_556] : memref<10x1x3xf32, #tpu.memory_space<vmem>>, vector<1x1x3xf32>
    %2076 = vector.shape_cast %2075 : vector<1x1x3xf32> to vector<1x3xf32>
    %cst_557 = arith.constant dense<0.000000e+00> : vector<2x8xf32>
    %2077 = vector.multi_reduction <add>, %2072, %cst_557 [2] : vector<2x8x3xf32> to vector<2x8xf32>
    %2078 = vector.shape_cast %2077 : vector<2x8xf32> to vector<2x8x1xf32>
    %cst_558 = arith.constant 3.000000e+00 : f32
    %2079 = vector.broadcast %cst_558 : f32 to vector<2x8x1xf32>
    %2080 = arith.divf %2078, %2079 : vector<2x8x1xf32>
    %2081 = vector.broadcast %2080 : vector<2x8x1xf32> to vector<2x8x3xf32>
    %2082 = arith.subf %2072, %2081 : vector<2x8x3xf32>
    %2083 = arith.mulf %2082, %2082 : vector<2x8x3xf32>
    %cst_559 = arith.constant dense<0.000000e+00> : vector<2x8xf32>
    %2084 = vector.multi_reduction <add>, %2083, %cst_559 [2] : vector<2x8x3xf32> to vector<2x8xf32>
    %2085 = vector.shape_cast %2084 : vector<2x8xf32> to vector<2x8x1xf32>
    %cst_560 = arith.constant 3.000000e+00 : f32
    %2086 = vector.broadcast %cst_560 : f32 to vector<2x8x1xf32>
    %2087 = arith.divf %2085, %2086 : vector<2x8x1xf32>
    %2088 = vector.broadcast %2080 : vector<2x8x1xf32> to vector<2x8x3xf32>
    %2089 = arith.subf %2072, %2088 : vector<2x8x3xf32>
    %cst_561 = arith.constant 9.99999974E-6 : f32
    %2090 = vector.broadcast %cst_561 : f32 to vector<2x8x1xf32>
    %2091 = arith.addf %2087, %2090 : vector<2x8x1xf32>
    %2092 = math.rsqrt %2091 : vector<2x8x1xf32>
    %2093 = vector.broadcast %2092 : vector<2x8x1xf32> to vector<2x8x3xf32>
    %2094 = arith.mulf %2089, %2093 : vector<2x8x3xf32>
    %2095 = vector.shape_cast %2074 : vector<1x3xf32> to vector<1x1x3xf32>
    %2096 = vector.broadcast %2095 : vector<1x1x3xf32> to vector<2x8x3xf32>
    %2097 = arith.mulf %2094, %2096 : vector<2x8x3xf32>
    %2098 = vector.shape_cast %2076 : vector<1x3xf32> to vector<1x1x3xf32>
    %2099 = vector.broadcast %2098 : vector<1x1x3xf32> to vector<2x8x3xf32>
    %2100 = arith.addf %2097, %2099 : vector<2x8x3xf32>
    %2101 = vector.extract_strided_slice %2100 {offsets = [0, 7, 0], sizes = [2, 1, 3], strides = [1, 1, 1]} : vector<2x8x3xf32> to vector<2x1x3xf32>
    %c0_562 = arith.constant 0 : index
    %c0_563 = arith.constant 0 : index
    %2102 = vector.load %arg14[%c0_562, %c0_563] : memref<3x3xf32, #tpu.memory_space<vmem>>, vector<3x3xf32>
    %2103 = vector.extract_strided_slice %2101 {offsets = [0, 0, 0], sizes = [2, 1, 1], strides = [1, 1, 1]} : vector<2x1x3xf32> to vector<2x1x1xf32>
    %2104 = vector.extract_strided_slice %2102 {offsets = [0, 0], sizes = [1, 3], strides = [1, 1]} : vector<3x3xf32> to vector<1x3xf32>
    %2105 = vector.shape_cast %2104 : vector<1x3xf32> to vector<1x1x3xf32>
    %2106 = vector.broadcast %2103 : vector<2x1x1xf32> to vector<2x1x3xf32>
    %2107 = vector.broadcast %2105 : vector<1x1x3xf32> to vector<2x1x3xf32>
    %2108 = arith.mulf %2106, %2107 : vector<2x1x3xf32>
    %2109 = vector.extract_strided_slice %2101 {offsets = [0, 0, 1], sizes = [2, 1, 1], strides = [1, 1, 1]} : vector<2x1x3xf32> to vector<2x1x1xf32>
    %2110 = vector.extract_strided_slice %2102 {offsets = [1, 0], sizes = [1, 3], strides = [1, 1]} : vector<3x3xf32> to vector<1x3xf32>
    %2111 = vector.shape_cast %2110 : vector<1x3xf32> to vector<1x1x3xf32>
    %2112 = vector.broadcast %2109 : vector<2x1x1xf32> to vector<2x1x3xf32>
    %2113 = vector.broadcast %2111 : vector<1x1x3xf32> to vector<2x1x3xf32>
    %2114 = arith.mulf %2112, %2113 : vector<2x1x3xf32>
    %2115 = arith.addf %2108, %2114 : vector<2x1x3xf32>
    %2116 = vector.extract_strided_slice %2101 {offsets = [0, 0, 2], sizes = [2, 1, 1], strides = [1, 1, 1]} : vector<2x1x3xf32> to vector<2x1x1xf32>
    %2117 = vector.extract_strided_slice %2102 {offsets = [2, 0], sizes = [1, 3], strides = [1, 1]} : vector<3x3xf32> to vector<1x3xf32>
    %2118 = vector.shape_cast %2117 : vector<1x3xf32> to vector<1x1x3xf32>
    %2119 = vector.broadcast %2116 : vector<2x1x1xf32> to vector<2x1x3xf32>
    %2120 = vector.broadcast %2118 : vector<1x1x3xf32> to vector<2x1x3xf32>
    %2121 = arith.mulf %2119, %2120 : vector<2x1x3xf32>
    %2122 = arith.addf %2115, %2121 : vector<2x1x3xf32>
    %c0_564 = arith.constant 0 : index
    %c0_565 = arith.constant 0 : index
    %2123 = vector.load %arg15[%c0_564, %c0_565] : memref<1x3xf32, #tpu.memory_space<vmem>>, vector<1x3xf32>
    %2124 = vector.shape_cast %2123 : vector<1x3xf32> to vector<1x1x3xf32>
    %2125 = vector.broadcast %2124 : vector<1x1x3xf32> to vector<2x1x3xf32>
    %2126 = arith.addf %2122, %2125 : vector<2x1x3xf32>
    %c0_566 = arith.constant 0 : index
    %c0_567 = arith.constant 0 : index
    %c0_568 = arith.constant 0 : index
    %2127 = vector.load %arg16[%c0_566, %c0_567, %c0_568] : memref<2x1x3xf32, #tpu.memory_space<vmem>>, vector<2x1x3xf32>
    tpu.vector_store %arg16[%c0_566, %c0_567, %c0_568], %2126 {strides = array<i32>} : memref<2x1x3xf32, #tpu.memory_space<vmem>>, vector<2x1x3xf32>,
    return
  }
  func.func @transform_0(%arg0: i32) -> (i32, i32, i32) {
    %c0_i32 = arith.constant 0 : i32
    %c0_i32_0 = arith.constant 0 : i32
    %c0_i32_1 = arith.constant 0 : i32
    return %arg0, %c0_i32, %c0_i32_0 : i32, i32, i32
  }
  func.func @transform_1(%arg0: i32) -> (i32, i32, i32) {
    %c0_i32 = arith.constant 0 : i32
    %c0_i32_0 = arith.constant 0 : i32
    %c0_i32_1 = arith.constant 0 : i32
    %c0_i32_2 = arith.constant 0 : i32
    return %c0_i32, %c0_i32_0, %c0_i32_1 : i32, i32, i32
  }
  func.func @transform_2(%arg0: i32) -> (i32, i32, i32) {
    %c0_i32 = arith.constant 0 : i32
    %c0_i32_0 = arith.constant 0 : i32
    %c0_i32_1 = arith.constant 0 : i32
    %c0_i32_2 = arith.constant 0 : i32
    return %c0_i32, %c0_i32_0, %c0_i32_1 : i32, i32, i32
  }
  func.func @transform_3(%arg0: i32) -> (i32, i32, i32) {
    %c0_i32 = arith.constant 0 : i32
    %c0_i32_0 = arith.constant 0 : i32
    %c0_i32_1 = arith.constant 0 : i32
    %c0_i32_2 = arith.constant 0 : i32
    return %c0_i32, %c0_i32_0, %c0_i32_1 : i32, i32, i32
  }
  func.func @transform_4(%arg0: i32) -> (i32, i32, i32) {
    %c0_i32 = arith.constant 0 : i32
    %c0_i32_0 = arith.constant 0 : i32
    %c0_i32_1 = arith.constant 0 : i32
    %c0_i32_2 = arith.constant 0 : i32
    return %c0_i32, %c0_i32_0, %c0_i32_1 : i32, i32, i32
  }
  func.func @transform_5(%arg0: i32) -> (i32, i32, i32) {
    %c0_i32 = arith.constant 0 : i32
    %c0_i32_0 = arith.constant 0 : i32
    %c0_i32_1 = arith.constant 0 : i32
    %c0_i32_2 = arith.constant 0 : i32
    return %c0_i32, %c0_i32_0, %c0_i32_1 : i32, i32, i32
  }
  func.func @transform_6(%arg0: i32) -> (i32, i32, i32) {
    %c0_i32 = arith.constant 0 : i32
    %c0_i32_0 = arith.constant 0 : i32
    %c0_i32_1 = arith.constant 0 : i32
    %c0_i32_2 = arith.constant 0 : i32
    return %c0_i32, %c0_i32_0, %c0_i32_1 : i32, i32, i32
  }
  func.func @transform_7(%arg0: i32) -> (i32, i32, i32) {
    %c0_i32 = arith.constant 0 : i32
    %c0_i32_0 = arith.constant 0 : i32
    %c0_i32_1 = arith.constant 0 : i32
    %c0_i32_2 = arith.constant 0 : i32
    return %c0_i32, %c0_i32_0, %c0_i32_1 : i32, i32, i32
  }
  func.func @transform_8(%arg0: i32) -> (i32, i32, i32) {
    %c0_i32 = arith.constant 0 : i32
    %c0_i32_0 = arith.constant 0 : i32
    %c0_i32_1 = arith.constant 0 : i32
    %c0_i32_2 = arith.constant 0 : i32
    return %c0_i32, %c0_i32_0, %c0_i32_1 : i32, i32, i32
  }
  func.func @transform_9(%arg0: i32) -> (i32, i32, i32) {
    %c0_i32 = arith.constant 0 : i32
    %c0_i32_0 = arith.constant 0 : i32
    %c0_i32_1 = arith.constant 0 : i32
    %c0_i32_2 = arith.constant 0 : i32
    return %c0_i32, %c0_i32_0, %c0_i32_1 : i32, i32, i32
  }
  func.func @transform_10(%arg0: i32) -> (i32, i32, i32) {
    %c0_i32 = arith.constant 0 : i32
    %c0_i32_0 = arith.constant 0 : i32
    %c0_i32_1 = arith.constant 0 : i32
    %c0_i32_2 = arith.constant 0 : i32
    return %c0_i32, %c0_i32_0, %c0_i32_1 : i32, i32, i32
  }
  func.func @transform_11(%arg0: i32) -> (i32, i32, i32) {
    %c0_i32 = arith.constant 0 : i32
    %c0_i32_0 = arith.constant 0 : i32
    %c0_i32_1 = arith.constant 0 : i32
    %c0_i32_2 = arith.constant 0 : i32
    return %c0_i32, %c0_i32_0, %c0_i32_1 : i32, i32, i32
  }
  func.func @transform_12(%arg0: i32) -> (i32, i32, i32) {
    %c0_i32 = arith.constant 0 : i32
    %c0_i32_0 = arith.constant 0 : i32
    %c0_i32_1 = arith.constant 0 : i32
    %c0_i32_2 = arith.constant 0 : i32
    return %c0_i32, %c0_i32_0, %c0_i32_1 : i32, i32, i32
  }
  func.func @transform_13(%arg0: i32) -> (i32, i32) {
    %c0_i32 = arith.constant 0 : i32
    %c0_i32_0 = arith.constant 0 : i32
    %c0_i32_1 = arith.constant 0 : i32
    return %c0_i32, %c0_i32_0 : i32, i32
  }
  func.func @transform_14(%arg0: i32) -> (i32, i32) {
    %c0_i32 = arith.constant 0 : i32
    %c0_i32_0 = arith.constant 0 : i32
    %c0_i32_1 = arith.constant 0 : i32
    return %c0_i32, %c0_i32_0 : i32, i32
  }
  func.func @transform_15(%arg0: i32) -> (i32, i32, i32) {
    %c0_i32 = arith.constant 0 : i32
    %c0_i32_0 = arith.constant 0 : i32
    %c0_i32_1 = arith.constant 0 : i32
    return %arg0, %c0_i32, %c0_i32_0 : i32, i32, i32
  }
}

</mosaic_0001>

<bundles_post_ra>
// kernel: tpu_custom_call.1
= control target key start
LH: loop header
LB: loop body
LE: loop exit
PB: predicated region body
PF: predicated region fallthrough
CT: control target
= control target key end

     0   :  { %v6404_v1 = vmov 2   ;;  %v6405_v2 = vmov 0   ;;  %v6406_v4 = vmov 1   ;;  %s7675_s0 = inlined_call_operand.vmem [shape: f32[2,8,3], index: 0, kind: input, shape index: {}]   ;;  %s7676_s1 = inlined_call_operand.vmem [shape: f32[10,3,9], index: 1, kind: input, shape index: {}]   ;;  %s7677_s2 = inlined_call_operand.vmem [shape: f32[10,1,9], index: 2, kind: input, shape index: {}]   ;;  %s7678_s3 = inlined_call_operand.vmem [shape: f32[10,3,3], index: 3, kind: input, shape index: {}]   ;;  %s7679_s4 = inlined_call_operand.vmem [shape: f32[10,1,3], index: 4, kind: input, shape index: {}]   ;;  %s7680_s5 = inlined_call_operand.vmem [shape: f32[10,1,3], index: 5, kind: input, shape index: {}]   ;;  %s7681_s6 = inlined_call_operand.vmem [shape: f32[10,1,3], index: 6, kind: input, shape index: {}]   ;;  %s7682_s7 = inlined_call_operand.vmem [shape: f32[10,1,3], index: 7, kind: input, shape index: {}]   ;;  %s7683_s8 = inlined_call_operand.vmem [shape: f32[10,1,3], index: 8, kind: input, shape index: {}]   ;;  %s7684_s9 = inlined_call_operand.vmem [shape: f32[10,3,32], index: 9, kind: input, shape index: {}]   ;;  %s7685_s10 = inlined_call_operand.vmem [shape: f32[10,1,32], index: 10, kind: input, shape index: {}]   ;;  %s7686_s11 = inlined_call_operand.vmem [shape: f32[10,32,3], index: 11, kind: input, shape index: {}]   ;;  %s7687_s12 = inlined_call_operand.vmem [shape: f32[10,1,3], index: 12, kind: input, shape index: {}]   ;;  %s7688_s13 = inlined_call_operand.vmem [shape: f32[3,3], index: 13, kind: input, shape index: {}]   ;;  %s7689_s14 = inlined_call_operand.vmem [shape: f32[1,3], index: 14, kind: input, shape index: {}]   ;;  %s7690_s15 = inlined_call_operand.hbm [shape: f32[2,1,3], index: 15, kind: output, shape index: {}]  }
   0x1   :  { %v6496_v0 = vld [vmem:[%s7675_s0 + $0x8] sm:$0xff]  ;;  %5847 = vset.pattern.permute.xlu1 %v6404_v1  ;;  %5845 = vset.pattern.permute.xlu0 %v6405_v2  ;;  %v6505_v3 = vld [vmem:[%s7675_s0] sm:$0xff] }
   0x2   :  { %85 = vperm.xlu1 %5847, %v6496_v0   ;;  %61 = vperm.xlu0 %5845, %v6496_v0  }
   0x3   :  { %5849 = vset.pattern.permute.xlu2 %v6406_v4 }
   0x4   :  { %68 = vperm.xlu2 %5849, %v6505_v3  }
   0xa   :  { %5848 = vset.pattern.permute.xlu1 %v6405_v2  ;;  %5846 = vset.pattern.permute.xlu0 %v6406_v4 }
   0xb   :  { %72 = vperm.xlu0 %5846, %v6496_v0   ;;  %56 = vperm.xlu1 %5848, %v6505_v3  }
   0xc   :  { %5850 = vset.pattern.permute.xlu2 %v6404_v1 }
   0xd   :  { %81 = vperm.xlu2 %5850, %v6505_v3  }
  0x13   :  { %5855 = vset.pattern.permute.xlu0 %v6404_v1  ;;  %5851 = vset.pattern.permute.xlu1 %v6406_v4 }
  0x15   :  { %5852 = vset.pattern.permute.xlu2 %v6405_v2 }
  0x16   :  { %20 = vsyncpa [#allocation3], 0  ;;  %v53_v8 = vld [vmem:[%s7676_s1] sm:$0x7]  ;;  %s6407_s25 = smov 125   ;;  %s6408_s26 = smov 122  }
  0x17   :  { %v64_v9 = vperm.slane %v53_v8, 0  ;;  %v75_v10 = vperm.slane %v53_v8, 1  ;;  %v88_v12 = vperm.slane %v53_v8, 2  ;;  %v5975_v21 = vld [vmem:[%s7677_s2] ss:$0 sm:$0xff]  ;;  %vm255_vm0 = vcmask 64512  }
  0x18   :  { %vm398_vm1 = vcmask 23552   ;;  %vm512_vm9 = vcmask 261120   ;;  %s6412_s16 = smov 1  }
  0x5e   :  { %v69_v5 = vpop.permute.xlu2 %68 }
  0x5f   :  { %v76_v16 = vmul.f32 %v75_v10, %v69_v5 }
  0x67   :  { %v82_v11 = vpop.permute.xlu2 %81 }
  0x68   :  { %v89_v19 = vmul.f32 %v88_v12, %v82_v11 }
  0x74   :  { %v86_v6 = vpop.permute.xlu1 %85  ;;  %v62_v7 = vpop.permute.xlu0 %61 }
  0x75   :  { %v66_v13 = vmul.f32 %v64_v9, %v62_v7  ;;  %v90_v20 = vmul.f32 %v88_v12, %v86_v6 }
  0x7d   :  { %v73_v14 = vpop.permute.xlu0 %72  ;;  %v57_v15 = vpop.permute.xlu1 %56 }
  0x7e   :  { %v77_v17 = vmul.f32 %v75_v10, %v73_v14  ;;  %v65_v18 = vmul.f32 %v64_v9, %v57_v15 }
  0x80   :  { %v79_v22 = vadd.f32 %v77_v17, %v66_v13  ;;  %v78_v23 = vadd.f32 %v76_v16, %v65_v18 }
  0x82   :  { %v92_v24 = vadd.f32 %v90_v20, %v79_v22  ;;  %v91_v25 = vadd.f32 %v89_v19, %v78_v23 }
  0x84   :  { %v98_v26 = vadd.f32 %v5975_v21, %v92_v24  ;;  %v97_v27 = vadd.f32 %v5975_v21, %v91_v25 }
  0x86   :  { %103 = vrot.lane.b32.xlu1 %v98_v26, %s6407_s25  ;;  %346 = vperm.xlu0 %5855, %v97_v27  }
  0x87   :  { %101 = vrot.lane.b32.xlu2 %v97_v27, %s6407_s25 }
  0x8e   :  { %301 = vperm.xlu1 %5851, %v98_v26   ;;  %173 = vrot.lane.b32.xlu0 %v98_v26, %s6408_s26 }
  0x8f   :  { %244 = vperm.xlu2 %5852, %v97_v27  }
  0x96   :  { %5853 = vset.pattern.permute.xlu1 %v6404_v1 }
  0x97   :  { %5854 = vset.pattern.permute.xlu2 %v6406_v4  ;;  %350 = vperm.xlu1 %5853, %v98_v26  }
  0x98   :  { %297 = vperm.xlu2 %5854, %v97_v27  }
  0xe1   :  { %v102_v28 = vpop.permute.xlu2 %101 }
  0xe2   :  { %107 = vxpose.xlu2.b32.start.end [1/1] (short) (narrow) %v102_v28, 8 }
  0xe9   :  { %v245_v38 = vpop.permute.xlu2 %244 }
  0xf2   :  { %v298_v40 = vpop.permute.xlu2 %297 }
  0xf8   :  { %v347_v29 = vpop.permute.xlu0 %346  ;;  %v104_v30 = vpop.permute.xlu1 %103 }
  0xf9   :  { %139 = vxpose.xlu1.b32.start.end [1/1] (short) (narrow) %v104_v30, 8 }
 0x100   :  { %v174_v31 = vpop.permute.xlu0 %173  ;;  %v302_v32 = vpop.permute.xlu1 %301 }
 0x101   :  { %209 = vxpose.xlu0.b32.start.end [1/1] (short) (narrow) %v174_v31, 8 }
 0x109   :  { %v351_v33 = vpop.permute.xlu1 %350 }
 0x144   :  { %5857 = vset.pattern.permute.xlu2 %v6405_v2 }
 0x14c   :  { %5858 = vset.pattern.permute.xlu1 %v6406_v4 }
 0x153   :  { %171 = vrot.lane.b32.xlu1 %v97_v27, %s6408_s26 }
 0x168   :  { %5856 = vset.pattern.permute.xlu0 %v6405_v2 }
 0x16f   :  { %248 = vperm.xlu0 %5856, %v98_v26  }
 0x17b   :  { %v123_v42 = vpop.trf.xlu2 }
 0x17c   :  { %v251_v46 = vperm.slane %v123_v42, 0  ;;  %v304_v52 = vperm.slane %v123_v42, 1  ;;  %v353_v55 = vperm.slane %v123_v42, 2 }
 0x17e   :  { %v253_v47 = vmul.f32 %v251_v46, %v245_v38  ;;  %v306_v53 = vmul.f32 %v304_v52, %v298_v40  ;;  %v355_v56 = vmul.f32 %v353_v55, %v347_v29 }
 0x180   :  { %v256_v48 = vsel %vm255_vm0, %v253_v47, -inf  ;;  %v308_v54 = vsel %vm255_vm0, %v306_v53, -inf  ;;  %v357_v57 = vsel %vm255_vm0, %v355_v56, -inf }
 0x19d   :  { %v155_v34 = vpop.trf.xlu1 }
 0x19e   :  { %v305_v35 = vperm.slane %v155_v34, 1  ;;  %v252_v41 = vperm.slane %v155_v34, 0  ;;  %v354_v49 = vperm.slane %v155_v34, 2 }
 0x1a0   :  { %v307_v36 = vmul.f32 %v305_v35, %v302_v32  ;;  %v356_v50 = vmul.f32 %v354_v49, %v351_v33 }
 0x1a2   :  { %v311_v37 = vsel %vm255_vm0, %v307_v36, -inf  ;;  %v360_v51 = vsel %vm255_vm0, %v356_v50, -inf }
 0x1a3   :  { %312 = vmax.xlane.f32.xlu2 %v311_v37 }
 0x1a5   :  { %v6534_v39 = vpop.trf.xlu0 }
 0x1a6   :  { %v327_v12 = vperm.slane %v6534_v39, 1  ;;  %v376_v22 = vperm.slane %v6534_v39, 2  ;;  %v275_v35 = vperm.slane %v6534_v39, 0 }
 0x1c5   :  { %v172_v58 = vpop.permute.xlu1 %171 }
 0x1e1   :  { %v249_v43 = vpop.permute.xlu0 %248 }
 0x1e2   :  { %v254_v44 = vmul.f32 %v252_v41, %v249_v43 }
 0x1e4   :  { %v259_v45 = vsel %vm255_vm0, %v254_v44, -inf }
 0x1e5   :  { %260 = vmax.xlane.f32.xlu0 %v259_v45 }
 0x1ed   :  { %257 = vmax.xlane.f32.xlu0 %v256_v48 }
 0x1f5   :  { %361 = vmax.xlane.f32.xlu0 %v360_v51 }
 0x1fd   :  { %309 = vmax.xlane.f32.xlu0 %v308_v54 }
 0x205   :  { %358 = vmax.xlane.f32.xlu0 %v357_v57 }
 0x216   :  { %v313_v59 = vpop.xlane.xlu2 %312 }
 0x217   :  { %v315_v60 = vsub.f32 %v307_v36, %v313_v59 }
 0x219   :  { %v318_v63 = vmul.f32 1.442695, %v315_v60 }
 0x22e   :  { %177 = vxpose.xlu0.b32.start.end [1/1] (short) (narrow) %v172_v58, 8  ;;  %v241_v58 = vld [vmem:[%s7678_s3] sm:$0x7] }
 0x22f   :  { %v288_v59 = vperm.slane %v241_v58, 0 }
 0x258   :  { %v261_v61 = vpop.xlane.xlu0 %260 }
 0x259   :  { %v263_v62 = vsub.f32 %v254_v44, %v261_v61 }
 0x25b   :  { %v266_v5 = vmul.f32 1.442695, %v263_v62  ;;  %v340_v62 = vperm.slane %v241_v58, 1 }
 0x25d   :  { %6056 = vpow2.f32 %v266_v5 }
 0x25e   :  { %6058 = vpow2.f32 %v318_v63  ;;  %v5976_v63 = vld [vmem:[%s7679_s4] ss:$0 sm:$0xff] }
 0x260   :  { %v258_v6 = vpop.xlane.xlu0 %257 }
 0x261   :  { %v262_v7 = vsub.f32 %v253_v47, %v258_v6 }
 0x263   :  { %v6057_v8 = vpop.eup %6056  ;;  %v264_v9 = vmul.f32 1.442695, %v262_v7 }
 0x264   :  { %v271_v10 = vsel %vm255_vm0, %v6057_v8, 0.0  ;;  %v6059_v11 = vpop.eup %6058  ;;  %v277_v36 = vmul.f32 %v6057_v8, %v275_v35  ;;  %v389_v8 = vperm.slane %v241_v58, 2 }
 0x265   :  { %6060 = vpow2.f32 %v264_v9  ;;  %272 = vadd.xlane.f32.xlu1 %v271_v10  ;;  %v329_v14 = vmul.f32 %v6059_v11, %v327_v12  ;;  %v323_v38 = vsel %vm255_vm0, %v6059_v11, 0.0 }
 0x266   :  { %v281_v37 = vsel %vm255_vm0, %v277_v36, 0.0 }
 0x267   :  { %v333_v18 = vsel %vm255_vm0, %v329_v14, 0.0 }
 0x268   :  { %v362_v13 = vpop.xlane.xlu0 %361 }
 0x269   :  { %v364_v15 = vsub.f32 %v356_v50, %v362_v13 }
 0x26b   :  { %v6061_v16 = vpop.eup %6060  ;;  %v367_v17 = vmul.f32 1.442695, %v364_v15 }
 0x26c   :  { %v268_v19 = vsel %vm255_vm0, %v6061_v16, 0.0 }
 0x26d   :  { %6062 = vpow2.f32 %v367_v17  ;;  %334 = vadd.xlane.f32.xlu1 %v333_v18  ;;  %269 = vadd.xlane.f32.xlu2 %v268_v19 }
 0x270   :  { %v310_v20 = vpop.xlane.xlu0 %309 }
 0x271   :  { %v314_v21 = vsub.f32 %v306_v53, %v310_v20 }
 0x273   :  { %v6063_v23 = vpop.eup %6062  ;;  %v316_v24 = vmul.f32 1.442695, %v314_v21 }
 0x274   :  { %v372_v25 = vsel %vm255_vm0, %v6063_v23, 0.0  ;;  %v378_v26 = vmul.f32 %v6063_v23, %v376_v22 }
 0x275   :  { %6064 = vpow2.f32 %v316_v24  ;;  %373 = vadd.xlane.f32.xlu2 %v372_v25 }
 0x276   :  { %v382_v27 = vsel %vm255_vm0, %v378_v26, 0.0 }
 0x277   :  { %383 = vadd.xlane.f32.xlu1 %v382_v27 }
 0x278   :  { %v359_v28 = vpop.xlane.xlu0 %358 }
 0x279   :  { %v363_v29 = vsub.f32 %v355_v56, %v359_v28 }
 0x27b   :  { %v6065_v30 = vpop.eup %6064  ;;  %v365_v31 = vmul.f32 1.442695, %v363_v29 }
 0x27c   :  { %v320_v32 = vsel %vm255_vm0, %v6065_v30, 0.0 }
 0x27d   :  { %6066 = vpow2.f32 %v365_v31  ;;  %321 = vadd.xlane.f32.xlu2 %v320_v32 }
 0x283   :  { %v6067_v33 = vpop.eup %6066 }
 0x284   :  { %v369_v34 = vsel %vm255_vm0, %v6067_v33, 0.0 }
 0x285   :  { %370 = vadd.xlane.f32.xlu2 %v369_v34  ;;  %v6409_v34 = vmov 3.0  }
 0x28d   :  { %282 = vadd.xlane.f32.xlu2 %v281_v37 }
 0x29f   :  { %324 = vadd.xlane.f32.xlu0 %v323_v38 }
 0x2d2   :  { %v193_v40 = vpop.trf.xlu0 }
 0x2d3   :  { %v375_v41 = vperm.slane %v193_v40, 2  ;;  %v274_v42 = vperm.slane %v193_v40, 0  ;;  %v326_v47 = vperm.slane %v193_v40, 1 }
 0x2d5   :  { %v377_v43 = vmul.f32 %v6067_v33, %v375_v41  ;;  %v276_v44 = vmul.f32 %v6061_v16, %v274_v42  ;;  %v328_v39 = vmul.f32 %v6065_v30, %v326_v47 }
 0x2d7   :  { %v379_v45 = vsel %vm255_vm0, %v377_v43, 0.0  ;;  %v278_v46 = vsel %vm255_vm0, %v276_v44, 0.0  ;;  %v330_v48 = vsel %vm255_vm0, %v328_v39, 0.0 }
 0x2d8   :  { %380 = vadd.xlane.f32.xlu1 %v379_v45  ;;  %279 = vadd.xlane.f32.xlu2 %v278_v46  ;;  %v273_v52 = vpop.xlane.xlu1 %272 }
 0x2d9   :  { %6068 = vrcp.f32 %v273_v52 }
 0x2df   :  { %v6069_v57 = vpop.eup %6068 }
 0x2e0   :  { %331 = vadd.xlane.f32.xlu2 %v330_v48  ;;  %v270_v49 = vpop.xlane.xlu2 %269  ;;  %v335_v54 = vpop.xlane.xlu1 %334 }
 0x2e8   :  { %v374_v50 = vpop.xlane.xlu2 %373 }
 0x2e9   :  { %6070 = vrcp.f32 %v374_v50 }
 0x2ea   :  { %v384_v7 = vpop.xlane.xlu1 %383 }
 0x2ef   :  { %v6071_v61 = vpop.eup %6070 }
 0x2f0   :  { %v322_v51 = vpop.xlane.xlu2 %321  ;;  %v388_v9 = vmul.f32 %v6071_v61, %v384_v7 }
 0x2f2   :  { %v391_v13 = vmul.f32 %v389_v8, %v388_v9 }
 0x2f8   :  { %v371_v53 = vpop.xlane.xlu2 %370 }
 0x300   :  { %v283_v55 = vpop.xlane.xlu2 %282 }
 0x301   :  { %v287_v60 = vmul.f32 %v6069_v57, %v283_v55 }
 0x303   :  { %v290_v5 = vmul.f32 %v288_v59, %v287_v60 }
 0x305   :  { %v295_v11 = vadd.f32 %v5976_v63, %v290_v5 }
 0x312   :  { %v325_v56 = vpop.xlane.xlu0 %324 }
 0x313   :  { %6072 = vrcp.f32 %v325_v56 }
 0x314   :  { %6074 = vrcp.f32 %v270_v49 }
 0x315   :  { %6076 = vrcp.f32 %v322_v51 }
 0x316   :  { %6078 = vrcp.f32 %v371_v53 }
 0x317   :  { %6080 = vrcp.f32 %v6409_v34 }
 0x319   :  { %v6073_v6 = vpop.eup %6072 }
 0x31a   :  { %v339_v10 = vmul.f32 %v6073_v6, %v335_v54  ;;  %v6075_v19 = vpop.eup %6074 }
 0x31b   :  { %v6077_v22 = vpop.eup %6076 }
 0x31c   :  { %v342_v12 = vmul.f32 %v340_v62, %v339_v10  ;;  %v6079_v24 = vpop.eup %6078 }
 0x31d   :  { %v6081_v35 = vpop.eup %6080 }
 0x31e   :  { %v344_v14 = vadd.f32 %v342_v12, %v295_v11  ;;  %v406_v36 = vmul.f32 3.0, %v6081_v35  ;;  %vm410_vm2 = vweird.f32 %v6081_v35 }
 0x320   :  { %v393_v15 = vadd.f32 %v391_v13, %v344_v14  ;;  %v407_v37 = vsub.f32 1.0, %v406_v36 }
 0x322   :  { %v395_v16 = vadd.f32 %v393_v15, %v6496_v0  ;;  %v408_v38 = vmul.f32 %v6081_v35, %v407_v37 }
 0x324   :  { %v402_v17 = vsel %vm398_vm1, %v395_v16, 0.0  ;;  %v409_v40 = vadd.f32 %v6081_v35, %v408_v38 }
 0x325   :  { %403 = vadd.xlane.f32.xlu2 %v402_v17 }
 0x326   :  { %v6566_v41 = vsel %vm410_vm2, %v6081_v35, %v409_v40 }
 0x34b   :  { %v280_v18 = vpop.xlane.xlu2 %279  ;;  %v381_v21 = vpop.xlane.xlu1 %380 }
 0x34c   :  { %v286_v20 = vmul.f32 %v6075_v19, %v280_v18  ;;  %v387_v26 = vmul.f32 %v6079_v24, %v381_v21  ;;  %v511_v19 = vld [vmem:[%s7686_s11 + $0x18] sm:$0xff]  ;;  %v509_v21 = vld [vmem:[%s7686_s11 + $0x8] sm:$0xff]  ;;  %v460_v24 = vld [vmem:[%s7684_s9] sm:$0x7] }
 0x34d   :  { %5827 = vmatpush.msra.mxu2 %v511_v19  ;;  %531 = vmatpush.msra.mxu0 %v511_v19  ;;  %v5982_v19 = vld [vmem:[%s7683_s8] ss:$0 sm:$0xff] }
 0x34e   :  { %v289_v23 = vmul.f32 %v288_v59, %v286_v20  ;;  %v390_v30 = vmul.f32 %v389_v8, %v387_v26  ;;  %v5977_v59 = vld [vmem:[%s7680_s5] ss:$0 sm:$0xff]  ;;  %v510_v20 = vld [vmem:[%s7686_s11 + $0x10] sm:$0xff]  ;;  %v482_v26 = vperm.slane %v460_v24, 1 }
 0x34f   :  { %5828 = vmatpush.msra.mxu2 %v510_v20  ;;  %532 = vmatpush.msra.mxu0 %v510_v20 }
 0x350   :  { %v294_v28 = vadd.f32 %v5976_v63, %v289_v23 }
 0x351   :  { %5829 = vmatpush.msra.mxu2 %v509_v21  ;;  %533 = vmatpush.msra.mxu0 %v509_v21 }
 0x353   :  { %v332_v25 = vpop.xlane.xlu2 %331 }
 0x354   :  { %v338_v27 = vmul.f32 %v6077_v22, %v332_v25  ;;  %v508_v22 = vld [vmem:[%s7686_s11] sm:$0xff]  ;;  %v471_v25 = vperm.slane %v460_v24, 0 }
 0x355   :  { %5830 = vmatpush.msra.mxu2 %v508_v22  ;;  %534 = vmatpush.msra.mxu0 %v508_v22 }
 0x356   :  { %v341_v29 = vmul.f32 %v340_v62, %v338_v27  ;;  %v5978_v62 = vld [vmem:[%s7681_s6] ss:$0 sm:$0xff]  ;;  %v495_v27 = vperm.slane %v460_v24, 2 }
 0x358   :  { %v343_v0 = vadd.f32 %v341_v29, %v294_v28 }
 0x35a   :  { %v392_v31 = vadd.f32 %v390_v30, %v343_v0 }
 0x35c   :  { %v394_v32 = vadd.f32 %v392_v31, %v6505_v3 }
 0x35e   :  { %v399_v33 = vsel %vm398_vm1, %v394_v32, 0.0 }
 0x35f   :  { %400 = vadd.xlane.f32.xlu1 %v399_v33  ;;  %v5979_v33 = vld [vmem:[%s7685_s10] ss:$0 sm:$0xff] }
 0x398   :  { %v404_v42 = vpop.xlane.xlu2 %403 }
 0x399   :  { %v413_v43 = vmul.f32 %v6566_v41, %v404_v42 }
 0x39b   :  { %v415_v44 = vsub.f32 %v395_v16, %v413_v43 }
 0x39d   :  { %v417_v45 = vmul.f32 %v415_v44, %v415_v44 }
 0x39f   :  { %v421_v3 = vsel %vm398_vm1, %v417_v45, 0.0 }
 0x3a0   :  { %422 = vadd.xlane.f32.xlu2 %v421_v3 }
 0x3d2   :  { %v401_v46 = vpop.xlane.xlu1 %400 }
 0x3d3   :  { %v412_v47 = vmul.f32 %v6566_v41, %v401_v46 }
 0x3d5   :  { %v414_v39 = vsub.f32 %v394_v32, %v412_v47 }
 0x3d7   :  { %v416_v48 = vmul.f32 %v414_v39, %v414_v39 }
 0x3d9   :  { %v418_v49 = vsel %vm398_vm1, %v416_v48, 0.0 }
 0x3da   :  { %419 = vadd.xlane.f32.xlu1 %v418_v49 }
 0x413   :  { %v423_v50 = vpop.xlane.xlu2 %422 }
 0x414   :  { %v425_v51 = vmul.f32 %v423_v50, %v6566_v41 }
 0x416   :  { %v427_v52 = vadd.f32 1e-05, %v425_v51 }
 0x418   :  { %6082 = vrsqrt.f32 %v427_v52  ;;  %vm444_vm4 = vweird.f32 %v427_v52 }
 0x41e   :  { %v6083_v53 = vpop.eup %6082 }
 0x41f   :  { %v439_v54 = vmul.f32 %v6083_v53, %v427_v52  ;;  %vm445_vm3 = vweird.f32 %v6083_v53 }
 0x420   :  { %vm446_vm5 = vmor %vm444_vm4, %vm445_vm3 }
 0x421   :  { %v440_v55 = vmul.f32 %v6083_v53, %v439_v54 }
 0x423   :  { %v441_v56 = vmul.f32 0.5, %v440_v55 }
 0x425   :  { %v442_v57 = vsub.f32 1.5, %v441_v56 }
 0x427   :  { %v443_v58 = vmul.f32 %v6083_v53, %v442_v57 }
 0x429   :  { %v447_v60 = vsel %vm446_vm5, %v6083_v53, %v443_v58 }
 0x42a   :  { %v449_v61 = vmul.f32 %v447_v60, %v415_v44 }
 0x42c   :  { %v454_v63 = vmul.f32 %v5977_v59, %v449_v61 }
 0x42e   :  { %v6579_v5 = vadd.f32 %v5978_v62, %v454_v63 }
 0x430   :  { %479 = vperm.xlu1 %5858, %v6579_v5   ;;  %468 = vperm.xlu2 %5857, %v6579_v5  }
 0x438   :  { %5859 = vset.pattern.permute.xlu2 %v6404_v1  ;;  %5860 = vset.pattern.permute.xlu1 %v6405_v2 }
 0x439   :  { %492 = vperm.xlu2 %5859, %v6579_v5  }
 0x441   :  { %5861 = vset.pattern.permute.xlu2 %v6406_v4 }
 0x44d   :  { %v420_v6 = vpop.xlane.xlu1 %419 }
 0x44e   :  { %v424_v7 = vmul.f32 %v420_v6, %v6566_v41 }
 0x450   :  { %v426_v8 = vadd.f32 1e-05, %v424_v7 }
 0x452   :  { %6084 = vrsqrt.f32 %v426_v8  ;;  %vm434_vm7 = vweird.f32 %v426_v8 }
 0x458   :  { %v6085_v9 = vpop.eup %6084 }
 0x459   :  { %v429_v10 = vmul.f32 %v6085_v9, %v426_v8  ;;  %vm435_vm6 = vweird.f32 %v6085_v9 }
 0x45a   :  { %vm436_vm8 = vmor %vm434_vm7, %vm435_vm6 }
 0x45b   :  { %v430_v11 = vmul.f32 %v6085_v9, %v429_v10 }
 0x45d   :  { %v431_v12 = vmul.f32 0.5, %v430_v11 }
 0x45f   :  { %v432_v13 = vsub.f32 1.5, %v431_v12 }
 0x461   :  { %v433_v14 = vmul.f32 %v6085_v9, %v432_v13 }
 0x463   :  { %v437_v15 = vsel %vm436_vm8, %v6085_v9, %v433_v14 }
 0x464   :  { %v448_v16 = vmul.f32 %v437_v15, %v414_v39  ;;  %v5980_v39 = vld [vmem:[%s7687_s12] ss:$0 sm:$0xff] }
 0x466   :  { %v453_v17 = vmul.f32 %v5977_v59, %v448_v16  ;;  %v5981_v16 = vld [vmem:[%s7682_s7] ss:$0 sm:$0xff] }
 0x468   :  { %v458_v18 = vadd.f32 %v5978_v62, %v453_v17 }
 0x46a   :  { %463 = vperm.xlu1 %5860, %v458_v18   ;;  %475 = vperm.xlu2 %5861, %v458_v18  }
 0x472   :  { %5862 = vset.pattern.permute.xlu1 %v6404_v1 }
 0x473   :  { %488 = vperm.xlu1 %5862, %v458_v18  }
 0x47b   :  { %5864 = vset.pattern.permute.xlu1 %v6405_v2 }
 0x48a   :  { %v469_v23 = vpop.permute.xlu2 %468 }
 0x48b   :  { %v473_v30 = vmul.f32 %v471_v25, %v469_v23 }
 0x493   :  { %v493_v28 = vpop.permute.xlu2 %492 }
 0x494   :  { %v497_v31 = vmul.f32 %v495_v27, %v493_v28 }
 0x4a2   :  { %v480_v29 = vpop.permute.xlu1 %479 }
 0x4a3   :  { %v484_v0 = vmul.f32 %v482_v26, %v480_v29 }
 0x4a5   :  { %v486_v32 = vadd.f32 %v484_v0, %v473_v30 }
 0x4a7   :  { %v499_v34 = vadd.f32 %v497_v31, %v486_v32 }
 0x4a9   :  { %v505_v35 = vadd.f32 %v5979_v33, %v499_v34 }
 0x4ab   :  { %v507_v36 = vmax.f32 %v505_v35, 0.0  ;;  %v5674_v35 = vld [vmem:[%s7676_s1 + $0x4] sm:$0x7] }
 0x4ad   :  { %5673 = vmatmul.msk.f32.vlgmr.msra.gmra.mxu2 %vm512_vm9, %v507_v36  ;;  %v629_v36 = vperm.slane %v5674_v35, 1 }
 0x4c4   :  { %v476_v38 = vpop.permute.xlu2 %475 }
 0x4c5   :  { %v483_v42 = vmul.f32 %v482_v26, %v476_v38  ;;  %v642_v38 = vperm.slane %v5674_v35, 2 }
 0x4dc   :  { %v464_v37 = vpop.permute.xlu1 %463 }
 0x4dd   :  { %v472_v40 = vmul.f32 %v471_v25, %v464_v37  ;;  %v618_v37 = vperm.slane %v5674_v35, 0 }
 0x4df   :  { %v485_v44 = vadd.f32 %v483_v42, %v472_v40 }
 0x4e5   :  { %v489_v43 = vpop.permute.xlu1 %488 }
 0x4e6   :  { %v496_v45 = vmul.f32 %v495_v27, %v489_v43 }
 0x4e8   :  { %v498_v3 = vadd.f32 %v496_v45, %v485_v44 }
 0x4ea   :  { %v504_v46 = vadd.f32 %v5979_v33, %v498_v3  ;;  %v5983_v3 = vld [vmem:[%s7677_s2 + $0x1] ss:$0 sm:$0xff] }
 0x4ec   :  { %v506_v47 = vmax.f32 %v504_v46, 0.0 }
 0x4ee   :  { %5672 = vmatmul.msk.f32.vlgmr.msra.gmra.mxu0 %vm512_vm9, %v506_v47 }
 0x530   :  { %v539_v48 = vpop.f32.mrf.mxu2 }
 0x531   :  { %v547_v49 = vadd.f32 %v5980_v39, %v539_v48 }
 0x533   :  { %v549_v50 = vadd.f32 %v547_v49, %v6579_v5 }
 0x535   :  { %v555_v51 = vsel %vm398_vm1, %v549_v50, 0.0 }
 0x536   :  { %556 = vadd.xlane.f32.xlu2 %v555_v51 }
 0x56b   :  { %v536_v52 = vpop.f32.mrf.mxu0 }
 0x56c   :  { %v546_v53 = vadd.f32 %v5980_v39, %v536_v52 }
 0x56e   :  { %v548_v54 = vadd.f32 %v546_v53, %v458_v18 }
 0x570   :  { %v552_v55 = vsel %vm398_vm1, %v548_v54, 0.0 }
 0x571   :  { %553 = vadd.xlane.f32.xlu0 %v552_v55 }
 0x5a9   :  { %v557_v56 = vpop.xlane.xlu2 %556 }
 0x5aa   :  { %v559_v57 = vmul.f32 %v557_v56, %v6566_v41 }
 0x5ac   :  { %v561_v58 = vsub.f32 %v549_v50, %v559_v57 }
 0x5ae   :  { %v563_v59 = vmul.f32 %v561_v58, %v561_v58 }
 0x5b0   :  { %v567_v60 = vsel %vm398_vm1, %v563_v59, 0.0 }
 0x5b1   :  { %568 = vadd.xlane.f32.xlu0 %v567_v60 }
 0x5e4   :  { %v554_v61 = vpop.xlane.xlu0 %553 }
 0x5e5   :  { %v558_v62 = vmul.f32 %v554_v61, %v6566_v41 }
 0x5e7   :  { %v560_v63 = vsub.f32 %v548_v54, %v558_v62 }
 0x5e9   :  { %v562_v5 = vmul.f32 %v560_v63, %v560_v63 }
 0x5eb   :  { %v564_v6 = vsel %vm398_vm1, %v562_v5, 0.0 }
 0x5ec   :  { %565 = vadd.xlane.f32.xlu1 %v564_v6 }
 0x624   :  { %v569_v7 = vpop.xlane.xlu0 %568 }
 0x625   :  { %v571_v8 = vmul.f32 %v569_v7, %v6566_v41 }
 0x627   :  { %v573_v9 = vadd.f32 1e-05, %v571_v8 }
 0x629   :  { %6086 = vrsqrt.f32 %v573_v9  ;;  %vm590_vm11 = vweird.f32 %v573_v9 }
 0x62f   :  { %v6087_v10 = vpop.eup %6086 }
 0x630   :  { %v585_v11 = vmul.f32 %v6087_v10, %v573_v9  ;;  %vm591_vm10 = vweird.f32 %v6087_v10 }
 0x631   :  { %vm592_vm12 = vmor %vm590_vm11, %vm591_vm10 }
 0x632   :  { %v586_v12 = vmul.f32 %v6087_v10, %v585_v11 }
 0x634   :  { %v587_v13 = vmul.f32 0.5, %v586_v12 }
 0x636   :  { %v588_v14 = vsub.f32 1.5, %v587_v13 }
 0x638   :  { %v589_v15 = vmul.f32 %v6087_v10, %v588_v14 }
 0x63a   :  { %v593_v17 = vsel %vm592_vm12, %v6087_v10, %v589_v15 }
 0x63b   :  { %v595_v18 = vmul.f32 %v593_v17, %v561_v58 }
 0x63d   :  { %v600_v20 = vmul.f32 %v5981_v16, %v595_v18 }
 0x63f   :  { %v6627_v21 = vadd.f32 %v5982_v19, %v600_v20 }
 0x641   :  { %615 = vperm.xlu1 %5864, %v6627_v21  }
 0x65f   :  { %v566_v22 = vpop.xlane.xlu1 %565 }
 0x660   :  { %v570_v23 = vmul.f32 %v566_v22, %v6566_v41 }
 0x662   :  { %v572_v24 = vadd.f32 1e-05, %v570_v23 }
 0x664   :  { %6088 = vrsqrt.f32 %v572_v24  ;;  %vm580_vm14 = vweird.f32 %v572_v24 }
 0x66a   :  { %v6089_v25 = vpop.eup %6088 }
 0x66b   :  { %v575_v26 = vmul.f32 %v6089_v25, %v572_v24  ;;  %vm581_vm13 = vweird.f32 %v6089_v25 }
 0x66c   :  { %vm582_vm15 = vmor %vm580_vm14, %vm581_vm13 }
 0x66d   :  { %v576_v27 = vmul.f32 %v6089_v25, %v575_v26 }
 0x66f   :  { %v577_v28 = vmul.f32 0.5, %v576_v27 }
 0x671   :  { %v578_v29 = vsub.f32 1.5, %v577_v28 }
 0x673   :  { %v579_v30 = vmul.f32 %v6089_v25, %v578_v29 }
 0x675   :  { %v583_v0 = vsel %vm582_vm15, %v6089_v25, %v579_v30 }
 0x676   :  { %v594_v31 = vmul.f32 %v583_v0, %v560_v63 }
 0x678   :  { %v599_v32 = vmul.f32 %v5981_v16, %v594_v31 }
 0x67a   :  { %v6631_v33 = vadd.f32 %v5982_v19, %v599_v32 }
 0x67c   :  { %622 = vperm.xlu2 %5861, %v6631_v33   ;;  %610 = vperm.xlu0 %5856, %v6631_v33  }
 0x684   :  { %5863 = vset.pattern.permute.xlu2 %v6404_v1  ;;  %5865 = vset.pattern.permute.xlu0 %v6406_v4 }
 0x685   :  { %635 = vperm.xlu2 %5863, %v6631_v33   ;;  %626 = vperm.xlu0 %5865, %v6627_v21  }
 0x68d   :  { %5866 = vset.pattern.permute.xlu0 %v6404_v1 }
 0x68e   :  { %639 = vperm.xlu0 %5866, %v6627_v21  }
 0x696   :  { %5867 = vset.pattern.permute.xlu0 %v6406_v4 }
 0x6b3   :  { %v616_v49 = vpop.permute.xlu1 %615 }
 0x6b4   :  { %v620_v51 = vmul.f32 %v618_v37, %v616_v49 }
 0x6d6   :  { %v623_v34 = vpop.permute.xlu2 %622 }
 0x6d7   :  { %v630_v43 = vmul.f32 %v629_v36, %v623_v34 }
 0x6df   :  { %v636_v40 = vpop.permute.xlu2 %635 }
 0x6e0   :  { %v643_v45 = vmul.f32 %v642_v38, %v636_v40 }
 0x6ee   :  { %v611_v42 = vpop.permute.xlu0 %610 }
 0x6ef   :  { %v619_v44 = vmul.f32 %v618_v37, %v611_v42 }
 0x6f1   :  { %v632_v46 = vadd.f32 %v630_v43, %v619_v44 }
 0x6f3   :  { %v645_v47 = vadd.f32 %v643_v45, %v632_v46 }
 0x6f5   :  { %v652_v39 = vadd.f32 %v5983_v3, %v645_v47 }
 0x6f7   :  { %v627_v48 = vpop.permute.xlu0 %626  ;;  %902 = vperm.xlu2 %5863, %v652_v39   ;;  %853 = vperm.xlu0 %5867, %v652_v39  }
 0x6f8   :  { %656 = vrot.lane.b32.xlu1 %v652_v39, %s6407_s25  ;;  %v631_v50 = vmul.f32 %v629_v36, %v627_v48 }
 0x6fa   :  { %v633_v53 = vadd.f32 %v631_v50, %v620_v51 }
 0x6ff   :  { %5868 = vset.pattern.permute.xlu2 %v6405_v2 }
 0x700   :  { %801 = vperm.xlu1 %5864, %v652_v39   ;;  %v640_v52 = vpop.permute.xlu0 %639 }
 0x701   :  { %v644_v54 = vmul.f32 %v642_v38, %v640_v52 }
 0x703   :  { %v646_v55 = vadd.f32 %v644_v54, %v633_v53 }
 0x705   :  { %v653_v56 = vadd.f32 %v5983_v3, %v646_v55 }
 0x707   :  { %658 = vrot.lane.b32.xlu2 %v653_v56, %s6407_s25  ;;  %728 = vrot.lane.b32.xlu0 %v653_v56, %s6408_s26 }
 0x708   :  { %726 = vrot.lane.b32.xlu1 %v652_v39, %s6408_s26 }
 0x709   :  { %5869 = vset.pattern.permute.xlu1 %v6404_v1 }
 0x70f   :  { %805 = vperm.xlu2 %5868, %v653_v56  }
 0x710   :  { %906 = vperm.xlu1 %5869, %v653_v56  }
 0x751   :  { %v903_v57 = vpop.permute.xlu2 %902 }
 0x761   :  { %v659_v58 = vpop.permute.xlu2 %658 }
 0x762   :  { %694 = vxpose.xlu0.b32.start.end [1/1] (short) (narrow) %v659_v58, 8 }
 0x769   :  { %v854_v62 = vpop.permute.xlu0 %853  ;;  %v806_v63 = vpop.permute.xlu2 %805 }
 0x76a   :  { %v657_v59 = vpop.permute.xlu1 %656 }
 0x76b   :  { %662 = vxpose.xlu2.b32.start.end [1/1] (short) (narrow) %v657_v59, 8 }
 0x772   :  { %v802_v60 = vpop.permute.xlu1 %801 }
 0x779   :  { %v729_v5 = vpop.permute.xlu0 %728 }
 0x77a   :  { %v727_v61 = vpop.permute.xlu1 %726 }
 0x77b   :  { %732 = vxpose.xlu1.b32.start.end [1/1] (short) (narrow) %v727_v61, 8 }
 0x782   :  { %v907_v20 = vpop.permute.xlu1 %906 }
 0x7ce   :  { %5870 = vset.pattern.permute.xlu1 %v6406_v4 }
 0x7d5   :  { %857 = vperm.xlu1 %5870, %v653_v56  }
 0x804   :  { %v678_v6 = vpop.trf.xlu2 }
 0x805   :  { %v808_v7 = vperm.slane %v678_v6, 0  ;;  %v860_v13 = vperm.slane %v678_v6, 1  ;;  %v909_v17 = vperm.slane %v678_v6, 2 }
 0x806   :  { %v710_v8 = vpop.trf.xlu0 }
 0x807   :  { %v810_v9 = vmul.f32 %v808_v7, %v802_v60  ;;  %v809_v10 = vperm.slane %v710_v8, 0  ;;  %v862_v15 = vmul.f32 %v860_v13, %v854_v62  ;;  %v911_v18 = vmul.f32 %v909_v17, %v903_v57 }
 0x808   :  { %v861_v23 = vperm.slane %v710_v8, 1  ;;  %v910_v27 = vperm.slane %v710_v8, 2 }
 0x809   :  { %v812_v11 = vsel %vm255_vm0, %v810_v9, -inf  ;;  %v811_v12 = vmul.f32 %v809_v10, %v806_v63  ;;  %v864_v16 = vsel %vm255_vm0, %v862_v15, -inf  ;;  %v913_v19 = vsel %vm255_vm0, %v911_v18, -inf }
 0x80a   :  { %813 = vmax.xlane.f32.xlu1 %v812_v11  ;;  %v912_v28 = vmul.f32 %v910_v27, %v907_v20 }
 0x80b   :  { %v815_v14 = vsel %vm255_vm0, %v811_v12, -inf }
 0x80c   :  { %816 = vmax.xlane.f32.xlu2 %v815_v14  ;;  %v916_v29 = vsel %vm255_vm0, %v912_v28, -inf }
 0x812   :  { %865 = vmax.xlane.f32.xlu1 %v864_v16 }
 0x81a   :  { %914 = vmax.xlane.f32.xlu1 %v913_v19 }
 0x81f   :  { %v748_v22 = vpop.trf.xlu1 }
 0x820   :  { %v830_v45 = vperm.slane %v748_v22, 0  ;;  %v882_v49 = vperm.slane %v748_v22, 1  ;;  %v931_v6 = vperm.slane %v748_v22, 2 }
 0x847   :  { %v858_v24 = vpop.permute.xlu1 %857 }
 0x848   :  { %v863_v25 = vmul.f32 %v861_v23, %v858_v24 }
 0x84a   :  { %v867_v26 = vsel %vm255_vm0, %v863_v25, -inf }
 0x84b   :  { %868 = vmax.xlane.f32.xlu1 %v867_v26 }
 0x853   :  { %917 = vmax.xlane.f32.xlu1 %v916_v29 }
 0x87d   :  { %v814_v30 = vpop.xlane.xlu1 %813 }
 0x87e   :  { %v818_v0 = vsub.f32 %v810_v9, %v814_v30 }
 0x87f   :  { %v817_v3 = vpop.xlane.xlu2 %816 }
 0x880   :  { %v820_v31 = vmul.f32 1.442695, %v818_v0  ;;  %v819_v47 = vsub.f32 %v811_v12, %v817_v3 }
 0x882   :  { %6090 = vpow2.f32 %v820_v31  ;;  %v822_v50 = vmul.f32 1.442695, %v819_v47 }
 0x885   :  { %v866_v32 = vpop.xlane.xlu1 %865 }
 0x886   :  { %v870_v40 = vsub.f32 %v862_v15, %v866_v32 }
 0x888   :  { %v6091_v34 = vpop.eup %6090  ;;  %v872_v43 = vmul.f32 1.442695, %v870_v40 }
 0x889   :  { %v824_v35 = vsel %vm255_vm0, %v6091_v34, 0.0  ;;  %v832_v46 = vmul.f32 %v6091_v34, %v830_v45 }
 0x88a   :  { %825 = vadd.xlane.f32.xlu0 %v824_v35  ;;  %v5984_v35 = vld [vmem:[%s7679_s4 + $0x1] ss:$0 sm:$0xff] }
 0x88b   :  { %v834_v39 = vsel %vm255_vm0, %v832_v46, 0.0 }
 0x88d   :  { %764 = vxpose.xlu1.b32.start.end [1/1] (short) (narrow) %v729_v5, 8  ;;  %v915_v36 = vpop.xlane.xlu1 %914 }
 0x88e   :  { %v919_v37 = vsub.f32 %v911_v18, %v915_v36 }
 0x890   :  { %v921_v38 = vmul.f32 1.442695, %v919_v37 }
 0x892   :  { %6092 = vpow2.f32 %v921_v38 }
 0x893   :  { %6094 = vpow2.f32 %v872_v43 }
 0x894   :  { %6096 = vpow2.f32 %v822_v50 }
 0x898   :  { %v6093_v42 = vpop.eup %6092 }
 0x899   :  { %v925_v44 = vsel %vm255_vm0, %v6093_v42, 0.0  ;;  %v6095_v48 = vpop.eup %6094  ;;  %v933_v7 = vmul.f32 %v6093_v42, %v931_v6 }
 0x89a   :  { %926 = vadd.xlane.f32.xlu2 %v925_v44  ;;  %v884_v51 = vmul.f32 %v6095_v48, %v882_v49  ;;  %v6097_v53 = vpop.eup %6096  ;;  %v876_v9 = vsel %vm255_vm0, %v6095_v48, 0.0 }
 0x89b   :  { %v827_v54 = vsel %vm255_vm0, %v6097_v53, 0.0  ;;  %v935_v8 = vsel %vm255_vm0, %v933_v7, 0.0 }
 0x89c   :  { %v886_v52 = vsel %vm255_vm0, %v884_v51, 0.0 }
 0x8a2   :  { %835 = vadd.xlane.f32.xlu2 %v834_v39 }
 0x8aa   :  { %887 = vadd.xlane.f32.xlu2 %v886_v52 }
 0x8b2   :  { %828 = vadd.xlane.f32.xlu2 %v827_v54 }
 0x8be   :  { %v869_v55 = vpop.xlane.xlu1 %868 }
 0x8bf   :  { %v871_v56 = vsub.f32 %v863_v25, %v869_v55 }
 0x8c1   :  { %v874_v57 = vmul.f32 1.442695, %v871_v56 }
 0x8c3   :  { %6098 = vpow2.f32 %v874_v57 }
 0x8c6   :  { %v918_v58 = vpop.xlane.xlu1 %917 }
 0x8c7   :  { %v920_v59 = vsub.f32 %v912_v28, %v918_v58  ;;  %v5676_v28 = vld [vmem:[%s7678_s3 + $0x4] sm:$0x7] }
 0x8c8   :  { %v844_v0 = vperm.slane %v5676_v28, 0  ;;  %v896_v36 = vperm.slane %v5676_v28, 1  ;;  %v945_v40 = vperm.slane %v5676_v28, 2  ;;  %v5986_v28 = vld [vmem:[%s7681_s6 + $0x1] ss:$0 sm:$0xff] }
 0x8c9   :  { %v6099_v60 = vpop.eup %6098  ;;  %v923_v61 = vmul.f32 1.442695, %v920_v59 }
 0x8ca   :  { %v879_v62 = vsel %vm255_vm0, %v6099_v60, 0.0 }
 0x8cb   :  { %6100 = vpow2.f32 %v923_v61  ;;  %880 = vadd.xlane.f32.xlu2 %v879_v62 }
 0x8d1   :  { %v6101_v63 = vpop.eup %6100 }
 0x8d2   :  { %v928_v5 = vsel %vm255_vm0, %v6101_v63, 0.0 }
 0x8d3   :  { %929 = vadd.xlane.f32.xlu2 %v928_v5 }
 0x8db   :  { %936 = vadd.xlane.f32.xlu2 %v935_v8 }
 0x8ed   :  { %877 = vadd.xlane.f32.xlu1 %v876_v9 }
 0x8fd   :  { %v826_v26 = vpop.xlane.xlu0 %825 }
 0x8fe   :  { %6102 = vrcp.f32 %v826_v26 }
 0x904   :  { %v6103_v30 = vpop.eup %6102 }
 0x90d   :  { %v927_v10 = vpop.xlane.xlu2 %926 }
 0x90e   :  { %6104 = vrcp.f32 %v927_v10 }
 0x914   :  { %v6105_v34 = vpop.eup %6104 }
 0x915   :  { %v836_v14 = vpop.xlane.xlu2 %835 }
 0x916   :  { %v842_v31 = vmul.f32 %v6103_v30, %v836_v14 }
 0x918   :  { %v845_v37 = vmul.f32 %v844_v0, %v842_v31 }
 0x91a   :  { %v850_v44 = vadd.f32 %v5984_v35, %v845_v37 }
 0x91d   :  { %v888_v20 = vpop.xlane.xlu2 %887 }
 0x925   :  { %v829_v24 = vpop.xlane.xlu2 %828 }
 0x931   :  { %v780_v11 = vpop.trf.xlu1 }
 0x932   :  { %v831_v12 = vperm.slane %v780_v11, 0  ;;  %v883_v16 = vperm.slane %v780_v11, 1  ;;  %v932_v19 = vperm.slane %v780_v11, 2 }
 0x934   :  { %v833_v13 = vmul.f32 %v6097_v53, %v831_v12  ;;  %v885_v17 = vmul.f32 %v6099_v60, %v883_v16  ;;  %v934_v22 = vmul.f32 %v6101_v63, %v932_v19 }
 0x936   :  { %v837_v15 = vsel %vm255_vm0, %v833_v13, 0.0  ;;  %v889_v18 = vsel %vm255_vm0, %v885_v17, 0.0  ;;  %v938_v23 = vsel %vm255_vm0, %v934_v22, 0.0 }
 0x937   :  { %838 = vadd.xlane.f32.xlu0 %v837_v15 }
 0x93e   :  { %v881_v25 = vpop.xlane.xlu2 %880 }
 0x93f   :  { %890 = vadd.xlane.f32.xlu0 %v889_v18 }
 0x946   :  { %v930_v27 = vpop.xlane.xlu2 %929 }
 0x947   :  { %939 = vadd.xlane.f32.xlu0 %v938_v23 }
 0x94e   :  { %v937_v32 = vpop.xlane.xlu2 %936 }
 0x94f   :  { %v943_v42 = vmul.f32 %v6105_v34, %v937_v32 }
 0x951   :  { %v946_v3 = vmul.f32 %v945_v40, %v943_v42 }
 0x960   :  { %v878_v29 = vpop.xlane.xlu1 %877 }
 0x961   :  { %6106 = vrcp.f32 %v878_v29 }
 0x962   :  { %6108 = vrcp.f32 %v829_v24 }
 0x963   :  { %6110 = vrcp.f32 %v881_v25  ;;  %v5985_v25 = vld [vmem:[%s7680_s5 + $0x1] ss:$0 sm:$0xff] }
 0x964   :  { %6112 = vrcp.f32 %v930_v27 }
 0x967   :  { %v6107_v38 = vpop.eup %6106 }
 0x968   :  { %v894_v43 = vmul.f32 %v6107_v38, %v888_v20  ;;  %v6109_v50 = vpop.eup %6108 }
 0x969   :  { %v6111_v53 = vpop.eup %6110 }
 0x96a   :  { %v897_v45 = vmul.f32 %v896_v36, %v894_v43  ;;  %v6113_v57 = vpop.eup %6112 }
 0x96c   :  { %v899_v46 = vadd.f32 %v897_v45, %v850_v44 }
 0x96e   :  { %v948_v47 = vadd.f32 %v946_v3, %v899_v46  ;;  %v5685_v3 = vld [vmem:[%s7686_s11 + $0x38] sm:$0xff]  ;;  %v5684_v46 = vld [vmem:[%s7686_s11 + $0x30] sm:$0xff] }
 0x96f   :  { %1083 = vmatpush.msra.mxu1 %v5685_v3  ;;  %5831 = vmatpush.msra.mxu3 %v5685_v3  ;;  %v5990_v3 = vld [vmem:[%s7683_s8 + $0x1] ss:$0 sm:$0xff] }
 0x970   :  { %v950_v39 = vadd.f32 %v948_v47, %v6631_v33  ;;  %v5683_v47 = vld [vmem:[%s7686_s11 + $0x28] sm:$0xff] }
 0x971   :  { %1084 = vmatpush.msra.mxu1 %v5684_v46  ;;  %5832 = vmatpush.msra.mxu3 %v5684_v46 }
 0x972   :  { %v956_v48 = vsel %vm398_vm1, %v950_v39, 0.0 }
 0x973   :  { %957 = vadd.xlane.f32.xlu2 %v956_v48  ;;  %1085 = vmatpush.msra.mxu1 %v5683_v47 }
 0x974   :  { %5833 = vmatpush.msra.mxu3 %v5683_v47 }
 0x9aa   :  { %v839_v49 = vpop.xlane.xlu0 %838 }
 0x9ab   :  { %v843_v52 = vmul.f32 %v6109_v50, %v839_v49  ;;  %v5680_v49 = vld [vmem:[%s7684_s9 + $0x4] sm:$0x7] }
 0x9ac   :  { %v1033_v50 = vperm.slane %v5680_v49, 1 }
 0x9ad   :  { %v846_v55 = vmul.f32 %v844_v0, %v843_v52 }
 0x9af   :  { %v851_v59 = vadd.f32 %v5984_v35, %v846_v55 }
 0x9b2   :  { %v891_v51 = vpop.xlane.xlu0 %890 }
 0x9b3   :  { %v895_v54 = vmul.f32 %v6111_v53, %v891_v51  ;;  %v1022_v51 = vperm.slane %v5680_v49, 0 }
 0x9b5   :  { %v898_v56 = vmul.f32 %v896_v36, %v895_v54  ;;  %v1046_v54 = vperm.slane %v5680_v49, 2 }
 0x9b7   :  { %v900_v61 = vadd.f32 %v898_v56, %v851_v59  ;;  %v5987_v59 = vld [vmem:[%s7685_s10 + $0x1] ss:$0 sm:$0xff] }
 0x9ba   :  { %v940_v58 = vpop.xlane.xlu0 %939 }
 0x9bb   :  { %v944_v60 = vmul.f32 %v6113_v57, %v940_v58 }
 0x9bd   :  { %v947_v33 = vmul.f32 %v945_v40, %v944_v60 }
 0x9bf   :  { %v949_v62 = vadd.f32 %v947_v33, %v900_v61 }
 0x9c1   :  { %v951_v63 = vadd.f32 %v949_v62, %v6627_v21 }
 0x9c3   :  { %v959_v5 = vsel %vm398_vm1, %v951_v63, 0.0 }
 0x9c4   :  { %960 = vadd.xlane.f32.xlu0 %v959_v5 }
 0x9e6   :  { %v958_v6 = vpop.xlane.xlu2 %957 }
 0x9e7   :  { %v962_v7 = vmul.f32 %v958_v6, %v6566_v41 }
 0x9e9   :  { %v964_v8 = vsub.f32 %v950_v39, %v962_v7  ;;  %v5682_v39 = vld [vmem:[%s7686_s11 + $0x20] sm:$0xff] }
 0x9ea   :  { %1086 = vmatpush.msra.mxu1 %v5682_v39  ;;  %5834 = vmatpush.msra.mxu3 %v5682_v39 }
 0x9eb   :  { %v966_v9 = vmul.f32 %v964_v8, %v964_v8 }
 0x9ed   :  { %v968_v10 = vsel %vm398_vm1, %v966_v9, 0.0 }
 0x9ee   :  { %969 = vadd.xlane.f32.xlu2 %v968_v10 }
 0xa37   :  { %v961_v11 = vpop.xlane.xlu0 %960 }
 0xa38   :  { %v963_v12 = vmul.f32 %v961_v11, %v6566_v41 }
 0xa3a   :  { %v965_v13 = vsub.f32 %v951_v63, %v963_v12 }
 0xa3c   :  { %v967_v14 = vmul.f32 %v965_v13, %v965_v13 }
 0xa3e   :  { %v971_v15 = vsel %vm398_vm1, %v967_v14, 0.0 }
 0xa3f   :  { %972 = vadd.xlane.f32.xlu0 %v971_v15 }
 0xa61   :  { %v970_v21 = vpop.xlane.xlu2 %969 }
 0xa62   :  { %v974_v16 = vmul.f32 %v970_v21, %v6566_v41 }
 0xa64   :  { %v976_v17 = vadd.f32 1e-05, %v974_v16 }
 0xa66   :  { %6114 = vrsqrt.f32 %v976_v17  ;;  %vm984_vm3 = vweird.f32 %v976_v17 }
 0xa6c   :  { %v6115_v18 = vpop.eup %6114 }
 0xa6d   :  { %v979_v19 = vmul.f32 %v6115_v18, %v976_v17  ;;  %vm985_vm2 = vweird.f32 %v6115_v18 }
 0xa6e   :  { %vm986_vm4 = vmor %vm984_vm3, %vm985_vm2 }
 0xa6f   :  { %v980_v20 = vmul.f32 %v6115_v18, %v979_v19 }
 0xa71   :  { %v981_v22 = vmul.f32 0.5, %v980_v20 }
 0xa73   :  { %v982_v23 = vsub.f32 1.5, %v981_v22 }
 0xa75   :  { %v983_v24 = vmul.f32 %v6115_v18, %v982_v23 }
 0xa77   :  { %v987_v26 = vsel %vm986_vm4, %v6115_v18, %v983_v24 }
 0xa78   :  { %v998_v27 = vmul.f32 %v987_v26, %v964_v8 }
 0xa7a   :  { %v1003_v29 = vmul.f32 %v5985_v25, %v998_v27 }
 0xa7c   :  { %v6694_v30 = vadd.f32 %v5986_v28, %v1003_v29 }
 0xa7e   :  { %1026 = vperm.xlu0 %5867, %v6694_v30   ;;  %1014 = vperm.xlu2 %5868, %v6694_v30  }
 0xa86   :  { %5871 = vset.pattern.permute.xlu0 %v6404_v1 }
 0xa87   :  { %1039 = vperm.xlu0 %5871, %v6694_v30  }
 0xa8f   :  { %5873 = vset.pattern.permute.xlu0 %v6405_v2 }
 0xab2   :  { %v973_v0 = vpop.xlane.xlu0 %972 }
 0xab3   :  { %v975_v31 = vmul.f32 %v973_v0, %v6566_v41 }
 0xab5   :  { %v977_v32 = vadd.f32 1e-05, %v975_v31 }
 0xab7   :  { %6116 = vrsqrt.f32 %v977_v32  ;;  %vm994_vm6 = vweird.f32 %v977_v32 }
 0xabd   :  { %v6117_v34 = vpop.eup %6116 }
 0xabe   :  { %v989_v35 = vmul.f32 %v6117_v34, %v977_v32  ;;  %vm995_vm5 = vweird.f32 %v6117_v34 }
 0xabf   :  { %vm996_vm7 = vmor %vm994_vm6, %vm995_vm5 }
 0xac0   :  { %v990_v36 = vmul.f32 %v6117_v34, %v989_v35 }
 0xac2   :  { %v991_v37 = vmul.f32 0.5, %v990_v36 }
 0xac4   :  { %v992_v38 = vsub.f32 1.5, %v991_v37 }
 0xac6   :  { %v993_v40 = vmul.f32 %v6117_v34, %v992_v38 }
 0xac8   :  { %v997_v42 = vsel %vm996_vm7, %v6117_v34, %v993_v40 }
 0xac9   :  { %v999_v43 = vmul.f32 %v997_v42, %v965_v13  ;;  %v5988_v13 = vld [vmem:[%s7687_s12 + $0x1] ss:$0 sm:$0xff] }
 0xacb   :  { %v1004_v44 = vmul.f32 %v5985_v25, %v999_v43  ;;  %v5989_v43 = vld [vmem:[%s7682_s7 + $0x1] ss:$0 sm:$0xff] }
 0xacd   :  { %v1009_v45 = vadd.f32 %v5986_v28, %v1004_v44 }
 0xacf   :  { %1030 = vperm.xlu1 %5870, %v1009_v45   ;;  %1019 = vperm.xlu2 %5868, %v1009_v45  }
 0xad7   :  { %5872 = vset.pattern.permute.xlu2 %v6404_v1  ;;  %5875 = vset.pattern.permute.xlu1 %v6404_v1 }
 0xad8   :  { %1043 = vperm.xlu2 %5872, %v1009_v45   ;;  %v1015_v52 = vpop.permute.xlu2 %1014 }
 0xad9   :  { %v1023_v55 = vmul.f32 %v1022_v51, %v1015_v52 }
 0xae0   :  { %5874 = vset.pattern.permute.xlu2 %v6406_v4 }
 0xaf0   :  { %v1027_v48 = vpop.permute.xlu0 %1026 }
 0xaf1   :  { %v1034_v53 = vmul.f32 %v1033_v50, %v1027_v48 }
 0xaf3   :  { %v1036_v57 = vadd.f32 %v1034_v53, %v1023_v55 }
 0xaf9   :  { %v1040_v56 = vpop.permute.xlu0 %1039 }
 0xafa   :  { %v1047_v58 = vmul.f32 %v1046_v54, %v1040_v56 }
 0xafc   :  { %v1049_v60 = vadd.f32 %v1047_v58, %v1036_v57 }
 0xafe   :  { %v1056_v61 = vadd.f32 %v5987_v59, %v1049_v60  ;;  %v5691_v60 = vld [vmem:[%s7676_s1 + $0x8] sm:$0x7] }
 0xb00   :  { %v1058_v33 = vmax.f32 %v1056_v61, 0.0  ;;  %v1184_v61 = vperm.slane %v5691_v60, 1 }
 0xb02   :  { %5686 = vmatmul.msk.f32.vlgmr.msra.gmra.mxu1 %vm512_vm9, %v1058_v33  ;;  %v1173_v33 = vperm.slane %v5691_v60, 0 }
 0xb29   :  { %v1020_v62 = vpop.permute.xlu2 %1019 }
 0xb2a   :  { %v1024_v6 = vmul.f32 %v1022_v51, %v1020_v62 }
 0xb32   :  { %v1044_v63 = vpop.permute.xlu2 %1043 }
 0xb33   :  { %v1048_v8 = vmul.f32 %v1046_v54, %v1044_v63  ;;  %v1197_v63 = vperm.slane %v5691_v60, 2 }
 0xb41   :  { %v1031_v5 = vpop.permute.xlu1 %1030 }
 0xb42   :  { %v1035_v7 = vmul.f32 %v1033_v50, %v1031_v5 }
 0xb44   :  { %v1037_v9 = vadd.f32 %v1035_v7, %v1024_v6 }
 0xb46   :  { %v1050_v10 = vadd.f32 %v1048_v8, %v1037_v9 }
 0xb48   :  { %v1057_v11 = vadd.f32 %v5987_v59, %v1050_v10  ;;  %v5991_v10 = vld [vmem:[%s7677_s2 + $0x2] ss:$0 sm:$0xff] }
 0xb4a   :  { %v1059_v12 = vmax.f32 %v1057_v11, 0.0 }
 0xb4c   :  { %5687 = vmatmul.msk.f32.vlgmr.msra.gmra.mxu3 %vm512_vm9, %v1059_v12 }
 0xb7f   :  { %v1088_v14 = vpop.f32.mrf.mxu1 }
 0xb80   :  { %v1099_v15 = vadd.f32 %v5988_v13, %v1088_v14 }
 0xb82   :  { %v1101_v21 = vadd.f32 %v1099_v15, %v6694_v30 }
 0xb84   :  { %v1107_v16 = vsel %vm398_vm1, %v1101_v21, 0.0 }
 0xb85   :  { %1108 = vadd.xlane.f32.xlu2 %v1107_v16 }
 0xbcf   :  { %v1091_v17 = vpop.f32.mrf.mxu3 }
 0xbd0   :  { %v1100_v18 = vadd.f32 %v5988_v13, %v1091_v17 }
 0xbd2   :  { %v1102_v19 = vadd.f32 %v1100_v18, %v1009_v45 }
 0xbd4   :  { %v1110_v20 = vsel %vm398_vm1, %v1102_v19, 0.0 }
 0xbd5   :  { %1111 = vadd.xlane.f32.xlu0 %v1110_v20 }
 0xbf8   :  { %v1109_v22 = vpop.xlane.xlu2 %1108 }
 0xbf9   :  { %v1113_v23 = vmul.f32 %v1109_v22, %v6566_v41 }
 0xbfb   :  { %v1115_v24 = vsub.f32 %v1101_v21, %v1113_v23 }
 0xbfd   :  { %v1117_v25 = vmul.f32 %v1115_v24, %v1115_v24 }
 0xbff   :  { %v1119_v26 = vsel %vm398_vm1, %v1117_v25, 0.0 }
 0xc00   :  { %1120 = vadd.xlane.f32.xlu1 %v1119_v26 }
 0xc48   :  { %v1112_v27 = vpop.xlane.xlu0 %1111 }
 0xc49   :  { %v1114_v28 = vmul.f32 %v1112_v27, %v6566_v41 }
 0xc4b   :  { %v1116_v29 = vsub.f32 %v1102_v19, %v1114_v28 }
 0xc4d   :  { %v1118_v30 = vmul.f32 %v1116_v29, %v1116_v29 }
 0xc4f   :  { %v1122_v0 = vsel %vm398_vm1, %v1118_v30, 0.0 }
 0xc50   :  { %1123 = vadd.xlane.f32.xlu2 %v1122_v0 }
 0xc73   :  { %v1121_v31 = vpop.xlane.xlu1 %1120 }
 0xc74   :  { %v1125_v32 = vmul.f32 %v1121_v31, %v6566_v41 }
 0xc76   :  { %v1127_v34 = vadd.f32 1e-05, %v1125_v32 }
 0xc78   :  { %6118 = vrsqrt.f32 %v1127_v34  ;;  %vm1135_vm10 = vweird.f32 %v1127_v34 }
 0xc7e   :  { %v6119_v35 = vpop.eup %6118 }
 0xc7f   :  { %v1130_v36 = vmul.f32 %v6119_v35, %v1127_v34  ;;  %vm1136_vm8 = vweird.f32 %v6119_v35 }
 0xc80   :  { %vm1137_vm11 = vmor %vm1135_vm10, %vm1136_vm8 }
 0xc81   :  { %v1131_v37 = vmul.f32 %v6119_v35, %v1130_v36 }
 0xc83   :  { %v1132_v38 = vmul.f32 0.5, %v1131_v37 }
 0xc85   :  { %v1133_v40 = vsub.f32 1.5, %v1132_v38 }
 0xc87   :  { %v1134_v42 = vmul.f32 %v6119_v35, %v1133_v40 }
 0xc89   :  { %v1138_v44 = vsel %vm1137_vm11, %v6119_v35, %v1134_v42 }
 0xc8a   :  { %v1149_v45 = vmul.f32 %v1138_v44, %v1115_v24 }
 0xc8c   :  { %v1154_v46 = vmul.f32 %v5989_v43, %v1149_v45 }
 0xc8e   :  { %v6742_v47 = vadd.f32 %v5990_v3, %v1154_v46 }
 0xc90   :  { %1190 = vperm.xlu1 %5875, %v6742_v47   ;;  %1177 = vperm.xlu2 %5874, %v6742_v47  }
 0xc91   :  { %1165 = vperm.xlu0 %5873, %v6742_v47  }
 0xc98   :  { %5877 = vset.pattern.permute.xlu1 %v6406_v4  ;;  %5876 = vset.pattern.permute.xlu2 %v6405_v2 }
 0xc99   :  { %5880 = vset.pattern.permute.xlu0 %v6406_v4 }
 0xcc3   :  { %v1124_v39 = vpop.xlane.xlu2 %1123 }
 0xcc4   :  { %v1126_v48 = vmul.f32 %v1124_v39, %v6566_v41 }
 0xcc6   :  { %v1128_v49 = vadd.f32 1e-05, %v1126_v48 }
 0xcc8   :  { %6120 = vrsqrt.f32 %v1128_v49  ;;  %vm1145_vm13 = vweird.f32 %v1128_v49 }
 0xcce   :  { %v6121_v50 = vpop.eup %6120 }
 0xccf   :  { %v1140_v51 = vmul.f32 %v6121_v50, %v1128_v49  ;;  %vm1146_vm12 = vweird.f32 %v6121_v50 }
 0xcd0   :  { %vm1147_vm14 = vmor %vm1145_vm13, %vm1146_vm12 }
 0xcd1   :  { %v1141_v52 = vmul.f32 %v6121_v50, %v1140_v51 }
 0xcd3   :  { %v1142_v53 = vmul.f32 0.5, %v1141_v52 }
 0xcd5   :  { %v1143_v54 = vsub.f32 1.5, %v1142_v53 }
 0xcd7   :  { %v1144_v55 = vmul.f32 %v6121_v50, %v1143_v54 }
 0xcd9   :  { %v1148_v56 = vsel %vm1147_vm14, %v6121_v50, %v1144_v55 }
 0xcda   :  { %v1150_v57 = vmul.f32 %v1148_v56, %v1116_v29 }
 0xcdc   :  { %v1155_v58 = vmul.f32 %v5989_v43, %v1150_v57 }
 0xcde   :  { %v6751_v59 = vadd.f32 %v5990_v3, %v1155_v58 }
 0xce0   :  { %1181 = vperm.xlu1 %5877, %v6751_v59   ;;  %1170 = vperm.xlu2 %5876, %v6751_v59  }
 0xce8   :  { %5878 = vset.pattern.permute.xlu2 %v6404_v1  ;;  %5881 = vset.pattern.permute.xlu1 %v6404_v1 }
 0xce9   :  { %1194 = vperm.xlu2 %5878, %v6751_v59  }
 0xcea   :  { %v1178_v62 = vpop.permute.xlu2 %1177 }
 0xceb   :  { %v1185_v7 = vmul.f32 %v1184_v61, %v1178_v62 }
 0xcf1   :  { %5879 = vset.pattern.permute.xlu2 %v6405_v2 }
 0xd02   :  { %v1191_v5 = vpop.permute.xlu1 %1190 }
 0xd03   :  { %v1166_v6 = vpop.permute.xlu0 %1165  ;;  %v1198_v9 = vmul.f32 %v1197_v63, %v1191_v5 }
 0xd04   :  { %v1174_v8 = vmul.f32 %v1173_v33, %v1166_v6 }
 0xd06   :  { %v1187_v11 = vadd.f32 %v1185_v7, %v1174_v8 }
 0xd08   :  { %v1200_v12 = vadd.f32 %v1198_v9, %v1187_v11 }
 0xd0a   :  { %v1207_v13 = vadd.f32 %v5991_v10, %v1200_v12 }
 0xd0c   :  { %1457 = vperm.xlu1 %5881, %v1207_v13   ;;  %1356 = vperm.xlu2 %5879, %v1207_v13  }
 0xd0d   :  { %1211 = vrot.lane.b32.xlu0 %v1207_v13, %s6407_s25 }
 0xd14   :  { %1281 = vrot.lane.b32.xlu2 %v1207_v13, %s6408_s26  ;;  %5882 = vset.pattern.permute.xlu1 %v6406_v4 }
 0xd15   :  { %1408 = vperm.xlu0 %5880, %v1207_v13  }
 0xd3a   :  { %v1171_v14 = vpop.permute.xlu2 %1170 }
 0xd3b   :  { %v1175_v16 = vmul.f32 %v1173_v33, %v1171_v14 }
 0xd43   :  { %v1195_v15 = vpop.permute.xlu2 %1194 }
 0xd44   :  { %v1199_v18 = vmul.f32 %v1197_v63, %v1195_v15 }
 0xd52   :  { %v1182_v21 = vpop.permute.xlu1 %1181 }
 0xd53   :  { %v1186_v17 = vmul.f32 %v1184_v61, %v1182_v21 }
 0xd55   :  { %v1188_v19 = vadd.f32 %v1186_v17, %v1175_v16 }
 0xd57   :  { %v1201_v20 = vadd.f32 %v1199_v18, %v1188_v19 }
 0xd59   :  { %v1208_v22 = vadd.f32 %v5991_v10, %v1201_v20 }
 0xd5b   :  { %1213 = vrot.lane.b32.xlu1 %v1208_v22, %s6407_s25  ;;  %1360 = vperm.xlu2 %5879, %v1208_v22  }
 0xd63   :  { %1412 = vperm.xlu1 %5882, %v1208_v22  }
 0xd66   :  { %v1357_v23 = vpop.permute.xlu2 %1356 }
 0xd6e   :  { %v1282_v25 = vpop.permute.xlu2 %1281 }
 0xd7e   :  { %v1458_v26 = vpop.permute.xlu1 %1457 }
 0xd7f   :  { %v1212_v24 = vpop.permute.xlu0 %1211 }
 0xd80   :  { %1217 = vxpose.xlu0.b32.start.end [1/1] (short) (narrow) %v1212_v24, 8 }
 0xd81   :  { %1287 = vxpose.xlu2.b32.start.end [1/1] (short) (narrow) %v1282_v25, 8 }
 0xd87   :  { %v1409_v28 = vpop.permute.xlu0 %1408 }
 0xdb5   :  { %v1361_v42 = vpop.permute.xlu2 %1360 }
 0xdcd   :  { %v1214_v27 = vpop.permute.xlu1 %1213 }
 0xdce   :  { %1249 = vxpose.xlu1.b32.start.end [1/1] (short) (narrow) %v1214_v27, 8 }
 0xdd5   :  { %v1413_v40 = vpop.permute.xlu1 %1412 }
 0xde3   :  { %5883 = vset.pattern.permute.xlu2 %v6404_v1 }
 0xde7   :  { %5884 = vset.pattern.permute.xlu0 %v6405_v2 }
 0xdea   :  { %1461 = vperm.xlu2 %5883, %v1208_v22  }
 0xe1a   :  { %v1303_v39 = vpop.trf.xlu2 }
 0xe1b   :  { %v1486_v6 = vperm.slane %v1303_v39, 2  ;;  %v1385_v13 = vperm.slane %v1303_v39, 0  ;;  %v1437_v21 = vperm.slane %v1303_v39, 1 }
 0xe24   :  { %v1233_v29 = vpop.trf.xlu0 }
 0xe25   :  { %v1415_v30 = vperm.slane %v1233_v29, 1  ;;  %v1363_v0 = vperm.slane %v1233_v29, 0  ;;  %v1464_v36 = vperm.slane %v1233_v29, 2 }
 0xe27   :  { %v1417_v31 = vmul.f32 %v1415_v30, %v1409_v28  ;;  %v1365_v32 = vmul.f32 %v1363_v0, %v1357_v23  ;;  %v1466_v37 = vmul.f32 %v1464_v36, %v1458_v26 }
 0xe28   :  { %1283 = vrot.lane.b32.xlu1 %v1208_v22, %s6408_s26 }
 0xe29   :  { %v1419_v34 = vsel %vm255_vm0, %v1417_v31, -inf  ;;  %v1367_v35 = vsel %vm255_vm0, %v1365_v32, -inf  ;;  %v1468_v38 = vsel %vm255_vm0, %v1466_v37, -inf }
 0xe2a   :  { %1420 = vmax.xlane.f32.xlu0 %v1419_v34  ;;  %1368 = vmax.xlane.f32.xlu2 %v1367_v35 }
 0xe32   :  { %1469 = vmax.xlane.f32.xlu2 %v1468_v38 }
 0xe44   :  { %v1462_v51 = vpop.permute.xlu2 %1461 }
 0xe72   :  { %v1265_v43 = vpop.trf.xlu1 }
 0xe73   :  { %v1364_v44 = vperm.slane %v1265_v43, 0  ;;  %v1416_v46 = vperm.slane %v1265_v43, 1  ;;  %v1465_v50 = vperm.slane %v1265_v43, 2 }
 0xe75   :  { %v1366_v45 = vmul.f32 %v1364_v44, %v1361_v42  ;;  %v1418_v48 = vmul.f32 %v1416_v46, %v1413_v40  ;;  %v1467_v52 = vmul.f32 %v1465_v50, %v1462_v51  ;;  %v5693_v51 = vld [vmem:[%s7678_s3 + $0x8] sm:$0x7] }
 0xe77   :  { %v1370_v3 = vsel %vm255_vm0, %v1366_v45, -inf  ;;  %v1422_v49 = vsel %vm255_vm0, %v1418_v48, -inf  ;;  %v1471_v53 = vsel %vm255_vm0, %v1467_v52, -inf }
 0xe78   :  { %1371 = vmax.xlane.f32.xlu2 %v1370_v3 }
 0xe80   :  { %1423 = vmax.xlane.f32.xlu2 %v1422_v49 }
 0xe88   :  { %1472 = vmax.xlane.f32.xlu2 %v1471_v53 }
 0xe9a   :  { %v1284_v8 = vpop.permute.xlu1 %1283 }
 0xe9d   :  { %v1421_v54 = vpop.xlane.xlu0 %1420  ;;  %v1369_v55 = vpop.xlane.xlu2 %1368 }
 0xe9e   :  { %v1425_v56 = vsub.f32 %v1417_v31, %v1421_v54  ;;  %v1373_v58 = vsub.f32 %v1365_v32, %v1369_v55  ;;  %v1399_v54 = vperm.slane %v5693_v51, 0 }
 0xea0   :  { %v1427_v57 = vmul.f32 1.442695, %v1425_v56  ;;  %v1375_v62 = vmul.f32 1.442695, %v1373_v58  ;;  %v1451_v56 = vperm.slane %v5693_v51, 1 }
 0xea2   :  { %6122 = vpow2.f32 %v1427_v57 }
 0xea5   :  { %v1470_v60 = vpop.xlane.xlu2 %1469 }
 0xea6   :  { %v1474_v61 = vsub.f32 %v1466_v37, %v1470_v60  ;;  %v5992_v60 = vld [vmem:[%s7679_s4 + $0x2] ss:$0 sm:$0xff] }
 0xea8   :  { %v6123_v33 = vpop.eup %6122  ;;  %v1476_v63 = vmul.f32 1.442695, %v1474_v61 }
 0xea9   :  { %v1431_v5 = vsel %vm255_vm0, %v6123_v33, 0.0  ;;  %v1439_v16 = vmul.f32 %v6123_v33, %v1437_v21  ;;  %v1500_v33 = vperm.slane %v5693_v51, 2 }
 0xeaa   :  { %6124 = vpow2.f32 %v1476_v63  ;;  %1432 = vadd.xlane.f32.xlu1 %v1431_v5 }
 0xeab   :  { %6126 = vpow2.f32 %v1375_v62  ;;  %v1441_v17 = vsel %vm255_vm0, %v1439_v16, 0.0 }
 0xeb0   :  { %v6125_v7 = vpop.eup %6124 }
 0xeb1   :  { %v1480_v9 = vsel %vm255_vm0, %v6125_v7, 0.0  ;;  %1319 = vxpose.xlu2.b32.start.end [1/1] (short) (narrow) %v1284_v8, 8  ;;  %v1488_v10 = vmul.f32 %v6125_v7, %v1486_v6  ;;  %v6127_v11 = vpop.eup %6126 }
 0xeb2   :  { %1481 = vadd.xlane.f32.xlu0 %v1480_v9  ;;  %v1387_v14 = vmul.f32 %v6127_v11, %v1385_v13  ;;  %v1379_v34 = vsel %vm255_vm0, %v6127_v11, 0.0 }
 0xeb3   :  { %v1490_v12 = vsel %vm255_vm0, %v1488_v10, 0.0 }
 0xeb4   :  { %1491 = vadd.xlane.f32.xlu1 %v1490_v12  ;;  %v1389_v15 = vsel %vm255_vm0, %v1387_v14, 0.0 }
 0xeba   :  { %1390 = vadd.xlane.f32.xlu0 %v1389_v15 }
 0xec2   :  { %1442 = vadd.xlane.f32.xlu0 %v1441_v17 }
 0xeeb   :  { %v1372_v18 = vpop.xlane.xlu2 %1371 }
 0xeec   :  { %v1374_v19 = vsub.f32 %v1366_v45, %v1372_v18 }
 0xeee   :  { %v1377_v20 = vmul.f32 1.442695, %v1374_v19 }
 0xef0   :  { %6128 = vpow2.f32 %v1377_v20 }
 0xef3   :  { %v1424_v22 = vpop.xlane.xlu2 %1423 }
 0xef4   :  { %v1426_v23 = vsub.f32 %v1418_v48, %v1424_v22 }
 0xef6   :  { %v6129_v24 = vpop.eup %6128  ;;  %v1429_v25 = vmul.f32 1.442695, %v1426_v23 }
 0xef7   :  { %v1382_v26 = vsel %vm255_vm0, %v6129_v24, 0.0 }
 0xef8   :  { %6130 = vpow2.f32 %v1429_v25  ;;  %1383 = vadd.xlane.f32.xlu0 %v1382_v26 }
 0xefb   :  { %v1473_v27 = vpop.xlane.xlu2 %1472 }
 0xefc   :  { %v1475_v28 = vsub.f32 %v1467_v52, %v1473_v27 }
 0xefe   :  { %v6131_v29 = vpop.eup %6130  ;;  %v1478_v30 = vmul.f32 1.442695, %v1475_v28 }
 0xeff   :  { %v1434_v0 = vsel %vm255_vm0, %v6131_v29, 0.0 }
 0xf00   :  { %6132 = vpow2.f32 %v1478_v30  ;;  %1435 = vadd.xlane.f32.xlu0 %v1434_v0 }
 0xf06   :  { %v6133_v31 = vpop.eup %6132 }
 0xf07   :  { %v1483_v32 = vsel %vm255_vm0, %v6133_v31, 0.0 }
 0xf08   :  { %1484 = vadd.xlane.f32.xlu0 %v1483_v32 }
 0xf1d   :  { %v1433_v48 = vpop.xlane.xlu1 %1432 }
 0xf1e   :  { %6134 = vrcp.f32 %v1433_v48 }
 0xf22   :  { %1380 = vadd.xlane.f32.xlu2 %v1379_v34 }
 0xf24   :  { %v6135_v50 = vpop.eup %6134 }
 0xf25   :  { %v1482_v46 = vpop.xlane.xlu0 %1481 }
 0xf26   :  { %6136 = vrcp.f32 %v1482_v46 }
 0xf27   :  { %v1492_v61 = vpop.xlane.xlu1 %1491 }
 0xf2c   :  { %v6137_v53 = vpop.eup %6136 }
 0xf2d   :  { %v1391_v39 = vpop.xlane.xlu0 %1390  ;;  %v1498_v62 = vmul.f32 %v6137_v53, %v1492_v61  ;;  %v5994_v53 = vld [vmem:[%s7681_s6 + $0x2] ss:$0 sm:$0xff] }
 0xf2f   :  { %v1501_v7 = vmul.f32 %v1500_v33, %v1498_v62 }
 0xf35   :  { %v1443_v52 = vpop.xlane.xlu0 %1442 }
 0xf36   :  { %v1449_v57 = vmul.f32 %v6135_v50, %v1443_v52  ;;  %v5993_v50 = vld [vmem:[%s7680_s5 + $0x2] ss:$0 sm:$0xff] }
 0xf38   :  { %v1452_v5 = vmul.f32 %v1451_v56, %v1449_v57 }
 0xf4a   :  { %v1335_v35 = vpop.trf.xlu2 }
 0xf4b   :  { %v1438_v36 = vperm.slane %v1335_v35, 1  ;;  %v1386_v37 = vperm.slane %v1335_v35, 0  ;;  %v1487_v44 = vperm.slane %v1335_v35, 2 }
 0xf4d   :  { %v1440_v38 = vmul.f32 %v6131_v29, %v1438_v36  ;;  %v1388_v40 = vmul.f32 %v6129_v24, %v1386_v37  ;;  %v1489_v45 = vmul.f32 %v6133_v31, %v1487_v44 }
 0xf4f   :  { %v1444_v42 = vsel %vm255_vm0, %v1440_v38, 0.0  ;;  %v1392_v43 = vsel %vm255_vm0, %v1388_v40, 0.0  ;;  %v1493_v3 = vsel %vm255_vm0, %v1489_v45, 0.0 }
 0xf50   :  { %1445 = vadd.xlane.f32.xlu0 %v1444_v42  ;;  %1393 = vadd.xlane.f32.xlu1 %v1392_v43 }
 0xf58   :  { %1494 = vadd.xlane.f32.xlu1 %v1493_v3 }
 0xf6b   :  { %v1384_v11 = vpop.xlane.xlu0 %1383 }
 0xf73   :  { %v1436_v13 = vpop.xlane.xlu0 %1435 }
 0xf7b   :  { %v1485_v14 = vpop.xlane.xlu0 %1484 }
 0xf95   :  { %v1381_v49 = vpop.xlane.xlu2 %1380 }
 0xf96   :  { %6138 = vrcp.f32 %v1381_v49 }
 0xf97   :  { %6140 = vrcp.f32 %v1384_v11  ;;  %v5701_v11 = vld [vmem:[%s7686_s11 + $0x50] sm:$0xff] }
 0xf98   :  { %6142 = vrcp.f32 %v1436_v13  ;;  %v5699_v13 = vld [vmem:[%s7686_s11 + $0x40] sm:$0xff] }
 0xf99   :  { %6144 = vrcp.f32 %v1485_v14  ;;  %v5697_v14 = vld [vmem:[%s7684_s9 + $0x8] sm:$0x7] }
 0xf9c   :  { %v6139_v55 = vpop.eup %6138 }
 0xf9d   :  { %v1397_v58 = vmul.f32 %v6139_v55, %v1391_v39  ;;  %v6141_v15 = vpop.eup %6140 }
 0xf9e   :  { %v6143_v19 = vpop.eup %6142 }
 0xf9f   :  { %v1400_v63 = vmul.f32 %v1399_v54, %v1397_v58  ;;  %v6145_v23 = vpop.eup %6144 }
 0xfa1   :  { %v1405_v6 = vadd.f32 %v5992_v60, %v1400_v63 }
 0xfa3   :  { %v1454_v8 = vadd.f32 %v1452_v5, %v1405_v6 }
 0xfa5   :  { %v1503_v9 = vadd.f32 %v1501_v7, %v1454_v8 }
 0xfa7   :  { %v1505_v10 = vadd.f32 %v1503_v9, %v6742_v47 }
 0xfa9   :  { %v1511_v12 = vsel %vm398_vm1, %v1505_v10, 0.0 }
 0xfaa   :  { %1512 = vadd.xlane.f32.xlu0 %v1511_v12  ;;  %v5700_v12 = vld [vmem:[%s7686_s11 + $0x48] sm:$0xff] }
 0xfc3   :  { %v1394_v21 = vpop.xlane.xlu1 %1393  ;;  %v1446_v17 = vpop.xlane.xlu0 %1445 }
 0xfc4   :  { %v1398_v16 = vmul.f32 %v6141_v15, %v1394_v21  ;;  %v1450_v20 = vmul.f32 %v6143_v19, %v1446_v17  ;;  %v1588_v15 = vperm.slane %v5697_v14, 1  ;;  %v1577_v21 = vperm.slane %v5697_v14, 0 }
 0xfc6   :  { %v1401_v18 = vmul.f32 %v1399_v54, %v1398_v16  ;;  %v1453_v47 = vmul.f32 %v1451_v56, %v1450_v20  ;;  %v1601_v16 = vperm.slane %v5697_v14, 2 }
 0xfc8   :  { %v1406_v22 = vadd.f32 %v5992_v60, %v1401_v18 }
 0xfca   :  { %v1455_v27 = vadd.f32 %v1453_v47, %v1406_v22 }
 0xfcb   :  { %v1495_v24 = vpop.xlane.xlu1 %1494 }
 0xfcc   :  { %v1499_v25 = vmul.f32 %v6145_v23, %v1495_v24  ;;  %v5995_v24 = vld [vmem:[%s7685_s10 + $0x2] ss:$0 sm:$0xff] }
 0xfce   :  { %v1502_v26 = vmul.f32 %v1500_v33, %v1499_v25 }
 0xfd0   :  { %v1504_v28 = vadd.f32 %v1502_v26, %v1455_v27 }
 0xfd2   :  { %v1506_v29 = vadd.f32 %v1504_v28, %v6751_v59 }
 0xfd4   :  { %v1514_v30 = vsel %vm398_vm1, %v1506_v29, 0.0 }
 0xfd5   :  { %1515 = vadd.xlane.f32.xlu1 %v1514_v30 }
0x101d   :  { %v1513_v0 = vpop.xlane.xlu0 %1512 }
0x101e   :  { %v1517_v31 = vmul.f32 %v1513_v0, %v6566_v41 }
0x1020   :  { %v1519_v32 = vsub.f32 %v1505_v10, %v1517_v31  ;;  %v5702_v10 = vld [vmem:[%s7686_s11 + $0x58] sm:$0xff] }
0x1021   :  { %1638 = vmatpush.msrb.mxu2 %v5702_v10  ;;  %v5998_v10 = vld [vmem:[%s7683_s8 + $0x2] ss:$0 sm:$0xff] }
0x1022   :  { %v1521_v34 = vmul.f32 %v1519_v32, %v1519_v32 }
0x1023   :  { %1639 = vmatpush.msrb.mxu2 %v5701_v11 }
0x1024   :  { %v1523_v35 = vsel %vm398_vm1, %v1521_v34, 0.0 }
0x1025   :  { %1524 = vadd.xlane.f32.xlu0 %v1523_v35  ;;  %1640 = vmatpush.msrb.mxu2 %v5700_v12 }
0x1027   :  { %1641 = vmatpush.msrb.mxu2 %v5699_v13 }
0x1048   :  { %v1516_v36 = vpop.xlane.xlu1 %1515 }
0x1049   :  { %v1518_v37 = vmul.f32 %v1516_v36, %v6566_v41 }
0x104b   :  { %v1520_v38 = vsub.f32 %v1506_v29, %v1518_v37 }
0x104d   :  { %v1522_v40 = vmul.f32 %v1520_v38, %v1520_v38 }
0x104f   :  { %v1526_v42 = vsel %vm398_vm1, %v1522_v40, 0.0 }
0x1050   :  { %1527 = vadd.xlane.f32.xlu1 %v1526_v42 }
0x1098   :  { %v1525_v59 = vpop.xlane.xlu0 %1524 }
0x1099   :  { %v1529_v43 = vmul.f32 %v1525_v59, %v6566_v41 }
0x109b   :  { %v1531_v44 = vadd.f32 1e-05, %v1529_v43 }
0x109d   :  { %6146 = vrsqrt.f32 %v1531_v44  ;;  %vm1539_vm2 = vweird.f32 %v1531_v44 }
0x10a3   :  { %v6147_v45 = vpop.eup %6146 }
0x10a4   :  { %v1534_v3 = vmul.f32 %v6147_v45, %v1531_v44  ;;  %vm1540_vm15 = vweird.f32 %v6147_v45 }
0x10a5   :  { %vm1541_vm3 = vmor %vm1539_vm2, %vm1540_vm15 }
0x10a6   :  { %v1535_v46 = vmul.f32 %v6147_v45, %v1534_v3 }
0x10a8   :  { %v1536_v39 = vmul.f32 0.5, %v1535_v46 }
0x10aa   :  { %v1537_v48 = vsub.f32 1.5, %v1536_v39 }
0x10ac   :  { %v1538_v49 = vmul.f32 %v6147_v45, %v1537_v48 }
0x10ae   :  { %v1542_v51 = vsel %vm1541_vm3, %v6147_v45, %v1538_v49 }
0x10af   :  { %v1553_v52 = vmul.f32 %v1542_v51, %v1519_v32 }
0x10b1   :  { %v1558_v54 = vmul.f32 %v5993_v50, %v1553_v52 }
0x10b3   :  { %v6811_v55 = vadd.f32 %v5994_v53, %v1558_v54 }
0x10b5   :  { %1594 = vperm.xlu2 %5883, %v6811_v55   ;;  %1581 = vperm.xlu1 %5882, %v6811_v55  }
0x10b6   :  { %1569 = vperm.xlu0 %5884, %v6811_v55  }
0x10bd   :  { %5885 = vset.pattern.permute.xlu1 %v6405_v2  ;;  %5888 = vset.pattern.permute.xlu2 %v6405_v2 }
0x10be   :  { %5886 = vset.pattern.permute.xlu0 %v6406_v4 }
0x10c3   :  { %v1528_v56 = vpop.xlane.xlu1 %1527 }
0x10c4   :  { %v1530_v57 = vmul.f32 %v1528_v56, %v6566_v41 }
0x10c6   :  { %v1532_v58 = vadd.f32 1e-05, %v1530_v57 }
0x10c8   :  { %6148 = vrsqrt.f32 %v1532_v58  ;;  %vm1549_vm5 = vweird.f32 %v1532_v58 }
0x10ce   :  { %v6149_v60 = vpop.eup %6148 }
0x10cf   :  { %v1544_v61 = vmul.f32 %v6149_v60, %v1532_v58  ;;  %vm1550_vm4 = vweird.f32 %v6149_v60 }
0x10d0   :  { %vm1551_vm6 = vmor %vm1549_vm5, %vm1550_vm4 }
0x10d1   :  { %v1545_v33 = vmul.f32 %v6149_v60, %v1544_v61 }
0x10d3   :  { %v1546_v62 = vmul.f32 0.5, %v1545_v33 }
0x10d5   :  { %v1547_v63 = vsub.f32 1.5, %v1546_v62 }
0x10d7   :  { %v1548_v5 = vmul.f32 %v6149_v60, %v1547_v63 }
0x10d9   :  { %v1552_v6 = vsel %vm1551_vm6, %v6149_v60, %v1548_v5 }
0x10da   :  { %v1554_v7 = vmul.f32 %v1552_v6, %v1520_v38  ;;  %v5996_v38 = vld [vmem:[%s7687_s12 + $0x2] ss:$0 sm:$0xff] }
0x10dc   :  { %v1559_v8 = vmul.f32 %v5993_v50, %v1554_v7  ;;  %v5997_v7 = vld [vmem:[%s7682_s7 + $0x2] ss:$0 sm:$0xff] }
0x10de   :  { %v1564_v9 = vadd.f32 %v5994_v53, %v1559_v8 }
0x10e0   :  { %1574 = vperm.xlu1 %5885, %v1564_v9   ;;  %1585 = vperm.xlu0 %5886, %v1564_v9  }
0x10e8   :  { %5887 = vset.pattern.permute.xlu1 %v6404_v1 }
0x10e9   :  { %1598 = vperm.xlu1 %5887, %v1564_v9  }
0x110f   :  { %v1595_v18 = vpop.permute.xlu2 %1594 }
0x1110   :  { %v1602_v23 = vmul.f32 %v1601_v16, %v1595_v18 }
0x1127   :  { %v1582_v17 = vpop.permute.xlu1 %1581 }
0x1128   :  { %v1589_v19 = vmul.f32 %v1588_v15, %v1582_v17  ;;  %v1570_v20 = vpop.permute.xlu0 %1569 }
0x1129   :  { %v1578_v22 = vmul.f32 %v1577_v21, %v1570_v20 }
0x112b   :  { %v1591_v47 = vadd.f32 %v1589_v19, %v1578_v22 }
0x112d   :  { %v1604_v25 = vadd.f32 %v1602_v23, %v1591_v47 }
0x112f   :  { %v1611_v26 = vadd.f32 %v5995_v24, %v1604_v25  ;;  %v5708_v25 = vld [vmem:[%s7676_s1 + $0xc] sm:$0x7] }
0x1131   :  { %v1613_v27 = vmax.f32 %v1611_v26, 0.0  ;;  %v1728_v26 = vperm.slane %v5708_v25, 0 }
0x1133   :  { %5703 = vmatmul.msk.f32.vlgmr.msrb.gmra.mxu2 %vm512_vm9, %v1613_v27  ;;  %v1739_v27 = vperm.slane %v5708_v25, 1 }
0x1152   :  { %v1575_v28 = vpop.permute.xlu1 %1574  ;;  %v1586_v29 = vpop.permute.xlu0 %1585 }
0x1153   :  { %v1579_v30 = vmul.f32 %v1577_v21, %v1575_v28  ;;  %v1590_v0 = vmul.f32 %v1588_v15, %v1586_v29  ;;  %v1752_v29 = vperm.slane %v5708_v25, 2 }
0x1155   :  { %v1592_v32 = vadd.f32 %v1590_v0, %v1579_v30 }
0x115b   :  { %v1599_v31 = vpop.permute.xlu1 %1598 }
0x115c   :  { %v1603_v34 = vmul.f32 %v1601_v16, %v1599_v31 }
0x115e   :  { %v1605_v35 = vadd.f32 %v1603_v34, %v1592_v32 }
0x1160   :  { %v1612_v36 = vadd.f32 %v5995_v24, %v1605_v35  ;;  %v5999_v35 = vld [vmem:[%s7677_s2 + $0x3] ss:$0 sm:$0xff] }
0x1162   :  { %v1614_v37 = vmax.f32 %v1612_v36, 0.0 }
0x1164   :  { %5704 = vmatmul.msk.f32.gmra.mxu2 %vm512_vm9, %v1614_v37 }
0x11b6   :  { %v1643_v40 = vpop.f32.mrf.mxu2 }
0x11b7   :  { %v1654_v42 = vadd.f32 %v5996_v38, %v1643_v40 }
0x11b9   :  { %v1656_v59 = vadd.f32 %v1654_v42, %v6811_v55 }
0x11bb   :  { %v1662_v43 = vsel %vm398_vm1, %v1656_v59, 0.0 }
0x11bc   :  { %1663 = vadd.xlane.f32.xlu1 %v1662_v43 }
0x11e7   :  { %v1646_v44 = vpop.f32.mrf.mxu2 }
0x11e8   :  { %v1655_v45 = vadd.f32 %v5996_v38, %v1646_v44 }
0x11ea   :  { %v1657_v3 = vadd.f32 %v1655_v45, %v1564_v9 }
0x11ec   :  { %v1665_v46 = vsel %vm398_vm1, %v1657_v3, 0.0 }
0x11ed   :  { %1666 = vadd.xlane.f32.xlu2 %v1665_v46 }
0x122f   :  { %v1664_v39 = vpop.xlane.xlu1 %1663 }
0x1230   :  { %v1668_v48 = vmul.f32 %v1664_v39, %v6566_v41 }
0x1232   :  { %v1670_v49 = vsub.f32 %v1656_v59, %v1668_v48 }
0x1234   :  { %v1672_v50 = vmul.f32 %v1670_v49, %v1670_v49 }
0x1236   :  { %v1674_v51 = vsel %vm398_vm1, %v1672_v50, 0.0 }
0x1237   :  { %1675 = vadd.xlane.f32.xlu0 %v1674_v51 }
0x1260   :  { %v1667_v52 = vpop.xlane.xlu2 %1666 }
0x1261   :  { %v1669_v53 = vmul.f32 %v1667_v52, %v6566_v41 }
0x1263   :  { %v1671_v54 = vsub.f32 %v1657_v3, %v1669_v53 }
0x1265   :  { %v1673_v55 = vmul.f32 %v1671_v54, %v1671_v54 }
0x1267   :  { %v1677_v56 = vsel %vm398_vm1, %v1673_v55, 0.0 }
0x1268   :  { %1678 = vadd.xlane.f32.xlu1 %v1677_v56 }
0x12aa   :  { %v1676_v57 = vpop.xlane.xlu0 %1675 }
0x12ab   :  { %v1680_v58 = vmul.f32 %v1676_v57, %v6566_v41 }
0x12ad   :  { %v1682_v60 = vadd.f32 1e-05, %v1680_v58 }
0x12af   :  { %6150 = vrsqrt.f32 %v1682_v60  ;;  %vm1690_vm8 = vweird.f32 %v1682_v60 }
0x12b5   :  { %v6151_v61 = vpop.eup %6150 }
0x12b6   :  { %v1685_v33 = vmul.f32 %v6151_v61, %v1682_v60  ;;  %vm1691_vm7 = vweird.f32 %v6151_v61 }
0x12b7   :  { %vm1692_vm10 = vmor %vm1690_vm8, %vm1691_vm7 }
0x12b8   :  { %v1686_v62 = vmul.f32 %v6151_v61, %v1685_v33 }
0x12ba   :  { %v1687_v63 = vmul.f32 0.5, %v1686_v62 }
0x12bc   :  { %v1688_v5 = vsub.f32 1.5, %v1687_v63 }
0x12be   :  { %v1689_v6 = vmul.f32 %v6151_v61, %v1688_v5 }
0x12c0   :  { %v1693_v8 = vsel %vm1692_vm10, %v6151_v61, %v1689_v6 }
0x12c1   :  { %v1704_v9 = vmul.f32 %v1693_v8, %v1670_v49 }
0x12c3   :  { %v1709_v11 = vmul.f32 %v5997_v7, %v1704_v9 }
0x12c5   :  { %v6858_v12 = vadd.f32 %v5998_v10, %v1709_v11 }
0x12c7   :  { %1745 = vperm.xlu1 %5887, %v6858_v12   ;;  %1732 = vperm.xlu0 %5886, %v6858_v12  }
0x12c8   :  { %1720 = vperm.xlu2 %5888, %v6858_v12  }
0x12db   :  { %v1679_v13 = vpop.xlane.xlu1 %1678 }
0x12dc   :  { %v1681_v14 = vmul.f32 %v1679_v13, %v6566_v41 }
0x12de   :  { %v1683_v15 = vadd.f32 1e-05, %v1681_v14 }
0x12e0   :  { %6152 = vrsqrt.f32 %v1683_v15  ;;  %vm1700_vm12 = vweird.f32 %v1683_v15 }
0x12e6   :  { %v6153_v21 = vpop.eup %6152 }
0x12e7   :  { %v1695_v16 = vmul.f32 %v6153_v21, %v1683_v15  ;;  %vm1701_vm11 = vweird.f32 %v6153_v21 }
0x12e8   :  { %vm1702_vm13 = vmor %vm1700_vm12, %vm1701_vm11 }
0x12e9   :  { %v1696_v17 = vmul.f32 %v6153_v21, %v1695_v16 }
0x12eb   :  { %v1697_v18 = vmul.f32 0.5, %v1696_v17 }
0x12ed   :  { %v1698_v19 = vsub.f32 1.5, %v1697_v18 }
0x12ef   :  { %v1699_v20 = vmul.f32 %v6153_v21, %v1698_v19 }
0x12f1   :  { %v1703_v22 = vsel %vm1702_vm13, %v6153_v21, %v1699_v20 }
0x12f2   :  { %v1705_v23 = vmul.f32 %v1703_v22, %v1671_v54 }
0x12f4   :  { %v1710_v24 = vmul.f32 %v5997_v7, %v1705_v23 }
0x12f6   :  { %v6864_v47 = vadd.f32 %v5998_v10, %v1710_v24 }
0x12f8   :  { %1749 = vperm.xlu1 %5887, %v6864_v47   ;;  %1736 = vperm.xlu0 %5886, %v6864_v47  }
0x12f9   :  { %1725 = vperm.xlu2 %5888, %v6864_v47  }
0x1300   :  { %5889 = vset.pattern.permute.xlu1 %v6405_v2  ;;  %5891 = vset.pattern.permute.xlu0 %v6404_v1 }
0x1301   :  { %5890 = vset.pattern.permute.xlu2 %v6406_v4 }
0x1322   :  { %v1721_v28 = vpop.permute.xlu2 %1720 }
0x1323   :  { %v1729_v31 = vmul.f32 %v1728_v26, %v1721_v28 }
0x1339   :  { %v1746_v30 = vpop.permute.xlu1 %1745  ;;  %v1733_v0 = vpop.permute.xlu0 %1732 }
0x133a   :  { %v1740_v32 = vmul.f32 %v1739_v27, %v1733_v0  ;;  %v1753_v34 = vmul.f32 %v1752_v29, %v1746_v30 }
0x133c   :  { %v1742_v36 = vadd.f32 %v1740_v32, %v1729_v31 }
0x133e   :  { %v1755_v37 = vadd.f32 %v1753_v34, %v1742_v36 }
0x1340   :  { %v1762_v38 = vadd.f32 %v5999_v35, %v1755_v37 }
0x1342   :  { %2012 = vperm.xlu0 %5891, %v1762_v38   ;;  %1911 = vperm.xlu1 %5889, %v1762_v38  }
0x1343   :  { %1766 = vrot.lane.b32.xlu2 %v1762_v38, %s6407_s25 }
0x134a   :  { %1836 = vrot.lane.b32.xlu1 %v1762_v38, %s6408_s26 }
0x134b   :  { %1963 = vperm.xlu2 %5890, %v1762_v38  }
0x1353   :  { %v1726_v40 = vpop.permute.xlu2 %1725 }
0x1354   :  { %v1730_v43 = vmul.f32 %v1728_v26, %v1726_v40 }
0x136a   :  { %v1750_v42 = vpop.permute.xlu1 %1749  ;;  %v1737_v59 = vpop.permute.xlu0 %1736 }
0x136b   :  { %v1741_v44 = vmul.f32 %v1739_v27, %v1737_v59  ;;  %v1754_v45 = vmul.f32 %v1752_v29, %v1750_v42 }
0x136d   :  { %v1743_v3 = vadd.f32 %v1741_v44, %v1730_v43 }
0x136f   :  { %v1756_v46 = vadd.f32 %v1754_v45, %v1743_v3 }
0x1371   :  { %v1763_v39 = vadd.f32 %v5999_v35, %v1756_v46 }
0x1373   :  { %1967 = vperm.xlu2 %5890, %v1763_v39   ;;  %1915 = vperm.xlu1 %5889, %v1763_v39  }
0x1374   :  { %1768 = vrot.lane.b32.xlu0 %v1763_v39, %s6407_s25 }
0x137b   :  { %5892 = vset.pattern.permute.xlu1 %v6404_v1 }
0x137c   :  { %2016 = vperm.xlu1 %5892, %v1763_v39  }
0x1384   :  { %1838 = vrot.lane.b32.xlu1 %v1763_v39, %s6408_s26 }
0x139d   :  { %v1767_v48 = vpop.permute.xlu2 %1766 }
0x139e   :  { %1772 = vxpose.xlu2.b32.start.end [1/1] (short) (narrow) %v1767_v48, 8 }
0x13a5   :  { %v1964_v51 = vpop.permute.xlu2 %1963 }
0x13b4   :  { %v2013_v49 = vpop.permute.xlu0 %2012  ;;  %v1912_v56 = vpop.permute.xlu1 %1911 }
0x13bc   :  { %v1837_v5 = vpop.permute.xlu1 %1836 }
0x13cd   :  { %v1968_v52 = vpop.permute.xlu2 %1967 }
0x13e5   :  { %v1916_v6 = vpop.permute.xlu1 %1915 }
0x13e6   :  { %v1769_v50 = vpop.permute.xlu0 %1768 }
0x13e7   :  { %1804 = vxpose.xlu0.b32.start.end [1/1] (short) (narrow) %v1769_v50, 8 }
0x13ee   :  { %v2017_v7 = vpop.permute.xlu1 %2016 }
0x13f6   :  { %v1839_v8 = vpop.permute.xlu1 %1838 }
0x1400   :  { %5893 = vset.pattern.permute.xlu2 %v6405_v2 }
0x1437   :  { %v1788_v53 = vpop.trf.xlu2 }
0x1438   :  { %v2019_v54 = vperm.slane %v1788_v53, 2  ;;  %v1918_v55 = vperm.slane %v1788_v53, 0  ;;  %v1970_v33 = vperm.slane %v1788_v53, 1 }
0x143a   :  { %v2021_v57 = vmul.f32 %v2019_v54, %v2013_v49  ;;  %v1920_v58 = vmul.f32 %v1918_v55, %v1912_v56  ;;  %v1972_v62 = vmul.f32 %v1970_v33, %v1964_v51 }
0x143c   :  { %v2023_v60 = vsel %vm255_vm0, %v2021_v57, -inf  ;;  %v1922_v61 = vsel %vm255_vm0, %v1920_v58, -inf  ;;  %v1974_v63 = vsel %vm255_vm0, %v1972_v62, -inf }
0x143d   :  { %2024 = vmax.xlane.f32.xlu2 %v2023_v60  ;;  %1923 = vmax.xlane.f32.xlu1 %v1922_v61 }
0x1458   :  { %1975 = vmax.xlane.f32.xlu0 %v1974_v63 }
0x1481   :  { %1874 = vxpose.xlu0.b32.start.end [1/1] (short) (narrow) %v1839_v8, 8 }
0x148b   :  { %v1820_v9 = vpop.trf.xlu0 }
0x148c   :  { %v1919_v10 = vperm.slane %v1820_v9, 0  ;;  %v1971_v14 = vperm.slane %v1820_v9, 1  ;;  %v2020_v16 = vperm.slane %v1820_v9, 2 }
0x148e   :  { %v1921_v11 = vmul.f32 %v1919_v10, %v1916_v6  ;;  %v1973_v15 = vmul.f32 %v1971_v14, %v1968_v52  ;;  %v2022_v17 = vmul.f32 %v2020_v16, %v2017_v7 }
0x1490   :  { %v1925_v13 = vsel %vm255_vm0, %v1921_v11, -inf  ;;  %v1977_v21 = vsel %vm255_vm0, %v1973_v15, -inf  ;;  %v2026_v18 = vsel %vm255_vm0, %v2022_v17, -inf }
0x1491   :  { %1926 = vmax.xlane.f32.xlu1 %v1925_v13 }
0x1499   :  { %1978 = vmax.xlane.f32.xlu1 %v1977_v21 }
0x14a1   :  { %2027 = vmax.xlane.f32.xlu1 %v2026_v18 }
0x14b0   :  { %v1924_v19 = vpop.xlane.xlu1 %1923  ;;  %v2025_v25 = vpop.xlane.xlu2 %2024 }
0x14b1   :  { %v1928_v20 = vsub.f32 %v1920_v58, %v1924_v19  ;;  %v2029_v28 = vsub.f32 %v2021_v57, %v2025_v25 }
0x14b3   :  { %v1930_v22 = vmul.f32 1.442695, %v1928_v20  ;;  %v2031_v30 = vmul.f32 1.442695, %v2029_v28 }
0x14b5   :  { %6154 = vpow2.f32 %v1930_v22 }
0x14bb   :  { %v6155_v23 = vpop.eup %6154 }
0x14bc   :  { %v1934_v24 = vsel %vm255_vm0, %v6155_v23, 0.0 }
0x14bd   :  { %1935 = vadd.xlane.f32.xlu2 %v1934_v24  ;;  %v6000_v24 = vld [vmem:[%s7679_s4 + $0x3] ss:$0 sm:$0xff] }
0x14cb   :  { %v1976_v26 = vpop.xlane.xlu0 %1975 }
0x14cc   :  { %v1980_v27 = vsub.f32 %v1972_v62, %v1976_v26 }
0x14ce   :  { %v1982_v29 = vmul.f32 1.442695, %v1980_v27 }
0x14d0   :  { %6156 = vpow2.f32 %v1982_v29 }
0x14d1   :  { %6158 = vpow2.f32 %v2031_v30 }
0x14d6   :  { %v6157_v0 = vpop.eup %6156 }
0x14d7   :  { %v1986_v31 = vsel %vm255_vm0, %v6157_v0, 0.0  ;;  %v6159_v32 = vpop.eup %6158 }
0x14d8   :  { %1987 = vadd.xlane.f32.xlu2 %v1986_v31  ;;  %v2035_v34 = vsel %vm255_vm0, %v6159_v32, 0.0 }
0x14db   :  { %1842 = vxpose.xlu1.b32.start.end [1/1] (short) (narrow) %v1837_v5, 8 }
0x14e0   :  { %2036 = vadd.xlane.f32.xlu2 %v2035_v34 }
0x14e8   :  { %5896 = vset.pattern.permute.xlu0 %v6406_v4 }
0x1504   :  { %v1927_v35 = vpop.xlane.xlu1 %1926 }
0x1505   :  { %v1929_v38 = vsub.f32 %v1921_v11, %v1927_v35 }
0x1507   :  { %v1932_v40 = vmul.f32 1.442695, %v1929_v38 }
0x1509   :  { %6160 = vpow2.f32 %v1932_v40 }
0x150c   :  { %v1979_v36 = vpop.xlane.xlu1 %1978 }
0x150d   :  { %v1981_v39 = vsub.f32 %v1973_v15, %v1979_v36  ;;  %v5710_v15 = vld [vmem:[%s7678_s3 + $0xc] sm:$0x7] }
0x150e   :  { %v2006_v22 = vperm.slane %v5710_v15, 1  ;;  %v2055_v27 = vperm.slane %v5710_v15, 2 }
0x150f   :  { %v1984_v51 = vmul.f32 1.442695, %v1981_v39  ;;  %v6161_v52 = vpop.eup %6160 }
0x1510   :  { %v1937_v54 = vsel %vm255_vm0, %v6161_v52, 0.0 }
0x1511   :  { %6162 = vpow2.f32 %v1984_v51 }
0x1514   :  { %v2028_v37 = vpop.xlane.xlu1 %2027 }
0x1515   :  { %v2030_v53 = vsub.f32 %v2022_v17, %v2028_v37  ;;  %v1954_v17 = vperm.slane %v5710_v15, 0 }
0x1517   :  { %v2033_v55 = vmul.f32 1.442695, %v2030_v53  ;;  %v6163_v56 = vpop.eup %6162 }
0x1518   :  { %v1989_v57 = vsel %vm255_vm0, %v6163_v56, 0.0 }
0x1519   :  { %6164 = vpow2.f32 %v2033_v55 }
0x151f   :  { %v6165_v58 = vpop.eup %6164 }
0x1520   :  { %v2038_v61 = vsel %vm255_vm0, %v6165_v58, 0.0 }
0x1525   :  { %v1890_v60 = vpop.trf.xlu0 }
0x1526   :  { %v1941_v33 = vperm.slane %v1890_v60, 0  ;;  %v1993_v5 = vperm.slane %v1890_v60, 1  ;;  %v2042_v8 = vperm.slane %v1890_v60, 2 }
0x1528   :  { %v1943_v62 = vmul.f32 %v6161_v52, %v1941_v33  ;;  %v1995_v6 = vmul.f32 %v6163_v56, %v1993_v5  ;;  %v2044_v9 = vmul.f32 %v6165_v58, %v2042_v8 }
0x152a   :  { %v1947_v63 = vsel %vm255_vm0, %v1943_v62, 0.0  ;;  %v1999_v7 = vsel %vm255_vm0, %v1995_v6, 0.0  ;;  %v2048_v10 = vsel %vm255_vm0, %v2044_v9, 0.0 }
0x1530   :  { %v1936_v11 = vpop.xlane.xlu2 %1935 }
0x1531   :  { %6166 = vrcp.f32 %v1936_v11 }
0x1537   :  { %v6167_v21 = vpop.eup %6166 }
0x154b   :  { %v1988_v13 = vpop.xlane.xlu2 %1987 }
0x154c   :  { %6168 = vrcp.f32 %v1988_v13 }
0x1552   :  { %v6169_v18 = vpop.eup %6168 }
0x1553   :  { %v2037_v14 = vpop.xlane.xlu2 %2036 }
0x1554   :  { %6170 = vrcp.f32 %v2037_v14 }
0x155a   :  { %v6171_v26 = vpop.eup %6170 }
0x157f   :  { %v1858_v42 = vpop.trf.xlu1 }
0x1580   :  { %v2041_v59 = vperm.slane %v1858_v42, 2  ;;  %v1992_v43 = vperm.slane %v1858_v42, 1  ;;  %v1940_v44 = vperm.slane %v1858_v42, 0 }
0x1582   :  { %v2043_v45 = vmul.f32 %v6159_v32, %v2041_v59  ;;  %v1994_v3 = vmul.f32 %v6157_v0, %v1992_v43  ;;  %v1942_v46 = vmul.f32 %v6155_v23, %v1940_v44 }
0x1584   :  { %v2045_v48 = vsel %vm255_vm0, %v2043_v45, 0.0  ;;  %v1996_v49 = vsel %vm255_vm0, %v1994_v3, 0.0  ;;  %v1944_v50 = vsel %vm255_vm0, %v1942_v46, 0.0 }
0x1585   :  { %2046 = vadd.xlane.f32.xlu1 %v2045_v48  ;;  %1997 = vadd.xlane.f32.xlu0 %v1996_v49 }
0x1586   :  { %1945 = vadd.xlane.f32.xlu2 %v1944_v50 }
0x158e   :  { %1938 = vadd.xlane.f32.xlu2 %v1937_v54 }
0x1596   :  { %1990 = vadd.xlane.f32.xlu2 %v1989_v57 }
0x159e   :  { %2039 = vadd.xlane.f32.xlu2 %v2038_v61 }
0x15a6   :  { %1948 = vadd.xlane.f32.xlu2 %v1947_v63 }
0x15ae   :  { %2000 = vadd.xlane.f32.xlu2 %v1999_v7 }
0x15b6   :  { %2049 = vadd.xlane.f32.xlu2 %v2048_v10 }
0x15f8   :  { %v1998_v16 = vpop.xlane.xlu0 %1997  ;;  %v2047_v19 = vpop.xlane.xlu1 %2046 }
0x15f9   :  { %v1946_v20 = vpop.xlane.xlu2 %1945  ;;  %v2004_v23 = vmul.f32 %v6169_v18, %v1998_v16  ;;  %v2053_v28 = vmul.f32 %v6171_v26, %v2047_v19  ;;  %v6002_v18 = vld [vmem:[%s7681_s6 + $0x3] ss:$0 sm:$0xff] }
0x15fa   :  { %v1952_v25 = vmul.f32 %v6167_v21, %v1946_v20  ;;  %v6001_v21 = vld [vmem:[%s7680_s5 + $0x3] ss:$0 sm:$0xff] }
0x15fb   :  { %v2007_v30 = vmul.f32 %v2006_v22, %v2004_v23  ;;  %v2056_v31 = vmul.f32 %v2055_v27, %v2053_v28 }
0x15fc   :  { %v1955_v29 = vmul.f32 %v1954_v17, %v1952_v25 }
0x15fe   :  { %v1960_v0 = vadd.f32 %v6000_v24, %v1955_v29 }
0x1600   :  { %v2009_v32 = vadd.f32 %v2007_v30, %v1960_v0 }
0x1601   :  { %v1939_v34 = vpop.xlane.xlu2 %1938 }
0x1602   :  { %v2058_v35 = vadd.f32 %v2056_v31, %v2009_v32  ;;  %6172 = vrcp.f32 %v1939_v34 }
0x1604   :  { %v2060_v36 = vadd.f32 %v2058_v35, %v6858_v12  ;;  %v5719_v35 = vld [vmem:[%s7686_s11 + $0x78] sm:$0xff] }
0x1605   :  { %2193 = vmatpush.msrb.mxu3 %v5719_v35  ;;  %v6006_v35 = vld [vmem:[%s7683_s8 + $0x3] ss:$0 sm:$0xff] }
0x1606   :  { %v2066_v37 = vsel %vm398_vm1, %v2060_v36, 0.0 }
0x1607   :  { %2067 = vadd.xlane.f32.xlu2 %v2066_v37  ;;  %v5717_v37 = vld [vmem:[%s7686_s11 + $0x68] sm:$0xff] }
0x1608   :  { %v6173_v59 = vpop.eup %6172 }
0x1609   :  { %v1991_v38 = vpop.xlane.xlu2 %1990 }
0x160a   :  { %6174 = vrcp.f32 %v1991_v38  ;;  %v5716_v38 = vld [vmem:[%s7686_s11 + $0x60] sm:$0xff] }
0x1610   :  { %v6175_v45 = vpop.eup %6174 }
0x1611   :  { %v2040_v40 = vpop.xlane.xlu2 %2039 }
0x1612   :  { %6176 = vrcp.f32 %v2040_v40 }
0x1618   :  { %v6177_v48 = vpop.eup %6176 }
0x1619   :  { %v1949_v42 = vpop.xlane.xlu2 %1948 }
0x161a   :  { %v1953_v44 = vmul.f32 %v6173_v59, %v1949_v42  ;;  %v5714_v42 = vld [vmem:[%s7684_s9 + $0xc] sm:$0x7] }
0x161b   :  { %v2143_v59 = vperm.slane %v5714_v42, 1 }
0x161c   :  { %v1956_v46 = vmul.f32 %v1954_v17, %v1953_v44  ;;  %v2132_v44 = vperm.slane %v5714_v42, 0 }
0x161e   :  { %v1961_v50 = vadd.f32 %v6000_v24, %v1956_v46 }
0x1621   :  { %v2001_v43 = vpop.xlane.xlu2 %2000 }
0x1622   :  { %v2005_v3 = vmul.f32 %v6175_v45, %v2001_v43 }
0x1624   :  { %v2008_v39 = vmul.f32 %v2006_v22, %v2005_v3  ;;  %v2156_v3 = vperm.slane %v5714_v42, 2 }
0x1626   :  { %v2010_v51 = vadd.f32 %v2008_v39, %v1961_v50 }
0x1629   :  { %v2050_v49 = vpop.xlane.xlu2 %2049 }
0x162a   :  { %v2054_v12 = vmul.f32 %v6177_v48, %v2050_v49  ;;  %v6003_v49 = vld [vmem:[%s7685_s10 + $0x3] ss:$0 sm:$0xff] }
0x162c   :  { %v2057_v52 = vmul.f32 %v2055_v27, %v2054_v12 }
0x162e   :  { %v2059_v53 = vadd.f32 %v2057_v52, %v2010_v51 }
0x1630   :  { %v2061_v54 = vadd.f32 %v2059_v53, %v6864_v47 }
0x1632   :  { %v2069_v55 = vsel %vm398_vm1, %v2061_v54, 0.0 }
0x1633   :  { %2070 = vadd.xlane.f32.xlu2 %v2069_v55 }
0x167a   :  { %v2068_v56 = vpop.xlane.xlu2 %2067 }
0x167b   :  { %v2072_v57 = vmul.f32 %v2068_v56, %v6566_v41 }
0x167d   :  { %v2074_v58 = vsub.f32 %v2060_v36, %v2072_v57  ;;  %v5718_v36 = vld [vmem:[%s7686_s11 + $0x70] sm:$0xff] }
0x167e   :  { %2194 = vmatpush.msrb.mxu3 %v5718_v36 }
0x167f   :  { %v2076_v60 = vmul.f32 %v2074_v58, %v2074_v58 }
0x1680   :  { %2195 = vmatpush.msrb.mxu3 %v5717_v37 }
0x1681   :  { %v2078_v61 = vsel %vm398_vm1, %v2076_v60, 0.0 }
0x1682   :  { %2079 = vadd.xlane.f32.xlu2 %v2078_v61  ;;  %2196 = vmatpush.msrb.mxu3 %v5716_v38 }
0x16a6   :  { %v2071_v33 = vpop.xlane.xlu2 %2070 }
0x16a7   :  { %v2073_v62 = vmul.f32 %v2071_v33, %v6566_v41 }
0x16a9   :  { %v2075_v63 = vsub.f32 %v2061_v54, %v2073_v62 }
0x16ab   :  { %v2077_v5 = vmul.f32 %v2075_v63, %v2075_v63 }
0x16ad   :  { %v2081_v6 = vsel %vm398_vm1, %v2077_v5, 0.0 }
0x16ae   :  { %2082 = vadd.xlane.f32.xlu2 %v2081_v6 }
0x16f5   :  { %v2080_v47 = vpop.xlane.xlu2 %2079 }
0x16f6   :  { %v2084_v7 = vmul.f32 %v2080_v47, %v6566_v41 }
0x16f8   :  { %v2086_v8 = vadd.f32 1e-05, %v2084_v7 }
0x16fa   :  { %6178 = vrsqrt.f32 %v2086_v8  ;;  %vm2094_vm15 = vweird.f32 %v2086_v8 }
0x1700   :  { %v6179_v9 = vpop.eup %6178 }
0x1701   :  { %v2089_v10 = vmul.f32 %v6179_v9, %v2086_v8  ;;  %vm2095_vm14 = vweird.f32 %v6179_v9 }
0x1702   :  { %vm2096_vm2 = vmor %vm2094_vm15, %vm2095_vm14 }
0x1703   :  { %v2090_v11 = vmul.f32 %v6179_v9, %v2089_v10 }
0x1705   :  { %v2091_v13 = vmul.f32 0.5, %v2090_v11 }
0x1707   :  { %v2092_v14 = vsub.f32 1.5, %v2091_v13 }
0x1709   :  { %v2093_v15 = vmul.f32 %v6179_v9, %v2092_v14 }
0x170b   :  { %v2097_v16 = vsel %vm2096_vm2, %v6179_v9, %v2093_v15 }
0x170c   :  { %v2108_v17 = vmul.f32 %v2097_v16, %v2074_v58 }
0x170e   :  { %v2113_v19 = vmul.f32 %v6001_v21, %v2108_v17 }
0x1710   :  { %v6924_v20 = vadd.f32 %v6002_v18, %v2113_v19 }
0x1712   :  { %2149 = vperm.xlu1 %5892, %v6924_v20   ;;  %2124 = vperm.xlu2 %5893, %v6924_v20  }
0x171a   :  { %5894 = vset.pattern.permute.xlu2 %v6406_v4  ;;  %5898 = vset.pattern.permute.xlu1 %v6405_v2 }
0x171b   :  { %2136 = vperm.xlu2 %5894, %v6924_v20  }
0x1721   :  { %v2083_v22 = vpop.xlane.xlu2 %2082 }
0x1722   :  { %v2085_v23 = vmul.f32 %v2083_v22, %v6566_v41 }
0x1723   :  { %5895 = vset.pattern.permute.xlu2 %v6405_v2 }
0x1724   :  { %v2087_v24 = vadd.f32 1e-05, %v2085_v23 }
0x1726   :  { %6180 = vrsqrt.f32 %v2087_v24  ;;  %vm2104_vm4 = vweird.f32 %v2087_v24 }
0x172c   :  { %v6181_v25 = vpop.eup %6180 }
0x172d   :  { %v2099_v26 = vmul.f32 %v6181_v25, %v2087_v24  ;;  %vm2105_vm3 = vweird.f32 %v6181_v25 }
0x172e   :  { %vm2106_vm5 = vmor %vm2104_vm4, %vm2105_vm3 }
0x172f   :  { %v2100_v27 = vmul.f32 %v6181_v25, %v2099_v26 }
0x1731   :  { %v2101_v28 = vmul.f32 0.5, %v2100_v27 }
0x1733   :  { %v2102_v29 = vsub.f32 1.5, %v2101_v28 }
0x1735   :  { %v2103_v30 = vmul.f32 %v6181_v25, %v2102_v29 }
0x1737   :  { %v2107_v0 = vsel %vm2106_vm5, %v6181_v25, %v2103_v30 }
0x1738   :  { %v2109_v31 = vmul.f32 %v2107_v0, %v2075_v63  ;;  %v6004_v63 = vld [vmem:[%s7687_s12 + $0x3] ss:$0 sm:$0xff] }
0x173a   :  { %v2114_v32 = vmul.f32 %v6001_v21, %v2109_v31  ;;  %v6005_v31 = vld [vmem:[%s7682_s7 + $0x3] ss:$0 sm:$0xff] }
0x173c   :  { %v2119_v34 = vadd.f32 %v6002_v18, %v2114_v32 }
0x173e   :  { %2140 = vperm.xlu0 %5896, %v2119_v34   ;;  %2129 = vperm.xlu2 %5895, %v2119_v34  }
0x1746   :  { %5897 = vset.pattern.permute.xlu2 %v6404_v1  ;;  %5900 = vset.pattern.permute.xlu0 %v6404_v1 }
0x1747   :  { %2153 = vperm.xlu2 %5897, %v2119_v34  }
0x174f   :  { %5899 = vset.pattern.permute.xlu2 %v6406_v4 }
0x176c   :  { %v2125_v40 = vpop.permute.xlu2 %2124 }
0x176d   :  { %v2133_v46 = vmul.f32 %v2132_v44, %v2125_v40 }
0x1775   :  { %v2137_v43 = vpop.permute.xlu2 %2136 }
0x1776   :  { %v2144_v45 = vmul.f32 %v2143_v59, %v2137_v43 }
0x1778   :  { %v2146_v48 = vadd.f32 %v2144_v45, %v2133_v46 }
0x1784   :  { %v2150_v39 = vpop.permute.xlu1 %2149 }
0x1785   :  { %v2157_v50 = vmul.f32 %v2156_v3, %v2150_v39 }
0x1787   :  { %v2159_v12 = vadd.f32 %v2157_v50, %v2146_v48 }
0x1789   :  { %v2166_v51 = vadd.f32 %v6003_v49, %v2159_v12  ;;  %v5725_v12 = vld [vmem:[%s7676_s1 + $0x10] sm:$0x7] }
0x178b   :  { %v2168_v52 = vmax.f32 %v2166_v51, 0.0  ;;  %v2294_v51 = vperm.slane %v5725_v12, 1 }
0x178d   :  { %5720 = vmatmul.msk.f32.vlgmr.msrb.gmra.mxu3 %vm512_vm9, %v2168_v52  ;;  %v2283_v52 = vperm.slane %v5725_v12, 0 }
0x1798   :  { %v2130_v53 = vpop.permute.xlu2 %2129 }
0x1799   :  { %v2134_v56 = vmul.f32 %v2132_v44, %v2130_v53 }
0x17a1   :  { %v2154_v54 = vpop.permute.xlu2 %2153 }
0x17a2   :  { %v2158_v58 = vmul.f32 %v2156_v3, %v2154_v54  ;;  %v2307_v54 = vperm.slane %v5725_v12, 2 }
0x17b0   :  { %v2141_v55 = vpop.permute.xlu0 %2140 }
0x17b1   :  { %v2145_v57 = vmul.f32 %v2143_v59, %v2141_v55 }
0x17b3   :  { %v2147_v60 = vadd.f32 %v2145_v57, %v2134_v56 }
0x17b5   :  { %v2160_v61 = vadd.f32 %v2158_v58, %v2147_v60 }
0x17b7   :  { %v2167_v33 = vadd.f32 %v6003_v49, %v2160_v61  ;;  %v6007_v61 = vld [vmem:[%s7677_s2 + $0x4] ss:$0 sm:$0xff] }
0x17b9   :  { %v2169_v62 = vmax.f32 %v2167_v33, 0.0 }
0x17bb   :  { %5721 = vmatmul.msk.f32.gmra.mxu3 %vm512_vm9, %v2169_v62 }
0x1810   :  { %v2198_v5 = vpop.f32.mrf.mxu3 }
0x1811   :  { %v2209_v6 = vadd.f32 %v6004_v63, %v2198_v5 }
0x1813   :  { %v2211_v47 = vadd.f32 %v2209_v6, %v6924_v20 }
0x1815   :  { %v2217_v7 = vsel %vm398_vm1, %v2211_v47, 0.0 }
0x1816   :  { %2218 = vadd.xlane.f32.xlu2 %v2217_v7 }
0x183e   :  { %v2201_v8 = vpop.f32.mrf.mxu3 }
0x183f   :  { %v2210_v9 = vadd.f32 %v6004_v63, %v2201_v8 }
0x1841   :  { %v2212_v10 = vadd.f32 %v2210_v9, %v2119_v34 }
0x1843   :  { %v2220_v11 = vsel %vm398_vm1, %v2212_v10, 0.0 }
0x1844   :  { %2221 = vadd.xlane.f32.xlu1 %v2220_v11 }
0x1889   :  { %v2219_v13 = vpop.xlane.xlu2 %2218 }
0x188a   :  { %v2223_v14 = vmul.f32 %v2219_v13, %v6566_v41 }
0x188c   :  { %v2225_v15 = vsub.f32 %v2211_v47, %v2223_v14 }
0x188e   :  { %v2227_v21 = vmul.f32 %v2225_v15, %v2225_v15 }
0x1890   :  { %v2229_v16 = vsel %vm398_vm1, %v2227_v21, 0.0 }
0x1891   :  { %2230 = vadd.xlane.f32.xlu0 %v2229_v16 }
0x18b7   :  { %v2222_v17 = vpop.xlane.xlu1 %2221 }
0x18b8   :  { %v2224_v18 = vmul.f32 %v2222_v17, %v6566_v41 }
0x18ba   :  { %v2226_v19 = vsub.f32 %v2212_v10, %v2224_v18 }
0x18bc   :  { %v2228_v20 = vmul.f32 %v2226_v19, %v2226_v19 }
0x18be   :  { %v2232_v22 = vsel %vm398_vm1, %v2228_v20, 0.0 }
0x18bf   :  { %2233 = vadd.xlane.f32.xlu2 %v2232_v22 }
0x1904   :  { %v2231_v23 = vpop.xlane.xlu0 %2230 }
0x1905   :  { %v2235_v24 = vmul.f32 %v2231_v23, %v6566_v41 }
0x1907   :  { %v2237_v25 = vadd.f32 1e-05, %v2235_v24 }
0x1909   :  { %6182 = vrsqrt.f32 %v2237_v25  ;;  %vm2245_vm7 = vweird.f32 %v2237_v25 }
0x190f   :  { %v6183_v26 = vpop.eup %6182 }
0x1910   :  { %v2240_v27 = vmul.f32 %v6183_v26, %v2237_v25  ;;  %vm2246_vm6 = vweird.f32 %v6183_v26 }
0x1911   :  { %vm2247_vm8 = vmor %vm2245_vm7, %vm2246_vm6 }
0x1912   :  { %v2241_v28 = vmul.f32 %v6183_v26, %v2240_v27 }
0x1914   :  { %v2242_v29 = vmul.f32 0.5, %v2241_v28 }
0x1916   :  { %v2243_v30 = vsub.f32 1.5, %v2242_v29 }
0x1918   :  { %v2244_v0 = vmul.f32 %v6183_v26, %v2243_v30 }
0x191a   :  { %v2248_v32 = vsel %vm2247_vm8, %v6183_v26, %v2244_v0 }
0x191b   :  { %v2259_v34 = vmul.f32 %v2248_v32, %v2225_v15 }
0x191d   :  { %v2264_v36 = vmul.f32 %v6005_v31, %v2259_v34 }
0x191f   :  { %v6973_v37 = vadd.f32 %v6006_v35, %v2264_v36 }
0x1921   :  { %2300 = vperm.xlu0 %5900, %v6973_v37   ;;  %2287 = vperm.xlu2 %5899, %v6973_v37  }
0x1922   :  { %2275 = vperm.xlu1 %5898, %v6973_v37  }
0x1929   :  { %5901 = vset.pattern.permute.xlu2 %v6405_v2 }
0x192a   :  { %5902 = vset.pattern.permute.xlu1 %v6406_v4 }
0x1932   :  { %v2234_v38 = vpop.xlane.xlu2 %2233 }
0x1933   :  { %v2236_v40 = vmul.f32 %v2234_v38, %v6566_v41 }
0x1935   :  { %v2238_v42 = vadd.f32 1e-05, %v2236_v40 }
0x1937   :  { %6184 = vrsqrt.f32 %v2238_v42  ;;  %vm2255_vm11 = vweird.f32 %v2238_v42 }
0x193d   :  { %v6185_v59 = vpop.eup %6184 }
0x193e   :  { %v2250_v43 = vmul.f32 %v6185_v59, %v2238_v42  ;;  %vm2256_vm10 = vweird.f32 %v6185_v59 }
0x193f   :  { %vm2257_vm12 = vmor %vm2255_vm11, %vm2256_vm10 }
0x1940   :  { %v2251_v44 = vmul.f32 %v6185_v59, %v2250_v43 }
0x1942   :  { %v2252_v45 = vmul.f32 0.5, %v2251_v44 }
0x1944   :  { %v2253_v3 = vsub.f32 1.5, %v2252_v45 }
0x1946   :  { %v2254_v46 = vmul.f32 %v6185_v59, %v2253_v3 }
0x1948   :  { %v2258_v39 = vsel %vm2257_vm12, %v6185_v59, %v2254_v46 }
0x1949   :  { %v2260_v48 = vmul.f32 %v2258_v39, %v2226_v19 }
0x194b   :  { %v2265_v49 = vmul.f32 %v6005_v31, %v2260_v48 }
0x194d   :  { %v6981_v50 = vadd.f32 %v6006_v35, %v2265_v49 }
0x194f   :  { %2291 = vperm.xlu1 %5902, %v6981_v50   ;;  %2280 = vperm.xlu2 %5901, %v6981_v50  }
0x1957   :  { %5903 = vset.pattern.permute.xlu2 %v6404_v1  ;;  %5904 = vset.pattern.permute.xlu1 %v6405_v2 }
0x1958   :  { %2304 = vperm.xlu2 %5903, %v6981_v50  }
0x1960   :  { %5905 = vset.pattern.permute.xlu2 %v6406_v4 }
0x197b   :  { %v2288_v53 = vpop.permute.xlu2 %2287 }
0x197c   :  { %v2295_v57 = vmul.f32 %v2294_v51, %v2288_v53 }
0x1993   :  { %v2301_v55 = vpop.permute.xlu0 %2300 }
0x1994   :  { %v2276_v56 = vpop.permute.xlu1 %2275  ;;  %v2308_v60 = vmul.f32 %v2307_v54, %v2301_v55 }
0x1995   :  { %v2284_v58 = vmul.f32 %v2283_v52, %v2276_v56 }
0x1997   :  { %v2297_v33 = vadd.f32 %v2295_v57, %v2284_v58 }
0x1999   :  { %v2310_v62 = vadd.f32 %v2308_v60, %v2297_v33 }
0x199b   :  { %v2317_v63 = vadd.f32 %v6007_v61, %v2310_v62 }
0x199d   :  { %2391 = vrot.lane.b32.xlu0 %v2317_v63, %s6408_s26  ;;  %2518 = vperm.xlu2 %5905, %v2317_v63  }
0x199e   :  { %2321 = vrot.lane.b32.xlu1 %v2317_v63, %s6407_s25 }
0x19a5   :  { %5907 = vset.pattern.permute.xlu2 %v6405_v2 }
0x19a6   :  { %2466 = vperm.xlu1 %5904, %v2317_v63  }
0x19a9   :  { %v2281_v5 = vpop.permute.xlu2 %2280 }
0x19aa   :  { %v2285_v7 = vmul.f32 %v2283_v52, %v2281_v5 }
0x19ae   :  { %5906 = vset.pattern.permute.xlu1 %v6404_v1 }
0x19af   :  { %2567 = vperm.xlu1 %5906, %v2317_v63  }
0x19b2   :  { %v2305_v6 = vpop.permute.xlu2 %2304 }
0x19b3   :  { %v2309_v9 = vmul.f32 %v2307_v54, %v2305_v6 }
0x19b7   :  { %5908 = vset.pattern.permute.xlu1 %v6406_v4 }
0x19c1   :  { %v2292_v47 = vpop.permute.xlu1 %2291 }
0x19c2   :  { %v2296_v8 = vmul.f32 %v2294_v51, %v2292_v47 }
0x19c4   :  { %v2298_v10 = vadd.f32 %v2296_v8, %v2285_v7 }
0x19c6   :  { %v2311_v11 = vadd.f32 %v2309_v9, %v2298_v10 }
0x19c8   :  { %v2318_v13 = vadd.f32 %v6007_v61, %v2311_v11 }
0x19ca   :  { %2571 = vperm.xlu0 %5900, %v2318_v13   ;;  %2522 = vperm.xlu1 %5908, %v2318_v13  }
0x19cb   :  { %2323 = vrot.lane.b32.xlu2 %v2318_v13, %s6407_s25 }
0x19d2   :  { %2393 = vrot.lane.b32.xlu0 %v2318_v13, %s6408_s26 }
0x19d3   :  { %2470 = vperm.xlu2 %5907, %v2318_v13  }
0x19f7   :  { %v2519_v15 = vpop.permute.xlu2 %2518 }
0x1a0f   :  { %v2392_v36 = vpop.permute.xlu0 %2391 }
0x1a10   :  { %v2322_v14 = vpop.permute.xlu1 %2321 }
0x1a11   :  { %2327 = vxpose.xlu2.b32.start.end [1/1] (short) (narrow) %v2322_v14, 8 }
0x1a18   :  { %v2467_v16 = vpop.permute.xlu1 %2466 }
0x1a21   :  { %v2568_v23 = vpop.permute.xlu1 %2567 }
0x1a25   :  { %v2324_v21 = vpop.permute.xlu2 %2323 }
0x1a26   :  { %2359 = vxpose.xlu1.b32.start.end [1/1] (short) (narrow) %v2324_v21, 8 }
0x1a2d   :  { %v2471_v17 = vpop.permute.xlu2 %2470 }
0x1a3c   :  { %v2523_v30 = vpop.permute.xlu1 %2522  ;;  %v2572_v59 = vpop.permute.xlu0 %2571 }
0x1a44   :  { %v2394_v45 = vpop.permute.xlu0 %2393 }
0x1aaa   :  { %v2343_v18 = vpop.trf.xlu2 }
0x1aab   :  { %v2574_v19 = vperm.slane %v2343_v18, 2  ;;  %v2525_v20 = vperm.slane %v2343_v18, 1  ;;  %v2473_v22 = vperm.slane %v2343_v18, 0 }
0x1aad   :  { %v2576_v24 = vmul.f32 %v2574_v19, %v2568_v23  ;;  %v2527_v25 = vmul.f32 %v2525_v20, %v2519_v15  ;;  %v2475_v26 = vmul.f32 %v2473_v22, %v2467_v16 }
0x1aaf   :  { %v2578_v27 = vsel %vm255_vm0, %v2576_v24, -inf  ;;  %v2529_v28 = vsel %vm255_vm0, %v2527_v25, -inf  ;;  %v2477_v29 = vsel %vm255_vm0, %v2475_v26, -inf }
0x1ab0   :  { %2579 = vmax.xlane.f32.xlu1 %v2578_v27  ;;  %2530 = vmax.xlane.f32.xlu2 %v2529_v28 }
0x1ab1   :  { %2478 = vmax.xlane.f32.xlu0 %v2477_v29 }
0x1aca   :  { %v2375_v0 = vpop.trf.xlu1 }
0x1acb   :  { %v2474_v31 = vperm.slane %v2375_v0, 0  ;;  %v2526_v35 = vperm.slane %v2375_v0, 1  ;;  %v2575_v42 = vperm.slane %v2375_v0, 2 }
0x1acd   :  { %v2476_v32 = vmul.f32 %v2474_v31, %v2471_v17  ;;  %v2528_v38 = vmul.f32 %v2526_v35, %v2523_v30  ;;  %v2577_v43 = vmul.f32 %v2575_v42, %v2572_v59 }
0x1acf   :  { %v2480_v34 = vsel %vm255_vm0, %v2476_v32, -inf  ;;  %v2532_v40 = vsel %vm255_vm0, %v2528_v38, -inf  ;;  %v2581_v44 = vsel %vm255_vm0, %v2577_v43, -inf }
0x1ad0   :  { %2481 = vmax.xlane.f32.xlu0 %v2480_v34 }
0x1ad8   :  { %2533 = vmax.xlane.f32.xlu0 %v2532_v40 }
0x1ae0   :  { %2582 = vmax.xlane.f32.xlu0 %v2581_v44 }
0x1aea   :  { %2429 = vxpose.xlu1.b32.start.end [1/1] (short) (narrow) %v2394_v45, 8 }
0x1b09   :  { %2397 = vxpose.xlu0.b32.start.end [1/1] (short) (narrow) %v2392_v36, 8 }
0x1b23   :  { %v2531_v46 = vpop.xlane.xlu2 %2530  ;;  %v2580_v51 = vpop.xlane.xlu1 %2579 }
0x1b24   :  { %v2479_v3 = vpop.xlane.xlu0 %2478  ;;  %v2535_v49 = vsub.f32 %v2527_v25, %v2531_v46  ;;  %v2584_v53 = vsub.f32 %v2576_v24, %v2580_v51 }
0x1b25   :  { %v2483_v39 = vsub.f32 %v2475_v26, %v2479_v3 }
0x1b26   :  { %v2537_v12 = vmul.f32 1.442695, %v2535_v49  ;;  %v2586_v55 = vmul.f32 1.442695, %v2584_v53 }
0x1b27   :  { %v2485_v48 = vmul.f32 1.442695, %v2483_v39 }
0x1b29   :  { %6186 = vpow2.f32 %v2485_v48 }
0x1b2a   :  { %6188 = vpow2.f32 %v2537_v12  ;;  %v6008_v12 = vld [vmem:[%s7679_s4 + $0x4] ss:$0 sm:$0xff] }
0x1b2b   :  { %6190 = vpow2.f32 %v2586_v55 }
0x1b2f   :  { %v6187_v52 = vpop.eup %6186 }
0x1b30   :  { %v2489_v54 = vsel %vm255_vm0, %v6187_v52, 0.0  ;;  %v6189_v56 = vpop.eup %6188 }
0x1b31   :  { %2490 = vadd.xlane.f32.xlu2 %v2489_v54  ;;  %v2541_v57 = vsel %vm255_vm0, %v6189_v56, 0.0  ;;  %v6191_v58 = vpop.eup %6190 }
0x1b32   :  { %v2590_v60 = vsel %vm255_vm0, %v6191_v58, 0.0 }
0x1b39   :  { %2542 = vadd.xlane.f32.xlu2 %v2541_v57 }
0x1b3d   :  { %5912 = vset.pattern.permute.xlu1 %v6404_v1 }
0x1b41   :  { %2591 = vadd.xlane.f32.xlu2 %v2590_v60 }
0x1b43   :  { %v2482_v61 = vpop.xlane.xlu0 %2481 }
0x1b44   :  { %v2484_v33 = vsub.f32 %v2476_v32, %v2482_v61 }
0x1b46   :  { %v2487_v62 = vmul.f32 1.442695, %v2484_v33 }
0x1b48   :  { %6192 = vpow2.f32 %v2487_v62 }
0x1b4b   :  { %v2534_v9 = vpop.xlane.xlu0 %2533 }
0x1b4c   :  { %v2536_v17 = vsub.f32 %v2528_v38, %v2534_v9 }
0x1b4e   :  { %v6193_v63 = vpop.eup %6192  ;;  %v2539_v20 = vmul.f32 1.442695, %v2536_v17 }
0x1b4f   :  { %v2492_v5 = vsel %vm255_vm0, %v6193_v63, 0.0 }
0x1b50   :  { %6194 = vpow2.f32 %v2539_v20 }
0x1b53   :  { %v2583_v10 = vpop.xlane.xlu0 %2582 }
0x1b54   :  { %v2585_v23 = vsub.f32 %v2577_v43, %v2583_v10  ;;  %v5727_v43 = vld [vmem:[%s7678_s3 + $0x10] sm:$0x7] }
0x1b55   :  { %v2509_v46 = vperm.slane %v5727_v43, 0  ;;  %v2561_v39 = vperm.slane %v5727_v43, 1 }
0x1b56   :  { %v2588_v25 = vmul.f32 1.442695, %v2585_v23  ;;  %v6195_v26 = vpop.eup %6194 }
0x1b57   :  { %v2544_v27 = vsel %vm255_vm0, %v6195_v26, 0.0 }
0x1b58   :  { %6196 = vpow2.f32 %v2588_v25 }
0x1b5e   :  { %v6197_v28 = vpop.eup %6196 }
0x1b5f   :  { %v2593_v29 = vsel %vm255_vm0, %v6197_v28, 0.0 }
0x1b7a   :  { %2493 = vadd.xlane.f32.xlu0 %v2492_v5 }
0x1b8e   :  { %v2445_v6 = vpop.trf.xlu1 }
0x1b8f   :  { %v2496_v47 = vperm.slane %v2445_v6, 0  ;;  %v2548_v30 = vperm.slane %v2445_v6, 1  ;;  %v2597_v32 = vperm.slane %v2445_v6, 2 }
0x1b91   :  { %v2498_v7 = vmul.f32 %v6193_v63, %v2496_v47  ;;  %v2550_v0 = vmul.f32 %v6195_v26, %v2548_v30  ;;  %v2599_v34 = vmul.f32 %v6197_v28, %v2597_v32 }
0x1b93   :  { %v2502_v8 = vsel %vm255_vm0, %v2498_v7, 0.0  ;;  %v2554_v31 = vsel %vm255_vm0, %v2550_v0, 0.0  ;;  %v2603_v35 = vsel %vm255_vm0, %v2599_v34, 0.0 }
0x1b94   :  { %2503 = vadd.xlane.f32.xlu1 %v2502_v8 }
0x1ba4   :  { %v2491_v36 = vpop.xlane.xlu2 %2490 }
0x1ba5   :  { %6198 = vrcp.f32 %v2491_v36 }
0x1bab   :  { %v6199_v59 = vpop.eup %6198 }
0x1bac   :  { %v2543_v38 = vpop.xlane.xlu2 %2542 }
0x1bad   :  { %v2413_v11 = vpop.trf.xlu0  ;;  %6200 = vrcp.f32 %v2543_v38 }
0x1bae   :  { %v2495_v13 = vperm.slane %v2413_v11, 0  ;;  %v2547_v21 = vperm.slane %v2413_v11, 1  ;;  %v2596_v19 = vperm.slane %v2413_v11, 2 }
0x1bb0   :  { %v2497_v14 = vmul.f32 %v6187_v52, %v2495_v13  ;;  %v2549_v16 = vmul.f32 %v6189_v56, %v2547_v21  ;;  %v2598_v22 = vmul.f32 %v6191_v58, %v2596_v19  ;;  %v2610_v52 = vperm.slane %v5727_v43, 2 }
0x1bb2   :  { %v2499_v15 = vsel %vm255_vm0, %v2497_v14, 0.0  ;;  %v2551_v18 = vsel %vm255_vm0, %v2549_v16, 0.0  ;;  %v2600_v24 = vsel %vm255_vm0, %v2598_v22, 0.0 }
0x1bb3   :  { %2500 = vadd.xlane.f32.xlu2 %v2499_v15  ;;  %v6201_v3 = vpop.eup %6200 }
0x1bb4   :  { %v2592_v40 = vpop.xlane.xlu2 %2591 }
0x1bb5   :  { %6202 = vrcp.f32 %v2592_v40 }
0x1bbb   :  { %2552 = vadd.xlane.f32.xlu2 %v2551_v18  ;;  %v6203_v53 = vpop.eup %6202 }
0x1bc3   :  { %2601 = vadd.xlane.f32.xlu2 %v2600_v24 }
0x1bcb   :  { %2545 = vadd.xlane.f32.xlu2 %v2544_v27 }
0x1bd3   :  { %2594 = vadd.xlane.f32.xlu2 %v2593_v29 }
0x1bdb   :  { %2555 = vadd.xlane.f32.xlu2 %v2554_v31 }
0x1be3   :  { %2604 = vadd.xlane.f32.xlu2 %v2603_v35 }
0x1bed   :  { %v2494_v63 = vpop.xlane.xlu0 %2493 }
0x1bee   :  { %6204 = vrcp.f32 %v2494_v63  ;;  %v5733_v63 = vld [vmem:[%s7686_s11 + $0x80] sm:$0xff] }
0x1bf4   :  { %v6205_v47 = vpop.eup %6204 }
0x1c07   :  { %v2504_v6 = vpop.xlane.xlu1 %2503 }
0x1c08   :  { %v2508_v8 = vmul.f32 %v6205_v47, %v2504_v6  ;;  %v5731_v6 = vld [vmem:[%s7684_s9 + $0x10] sm:$0x7] }
0x1c09   :  { %v2698_v47 = vperm.slane %v5731_v6, 1 }
0x1c0a   :  { %v2511_v11 = vmul.f32 %v2509_v46, %v2508_v8  ;;  %v2687_v8 = vperm.slane %v5731_v6, 0 }
0x1c26   :  { %v2501_v42 = vpop.xlane.xlu2 %2500 }
0x1c27   :  { %v2507_v45 = vmul.f32 %v6199_v59, %v2501_v42  ;;  %v6009_v59 = vld [vmem:[%s7680_s5 + $0x4] ss:$0 sm:$0xff] }
0x1c29   :  { %v2510_v49 = vmul.f32 %v2509_v46, %v2507_v45  ;;  %v6010_v45 = vld [vmem:[%s7681_s6 + $0x4] ss:$0 sm:$0xff] }
0x1c2b   :  { %v2515_v55 = vadd.f32 %v6008_v12, %v2510_v49 }
0x1c2e   :  { %v2553_v44 = vpop.xlane.xlu2 %2552 }
0x1c2f   :  { %v2559_v48 = vmul.f32 %v6201_v3, %v2553_v44 }
0x1c31   :  { %v2562_v51 = vmul.f32 %v2561_v39, %v2559_v48 }
0x1c33   :  { %v2564_v57 = vadd.f32 %v2562_v51, %v2515_v55 }
0x1c36   :  { %v2602_v54 = vpop.xlane.xlu2 %2601 }
0x1c37   :  { %v2608_v56 = vmul.f32 %v6203_v53, %v2602_v54 }
0x1c39   :  { %v2611_v58 = vmul.f32 %v2610_v52, %v2608_v56 }
0x1c3b   :  { %v2613_v60 = vadd.f32 %v2611_v58, %v2564_v57 }
0x1c3d   :  { %v2615_v61 = vadd.f32 %v2613_v60, %v6973_v37  ;;  %v2516_v37 = vadd.f32 %v6008_v12, %v2511_v11 }
0x1c3e   :  { %v2546_v33 = vpop.xlane.xlu2 %2545 }
0x1c3f   :  { %v2621_v62 = vsel %vm398_vm1, %v2615_v61, 0.0  ;;  %6206 = vrcp.f32 %v2546_v33  ;;  %v5735_v33 = vld [vmem:[%s7686_s11 + $0x90] sm:$0xff] }
0x1c40   :  { %2622 = vadd.xlane.f32.xlu2 %v2621_v62  ;;  %v5734_v62 = vld [vmem:[%s7686_s11 + $0x88] sm:$0xff] }
0x1c45   :  { %v6207_v9 = vpop.eup %6206 }
0x1c46   :  { %v2595_v5 = vpop.xlane.xlu2 %2594 }
0x1c47   :  { %6208 = vrcp.f32 %v2595_v5 }
0x1c4d   :  { %v6209_v14 = vpop.eup %6208 }
0x1c4e   :  { %v2556_v7 = vpop.xlane.xlu2 %2555 }
0x1c4f   :  { %v2560_v10 = vmul.f32 %v6207_v9, %v2556_v7 }
0x1c51   :  { %v2563_v13 = vmul.f32 %v2561_v39, %v2560_v10  ;;  %v2711_v10 = vperm.slane %v5731_v6, 2 }
0x1c53   :  { %v2565_v16 = vadd.f32 %v2563_v13, %v2516_v37 }
0x1c56   :  { %v2605_v15 = vpop.xlane.xlu2 %2604 }
0x1c57   :  { %v2609_v21 = vmul.f32 %v6209_v14, %v2605_v15  ;;  %v6011_v15 = vld [vmem:[%s7685_s10 + $0x4] ss:$0 sm:$0xff] }
0x1c59   :  { %v2612_v17 = vmul.f32 %v2610_v52, %v2609_v21 }
0x1c5b   :  { %v2614_v18 = vadd.f32 %v2612_v17, %v2565_v16 }
0x1c5d   :  { %v2616_v19 = vadd.f32 %v2614_v18, %v6981_v50 }
0x1c5f   :  { %v2624_v20 = vsel %vm398_vm1, %v2616_v19, 0.0 }
0x1c60   :  { %2625 = vadd.xlane.f32.xlu2 %v2624_v20 }
0x1cb3   :  { %v2623_v22 = vpop.xlane.xlu2 %2622 }
0x1cb4   :  { %v2627_v23 = vmul.f32 %v2623_v22, %v6566_v41 }
0x1cb6   :  { %v2629_v24 = vsub.f32 %v2615_v61, %v2627_v23  ;;  %v5736_v61 = vld [vmem:[%s7686_s11 + $0x98] sm:$0xff] }
0x1cb7   :  { %2748 = vmatpush.msrb.mxu0 %v5736_v61  ;;  %v6014_v61 = vld [vmem:[%s7683_s8 + $0x4] ss:$0 sm:$0xff] }
0x1cb8   :  { %v2631_v25 = vmul.f32 %v2629_v24, %v2629_v24 }
0x1cb9   :  { %2749 = vmatpush.msrb.mxu0 %v5735_v33 }
0x1cba   :  { %v2633_v26 = vsel %vm398_vm1, %v2631_v25, 0.0 }
0x1cbb   :  { %2634 = vadd.xlane.f32.xlu2 %v2633_v26  ;;  %2750 = vmatpush.msrb.mxu0 %v5734_v62 }
0x1cbd   :  { %2751 = vmatpush.msrb.mxu0 %v5733_v63 }
0x1cd3   :  { %v2626_v27 = vpop.xlane.xlu2 %2625 }
0x1cd4   :  { %v2628_v28 = vmul.f32 %v2626_v27, %v6566_v41 }
0x1cd6   :  { %v2630_v29 = vsub.f32 %v2616_v19, %v2628_v28 }
0x1cd8   :  { %v2632_v30 = vmul.f32 %v2630_v29, %v2630_v29 }
0x1cda   :  { %v2636_v0 = vsel %vm398_vm1, %v2632_v30, 0.0 }
0x1cdb   :  { %2637 = vadd.xlane.f32.xlu2 %v2636_v0 }
0x1d2e   :  { %v2635_v50 = vpop.xlane.xlu2 %2634 }
0x1d2f   :  { %v2639_v31 = vmul.f32 %v2635_v50, %v6566_v41 }
0x1d31   :  { %v2641_v32 = vadd.f32 1e-05, %v2639_v31 }
0x1d33   :  { %6210 = vrsqrt.f32 %v2641_v32  ;;  %vm2649_vm14 = vweird.f32 %v2641_v32 }
0x1d39   :  { %v6211_v34 = vpop.eup %6210 }
0x1d3a   :  { %v2644_v35 = vmul.f32 %v6211_v34, %v2641_v32  ;;  %vm2650_vm13 = vweird.f32 %v6211_v34 }
0x1d3b   :  { %vm2651_vm15 = vmor %vm2649_vm14, %vm2650_vm13 }
0x1d3c   :  { %v2645_v36 = vmul.f32 %v6211_v34, %v2644_v35 }
0x1d3e   :  { %v2646_v38 = vmul.f32 0.5, %v2645_v36 }
0x1d40   :  { %v2647_v40 = vsub.f32 1.5, %v2646_v38 }
0x1d42   :  { %v2648_v42 = vmul.f32 %v6211_v34, %v2647_v40 }
0x1d44   :  { %v2652_v43 = vsel %vm2651_vm15, %v6211_v34, %v2648_v42 }
0x1d45   :  { %v2663_v44 = vmul.f32 %v2652_v43, %v2629_v24 }
0x1d47   :  { %v2668_v3 = vmul.f32 %v6009_v59, %v2663_v44 }
0x1d49   :  { %v7042_v46 = vadd.f32 %v6010_v45, %v2668_v3 }
0x1d4b   :  { %2704 = vperm.xlu0 %5900, %v7042_v46   ;;  %2679 = vperm.xlu2 %5907, %v7042_v46  }
0x1d4e   :  { %v2638_v39 = vpop.xlane.xlu2 %2637 }
0x1d4f   :  { %v2640_v48 = vmul.f32 %v2638_v39, %v6566_v41 }
0x1d51   :  { %v2642_v49 = vadd.f32 1e-05, %v2640_v48 }
0x1d53   :  { %6212 = vrsqrt.f32 %v2642_v49  ;;  %5909 = vset.pattern.permute.xlu2 %v6406_v4  ;;  %5914 = vset.pattern.permute.xlu0 %v6406_v4  ;;  %vm2659_vm3 = vweird.f32 %v2642_v49 }
0x1d54   :  { %2691 = vperm.xlu2 %5909, %v7042_v46  }
0x1d59   :  { %v6213_v12 = vpop.eup %6212 }
0x1d5a   :  { %v2654_v51 = vmul.f32 %v6213_v12, %v2642_v49  ;;  %vm2660_vm2 = vweird.f32 %v6213_v12 }
0x1d5b   :  { %vm2661_vm4 = vmor %vm2659_vm3, %vm2660_vm2 }
0x1d5c   :  { %v2655_v52 = vmul.f32 %v6213_v12, %v2654_v51  ;;  %5910 = vset.pattern.permute.xlu2 %v6405_v2 }
0x1d5e   :  { %v2656_v53 = vmul.f32 0.5, %v2655_v52 }
0x1d60   :  { %v2657_v54 = vsub.f32 1.5, %v2656_v53 }
0x1d62   :  { %v2658_v55 = vmul.f32 %v6213_v12, %v2657_v54 }
0x1d64   :  { %v2662_v56 = vsel %vm2661_vm4, %v6213_v12, %v2658_v55 }
0x1d65   :  { %v2664_v57 = vmul.f32 %v2662_v56, %v2630_v29  ;;  %v6012_v29 = vld [vmem:[%s7687_s12 + $0x4] ss:$0 sm:$0xff] }
0x1d67   :  { %v2669_v58 = vmul.f32 %v6009_v59, %v2664_v57  ;;  %v6013_v57 = vld [vmem:[%s7682_s7 + $0x4] ss:$0 sm:$0xff] }
0x1d69   :  { %v2674_v60 = vadd.f32 %v6010_v45, %v2669_v58 }
0x1d6b   :  { %2708 = vperm.xlu1 %5912, %v2674_v60   ;;  %2684 = vperm.xlu2 %5910, %v2674_v60  }
0x1d73   :  { %5911 = vset.pattern.permute.xlu2 %v6406_v4 }
0x1d74   :  { %2695 = vperm.xlu2 %5911, %v2674_v60  }
0x1d7c   :  { %5913 = vset.pattern.permute.xlu2 %v6405_v2 }
0x1da5   :  { %v2680_v5 = vpop.permute.xlu2 %2679 }
0x1da6   :  { %v2688_v11 = vmul.f32 %v2687_v8, %v2680_v5 }
0x1dae   :  { %v2692_v7 = vpop.permute.xlu2 %2691 }
0x1daf   :  { %v2699_v9 = vmul.f32 %v2698_v47, %v2692_v7 }
0x1db1   :  { %v2701_v14 = vadd.f32 %v2699_v9, %v2688_v11 }
0x1dbd   :  { %v2705_v13 = vpop.permute.xlu0 %2704 }
0x1dbe   :  { %v2712_v37 = vmul.f32 %v2711_v10, %v2705_v13 }
0x1dc0   :  { %v2714_v21 = vadd.f32 %v2712_v37, %v2701_v14 }
0x1dc2   :  { %v2721_v16 = vadd.f32 %v6011_v15, %v2714_v21  ;;  %v5742_v21 = vld [vmem:[%s7676_s1 + $0x14] sm:$0x7] }
0x1dc4   :  { %v2723_v17 = vmax.f32 %v2721_v16, 0.0  ;;  %v2838_v16 = vperm.slane %v5742_v21, 0 }
0x1dc5   :  { %v2685_v18 = vpop.permute.xlu2 %2684 }
0x1dc6   :  { %5737 = vmatmul.msk.f32.vlgmr.msrb.gmra.mxu0 %vm512_vm9, %v2723_v17  ;;  %v2689_v22 = vmul.f32 %v2687_v8, %v2685_v18  ;;  %v2849_v17 = vperm.slane %v5742_v21, 1 }
0x1dce   :  { %v2696_v19 = vpop.permute.xlu2 %2695 }
0x1dcf   :  { %v2700_v20 = vmul.f32 %v2698_v47, %v2696_v19  ;;  %v2862_v19 = vperm.slane %v5742_v21, 2 }
0x1dd1   :  { %v2702_v24 = vadd.f32 %v2700_v20, %v2689_v22 }
0x1ddd   :  { %v2709_v23 = vpop.permute.xlu1 %2708 }
0x1dde   :  { %v2713_v25 = vmul.f32 %v2711_v10, %v2709_v23 }
0x1de0   :  { %v2715_v26 = vadd.f32 %v2713_v25, %v2702_v24 }
0x1de2   :  { %v2722_v27 = vadd.f32 %v6011_v15, %v2715_v26  ;;  %v6015_v26 = vld [vmem:[%s7677_s2 + $0x5] ss:$0 sm:$0xff] }
0x1de4   :  { %v2724_v28 = vmax.f32 %v2722_v27, 0.0 }
0x1de6   :  { %5738 = vmatmul.msk.f32.gmra.mxu0 %vm512_vm9, %v2724_v28 }
0x1e43   :  { %v2753_v30 = vpop.f32.mrf.mxu0 }
0x1e44   :  { %v2764_v0 = vadd.f32 %v6012_v29, %v2753_v30 }
0x1e46   :  { %v2766_v50 = vadd.f32 %v2764_v0, %v7042_v46 }
0x1e48   :  { %v2772_v31 = vsel %vm398_vm1, %v2766_v50, 0.0 }
0x1e49   :  { %2773 = vadd.xlane.f32.xlu0 %v2772_v31 }
0x1e63   :  { %v2756_v32 = vpop.f32.mrf.mxu0 }
0x1e64   :  { %v2765_v34 = vadd.f32 %v6012_v29, %v2756_v32 }
0x1e66   :  { %v2767_v35 = vadd.f32 %v2765_v34, %v2674_v60 }
0x1e68   :  { %v2775_v36 = vsel %vm398_vm1, %v2767_v35, 0.0 }
0x1e69   :  { %2776 = vadd.xlane.f32.xlu2 %v2775_v36 }
0x1ebc   :  { %v2774_v38 = vpop.xlane.xlu0 %2773 }
0x1ebd   :  { %v2778_v40 = vmul.f32 %v2774_v38, %v6566_v41 }
0x1ebf   :  { %v2780_v42 = vsub.f32 %v2766_v50, %v2778_v40 }
0x1ec1   :  { %v2782_v59 = vmul.f32 %v2780_v42, %v2780_v42 }
0x1ec3   :  { %v2784_v43 = vsel %vm398_vm1, %v2782_v59, 0.0 }
0x1ec4   :  { %2785 = vadd.xlane.f32.xlu1 %v2784_v43 }
0x1edc   :  { %v2777_v44 = vpop.xlane.xlu2 %2776 }
0x1edd   :  { %v2779_v45 = vmul.f32 %v2777_v44, %v6566_v41 }
0x1edf   :  { %v2781_v3 = vsub.f32 %v2767_v35, %v2779_v45 }
0x1ee1   :  { %v2783_v46 = vmul.f32 %v2781_v3, %v2781_v3 }
0x1ee3   :  { %v2787_v39 = vsel %vm398_vm1, %v2783_v46, 0.0 }
0x1ee4   :  { %2788 = vadd.xlane.f32.xlu0 %v2787_v39 }
0x1f37   :  { %v2786_v48 = vpop.xlane.xlu1 %2785 }
0x1f38   :  { %v2790_v49 = vmul.f32 %v2786_v48, %v6566_v41 }
0x1f3a   :  { %v2792_v12 = vadd.f32 1e-05, %v2790_v49 }
0x1f3c   :  { %6214 = vrsqrt.f32 %v2792_v12  ;;  %vm2800_vm6 = vweird.f32 %v2792_v12 }
0x1f42   :  { %v6215_v51 = vpop.eup %6214 }
0x1f43   :  { %v2795_v52 = vmul.f32 %v6215_v51, %v2792_v12  ;;  %vm2801_vm5 = vweird.f32 %v6215_v51 }
0x1f44   :  { %vm2802_vm7 = vmor %vm2800_vm6, %vm2801_vm5 }
0x1f45   :  { %v2796_v53 = vmul.f32 %v6215_v51, %v2795_v52 }
0x1f47   :  { %v2797_v54 = vmul.f32 0.5, %v2796_v53 }
0x1f49   :  { %v2798_v55 = vsub.f32 1.5, %v2797_v54 }
0x1f4b   :  { %v2799_v56 = vmul.f32 %v6215_v51, %v2798_v55 }
0x1f4d   :  { %v2803_v58 = vsel %vm2802_vm7, %v6215_v51, %v2799_v56 }
0x1f4e   :  { %v2814_v60 = vmul.f32 %v2803_v58, %v2780_v42 }
0x1f50   :  { %v2819_v33 = vmul.f32 %v6013_v57, %v2814_v60 }
0x1f52   :  { %v7090_v62 = vadd.f32 %v6014_v61, %v2819_v33 }
0x1f54   :  { %2855 = vperm.xlu1 %5912, %v7090_v62   ;;  %2830 = vperm.xlu2 %5913, %v7090_v62  }
0x1f55   :  { %2842 = vperm.xlu0 %5914, %v7090_v62  }
0x1f57   :  { %v2789_v63 = vpop.xlane.xlu0 %2788 }
0x1f58   :  { %v2791_v5 = vmul.f32 %v2789_v63, %v6566_v41 }
0x1f5a   :  { %v2793_v6 = vadd.f32 1e-05, %v2791_v5 }
0x1f5c   :  { %6216 = vrsqrt.f32 %v2793_v6  ;;  %5918 = vset.pattern.permute.xlu1 %v6406_v4  ;;  %vm2810_vm10 = vweird.f32 %v2793_v6 }
0x1f5d   :  { %5919 = vset.pattern.permute.xlu0 %v6404_v1 }
0x1f62   :  { %v6217_v47 = vpop.eup %6216 }
0x1f63   :  { %v2805_v7 = vmul.f32 %v6217_v47, %v2793_v6  ;;  %vm2811_vm8 = vweird.f32 %v6217_v47 }
0x1f64   :  { %vm2812_vm11 = vmor %vm2810_vm10, %vm2811_vm8 }
0x1f65   :  { %v2806_v8 = vmul.f32 %v6217_v47, %v2805_v7 }
0x1f67   :  { %v2807_v9 = vmul.f32 0.5, %v2806_v8 }
0x1f69   :  { %v2808_v10 = vsub.f32 1.5, %v2807_v9 }
0x1f6b   :  { %v2809_v11 = vmul.f32 %v6217_v47, %v2808_v10 }
0x1f6d   :  { %v2813_v13 = vsel %vm2812_vm11, %v6217_v47, %v2809_v11 }
0x1f6e   :  { %v2815_v14 = vmul.f32 %v2813_v13, %v2781_v3 }
0x1f70   :  { %v2820_v15 = vmul.f32 %v6013_v57, %v2815_v14 }
0x1f72   :  { %v7098_v37 = vadd.f32 %v6014_v61, %v2820_v15 }
0x1f74   :  { %2835 = vperm.xlu2 %5913, %v7098_v37  }
0x1f7c   :  { %5915 = vset.pattern.permute.xlu2 %v6406_v4 }
0x1f7d   :  { %2846 = vperm.xlu2 %5915, %v7098_v37  }
0x1f85   :  { %5916 = vset.pattern.permute.xlu2 %v6404_v1 }
0x1f86   :  { %2859 = vperm.xlu2 %5916, %v7098_v37  }
0x1f8e   :  { %5917 = vset.pattern.permute.xlu2 %v6405_v2 }
0x1fae   :  { %v2831_v18 = vpop.permute.xlu2 %2830 }
0x1faf   :  { %v2839_v23 = vmul.f32 %v2838_v16, %v2831_v18 }
0x1fc6   :  { %v2856_v20 = vpop.permute.xlu1 %2855 }
0x1fc7   :  { %v2843_v22 = vpop.permute.xlu0 %2842  ;;  %v2863_v25 = vmul.f32 %v2862_v19, %v2856_v20 }
0x1fc8   :  { %v2850_v24 = vmul.f32 %v2849_v17, %v2843_v22 }
0x1fca   :  { %v2852_v27 = vadd.f32 %v2850_v24, %v2839_v23 }
0x1fcc   :  { %v2865_v28 = vadd.f32 %v2863_v25, %v2852_v27 }
0x1fce   :  { %v2872_v29 = vadd.f32 %v6015_v26, %v2865_v28  ;;  %v2836_v30 = vpop.permute.xlu2 %2835 }
0x1fcf   :  { %v2840_v31 = vmul.f32 %v2838_v16, %v2836_v30 }
0x1fd0   :  { %3122 = vperm.xlu0 %5919, %v2872_v29   ;;  %3021 = vperm.xlu2 %5917, %v2872_v29  }
0x1fd1   :  { %2876 = vrot.lane.b32.xlu1 %v2872_v29, %s6407_s25 }
0x1fd7   :  { %v2847_v0 = vpop.permute.xlu2 %2846 }
0x1fd8   :  { %2946 = vrot.lane.b32.xlu2 %v2872_v29, %s6408_s26  ;;  %v2851_v50 = vmul.f32 %v2849_v17, %v2847_v0 }
0x1fd9   :  { %3073 = vperm.xlu1 %5918, %v2872_v29  }
0x1fda   :  { %v2853_v34 = vadd.f32 %v2851_v50, %v2840_v31 }
0x1fe0   :  { %v2860_v32 = vpop.permute.xlu2 %2859 }
0x1fe1   :  { %v2864_v35 = vmul.f32 %v2862_v19, %v2860_v32 }
0x1fe3   :  { %v2866_v36 = vadd.f32 %v2864_v35, %v2853_v34 }
0x1fe5   :  { %v2873_v38 = vadd.f32 %v6015_v26, %v2866_v36 }
0x1fe7   :  { %3077 = vperm.xlu1 %5918, %v2873_v38   ;;  %3025 = vperm.xlu2 %5917, %v2873_v38  }
0x1fe8   :  { %2878 = vrot.lane.b32.xlu0 %v2873_v38, %s6407_s25 }
0x1fef   :  { %5920 = vset.pattern.permute.xlu2 %v6404_v1 }
0x1ff0   :  { %3126 = vperm.xlu2 %5920, %v2873_v38  }
0x1ff8   :  { %2948 = vrot.lane.b32.xlu2 %v2873_v38, %s6408_s26 }
0x202a   :  { %v3022_v48 = vpop.permute.xlu2 %3021 }
0x2032   :  { %v2947_v55 = vpop.permute.xlu2 %2946 }
0x2041   :  { %v3026_v58 = vpop.permute.xlu2 %3025 }
0x2042   :  { %v3123_v42 = vpop.permute.xlu0 %3122 }
0x2043   :  { %v2877_v40 = vpop.permute.xlu1 %2876 }
0x2044   :  { %2882 = vxpose.xlu1.b32.start.end [1/1] (short) (narrow) %v2877_v40, 8 }
0x204a   :  { %v3127_v47 = vpop.permute.xlu2 %3126 }
0x204b   :  { %v3074_v43 = vpop.permute.xlu1 %3073 }
0x2052   :  { %v2949_v9 = vpop.permute.xlu2 %2948 }
0x2059   :  { %v3078_v44 = vpop.permute.xlu1 %3077 }
0x205a   :  { %v2879_v59 = vpop.permute.xlu0 %2878 }
0x205b   :  { %2914 = vxpose.xlu0.b32.start.end [1/1] (short) (narrow) %v2879_v59, 8 }
0x20c2   :  { %5921 = vset.pattern.permute.xlu0 %v6405_v2 }
0x20e8   :  { %v2898_v45 = vpop.trf.xlu1 }
0x20e9   :  { %v3129_v3 = vperm.slane %v2898_v45, 2  ;;  %v3080_v46 = vperm.slane %v2898_v45, 1  ;;  %v3028_v39 = vperm.slane %v2898_v45, 0 }
0x20eb   :  { %v3131_v49 = vmul.f32 %v3129_v3, %v3123_v42  ;;  %v3082_v12 = vmul.f32 %v3080_v46, %v3074_v43  ;;  %v3030_v51 = vmul.f32 %v3028_v39, %v3022_v48 }
0x20ed   :  { %v3133_v52 = vsel %vm255_vm0, %v3131_v49, -inf  ;;  %v3084_v53 = vsel %vm255_vm0, %v3082_v12, -inf  ;;  %v3032_v54 = vsel %vm255_vm0, %v3030_v51, -inf }
0x20ee   :  { %3134 = vmax.xlane.f32.xlu1 %v3133_v52  ;;  %3085 = vmax.xlane.f32.xlu0 %v3084_v53 }
0x20ef   :  { %3033 = vmax.xlane.f32.xlu2 %v3032_v54 }
0x20ff   :  { %v2930_v56 = vpop.trf.xlu0 }
0x2100   :  { %v3029_v57 = vperm.slane %v2930_v56, 0  ;;  %v3081_v33 = vperm.slane %v2930_v56, 1  ;;  %v3130_v6 = vperm.slane %v2930_v56, 2 }
0x2102   :  { %v3031_v60 = vmul.f32 %v3029_v57, %v3026_v58  ;;  %v3083_v63 = vmul.f32 %v3081_v33, %v3078_v44  ;;  %v3132_v7 = vmul.f32 %v3130_v6, %v3127_v47 }
0x2104   :  { %v3035_v61 = vsel %vm255_vm0, %v3031_v60, -inf  ;;  %v3087_v5 = vsel %vm255_vm0, %v3083_v63, -inf  ;;  %v3136_v8 = vsel %vm255_vm0, %v3132_v7, -inf }
0x2105   :  { %3036 = vmax.xlane.f32.xlu2 %v3035_v61 }
0x210d   :  { %3088 = vmax.xlane.f32.xlu2 %v3087_v5 }
0x2115   :  { %3137 = vmax.xlane.f32.xlu2 %v3136_v8 }
0x2128   :  { %2984 = vxpose.xlu1.b32.start.end [1/1] (short) (narrow) %v2949_v9, 8 }
0x213e   :  { %2952 = vxpose.xlu2.b32.start.end [1/1] (short) (narrow) %v2947_v55, 8 }
0x2161   :  { %v3086_v11 = vpop.xlane.xlu0 %3085  ;;  %v3135_v16 = vpop.xlane.xlu1 %3134 }
0x2162   :  { %v3034_v10 = vpop.xlane.xlu2 %3033  ;;  %v3090_v15 = vsub.f32 %v3082_v12, %v3086_v11  ;;  %v3139_v18 = vsub.f32 %v3131_v49, %v3135_v16 }
0x2163   :  { %v3038_v13 = vsub.f32 %v3030_v51, %v3034_v10 }
0x2164   :  { %v3092_v21 = vmul.f32 1.442695, %v3090_v15  ;;  %v3141_v20 = vmul.f32 1.442695, %v3139_v18 }
0x2165   :  { %v3040_v14 = vmul.f32 1.442695, %v3038_v13 }
0x2167   :  { %6218 = vpow2.f32 %v3040_v14 }
0x2168   :  { %6220 = vpow2.f32 %v3092_v21  ;;  %v6016_v21 = vld [vmem:[%s7679_s4 + $0x5] ss:$0 sm:$0xff] }
0x2169   :  { %6222 = vpow2.f32 %v3141_v20 }
0x216d   :  { %v6219_v17 = vpop.eup %6218 }
0x216e   :  { %v3044_v19 = vsel %vm255_vm0, %v6219_v17, 0.0  ;;  %v6221_v22 = vpop.eup %6220 }
0x216f   :  { %3045 = vadd.xlane.f32.xlu0 %v3044_v19  ;;  %v3096_v23 = vsel %vm255_vm0, %v6221_v22, 0.0  ;;  %v6223_v24 = vpop.eup %6222 }
0x2170   :  { %v3145_v25 = vsel %vm255_vm0, %v6223_v24, 0.0 }
0x2177   :  { %3097 = vadd.xlane.f32.xlu0 %v3096_v23 }
0x2178   :  { %v3037_v26 = vpop.xlane.xlu2 %3036 }
0x2179   :  { %v3039_v27 = vsub.f32 %v3031_v60, %v3037_v26 }
0x217b   :  { %5924 = vset.pattern.permute.xlu1 %v6405_v2  ;;  %v3042_v28 = vmul.f32 1.442695, %v3039_v27 }
0x217d   :  { %6224 = vpow2.f32 %v3042_v28 }
0x217f   :  { %3146 = vadd.xlane.f32.xlu0 %v3145_v25 }
0x2180   :  { %v3089_v0 = vpop.xlane.xlu2 %3088 }
0x2181   :  { %v3091_v44 = vsub.f32 %v3083_v63, %v3089_v0 }
0x2183   :  { %v6225_v29 = vpop.eup %6224  ;;  %v3094_v46 = vmul.f32 1.442695, %v3091_v44 }
0x2184   :  { %v3047_v30 = vsel %vm255_vm0, %v6225_v29, 0.0 }
0x2185   :  { %6226 = vpow2.f32 %v3094_v46 }
0x2188   :  { %v3138_v32 = vpop.xlane.xlu2 %3137 }
0x2189   :  { %v3140_v48 = vsub.f32 %v3132_v7, %v3138_v32  ;;  %v5744_v7 = vld [vmem:[%s7678_s3 + $0x14] sm:$0x7] }
0x218a   :  { %v3064_v11 = vperm.slane %v5744_v7, 0  ;;  %v3116_v13 = vperm.slane %v5744_v7, 1 }
0x218b   :  { %v3143_v12 = vmul.f32 1.442695, %v3140_v48  ;;  %v6227_v51 = vpop.eup %6226 }
0x218c   :  { %v3099_v52 = vsel %vm255_vm0, %v6227_v51, 0.0 }
0x218d   :  { %6228 = vpow2.f32 %v3143_v12 }
0x2193   :  { %v6229_v53 = vpop.eup %6228 }
0x2194   :  { %v3148_v54 = vsel %vm255_vm0, %v6229_v53, 0.0 }
0x21a0   :  { %5922 = vset.pattern.permute.xlu2 %v6406_v4 }
0x21af   :  { %3048 = vadd.xlane.f32.xlu2 %v3047_v30 }
0x21cc   :  { %v3000_v50 = vpop.trf.xlu1 }
0x21cd   :  { %v3051_v31 = vperm.slane %v3000_v50, 0  ;;  %v3103_v55 = vperm.slane %v3000_v50, 1  ;;  %v3152_v58 = vperm.slane %v3000_v50, 2 }
0x21cf   :  { %v3053_v34 = vmul.f32 %v6225_v29, %v3051_v31  ;;  %v3105_v56 = vmul.f32 %v6227_v51, %v3103_v55  ;;  %v3154_v60 = vmul.f32 %v6229_v53, %v3152_v58 }
0x21d1   :  { %v3057_v35 = vsel %vm255_vm0, %v3053_v34, 0.0  ;;  %v3109_v57 = vsel %vm255_vm0, %v3105_v56, 0.0  ;;  %v3158_v61 = vsel %vm255_vm0, %v3154_v60, 0.0 }
0x21d2   :  { %3058 = vadd.xlane.f32.xlu1 %v3057_v35 }
0x21d7   :  { %v2968_v36 = vpop.trf.xlu2 }
0x21d8   :  { %v3050_v38 = vperm.slane %v2968_v36, 0  ;;  %v3102_v59 = vperm.slane %v2968_v36, 1  ;;  %v3151_v3 = vperm.slane %v2968_v36, 2 }
0x21da   :  { %v3052_v40 = vmul.f32 %v6219_v17, %v3050_v38  ;;  %v3104_v43 = vmul.f32 %v6221_v22, %v3102_v59  ;;  %v3153_v39 = vmul.f32 %v6223_v24, %v3151_v3  ;;  %v3165_v17 = vperm.slane %v5744_v7, 2 }
0x21dc   :  { %v3054_v42 = vsel %vm255_vm0, %v3052_v40, 0.0  ;;  %v3106_v45 = vsel %vm255_vm0, %v3104_v43, 0.0  ;;  %v3155_v49 = vsel %vm255_vm0, %v3153_v39, 0.0 }
0x21dd   :  { %3055 = vadd.xlane.f32.xlu0 %v3054_v42 }
0x21e2   :  { %v3046_v33 = vpop.xlane.xlu0 %3045 }
0x21e3   :  { %6230 = vrcp.f32 %v3046_v33 }
0x21e5   :  { %3107 = vadd.xlane.f32.xlu0 %v3106_v45 }
0x21e9   :  { %v6231_v47 = vpop.eup %6230 }
0x21ea   :  { %v3098_v63 = vpop.xlane.xlu0 %3097 }
0x21eb   :  { %6232 = vrcp.f32 %v3098_v63 }
0x21ed   :  { %3156 = vadd.xlane.f32.xlu0 %v3155_v49 }
0x21f1   :  { %v6233_v10 = vpop.eup %6232 }
0x21f2   :  { %v3147_v5 = vpop.xlane.xlu0 %3146 }
0x21f3   :  { %6234 = vrcp.f32 %v3147_v5 }
0x21f5   :  { %3100 = vadd.xlane.f32.xlu0 %v3099_v52 }
0x21f9   :  { %v6235_v18 = vpop.eup %6234 }
0x21fd   :  { %3149 = vadd.xlane.f32.xlu0 %v3148_v54 }
0x2205   :  { %3110 = vadd.xlane.f32.xlu0 %v3109_v57 }
0x220d   :  { %3159 = vadd.xlane.f32.xlu0 %v3158_v61 }
0x2222   :  { %v3049_v29 = vpop.xlane.xlu2 %3048 }
0x2223   :  { %6236 = vrcp.f32 %v3049_v29  ;;  %v5750_v29 = vld [vmem:[%s7686_s11 + $0xa0] sm:$0xff] }
0x2229   :  { %v6237_v50 = vpop.eup %6236 }
0x2245   :  { %v3059_v0 = vpop.xlane.xlu1 %3058 }
0x2246   :  { %v3063_v32 = vmul.f32 %v6237_v50, %v3059_v0  ;;  %v5748_v0 = vld [vmem:[%s7684_s9 + $0x14] sm:$0x7] }
0x2247   :  { %v3242_v50 = vperm.slane %v5748_v0, 0 }
0x2248   :  { %v3066_v36 = vmul.f32 %v3064_v11, %v3063_v32 }
0x2250   :  { %v3056_v6 = vpop.xlane.xlu0 %3055 }
0x2251   :  { %v3062_v9 = vmul.f32 %v6231_v47, %v3056_v6  ;;  %v6017_v47 = vld [vmem:[%s7680_s5 + $0x5] ss:$0 sm:$0xff] }
0x2253   :  { %v3065_v15 = vmul.f32 %v3064_v11, %v3062_v9  ;;  %v6018_v9 = vld [vmem:[%s7681_s6 + $0x5] ss:$0 sm:$0xff] }
0x2255   :  { %v3070_v20 = vadd.f32 %v6016_v21, %v3065_v15 }
0x2258   :  { %v3108_v8 = vpop.xlane.xlu0 %3107 }
0x2259   :  { %v3114_v14 = vmul.f32 %v6233_v10, %v3108_v8 }
0x225b   :  { %v3117_v16 = vmul.f32 %v3116_v13, %v3114_v14 }
0x225d   :  { %v3119_v23 = vadd.f32 %v3117_v16, %v3070_v20 }
0x2260   :  { %v3157_v19 = vpop.xlane.xlu0 %3156 }
0x2261   :  { %v3163_v22 = vmul.f32 %v6235_v18, %v3157_v19 }
0x2263   :  { %v3166_v24 = vmul.f32 %v3165_v17, %v3163_v22 }
0x2265   :  { %v3168_v25 = vadd.f32 %v3166_v24, %v3119_v23 }
0x2267   :  { %v3170_v26 = vadd.f32 %v3168_v25, %v7090_v62  ;;  %v3071_v62 = vadd.f32 %v6016_v21, %v3066_v36 }
0x2268   :  { %v3101_v27 = vpop.xlane.xlu0 %3100 }
0x2269   :  { %v3176_v28 = vsel %vm398_vm1, %v3170_v26, 0.0  ;;  %6238 = vrcp.f32 %v3101_v27  ;;  %v5752_v27 = vld [vmem:[%s7686_s11 + $0xb0] sm:$0xff] }
0x226a   :  { %3177 = vadd.xlane.f32.xlu0 %v3176_v28  ;;  %v5751_v28 = vld [vmem:[%s7686_s11 + $0xa8] sm:$0xff] }
0x226f   :  { %v6239_v34 = vpop.eup %6238 }
0x2270   :  { %v3150_v30 = vpop.xlane.xlu0 %3149 }
0x2271   :  { %6240 = vrcp.f32 %v3150_v30 }
0x2277   :  { %v6241_v40 = vpop.eup %6240 }
0x2278   :  { %v3111_v31 = vpop.xlane.xlu0 %3110 }
0x2279   :  { %v3115_v35 = vmul.f32 %v6239_v34, %v3111_v31  ;;  %v3253_v31 = vperm.slane %v5748_v0, 1 }
0x227b   :  { %v3118_v38 = vmul.f32 %v3116_v13, %v3115_v35  ;;  %v3266_v35 = vperm.slane %v5748_v0, 2 }
0x227d   :  { %v3120_v43 = vadd.f32 %v3118_v38, %v3071_v62 }
0x2280   :  { %v3160_v42 = vpop.xlane.xlu0 %3159 }
0x2281   :  { %v3164_v59 = vmul.f32 %v6241_v40, %v3160_v42  ;;  %v6019_v42 = vld [vmem:[%s7685_s10 + $0x5] ss:$0 sm:$0xff] }
0x2283   :  { %v3167_v44 = vmul.f32 %v3165_v17, %v3164_v59 }
0x2285   :  { %v3169_v45 = vadd.f32 %v3167_v44, %v3120_v43 }
0x2287   :  { %v3171_v3 = vadd.f32 %v3169_v45, %v7098_v37 }
0x2289   :  { %v3179_v46 = vsel %vm398_vm1, %v3171_v3, 0.0 }
0x228a   :  { %3180 = vadd.xlane.f32.xlu0 %v3179_v46 }
0x22dd   :  { %v3178_v39 = vpop.xlane.xlu0 %3177 }
0x22de   :  { %v3182_v48 = vmul.f32 %v3178_v39, %v6566_v41 }
0x22e0   :  { %v3184_v49 = vsub.f32 %v3170_v26, %v3182_v48  ;;  %v5753_v26 = vld [vmem:[%s7686_s11 + $0xb8] sm:$0xff] }
0x22e1   :  { %3303 = vmatpush.msrb.mxu1 %v5753_v26  ;;  %v6022_v26 = vld [vmem:[%s7683_s8 + $0x5] ss:$0 sm:$0xff] }
0x22e2   :  { %v3186_v12 = vmul.f32 %v3184_v49, %v3184_v49 }
0x22e3   :  { %3304 = vmatpush.msrb.mxu1 %v5752_v27 }
0x22e4   :  { %v3188_v51 = vsel %vm398_vm1, %v3186_v12, 0.0 }
0x22e5   :  { %3189 = vadd.xlane.f32.xlu0 %v3188_v51  ;;  %3305 = vmatpush.msrb.mxu1 %v5751_v28 }
0x22e7   :  { %3306 = vmatpush.msrb.mxu1 %v5750_v29 }
0x22fd   :  { %v3181_v52 = vpop.xlane.xlu0 %3180 }
0x22fe   :  { %v3183_v53 = vmul.f32 %v3181_v52, %v6566_v41 }
0x2300   :  { %v3185_v54 = vsub.f32 %v3171_v3, %v3183_v53 }
0x2302   :  { %v3187_v55 = vmul.f32 %v3185_v54, %v3185_v54 }
0x2304   :  { %v3191_v56 = vsel %vm398_vm1, %v3187_v55, 0.0 }
0x2305   :  { %3192 = vadd.xlane.f32.xlu0 %v3191_v56 }
0x2358   :  { %v3190_v37 = vpop.xlane.xlu0 %3189 }
0x2359   :  { %v3194_v57 = vmul.f32 %v3190_v37, %v6566_v41 }
0x235b   :  { %v3196_v58 = vadd.f32 1e-05, %v3194_v57 }
0x235d   :  { %6242 = vrsqrt.f32 %v3196_v58  ;;  %vm3204_vm13 = vweird.f32 %v3196_v58 }
0x2363   :  { %v6243_v60 = vpop.eup %6242 }
0x2364   :  { %v3199_v61 = vmul.f32 %v6243_v60, %v3196_v58  ;;  %vm3205_vm12 = vweird.f32 %v6243_v60 }
0x2365   :  { %vm3206_vm14 = vmor %vm3204_vm13, %vm3205_vm12 }
0x2366   :  { %v3200_v33 = vmul.f32 %v6243_v60, %v3199_v61 }
0x2368   :  { %v3201_v63 = vmul.f32 0.5, %v3200_v33 }
0x236a   :  { %v3202_v5 = vsub.f32 1.5, %v3201_v63 }
0x236c   :  { %v3203_v6 = vmul.f32 %v6243_v60, %v3202_v5 }
0x236e   :  { %v3207_v7 = vsel %vm3206_vm14, %v6243_v60, %v3203_v6 }
0x236f   :  { %v3218_v8 = vmul.f32 %v3207_v7, %v3184_v49 }
0x2371   :  { %v3223_v10 = vmul.f32 %v6017_v47, %v3218_v8 }
0x2373   :  { %v7159_v11 = vadd.f32 %v6018_v9, %v3223_v10 }
0x2375   :  { %3246 = vperm.xlu2 %5922, %v7159_v11   ;;  %3234 = vperm.xlu0 %5921, %v7159_v11  }
0x2378   :  { %v3193_v13 = vpop.xlane.xlu0 %3192 }
0x2379   :  { %v3195_v14 = vmul.f32 %v3193_v13, %v6566_v41 }
0x237b   :  { %v3197_v15 = vadd.f32 1e-05, %v3195_v14 }
0x237d   :  { %6244 = vrsqrt.f32 %v3197_v15  ;;  %5923 = vset.pattern.permute.xlu0 %v6404_v1  ;;  %vm3214_vm2 = vweird.f32 %v3197_v15 }
0x237e   :  { %3259 = vperm.xlu0 %5923, %v7159_v11  }
0x2383   :  { %v6245_v21 = vpop.eup %6244 }
0x2384   :  { %v3209_v16 = vmul.f32 %v6245_v21, %v3197_v15  ;;  %vm3215_vm15 = vweird.f32 %v6245_v21 }
0x2385   :  { %vm3216_vm3 = vmor %vm3214_vm2, %vm3215_vm15 }
0x2386   :  { %v3210_v17 = vmul.f32 %v6245_v21, %v3209_v16 }
0x2388   :  { %v3211_v18 = vmul.f32 0.5, %v3210_v17 }
0x238a   :  { %v3212_v19 = vsub.f32 1.5, %v3211_v18 }
0x238c   :  { %v3213_v20 = vmul.f32 %v6245_v21, %v3212_v19 }
0x238e   :  { %v3217_v22 = vsel %vm3216_vm3, %v6245_v21, %v3213_v20 }
0x238f   :  { %v3219_v23 = vmul.f32 %v3217_v22, %v3185_v54  ;;  %v6020_v54 = vld [vmem:[%s7687_s12 + $0x5] ss:$0 sm:$0xff] }
0x2391   :  { %v3224_v24 = vmul.f32 %v6017_v47, %v3219_v23  ;;  %v6021_v23 = vld [vmem:[%s7682_s7 + $0x5] ss:$0 sm:$0xff] }
0x2393   :  { %v3229_v25 = vadd.f32 %v6018_v9, %v3224_v24 }
0x2395   :  { %3263 = vperm.xlu0 %5923, %v3229_v25   ;;  %3250 = vperm.xlu2 %5922, %v3229_v25  }
0x2396   :  { %3239 = vperm.xlu1 %5924, %v3229_v25  }
0x239d   :  { %5925 = vset.pattern.permute.xlu0 %v6405_v2 }
0x239e   :  { %5926 = vset.pattern.permute.xlu1 %v6404_v1 }
0x23cf   :  { %v3247_v32 = vpop.permute.xlu2 %3246 }
0x23d0   :  { %v3254_v36 = vmul.f32 %v3253_v31, %v3247_v32 }
0x23e7   :  { %v3235_v30 = vpop.permute.xlu0 %3234 }
0x23e8   :  { %v3243_v34 = vmul.f32 %v3242_v50, %v3235_v30 }
0x23ea   :  { %v3256_v40 = vadd.f32 %v3254_v36, %v3243_v34 }
0x23ef   :  { %v3251_v45 = vpop.permute.xlu2 %3250 }
0x23f0   :  { %v3260_v38 = vpop.permute.xlu0 %3259  ;;  %v3255_v39 = vmul.f32 %v3253_v31, %v3251_v45 }
0x23f1   :  { %v3267_v62 = vmul.f32 %v3266_v35, %v3260_v38 }
0x23f3   :  { %v3269_v59 = vadd.f32 %v3267_v62, %v3256_v40 }
0x23f5   :  { %v3276_v43 = vadd.f32 %v6019_v42, %v3269_v59  ;;  %v5759_v59 = vld [vmem:[%s7676_s1 + $0x18] sm:$0x7] }
0x23f7   :  { %v3278_v44 = vmax.f32 %v3276_v43, 0.0  ;;  %v3404_v43 = vperm.slane %v5759_v59, 1 }
0x23f9   :  { %5754 = vmatmul.msk.f32.vlgmr.msrb.gmra.mxu1 %vm512_vm9, %v3278_v44  ;;  %v3393_v44 = vperm.slane %v5759_v59, 0 }
0x2407   :  { %v3264_v46 = vpop.permute.xlu0 %3263 }
0x2408   :  { %v3240_v3 = vpop.permute.xlu1 %3239  ;;  %v3268_v12 = vmul.f32 %v3266_v35, %v3264_v46 }
0x2409   :  { %v3244_v48 = vmul.f32 %v3242_v50, %v3240_v3  ;;  %v3417_v3 = vperm.slane %v5759_v59, 2 }
0x240b   :  { %v3257_v49 = vadd.f32 %v3255_v39, %v3244_v48 }
0x240d   :  { %v3270_v51 = vadd.f32 %v3268_v12, %v3257_v49 }
0x240f   :  { %v3277_v52 = vadd.f32 %v6019_v42, %v3270_v51  ;;  %v6023_v51 = vld [vmem:[%s7677_s2 + $0x6] ss:$0 sm:$0xff] }
0x2411   :  { %v3279_v53 = vmax.f32 %v3277_v52, 0.0 }
0x2413   :  { %5755 = vmatmul.msk.f32.gmra.mxu1 %vm512_vm9, %v3279_v53 }
0x2476   :  { %v3308_v55 = vpop.f32.mrf.mxu1 }
0x2477   :  { %v3319_v56 = vadd.f32 %v6020_v54, %v3308_v55 }
0x2479   :  { %v3321_v37 = vadd.f32 %v3319_v56, %v7159_v11 }
0x247b   :  { %v3327_v57 = vsel %vm398_vm1, %v3321_v37, 0.0 }
0x247c   :  { %3328 = vadd.xlane.f32.xlu2 %v3327_v57 }
0x2490   :  { %v3311_v58 = vpop.f32.mrf.mxu1 }
0x2491   :  { %v3320_v60 = vadd.f32 %v6020_v54, %v3311_v58 }
0x2493   :  { %v3322_v61 = vadd.f32 %v3320_v60, %v3229_v25 }
0x2495   :  { %v3330_v33 = vsel %vm398_vm1, %v3322_v61, 0.0 }
0x2496   :  { %3331 = vadd.xlane.f32.xlu0 %v3330_v33 }
0x24ef   :  { %v3329_v63 = vpop.xlane.xlu2 %3328 }
0x24f0   :  { %v3333_v5 = vmul.f32 %v3329_v63, %v6566_v41 }
0x24f2   :  { %v3335_v6 = vsub.f32 %v3321_v37, %v3333_v5 }
0x24f4   :  { %v3337_v47 = vmul.f32 %v3335_v6, %v3335_v6 }
0x24f6   :  { %v3339_v7 = vsel %vm398_vm1, %v3337_v47, 0.0 }
0x24f7   :  { %3340 = vadd.xlane.f32.xlu1 %v3339_v7 }
0x2509   :  { %v3332_v8 = vpop.xlane.xlu0 %3331 }
0x250a   :  { %v3334_v9 = vmul.f32 %v3332_v8, %v6566_v41 }
0x250c   :  { %v3336_v10 = vsub.f32 %v3322_v61, %v3334_v9 }
0x250e   :  { %v3338_v11 = vmul.f32 %v3336_v10, %v3336_v10 }
0x2510   :  { %v3342_v13 = vsel %vm398_vm1, %v3338_v11, 0.0 }
0x2511   :  { %3343 = vadd.xlane.f32.xlu2 %v3342_v13 }
0x256a   :  { %v3341_v14 = vpop.xlane.xlu1 %3340 }
0x256b   :  { %v3345_v15 = vmul.f32 %v3341_v14, %v6566_v41 }
0x256d   :  { %v3347_v21 = vadd.f32 1e-05, %v3345_v15 }
0x256f   :  { %6246 = vrsqrt.f32 %v3347_v21  ;;  %vm3355_vm5 = vweird.f32 %v3347_v21 }
0x2575   :  { %v6247_v16 = vpop.eup %6246 }
0x2576   :  { %v3350_v17 = vmul.f32 %v6247_v16, %v3347_v21  ;;  %vm3356_vm4 = vweird.f32 %v6247_v16 }
0x2577   :  { %vm3357_vm6 = vmor %vm3355_vm5, %vm3356_vm4 }
0x2578   :  { %v3351_v18 = vmul.f32 %v6247_v16, %v3350_v17 }
0x257a   :  { %v3352_v19 = vmul.f32 0.5, %v3351_v18 }
0x257c   :  { %v3353_v20 = vsub.f32 1.5, %v3352_v19 }
0x257e   :  { %v3354_v22 = vmul.f32 %v6247_v16, %v3353_v20 }
0x2580   :  { %v3358_v24 = vsel %vm3357_vm6, %v6247_v16, %v3354_v22 }
0x2581   :  { %v3369_v25 = vmul.f32 %v3358_v24, %v3335_v6 }
0x2583   :  { %v3374_v27 = vmul.f32 %v6021_v23, %v3369_v25 }
0x2584   :  { %v3344_v28 = vpop.xlane.xlu2 %3343 }
0x2585   :  { %v3346_v29 = vmul.f32 %v3344_v28, %v6566_v41  ;;  %v7206_v30 = vadd.f32 %v6022_v26, %v3374_v27 }
0x2587   :  { %v3348_v0 = vadd.f32 1e-05, %v3346_v29  ;;  %3410 = vperm.xlu1 %5926, %v7206_v30   ;;  %3385 = vperm.xlu0 %5925, %v7206_v30  }
0x2588   :  { %3397 = vperm.xlu2 %5922, %v7206_v30  }
0x2589   :  { %6248 = vrsqrt.f32 %v3348_v0  ;;  %vm3365_vm8 = vweird.f32 %v3348_v0 }
0x258f   :  { %v6249_v50 = vpop.eup %6248  ;;  %5928 = vset.pattern.permute.xlu1 %v6406_v4  ;;  %5931 = vset.pattern.permute.xlu0 %v6404_v1 }
0x2590   :  { %v3360_v31 = vmul.f32 %v6249_v50, %v3348_v0  ;;  %5927 = vset.pattern.permute.xlu2 %v6405_v2  ;;  %vm3366_vm7 = vweird.f32 %v6249_v50 }
0x2591   :  { %vm3367_vm10 = vmor %vm3365_vm8, %vm3366_vm7 }
0x2592   :  { %v3361_v32 = vmul.f32 %v6249_v50, %v3360_v31 }
0x2594   :  { %v3362_v34 = vmul.f32 0.5, %v3361_v32 }
0x2596   :  { %v3363_v35 = vsub.f32 1.5, %v3362_v34 }
0x2598   :  { %v3364_v36 = vmul.f32 %v6249_v50, %v3363_v35 }
0x259a   :  { %v3368_v38 = vsel %vm3367_vm10, %v6249_v50, %v3364_v36 }
0x259b   :  { %v3370_v40 = vmul.f32 %v3368_v38, %v3336_v10 }
0x259d   :  { %v3375_v42 = vmul.f32 %v6021_v23, %v3370_v40 }
0x259f   :  { %v7214_v62 = vadd.f32 %v6022_v26, %v3375_v42 }
0x25a1   :  { %3401 = vperm.xlu1 %5928, %v7214_v62   ;;  %3390 = vperm.xlu2 %5927, %v7214_v62  }
0x25a9   :  { %5929 = vset.pattern.permute.xlu2 %v6404_v1 }
0x25aa   :  { %3414 = vperm.xlu2 %5929, %v7214_v62  }
0x25b2   :  { %5930 = vset.pattern.permute.xlu2 %v6405_v2 }
0x25e2   :  { %v3398_v45 = vpop.permute.xlu2 %3397 }
0x25e3   :  { %v3405_v48 = vmul.f32 %v3404_v43, %v3398_v45 }
0x25f9   :  { %v3411_v46 = vpop.permute.xlu1 %3410  ;;  %v3386_v39 = vpop.permute.xlu0 %3385 }
0x25fa   :  { %v3394_v49 = vmul.f32 %v3393_v44, %v3386_v39  ;;  %v3418_v12 = vmul.f32 %v3417_v3, %v3411_v46 }
0x25fb   :  { %v3391_v55 = vpop.permute.xlu2 %3390 }
0x25fc   :  { %v3407_v52 = vadd.f32 %v3405_v48, %v3394_v49  ;;  %v3395_v57 = vmul.f32 %v3393_v44, %v3391_v55 }
0x25fe   :  { %v3420_v53 = vadd.f32 %v3418_v12, %v3407_v52 }
0x2600   :  { %v3427_v54 = vadd.f32 %v6023_v51, %v3420_v53 }
0x2602   :  { %3677 = vperm.xlu0 %5931, %v3427_v54   ;;  %3576 = vperm.xlu2 %5930, %v3427_v54  }
0x2603   :  { %3431 = vrot.lane.b32.xlu1 %v3427_v54, %s6407_s25 }
0x2604   :  { %v3415_v56 = vpop.permute.xlu2 %3414 }
0x2605   :  { %v3419_v60 = vmul.f32 %v3417_v3, %v3415_v56 }
0x260a   :  { %3501 = vrot.lane.b32.xlu2 %v3427_v54, %s6408_s26 }
0x260b   :  { %3628 = vperm.xlu1 %5928, %v3427_v54  }
0x2613   :  { %v3402_v37 = vpop.permute.xlu1 %3401 }
0x2614   :  { %v3406_v58 = vmul.f32 %v3404_v43, %v3402_v37 }
0x2616   :  { %v3408_v61 = vadd.f32 %v3406_v58, %v3395_v57 }
0x2618   :  { %v3421_v33 = vadd.f32 %v3419_v60, %v3408_v61 }
0x261a   :  { %v3428_v63 = vadd.f32 %v6023_v51, %v3421_v33 }
0x261c   :  { %3433 = vrot.lane.b32.xlu0 %v3428_v63, %s6407_s25  ;;  %3580 = vperm.xlu2 %5930, %v3428_v63  }
0x261d   :  { %3632 = vperm.xlu1 %5928, %v3428_v63  }
0x2624   :  { %5932 = vset.pattern.permute.xlu2 %v6404_v1 }
0x2625   :  { %3681 = vperm.xlu2 %5932, %v3428_v63  }
0x262d   :  { %3503 = vrot.lane.b32.xlu2 %v3428_v63, %s6408_s26 }
0x265c   :  { %v3577_v14 = vpop.permute.xlu2 %3576 }
0x2664   :  { %v3502_v20 = vpop.permute.xlu2 %3501 }
0x2674   :  { %v3678_v6 = vpop.permute.xlu0 %3677 }
0x2675   :  { %v3432_v5 = vpop.permute.xlu1 %3431 }
0x2676   :  { %3437 = vxpose.xlu1.b32.start.end [1/1] (short) (narrow) %v3432_v5, 8  ;;  %v3581_v24 = vpop.permute.xlu2 %3580 }
0x267d   :  { %v3629_v7 = vpop.permute.xlu1 %3628 }
0x267f   :  { %v3682_v50 = vpop.permute.xlu2 %3681 }
0x2687   :  { %v3504_v34 = vpop.permute.xlu2 %3503 }
0x268e   :  { %v3434_v47 = vpop.permute.xlu0 %3433 }
0x268f   :  { %3469 = vxpose.xlu0.b32.start.end [1/1] (short) (narrow) %v3434_v47, 8  ;;  %v3633_v8 = vpop.permute.xlu1 %3632 }
0x26f6   :  { %5933 = vset.pattern.permute.xlu0 %v6405_v2 }
0x271a   :  { %v3453_v9 = vpop.trf.xlu1 }
0x271b   :  { %v3684_v10 = vperm.slane %v3453_v9, 2  ;;  %v3635_v11 = vperm.slane %v3453_v9, 1  ;;  %v3583_v13 = vperm.slane %v3453_v9, 0 }
0x271d   :  { %v3686_v15 = vmul.f32 %v3684_v10, %v3678_v6  ;;  %v3637_v21 = vmul.f32 %v3635_v11, %v3629_v7  ;;  %v3585_v16 = vmul.f32 %v3583_v13, %v3577_v14 }
0x271f   :  { %v3688_v17 = vsel %vm255_vm0, %v3686_v15, -inf  ;;  %v3639_v18 = vsel %vm255_vm0, %v3637_v21, -inf  ;;  %v3587_v19 = vsel %vm255_vm0, %v3585_v16, -inf }
0x2720   :  { %3689 = vmax.xlane.f32.xlu1 %v3688_v17  ;;  %3640 = vmax.xlane.f32.xlu0 %v3639_v18 }
0x2721   :  { %3588 = vmax.xlane.f32.xlu2 %v3587_v19 }
0x2733   :  { %v3485_v22 = vpop.trf.xlu0 }
0x2734   :  { %v3584_v23 = vperm.slane %v3485_v22, 0  ;;  %v3636_v27 = vperm.slane %v3485_v22, 1  ;;  %v3685_v0 = vperm.slane %v3485_v22, 2 }
0x2736   :  { %v3586_v25 = vmul.f32 %v3584_v23, %v3581_v24  ;;  %v3638_v28 = vmul.f32 %v3636_v27, %v3633_v8  ;;  %v3687_v31 = vmul.f32 %v3685_v0, %v3682_v50  ;;  %v5761_v50 = vld [vmem:[%s7678_s3 + $0x18] sm:$0x7] }
0x2738   :  { %v3590_v26 = vsel %vm255_vm0, %v3586_v25, -inf  ;;  %v3642_v29 = vsel %vm255_vm0, %v3638_v28, -inf  ;;  %v3691_v32 = vsel %vm255_vm0, %v3687_v31, -inf }
0x2739   :  { %3591 = vmax.xlane.f32.xlu2 %v3590_v26 }
0x2741   :  { %3643 = vmax.xlane.f32.xlu2 %v3642_v29 }
0x2749   :  { %3692 = vmax.xlane.f32.xlu2 %v3691_v32 }
0x275a   :  { %3539 = vxpose.xlu1.b32.start.end [1/1] (short) (narrow) %v3504_v34, 8  ;;  %v3619_v34 = vperm.slane %v5761_v50, 0 }
0x2772   :  { %3507 = vxpose.xlu2.b32.start.end [1/1] (short) (narrow) %v3502_v20, 8 }
0x2793   :  { %v3641_v36 = vpop.xlane.xlu0 %3640  ;;  %v3690_v43 = vpop.xlane.xlu1 %3689 }
0x2794   :  { %v3589_v35 = vpop.xlane.xlu2 %3588  ;;  %v3645_v42 = vsub.f32 %v3637_v21, %v3641_v36  ;;  %v3694_v45 = vsub.f32 %v3686_v15, %v3690_v43 }
0x2795   :  { %v3593_v38 = vsub.f32 %v3585_v16, %v3589_v35 }
0x2796   :  { %v3647_v59 = vmul.f32 1.442695, %v3645_v42  ;;  %v3696_v46 = vmul.f32 1.442695, %v3694_v45  ;;  %v6024_v42 = vld [vmem:[%s7679_s4 + $0x6] ss:$0 sm:$0xff] }
0x2797   :  { %v3595_v40 = vmul.f32 1.442695, %v3593_v38  ;;  %v3671_v38 = vperm.slane %v5761_v50, 1 }
0x2799   :  { %6250 = vpow2.f32 %v3595_v40 }
0x279a   :  { %6252 = vpow2.f32 %v3647_v59 }
0x279b   :  { %6254 = vpow2.f32 %v3696_v46 }
0x279f   :  { %v6251_v44 = vpop.eup %6250 }
0x27a0   :  { %v3599_v3 = vsel %vm255_vm0, %v6251_v44, 0.0  ;;  %v6253_v39 = vpop.eup %6252 }
0x27a1   :  { %3600 = vadd.xlane.f32.xlu0 %v3599_v3  ;;  %v3651_v48 = vsel %vm255_vm0, %v6253_v39, 0.0  ;;  %v6255_v12 = vpop.eup %6254 }
0x27a2   :  { %v3700_v51 = vsel %vm255_vm0, %v6255_v12, 0.0 }
0x27a9   :  { %3652 = vadd.xlane.f32.xlu0 %v3651_v48 }
0x27ac   :  { %v3592_v49 = vpop.xlane.xlu2 %3591 }
0x27ad   :  { %5935 = vset.pattern.permute.xlu1 %v6404_v1  ;;  %v3594_v57 = vsub.f32 %v3586_v25, %v3592_v49 }
0x27af   :  { %v3597_v58 = vmul.f32 1.442695, %v3594_v57 }
0x27b1   :  { %3701 = vadd.xlane.f32.xlu0 %v3700_v51 }
0x27b4   :  { %v3644_v52 = vpop.xlane.xlu2 %3643 }
0x27b5   :  { %v3646_v8 = vsub.f32 %v3638_v28, %v3644_v52 }
0x27b7   :  { %v3649_v11 = vmul.f32 1.442695, %v3646_v8 }
0x27bc   :  { %v3693_v53 = vpop.xlane.xlu2 %3692 }
0x27bd   :  { %v3695_v54 = vsub.f32 %v3687_v31, %v3693_v53 }
0x27bf   :  { %v3698_v55 = vmul.f32 1.442695, %v3695_v54 }
0x27c1   :  { %6256 = vpow2.f32 %v3698_v55 }
0x27c2   :  { %6258 = vpow2.f32 %v3597_v58 }
0x27c3   :  { %6260 = vpow2.f32 %v3649_v11 }
0x27c7   :  { %v6257_v56 = vpop.eup %6256 }
0x27c8   :  { %v3703_v37 = vsel %vm255_vm0, %v6257_v56, 0.0  ;;  %v6259_v60 = vpop.eup %6258 }
0x27c9   :  { %3704 = vadd.xlane.f32.xlu1 %v3703_v37  ;;  %v3602_v61 = vsel %vm255_vm0, %v6259_v60, 0.0  ;;  %v6261_v15 = vpop.eup %6260 }
0x27ca   :  { %v3654_v16 = vsel %vm255_vm0, %v6261_v15, 0.0 }
0x27d4   :  { %5934 = vset.pattern.permute.xlu2 %v6406_v4 }
0x27e3   :  { %3603 = vadd.xlane.f32.xlu2 %v3602_v61 }
0x27fe   :  { %v3555_v21 = vpop.trf.xlu1 }
0x27ff   :  { %v3606_v17 = vperm.slane %v3555_v21, 0  ;;  %v3658_v20 = vperm.slane %v3555_v21, 1  ;;  %v3707_v24 = vperm.slane %v3555_v21, 2 }
0x2801   :  { %v3608_v18 = vmul.f32 %v6259_v60, %v3606_v17  ;;  %v3660_v22 = vmul.f32 %v6261_v15, %v3658_v20  ;;  %v3709_v25 = vmul.f32 %v6257_v56, %v3707_v24 }
0x2803   :  { %v3612_v19 = vsel %vm255_vm0, %v3608_v18, 0.0  ;;  %v3664_v23 = vsel %vm255_vm0, %v3660_v22, 0.0  ;;  %v3713_v26 = vsel %vm255_vm0, %v3709_v25, 0.0 }
0x280b   :  { %v3523_v33 = vpop.trf.xlu2 }
0x280c   :  { %v3605_v63 = vperm.slane %v3523_v33, 0  ;;  %v3657_v47 = vperm.slane %v3523_v33, 1  ;;  %v3706_v10 = vperm.slane %v3523_v33, 2 }
0x280e   :  { %v3607_v5 = vmul.f32 %v6251_v44, %v3605_v63  ;;  %v3659_v7 = vmul.f32 %v6253_v39, %v3657_v47  ;;  %v3708_v13 = vmul.f32 %v6255_v12, %v3706_v10  ;;  %v3720_v44 = vperm.slane %v5761_v50, 2  ;;  %v6025_v50 = vld [vmem:[%s7680_s5 + $0x6] ss:$0 sm:$0xff] }
0x2810   :  { %v3609_v6 = vsel %vm255_vm0, %v3607_v5, 0.0  ;;  %v3661_v9 = vsel %vm255_vm0, %v3659_v7, 0.0  ;;  %v3710_v14 = vsel %vm255_vm0, %v3708_v13, 0.0 }
0x2811   :  { %3610 = vadd.xlane.f32.xlu0 %v3609_v6 }
0x2814   :  { %v3601_v27 = vpop.xlane.xlu0 %3600 }
0x2815   :  { %6262 = vrcp.f32 %v3601_v27 }
0x2819   :  { %3662 = vadd.xlane.f32.xlu0 %v3661_v9 }
0x281b   :  { %v6263_v31 = vpop.eup %6262 }
0x281c   :  { %v3653_v28 = vpop.xlane.xlu0 %3652 }
0x281d   :  { %6264 = vrcp.f32 %v3653_v28 }
0x2821   :  { %3711 = vadd.xlane.f32.xlu0 %v3710_v14 }
0x2823   :  { %v6265_v36 = vpop.eup %6264 }
0x2824   :  { %v3702_v29 = vpop.xlane.xlu0 %3701 }
0x2825   :  { %6266 = vrcp.f32 %v3702_v29 }
0x2829   :  { %3655 = vadd.xlane.f32.xlu0 %v3654_v16 }
0x282b   :  { %v6267_v45 = vpop.eup %6266 }
0x2831   :  { %3613 = vadd.xlane.f32.xlu0 %v3612_v19 }
0x2839   :  { %3665 = vadd.xlane.f32.xlu0 %v3664_v23 }
0x283c   :  { %v3705_v56 = vpop.xlane.xlu1 %3704 }
0x2841   :  { %3714 = vadd.xlane.f32.xlu0 %v3713_v26 }
0x2856   :  { %v3604_v54 = vpop.xlane.xlu2 %3603 }
0x2857   :  { %6268 = vrcp.f32 %v3604_v54  ;;  %v5767_v54 = vld [vmem:[%s7686_s11 + $0xc0] sm:$0xff] }
0x285d   :  { %v6269_v37 = vpop.eup %6268 }
0x2884   :  { %v3611_v0 = vpop.xlane.xlu0 %3610 }
0x2885   :  { %v3617_v35 = vmul.f32 %v6263_v31, %v3611_v0 }
0x2887   :  { %v3620_v59 = vmul.f32 %v3619_v34, %v3617_v35 }
0x2889   :  { %v3625_v46 = vadd.f32 %v6024_v42, %v3620_v59 }
0x288c   :  { %v3663_v32 = vpop.xlane.xlu0 %3662 }
0x288d   :  { %v3669_v40 = vmul.f32 %v6265_v36, %v3663_v32 }
0x288f   :  { %v3672_v43 = vmul.f32 %v3671_v38, %v3669_v40 }
0x2891   :  { %v3674_v48 = vadd.f32 %v3672_v43, %v3625_v46 }
0x2894   :  { %v3712_v3 = vpop.xlane.xlu0 %3711 }
0x2895   :  { %v3718_v39 = vmul.f32 %v6267_v45, %v3712_v3 }
0x2897   :  { %v3721_v49 = vmul.f32 %v3720_v44, %v3718_v39 }
0x2899   :  { %v3723_v12 = vadd.f32 %v3721_v49, %v3674_v48 }
0x289b   :  { %v3725_v51 = vadd.f32 %v3723_v12, %v7206_v30 }
0x289c   :  { %v3656_v52 = vpop.xlane.xlu0 %3655 }
0x289d   :  { %v3731_v53 = vsel %vm398_vm1, %v3725_v51, 0.0  ;;  %6270 = vrcp.f32 %v3656_v52  ;;  %v5769_v52 = vld [vmem:[%s7686_s11 + $0xd0] sm:$0xff] }
0x289e   :  { %3732 = vadd.xlane.f32.xlu0 %v3731_v53  ;;  %6272 = vrcp.f32 %v3705_v56  ;;  %v5768_v53 = vld [vmem:[%s7686_s11 + $0xc8] sm:$0xff] }
0x28a3   :  { %v6271_v60 = vpop.eup %6270 }
0x28a4   :  { %v3614_v55 = vpop.xlane.xlu0 %3613  ;;  %v6273_v5 = vpop.eup %6272 }
0x28a5   :  { %v3618_v58 = vmul.f32 %v6269_v37, %v3614_v55  ;;  %v5765_v55 = vld [vmem:[%s7684_s9 + $0x18] sm:$0x7] }
0x28a6   :  { %v3808_v56 = vperm.slane %v5765_v55, 1  ;;  %v3797_v37 = vperm.slane %v5765_v55, 0 }
0x28a7   :  { %v3621_v33 = vmul.f32 %v3619_v34, %v3618_v58  ;;  %v6026_v34 = vld [vmem:[%s7681_s6 + $0x6] ss:$0 sm:$0xff]  ;;  %v3821_v58 = vperm.slane %v5765_v55, 2 }
0x28a9   :  { %v3626_v30 = vadd.f32 %v6024_v42, %v3621_v33 }
0x28ac   :  { %v3666_v57 = vpop.xlane.xlu0 %3665 }
0x28ad   :  { %v3670_v61 = vmul.f32 %v6271_v60, %v3666_v57 }
0x28af   :  { %v3673_v63 = vmul.f32 %v3671_v38, %v3670_v61 }
0x28b1   :  { %v3675_v7 = vadd.f32 %v3673_v63, %v3626_v30 }
0x28b4   :  { %v3715_v6 = vpop.xlane.xlu0 %3714 }
0x28b5   :  { %v3719_v47 = vmul.f32 %v6273_v5, %v3715_v6  ;;  %v6027_v6 = vld [vmem:[%s7685_s10 + $0x6] ss:$0 sm:$0xff] }
0x28b7   :  { %v3722_v8 = vmul.f32 %v3720_v44, %v3719_v47 }
0x28b9   :  { %v3724_v9 = vadd.f32 %v3722_v8, %v3675_v7 }
0x28bb   :  { %v3726_v10 = vadd.f32 %v3724_v9, %v7214_v62 }
0x28bd   :  { %v3734_v11 = vsel %vm398_vm1, %v3726_v10, 0.0 }
0x28be   :  { %3735 = vadd.xlane.f32.xlu0 %v3734_v11 }
0x2911   :  { %v3733_v13 = vpop.xlane.xlu0 %3732 }
0x2912   :  { %v3737_v14 = vmul.f32 %v3733_v13, %v6566_v41 }
0x2914   :  { %v3739_v15 = vsub.f32 %v3725_v51, %v3737_v14  ;;  %v5770_v51 = vld [vmem:[%s7686_s11 + $0xd8] sm:$0xff] }
0x2915   :  { %3858 = vmatpush.msra.mxu2 %v5770_v51  ;;  %v6030_v51 = vld [vmem:[%s7683_s8 + $0x6] ss:$0 sm:$0xff] }
0x2916   :  { %v3741_v21 = vmul.f32 %v3739_v15, %v3739_v15 }
0x2917   :  { %3859 = vmatpush.msra.mxu2 %v5769_v52 }
0x2918   :  { %v3743_v16 = vsel %vm398_vm1, %v3741_v21, 0.0 }
0x2919   :  { %3744 = vadd.xlane.f32.xlu0 %v3743_v16  ;;  %3860 = vmatpush.msra.mxu2 %v5768_v53 }
0x291b   :  { %3861 = vmatpush.msra.mxu2 %v5767_v54 }
0x2931   :  { %v3736_v17 = vpop.xlane.xlu0 %3735 }
0x2932   :  { %v3738_v18 = vmul.f32 %v3736_v17, %v6566_v41 }
0x2934   :  { %v3740_v19 = vsub.f32 %v3726_v10, %v3738_v18 }
0x2936   :  { %v3742_v20 = vmul.f32 %v3740_v19, %v3740_v19 }
0x2938   :  { %v3746_v22 = vsel %vm398_vm1, %v3742_v20, 0.0 }
0x2939   :  { %3747 = vadd.xlane.f32.xlu0 %v3746_v22 }
0x298c   :  { %v3745_v62 = vpop.xlane.xlu0 %3744 }
0x298d   :  { %v3749_v23 = vmul.f32 %v3745_v62, %v6566_v41 }
0x298f   :  { %v3751_v24 = vadd.f32 1e-05, %v3749_v23 }
0x2991   :  { %6274 = vrsqrt.f32 %v3751_v24  ;;  %vm3759_vm12 = vweird.f32 %v3751_v24 }
0x2997   :  { %v6275_v25 = vpop.eup %6274 }
0x2998   :  { %v3754_v26 = vmul.f32 %v6275_v25, %v3751_v24  ;;  %vm3760_vm11 = vweird.f32 %v6275_v25 }
0x2999   :  { %vm3761_vm13 = vmor %vm3759_vm12, %vm3760_vm11 }
0x299a   :  { %v3755_v27 = vmul.f32 %v6275_v25, %v3754_v26 }
0x299c   :  { %v3756_v28 = vmul.f32 0.5, %v3755_v27 }
0x299e   :  { %v3757_v29 = vsub.f32 1.5, %v3756_v28 }
0x29a0   :  { %v3758_v0 = vmul.f32 %v6275_v25, %v3757_v29 }
0x29a2   :  { %v3762_v31 = vsel %vm3761_vm13, %v6275_v25, %v3758_v0 }
0x29a3   :  { %v3773_v32 = vmul.f32 %v3762_v31, %v3739_v15 }
0x29a5   :  { %v3778_v35 = vmul.f32 %v6025_v50, %v3773_v32 }
0x29a7   :  { %v7274_v36 = vadd.f32 %v6026_v34, %v3778_v35 }
0x29a9   :  { %3814 = vperm.xlu1 %5935, %v7274_v36   ;;  %3801 = vperm.xlu2 %5934, %v7274_v36  }
0x29aa   :  { %3789 = vperm.xlu0 %5933, %v7274_v36  }
0x29ac   :  { %v3748_v38 = vpop.xlane.xlu0 %3747 }
0x29ad   :  { %v3750_v40 = vmul.f32 %v3748_v38, %v6566_v41 }
0x29af   :  { %v3752_v42 = vadd.f32 1e-05, %v3750_v40 }
0x29b1   :  { %6276 = vrsqrt.f32 %v3752_v42  ;;  %5937 = vset.pattern.permute.xlu2 %v6404_v1  ;;  %5938 = vset.pattern.permute.xlu1 %v6405_v2  ;;  %vm3769_vm15 = vweird.f32 %v3752_v42 }
0x29b7   :  { %v6277_v59 = vpop.eup %6276 }
0x29b8   :  { %v3764_v43 = vmul.f32 %v6277_v59, %v3752_v42  ;;  %vm3770_vm14 = vweird.f32 %v6277_v59 }
0x29b9   :  { %vm3771_vm2 = vmor %vm3769_vm15, %vm3770_vm14 }
0x29ba   :  { %v3765_v44 = vmul.f32 %v6277_v59, %v3764_v43 }
0x29bc   :  { %v3766_v45 = vmul.f32 0.5, %v3765_v44 }
0x29be   :  { %v3767_v3 = vsub.f32 1.5, %v3766_v45 }
0x29c0   :  { %v3768_v46 = vmul.f32 %v6277_v59, %v3767_v3 }
0x29c2   :  { %v3772_v39 = vsel %vm3771_vm2, %v6277_v59, %v3768_v46 }
0x29c3   :  { %v3774_v48 = vmul.f32 %v3772_v39, %v3740_v19  ;;  %v6028_v19 = vld [vmem:[%s7687_s12 + $0x6] ss:$0 sm:$0xff] }
0x29c5   :  { %v3779_v49 = vmul.f32 %v6025_v50, %v3774_v48  ;;  %v6029_v48 = vld [vmem:[%s7682_s7 + $0x6] ss:$0 sm:$0xff] }
0x29c7   :  { %v3784_v12 = vadd.f32 %v6026_v34, %v3779_v49 }
0x29c9   :  { %3818 = vperm.xlu2 %5937, %v3784_v12   ;;  %3794 = vperm.xlu0 %5933, %v3784_v12  }
0x29d1   :  { %5936 = vset.pattern.permute.xlu0 %v6406_v4 }
0x29d2   :  { %3805 = vperm.xlu0 %5936, %v3784_v12  }
0x2a03   :  { %v3802_v57 = vpop.permute.xlu2 %3801 }
0x2a04   :  { %v3809_v33 = vmul.f32 %v3808_v56, %v3802_v57 }
0x2a1b   :  { %v3815_v60 = vpop.permute.xlu1 %3814 }
0x2a1c   :  { %v3790_v61 = vpop.permute.xlu0 %3789  ;;  %v3822_v5 = vmul.f32 %v3821_v58, %v3815_v60 }
0x2a1d   :  { %v3798_v63 = vmul.f32 %v3797_v37, %v3790_v61 }
0x2a1f   :  { %v3811_v30 = vadd.f32 %v3809_v33, %v3798_v63 }
0x2a21   :  { %v3824_v47 = vadd.f32 %v3822_v5, %v3811_v30 }
0x2a23   :  { %v3831_v7 = vadd.f32 %v6027_v6, %v3824_v47  ;;  %v3819_v10 = vpop.permute.xlu2 %3818  ;;  %v5776_v47 = vld [vmem:[%s7676_s1 + $0x1c] sm:$0x7] }
0x2a24   :  { %v3823_v15 = vmul.f32 %v3821_v58, %v3819_v10 }
0x2a25   :  { %v3833_v8 = vmax.f32 %v3831_v7, 0.0  ;;  %v3959_v7 = vperm.slane %v5776_v47, 1 }
0x2a27   :  { %5771 = vmatmul.msk.f32.vlgmr.msra.gmra.mxu2 %vm512_vm9, %v3833_v8  ;;  %v3948_v8 = vperm.slane %v5776_v47, 0 }
0x2a3b   :  { %v3795_v9 = vpop.permute.xlu0 %3794 }
0x2a3c   :  { %v3799_v13 = vmul.f32 %v3797_v37, %v3795_v9  ;;  %v3972_v9 = vperm.slane %v5776_v47, 2 }
0x2a44   :  { %v3806_v11 = vpop.permute.xlu0 %3805 }
0x2a45   :  { %v3810_v14 = vmul.f32 %v3808_v56, %v3806_v11 }
0x2a47   :  { %v3812_v21 = vadd.f32 %v3810_v14, %v3799_v13 }
0x2a49   :  { %v3825_v16 = vadd.f32 %v3823_v15, %v3812_v21 }
0x2a4b   :  { %v3832_v17 = vadd.f32 %v6027_v6, %v3825_v16  ;;  %v6031_v16 = vld [vmem:[%s7677_s2 + $0x7] ss:$0 sm:$0xff] }
0x2a4d   :  { %v3834_v18 = vmax.f32 %v3832_v17, 0.0 }
0x2a4f   :  { %5772 = vmatmul.msk.f32.gmra.mxu2 %vm512_vm9, %v3834_v18 }
0x2aaa   :  { %v3863_v20 = vpop.f32.mrf.mxu2 }
0x2aab   :  { %v3874_v22 = vadd.f32 %v6028_v19, %v3863_v20 }
0x2aad   :  { %v3876_v62 = vadd.f32 %v3874_v22, %v7274_v36 }
0x2aaf   :  { %v3882_v23 = vsel %vm398_vm1, %v3876_v62, 0.0 }
0x2ab0   :  { %3883 = vadd.xlane.f32.xlu2 %v3882_v23 }
0x2ad2   :  { %v3866_v24 = vpop.f32.mrf.mxu2 }
0x2ad3   :  { %v3875_v25 = vadd.f32 %v6028_v19, %v3866_v24 }
0x2ad5   :  { %v3877_v26 = vadd.f32 %v3875_v25, %v3784_v12 }
0x2ad7   :  { %v3885_v27 = vsel %vm398_vm1, %v3877_v26, 0.0 }
0x2ad8   :  { %3886 = vadd.xlane.f32.xlu1 %v3885_v27 }
0x2b23   :  { %v3884_v28 = vpop.xlane.xlu2 %3883 }
0x2b24   :  { %v3888_v29 = vmul.f32 %v3884_v28, %v6566_v41 }
0x2b26   :  { %v3890_v0 = vsub.f32 %v3876_v62, %v3888_v29 }
0x2b28   :  { %v3892_v50 = vmul.f32 %v3890_v0, %v3890_v0 }
0x2b2a   :  { %v3894_v31 = vsel %vm398_vm1, %v3892_v50, 0.0 }
0x2b2b   :  { %3895 = vadd.xlane.f32.xlu0 %v3894_v31 }
0x2b4b   :  { %v3887_v32 = vpop.xlane.xlu1 %3886 }
0x2b4c   :  { %v3889_v34 = vmul.f32 %v3887_v32, %v6566_v41 }
0x2b4e   :  { %v3891_v35 = vsub.f32 %v3877_v26, %v3889_v34 }
0x2b50   :  { %v3893_v36 = vmul.f32 %v3891_v35, %v3891_v35 }
0x2b52   :  { %v3897_v38 = vsel %vm398_vm1, %v3893_v36, 0.0 }
0x2b53   :  { %3898 = vadd.xlane.f32.xlu2 %v3897_v38 }
0x2b9e   :  { %v3896_v40 = vpop.xlane.xlu0 %3895 }
0x2b9f   :  { %v3900_v42 = vmul.f32 %v3896_v40, %v6566_v41 }
0x2ba1   :  { %v3902_v59 = vadd.f32 1e-05, %v3900_v42 }
0x2ba3   :  { %6278 = vrsqrt.f32 %v3902_v59  ;;  %vm3910_vm4 = vweird.f32 %v3902_v59 }
0x2ba9   :  { %v6279_v43 = vpop.eup %6278 }
0x2baa   :  { %v3905_v44 = vmul.f32 %v6279_v43, %v3902_v59  ;;  %vm3911_vm3 = vweird.f32 %v6279_v43 }
0x2bab   :  { %vm3912_vm5 = vmor %vm3910_vm4, %vm3911_vm3 }
0x2bac   :  { %v3906_v45 = vmul.f32 %v6279_v43, %v3905_v44 }
0x2bae   :  { %v3907_v3 = vmul.f32 0.5, %v3906_v45 }
0x2bb0   :  { %v3908_v46 = vsub.f32 1.5, %v3907_v3 }
0x2bb2   :  { %v3909_v39 = vmul.f32 %v6279_v43, %v3908_v46 }
0x2bb4   :  { %v3913_v49 = vsel %vm3912_vm5, %v6279_v43, %v3909_v39 }
0x2bb5   :  { %v3924_v12 = vmul.f32 %v3913_v49, %v3890_v0 }
0x2bb7   :  { %v3929_v52 = vmul.f32 %v6029_v48, %v3924_v12 }
0x2bb9   :  { %v7320_v53 = vadd.f32 %v6030_v51, %v3929_v52 }
0x2bbb   :  { %3965 = vperm.xlu2 %5937, %v7320_v53   ;;  %3952 = vperm.xlu0 %5936, %v7320_v53  }
0x2bbc   :  { %3940 = vperm.xlu1 %5938, %v7320_v53  }
0x2bc3   :  { %5939 = vset.pattern.permute.xlu0 %v6405_v2 }
0x2bc4   :  { %5940 = vset.pattern.permute.xlu1 %v6406_v4 }
0x2bc6   :  { %v3899_v54 = vpop.xlane.xlu2 %3898 }
0x2bc7   :  { %v3901_v55 = vmul.f32 %v3899_v54, %v6566_v41 }
0x2bc9   :  { %v3903_v56 = vadd.f32 1e-05, %v3901_v55 }
0x2bcb   :  { %6280 = vrsqrt.f32 %v3903_v56  ;;  %vm3920_vm7 = vweird.f32 %v3903_v56 }
0x2bd1   :  { %v6281_v37 = vpop.eup %6280 }
0x2bd2   :  { %v3915_v57 = vmul.f32 %v6281_v37, %v3903_v56  ;;  %vm3921_vm6 = vweird.f32 %v6281_v37 }
0x2bd3   :  { %vm3922_vm8 = vmor %vm3920_vm7, %vm3921_vm6 }
0x2bd4   :  { %v3916_v58 = vmul.f32 %v6281_v37, %v3915_v57 }
0x2bd6   :  { %v3917_v60 = vmul.f32 0.5, %v3916_v58 }
0x2bd8   :  { %v3918_v61 = vsub.f32 1.5, %v3917_v60 }
0x2bda   :  { %v3919_v33 = vmul.f32 %v6281_v37, %v3918_v61 }
0x2bdc   :  { %v3923_v63 = vsel %vm3922_vm8, %v6281_v37, %v3919_v33 }
0x2bdd   :  { %v3925_v5 = vmul.f32 %v3923_v63, %v3891_v35 }
0x2bdf   :  { %v3930_v6 = vmul.f32 %v6029_v48, %v3925_v5 }
0x2be1   :  { %v7328_v30 = vadd.f32 %v6030_v51, %v3930_v6 }
0x2be3   :  { %3969 = vperm.xlu2 %5937, %v7328_v30   ;;  %3945 = vperm.xlu0 %5939, %v7328_v30  }
0x2be4   :  { %3956 = vperm.xlu1 %5940, %v7328_v30  }
0x2c15   :  { %v3966_v11 = vpop.permute.xlu2 %3965 }
0x2c16   :  { %v3973_v21 = vmul.f32 %v3972_v9, %v3966_v11 }
0x2c2d   :  { %v3953_v10 = vpop.permute.xlu0 %3952 }
0x2c2e   :  { %v3960_v13 = vmul.f32 %v3959_v7, %v3953_v10  ;;  %v3941_v14 = vpop.permute.xlu1 %3940 }
0x2c2f   :  { %v3949_v15 = vmul.f32 %v3948_v8, %v3941_v14 }
0x2c31   :  { %v3962_v17 = vadd.f32 %v3960_v13, %v3949_v15 }
0x2c33   :  { %v3975_v18 = vadd.f32 %v3973_v21, %v3962_v17 }
0x2c35   :  { %v3982_v19 = vadd.f32 %v6031_v16, %v3975_v18 }
0x2c37   :  { %4232 = vperm.xlu2 %5937, %v3982_v19   ;;  %4131 = vperm.xlu0 %5939, %v3982_v19  }
0x2c38   :  { %3986 = vrot.lane.b32.xlu1 %v3982_v19, %s6407_s25 }
0x2c3d   :  { %v3970_v22 = vpop.permute.xlu2 %3969 }
0x2c3e   :  { %v3974_v25 = vmul.f32 %v3972_v9, %v3970_v22 }
0x2c3f   :  { %4056 = vrot.lane.b32.xlu2 %v3982_v19, %s6408_s26 }
0x2c40   :  { %4183 = vperm.xlu1 %5940, %v3982_v19  }
0x2c55   :  { %v3946_v20 = vpop.permute.xlu0 %3945 }
0x2c56   :  { %v3950_v62 = vmul.f32 %v3948_v8, %v3946_v20  ;;  %v3957_v23 = vpop.permute.xlu1 %3956 }
0x2c57   :  { %v3961_v24 = vmul.f32 %v3959_v7, %v3957_v23 }
0x2c59   :  { %v3963_v26 = vadd.f32 %v3961_v24, %v3950_v62 }
0x2c5b   :  { %v3976_v27 = vadd.f32 %v3974_v25, %v3963_v26 }
0x2c5d   :  { %v3983_v28 = vadd.f32 %v6031_v16, %v3976_v27 }
0x2c5f   :  { %4187 = vperm.xlu1 %5940, %v3983_v28   ;;  %4135 = vperm.xlu0 %5939, %v3983_v28  }
0x2c60   :  { %3988 = vrot.lane.b32.xlu2 %v3983_v28, %s6407_s25 }
0x2c68   :  { %4236 = vperm.xlu2 %5937, %v3983_v28  }
0x2c91   :  { %v4233_v29 = vpop.permute.xlu2 %4232 }
0x2c99   :  { %v4057_v0 = vpop.permute.xlu2 %4056 }
0x2c9a   :  { %4062 = vxpose.xlu2.b32.start.end [1/1] (short) (narrow) %v4057_v0, 8 }
0x2ca9   :  { %v4132_v32 = vpop.permute.xlu0 %4131 }
0x2caa   :  { %v3987_v50 = vpop.permute.xlu1 %3986 }
0x2cab   :  { %3992 = vxpose.xlu0.b32.start.end [1/1] (short) (narrow) %v3987_v50, 8 }
0x2cb2   :  { %v4184_v35 = vpop.permute.xlu1 %4183 }
0x2cba   :  { %v3989_v31 = vpop.permute.xlu2 %3988 }
0x2cbb   :  { %4024 = vxpose.xlu1.b32.start.end [1/1] (short) (narrow) %v3989_v31, 8 }
0x2cc2   :  { %v4237_v37 = vpop.permute.xlu2 %4236 }
0x2cd1   :  { %v4136_v34 = vpop.permute.xlu0 %4135  ;;  %v4188_v3 = vpop.permute.xlu1 %4187 }
0x2d0e   :  { %5941 = vset.pattern.permute.xlu1 %v6405_v2 }
0x2d12   :  { %5942 = vset.pattern.permute.xlu0 %v6406_v4 }
0x2d15   :  { %4058 = vrot.lane.b32.xlu1 %v3983_v28, %s6408_s26 }
0x2d33   :  { %v4078_v61 = vpop.trf.xlu2 }
0x2d34   :  { %v4160_v14 = vperm.slane %v4078_v61, 0  ;;  %v4212_v20 = vperm.slane %v4078_v61, 1  ;;  %v4261_v25 = vperm.slane %v4078_v61, 2 }
0x2d4f   :  { %v4008_v36 = vpop.trf.xlu0 }
0x2d50   :  { %v4138_v38 = vperm.slane %v4008_v36, 0  ;;  %v4190_v40 = vperm.slane %v4008_v36, 1  ;;  %v4239_v43 = vperm.slane %v4008_v36, 2 }
0x2d52   :  { %v4140_v42 = vmul.f32 %v4138_v38, %v4132_v32  ;;  %v4192_v59 = vmul.f32 %v4190_v40, %v4184_v35  ;;  %v4241_v46 = vmul.f32 %v4239_v43, %v4233_v29 }
0x2d54   :  { %v4142_v44 = vsel %vm255_vm0, %v4140_v42, -inf  ;;  %v4194_v45 = vsel %vm255_vm0, %v4192_v59, -inf  ;;  %v4243_v39 = vsel %vm255_vm0, %v4241_v46, -inf }
0x2d55   :  { %4143 = vmax.xlane.f32.xlu2 %v4142_v44  ;;  %4195 = vmax.xlane.f32.xlu0 %v4194_v45 }
0x2d5d   :  { %4244 = vmax.xlane.f32.xlu2 %v4243_v39 }
0x2d5f   :  { %v4040_v48 = vpop.trf.xlu1 }
0x2d60   :  { %v4139_v49 = vperm.slane %v4040_v48, 0  ;;  %v4191_v52 = vperm.slane %v4040_v48, 1  ;;  %v4240_v56 = vperm.slane %v4040_v48, 2 }
0x2d62   :  { %v4141_v12 = vmul.f32 %v4139_v49, %v4136_v34  ;;  %v4193_v54 = vmul.f32 %v4191_v52, %v4188_v3  ;;  %v4242_v57 = vmul.f32 %v4240_v56, %v4237_v37 }
0x2d64   :  { %v4145_v51 = vsel %vm255_vm0, %v4141_v12, -inf  ;;  %v4197_v55 = vsel %vm255_vm0, %v4193_v54, -inf  ;;  %v4246_v58 = vsel %vm255_vm0, %v4242_v57, -inf }
0x2d65   :  { %4146 = vmax.xlane.f32.xlu2 %v4145_v51 }
0x2d6d   :  { %4198 = vmax.xlane.f32.xlu2 %v4197_v55 }
0x2d75   :  { %4247 = vmax.xlane.f32.xlu2 %v4246_v58 }
0x2d87   :  { %v4059_v60 = vpop.permute.xlu1 %4058 }
0x2d9e   :  { %4094 = vxpose.xlu2.b32.start.end [1/1] (short) (narrow) %v4059_v60, 8 }
0x2dc8   :  { %v4144_v33 = vpop.xlane.xlu2 %4143  ;;  %v4196_v63 = vpop.xlane.xlu0 %4195 }
0x2dc9   :  { %v4148_v5 = vsub.f32 %v4140_v42, %v4144_v33  ;;  %v4200_v6 = vsub.f32 %v4192_v59, %v4196_v63 }
0x2dcb   :  { %v4202_v47 = vmul.f32 1.442695, %v4200_v6  ;;  %v4150_v7 = vmul.f32 1.442695, %v4148_v5 }
0x2dcd   :  { %6282 = vpow2.f32 %v4202_v47  ;;  %v6032_v47 = vld [vmem:[%s7679_s4 + $0x7] ss:$0 sm:$0xff] }
0x2dce   :  { %6284 = vpow2.f32 %v4150_v7 }
0x2dd0   :  { %v4245_v8 = vpop.xlane.xlu2 %4244 }
0x2dd1   :  { %v4249_v9 = vsub.f32 %v4241_v46, %v4245_v8 }
0x2dd3   :  { %v4251_v10 = vmul.f32 1.442695, %v4249_v9  ;;  %v6283_v11 = vpop.eup %6282 }
0x2dd4   :  { %v4206_v13 = vsel %vm255_vm0, %v6283_v11, 0.0  ;;  %v6285_v15 = vpop.eup %6284  ;;  %v4214_v62 = vmul.f32 %v6283_v11, %v4212_v20 }
0x2dd5   :  { %6286 = vpow2.f32 %v4251_v10  ;;  %4207 = vadd.xlane.f32.xlu0 %v4206_v13  ;;  %v4162_v16 = vmul.f32 %v6285_v15, %v4160_v14  ;;  %v4154_v59 = vsel %vm255_vm0, %v6285_v15, 0.0 }
0x2dd6   :  { %v4216_v24 = vsel %vm255_vm0, %v4214_v62, 0.0 }
0x2dd7   :  { %v4164_v19 = vsel %vm255_vm0, %v4162_v16, 0.0 }
0x2dd8   :  { %v4147_v21 = vpop.xlane.xlu2 %4146 }
0x2dd9   :  { %v4149_v23 = vsub.f32 %v4141_v12, %v4147_v21 }
0x2ddb   :  { %v6287_v17 = vpop.eup %6286  ;;  %v4152_v26 = vmul.f32 1.442695, %v4149_v23 }
0x2ddc   :  { %v4255_v18 = vsel %vm255_vm0, %v6287_v17, 0.0  ;;  %v4263_v29 = vmul.f32 %v6287_v17, %v4261_v25 }
0x2ddd   :  { %4256 = vadd.xlane.f32.xlu1 %v4255_v18  ;;  %4165 = vadd.xlane.f32.xlu0 %v4164_v19  ;;  %6288 = vpow2.f32 %v4152_v26 }
0x2dde   :  { %v4265_v31 = vsel %vm255_vm0, %v4263_v29, 0.0 }
0x2de0   :  { %v4199_v22 = vpop.xlane.xlu2 %4198 }
0x2de1   :  { %v4201_v50 = vsub.f32 %v4193_v54, %v4199_v22 }
0x2de3   :  { %v4204_v32 = vmul.f32 1.442695, %v4201_v50  ;;  %v6289_v34 = vpop.eup %6288 }
0x2de4   :  { %v4157_v38 = vsel %vm255_vm0, %v6289_v34, 0.0 }
0x2de5   :  { %4217 = vadd.xlane.f32.xlu0 %v4216_v24 }
0x2de8   :  { %v4248_v27 = vpop.xlane.xlu2 %4247 }
0x2de9   :  { %v4250_v28 = vsub.f32 %v4242_v57, %v4248_v27  ;;  %v5778_v57 = vld [vmem:[%s7678_s3 + $0x1c] sm:$0x7] }
0x2dea   :  { %v4174_v60 = vperm.slane %v5778_v57, 0  ;;  %v4226_v63 = vperm.slane %v5778_v57, 1  ;;  %v4275_v8 = vperm.slane %v5778_v57, 2 }
0x2deb   :  { %v4253_v0 = vmul.f32 1.442695, %v4250_v28 }
0x2ded   :  { %6290 = vpow2.f32 %v4253_v0  ;;  %4266 = vadd.xlane.f32.xlu0 %v4265_v31 }
0x2dee   :  { %6292 = vpow2.f32 %v4204_v32 }
0x2df3   :  { %v6291_v35 = vpop.eup %6290 }
0x2df4   :  { %v4258_v36 = vsel %vm255_vm0, %v6291_v35, 0.0  ;;  %v6293_v40 = vpop.eup %6292 }
0x2df5   :  { %4259 = vadd.xlane.f32.xlu1 %v4258_v36  ;;  %4158 = vadd.xlane.f32.xlu0 %v4157_v38  ;;  %v4209_v42 = vsel %vm255_vm0, %v6293_v40, 0.0 }
0x2dfd   :  { %4210 = vadd.xlane.f32.xlu0 %v4209_v42 }
0x2e00   :  { %5944 = vset.pattern.permute.xlu2 %v6405_v2 }
0x2e0f   :  { %4155 = vadd.xlane.f32.xlu2 %v4154_v59 }
0x2e37   :  { %v4110_v43 = vpop.trf.xlu2 }
0x2e38   :  { %v4213_v44 = vperm.slane %v4110_v43, 1  ;;  %v4161_v45 = vperm.slane %v4110_v43, 0  ;;  %v4262_v49 = vperm.slane %v4110_v43, 2 }
0x2e3a   :  { %v4215_v3 = vmul.f32 %v6293_v40, %v4213_v44  ;;  %v4163_v46 = vmul.f32 %v6289_v34, %v4161_v45  ;;  %v4264_v12 = vmul.f32 %v6291_v35, %v4262_v49 }
0x2e3c   :  { %v4219_v39 = vsel %vm255_vm0, %v4215_v3, 0.0  ;;  %v4167_v48 = vsel %vm255_vm0, %v4163_v46, 0.0  ;;  %v4268_v51 = vsel %vm255_vm0, %v4264_v12, 0.0 }
0x2e3d   :  { %4220 = vadd.xlane.f32.xlu1 %v4219_v39  ;;  %4168 = vadd.xlane.f32.xlu0 %v4167_v48 }
0x2e45   :  { %4269 = vadd.xlane.f32.xlu0 %v4268_v51 }
0x2e48   :  { %v4208_v52 = vpop.xlane.xlu0 %4207 }
0x2e49   :  { %6294 = vrcp.f32 %v4208_v52 }
0x2e4f   :  { %v6295_v58 = vpop.eup %6294 }
0x2e50   :  { %v4166_v54 = vpop.xlane.xlu0 %4165  ;;  %v4257_v56 = vpop.xlane.xlu1 %4256 }
0x2e58   :  { %v4218_v55 = vpop.xlane.xlu0 %4217 }
0x2e59   :  { %v4224_v5 = vmul.f32 %v6295_v58, %v4218_v55 }
0x2e5b   :  { %v4227_v11 = vmul.f32 %v4226_v63, %v4224_v5 }
0x2e60   :  { %v4267_v33 = vpop.xlane.xlu0 %4266 }
0x2e68   :  { %v4159_v18 = vpop.xlane.xlu0 %4158  ;;  %v4260_v20 = vpop.xlane.xlu1 %4259 }
0x2e70   :  { %v4211_v19 = vpop.xlane.xlu0 %4210 }
0x2e82   :  { %v4156_v37 = vpop.xlane.xlu2 %4155 }
0x2e83   :  { %6296 = vrcp.f32 %v4156_v37  ;;  %v6033_v37 = vld [vmem:[%s7680_s5 + $0x7] ss:$0 sm:$0xff] }
0x2e84   :  { %6298 = vrcp.f32 %v4257_v56 }
0x2e85   :  { %6300 = vrcp.f32 %v4159_v18  ;;  %v5785_v18 = vld [vmem:[%s7686_s11 + $0xe8] sm:$0xff] }
0x2e86   :  { %6302 = vrcp.f32 %v4211_v19  ;;  %v5784_v19 = vld [vmem:[%s7686_s11 + $0xe0] sm:$0xff] }
0x2e87   :  { %6304 = vrcp.f32 %v4260_v20  ;;  %v5782_v20 = vld [vmem:[%s7684_s9 + $0x1c] sm:$0x7] }
0x2e89   :  { %v6297_v61 = vpop.eup %6296 }
0x2e8a   :  { %v4172_v6 = vmul.f32 %v6297_v61, %v4166_v54  ;;  %v6299_v7 = vpop.eup %6298 }
0x2e8b   :  { %v4273_v9 = vmul.f32 %v6299_v7, %v4267_v33  ;;  %v6301_v22 = vpop.eup %6300 }
0x2e8c   :  { %v4175_v10 = vmul.f32 %v4174_v60, %v4172_v6  ;;  %v6303_v26 = vpop.eup %6302 }
0x2e8d   :  { %v4276_v14 = vmul.f32 %v4275_v8, %v4273_v9  ;;  %v6305_v29 = vpop.eup %6304 }
0x2e8e   :  { %v4180_v13 = vadd.f32 %v6032_v47, %v4175_v10 }
0x2e90   :  { %v4229_v15 = vadd.f32 %v4227_v11, %v4180_v13 }
0x2e92   :  { %v4278_v21 = vadd.f32 %v4276_v14, %v4229_v15 }
0x2e94   :  { %v4280_v16 = vadd.f32 %v4278_v21, %v7320_v53 }
0x2e96   :  { %v4286_v17 = vsel %vm398_vm1, %v4280_v16, 0.0 }
0x2e97   :  { %4287 = vadd.xlane.f32.xlu1 %v4286_v17  ;;  %v5786_v17 = vld [vmem:[%s7686_s11 + $0xf0] sm:$0xff] }
0x2eb0   :  { %v4169_v62 = vpop.xlane.xlu0 %4168  ;;  %v4221_v24 = vpop.xlane.xlu1 %4220 }
0x2eb1   :  { %v4173_v23 = vmul.f32 %v6301_v22, %v4169_v62  ;;  %v4225_v27 = vmul.f32 %v6303_v26, %v4221_v24  ;;  %v4363_v62 = vperm.slane %v5782_v20, 1 }
0x2eb3   :  { %v4176_v25 = vmul.f32 %v4174_v60, %v4173_v23  ;;  %v4228_v53 = vmul.f32 %v4226_v63, %v4225_v27  ;;  %v6034_v60 = vld [vmem:[%s7681_s6 + $0x7] ss:$0 sm:$0xff]  ;;  %v4352_v23 = vperm.slane %v5782_v20, 0  ;;  %v4376_v27 = vperm.slane %v5782_v20, 2 }
0x2eb5   :  { %v4181_v28 = vadd.f32 %v6032_v47, %v4176_v25 }
0x2eb7   :  { %v4230_v31 = vadd.f32 %v4228_v53, %v4181_v28 }
0x2eb8   :  { %v4270_v0 = vpop.xlane.xlu0 %4269 }
0x2eb9   :  { %v4274_v50 = vmul.f32 %v6305_v29, %v4270_v0  ;;  %v6035_v0 = vld [vmem:[%s7685_s10 + $0x7] ss:$0 sm:$0xff] }
0x2ebb   :  { %v4277_v32 = vmul.f32 %v4275_v8, %v4274_v50 }
0x2ebd   :  { %v4279_v34 = vadd.f32 %v4277_v32, %v4230_v31 }
0x2ebf   :  { %v4281_v35 = vadd.f32 %v4279_v34, %v7328_v30 }
0x2ec1   :  { %v4289_v36 = vsel %vm398_vm1, %v4281_v35, 0.0 }
0x2ec2   :  { %4290 = vadd.xlane.f32.xlu0 %v4289_v36 }
0x2f0a   :  { %v4288_v38 = vpop.xlane.xlu1 %4287 }
0x2f0b   :  { %v4292_v40 = vmul.f32 %v4288_v38, %v6566_v41 }
0x2f0d   :  { %v4294_v42 = vsub.f32 %v4280_v16, %v4292_v40  ;;  %v5787_v16 = vld [vmem:[%s7686_s11 + $0xf8] sm:$0xff] }
0x2f0e   :  { %4413 = vmatpush.msra.mxu3 %v5787_v16  ;;  %v6038_v16 = vld [vmem:[%s7683_s8 + $0x7] ss:$0 sm:$0xff] }
0x2f0f   :  { %v4296_v59 = vmul.f32 %v4294_v42, %v4294_v42 }
0x2f10   :  { %4414 = vmatpush.msra.mxu3 %v5786_v17 }
0x2f11   :  { %v4298_v43 = vsel %vm398_vm1, %v4296_v59, 0.0 }
0x2f12   :  { %4299 = vadd.xlane.f32.xlu1 %v4298_v43  ;;  %4415 = vmatpush.msra.mxu3 %v5785_v18 }
0x2f14   :  { %4416 = vmatpush.msra.mxu3 %v5784_v19 }
0x2f35   :  { %v4291_v44 = vpop.xlane.xlu0 %4290 }
0x2f36   :  { %v4293_v45 = vmul.f32 %v4291_v44, %v6566_v41 }
0x2f38   :  { %v4295_v3 = vsub.f32 %v4281_v35, %v4293_v45 }
0x2f3a   :  { %v4297_v46 = vmul.f32 %v4295_v3, %v4295_v3 }
0x2f3c   :  { %v4301_v39 = vsel %vm398_vm1, %v4297_v46, 0.0 }
0x2f3d   :  { %4302 = vadd.xlane.f32.xlu0 %v4301_v39 }
0x2f85   :  { %v4300_v30 = vpop.xlane.xlu1 %4299 }
0x2f86   :  { %v4304_v48 = vmul.f32 %v4300_v30, %v6566_v41 }
0x2f88   :  { %v4306_v49 = vadd.f32 1e-05, %v4304_v48 }
0x2f8a   :  { %6306 = vrsqrt.f32 %v4306_v49  ;;  %vm4314_vm11 = vweird.f32 %v4306_v49 }
0x2f90   :  { %v6307_v12 = vpop.eup %6306 }
0x2f91   :  { %v4309_v51 = vmul.f32 %v6307_v12, %v4306_v49  ;;  %vm4315_vm10 = vweird.f32 %v6307_v12 }
0x2f92   :  { %vm4316_vm12 = vmor %vm4314_vm11, %vm4315_vm10 }
0x2f93   :  { %v4310_v52 = vmul.f32 %v6307_v12, %v4309_v51 }
0x2f95   :  { %v4311_v54 = vmul.f32 0.5, %v4310_v52 }
0x2f97   :  { %v4312_v55 = vsub.f32 1.5, %v4311_v54 }
0x2f99   :  { %v4313_v56 = vmul.f32 %v6307_v12, %v4312_v55 }
0x2f9b   :  { %v4317_v57 = vsel %vm4316_vm12, %v6307_v12, %v4313_v56 }
0x2f9c   :  { %v4328_v58 = vmul.f32 %v4317_v57, %v4294_v42 }
0x2f9e   :  { %v4333_v61 = vmul.f32 %v6033_v37, %v4328_v58 }
0x2fa0   :  { %v7385_v33 = vadd.f32 %v6034_v60, %v4333_v61 }
0x2fa2   :  { %4356 = vperm.xlu0 %5942, %v7385_v33   ;;  %4344 = vperm.xlu1 %5941, %v7385_v33  }
0x2faa   :  { %5943 = vset.pattern.permute.xlu1 %v6404_v1  ;;  %5949 = vset.pattern.permute.xlu0 %v6404_v1 }
0x2fab   :  { %4369 = vperm.xlu1 %5943, %v7385_v33  }
0x2fb0   :  { %v4303_v63 = vpop.xlane.xlu0 %4302 }
0x2fb1   :  { %v4305_v5 = vmul.f32 %v4303_v63, %v6566_v41 }
0x2fb3   :  { %v4307_v6 = vadd.f32 1e-05, %v4305_v5  ;;  %5945 = vset.pattern.permute.xlu1 %v6406_v4 }
0x2fb5   :  { %6308 = vrsqrt.f32 %v4307_v6  ;;  %vm4324_vm14 = vweird.f32 %v4307_v6 }
0x2fbb   :  { %v6309_v47 = vpop.eup %6308 }
0x2fbc   :  { %v4319_v7 = vmul.f32 %v6309_v47, %v4307_v6  ;;  %vm4325_vm13 = vweird.f32 %v6309_v47 }
0x2fbd   :  { %vm4326_vm15 = vmor %vm4324_vm14, %vm4325_vm13 }
0x2fbe   :  { %v4320_v8 = vmul.f32 %v6309_v47, %v4319_v7 }
0x2fc0   :  { %v4321_v9 = vmul.f32 0.5, %v4320_v8 }
0x2fc2   :  { %v4322_v10 = vsub.f32 1.5, %v4321_v9 }
0x2fc4   :  { %v4323_v11 = vmul.f32 %v6309_v47, %v4322_v10 }
0x2fc6   :  { %v4327_v13 = vsel %vm4326_vm15, %v6309_v47, %v4323_v11 }
0x2fc7   :  { %v4329_v14 = vmul.f32 %v4327_v13, %v4295_v3  ;;  %v6036_v3 = vld [vmem:[%s7687_s12 + $0x7] ss:$0 sm:$0xff] }
0x2fc9   :  { %v4334_v15 = vmul.f32 %v6033_v37, %v4329_v14  ;;  %v6037_v14 = vld [vmem:[%s7682_s7 + $0x7] ss:$0 sm:$0xff] }
0x2fcb   :  { %v4339_v21 = vadd.f32 %v6034_v60, %v4334_v15 }
0x2fcd   :  { %4349 = vperm.xlu2 %5944, %v4339_v21   ;;  %4360 = vperm.xlu1 %5945, %v4339_v21  }
0x2fd5   :  { %5946 = vset.pattern.permute.xlu1 %v6404_v1  ;;  %5948 = vset.pattern.permute.xlu2 %v6406_v4 }
0x2fd6   :  { %4373 = vperm.xlu1 %5946, %v4339_v21  }
0x2fde   :  { %5947 = vset.pattern.permute.xlu1 %v6405_v2 }
0x3014   :  { %v4345_v22 = vpop.permute.xlu1 %4344  ;;  %v4357_v24 = vpop.permute.xlu0 %4356 }
0x3015   :  { %v4364_v25 = vmul.f32 %v4363_v62, %v4357_v24  ;;  %v4353_v26 = vmul.f32 %v4352_v23, %v4345_v22 }
0x3017   :  { %v4366_v29 = vadd.f32 %v4364_v25, %v4353_v26 }
0x301d   :  { %v4370_v28 = vpop.permute.xlu1 %4369 }
0x301e   :  { %v4377_v53 = vmul.f32 %v4376_v27, %v4370_v28 }
0x3020   :  { %v4379_v50 = vadd.f32 %v4377_v53, %v4366_v29 }
0x3022   :  { %v4386_v31 = vadd.f32 %v6035_v0, %v4379_v50  ;;  %v5793_v50 = vld [vmem:[%s7676_s1 + $0x20] sm:$0x7] }
0x3024   :  { %v4388_v32 = vmax.f32 %v4386_v31, 0.0  ;;  %v4514_v31 = vperm.slane %v5793_v50, 1 }
0x3026   :  { %5788 = vmatmul.msk.f32.vlgmr.msra.gmra.mxu3 %vm512_vm9, %v4388_v32  ;;  %v4503_v32 = vperm.slane %v5793_v50, 0 }
0x3027   :  { %v4350_v35 = vpop.permute.xlu2 %4349 }
0x3028   :  { %v4354_v38 = vmul.f32 %v4352_v23, %v4350_v35  ;;  %v4527_v35 = vperm.slane %v5793_v50, 2 }
0x303f   :  { %v4361_v34 = vpop.permute.xlu1 %4360 }
0x3040   :  { %v4365_v36 = vmul.f32 %v4363_v62, %v4361_v34 }
0x3042   :  { %v4367_v42 = vadd.f32 %v4365_v36, %v4354_v38 }
0x3048   :  { %v4374_v40 = vpop.permute.xlu1 %4373 }
0x3049   :  { %v4378_v59 = vmul.f32 %v4376_v27, %v4374_v40 }
0x304b   :  { %v4380_v43 = vadd.f32 %v4378_v59, %v4367_v42 }
0x304d   :  { %v4387_v44 = vadd.f32 %v6035_v0, %v4380_v43  ;;  %v6039_v43 = vld [vmem:[%s7677_s2 + $0x8] ss:$0 sm:$0xff] }
0x304f   :  { %v4389_v45 = vmax.f32 %v4387_v44, 0.0 }
0x3051   :  { %5789 = vmatmul.msk.f32.gmra.mxu3 %vm512_vm9, %v4389_v45 }
0x30a9   :  { %v4418_v46 = vpop.f32.mrf.mxu3 }
0x30aa   :  { %v4429_v39 = vadd.f32 %v6036_v3, %v4418_v46 }
0x30ac   :  { %v4431_v30 = vadd.f32 %v4429_v39, %v7385_v33 }
0x30ae   :  { %v4437_v48 = vsel %vm398_vm1, %v4431_v30, 0.0 }
0x30af   :  { %4438 = vadd.xlane.f32.xlu0 %v4437_v48 }
0x30d4   :  { %v4421_v49 = vpop.f32.mrf.mxu3 }
0x30d5   :  { %v4430_v12 = vadd.f32 %v6036_v3, %v4421_v49 }
0x30d7   :  { %v4432_v51 = vadd.f32 %v4430_v12, %v4339_v21 }
0x30d9   :  { %v4440_v52 = vsel %vm398_vm1, %v4432_v51, 0.0 }
0x30da   :  { %4441 = vadd.xlane.f32.xlu1 %v4440_v52 }
0x3122   :  { %v4439_v54 = vpop.xlane.xlu0 %4438 }
0x3123   :  { %v4443_v55 = vmul.f32 %v4439_v54, %v6566_v41 }
0x3125   :  { %v4445_v56 = vsub.f32 %v4431_v30, %v4443_v55 }
0x3127   :  { %v4447_v37 = vmul.f32 %v4445_v56, %v4445_v56 }
0x3129   :  { %v4449_v57 = vsel %vm398_vm1, %v4447_v37, 0.0 }
0x312a   :  { %4450 = vadd.xlane.f32.xlu2 %v4449_v57 }
0x314d   :  { %v4442_v58 = vpop.xlane.xlu1 %4441 }
0x314e   :  { %v4444_v60 = vmul.f32 %v4442_v58, %v6566_v41 }
0x3150   :  { %v4446_v61 = vsub.f32 %v4432_v51, %v4444_v60 }
0x3152   :  { %v4448_v33 = vmul.f32 %v4446_v61, %v4446_v61 }
0x3154   :  { %v4452_v63 = vsel %vm398_vm1, %v4448_v33, 0.0 }
0x3155   :  { %4453 = vadd.xlane.f32.xlu0 %v4452_v63 }
0x319d   :  { %v4451_v5 = vpop.xlane.xlu2 %4450 }
0x319e   :  { %v4455_v6 = vmul.f32 %v4451_v5, %v6566_v41 }
0x31a0   :  { %v4457_v47 = vadd.f32 1e-05, %v4455_v6 }
0x31a2   :  { %6310 = vrsqrt.f32 %v4457_v47  ;;  %vm4465_vm3 = vweird.f32 %v4457_v47 }
0x31a8   :  { %v6311_v7 = vpop.eup %6310 }
0x31a9   :  { %v4460_v8 = vmul.f32 %v6311_v7, %v4457_v47  ;;  %vm4466_vm2 = vweird.f32 %v6311_v7 }
0x31aa   :  { %vm4467_vm4 = vmor %vm4465_vm3, %vm4466_vm2 }
0x31ab   :  { %v4461_v9 = vmul.f32 %v6311_v7, %v4460_v8 }
0x31ad   :  { %v4462_v10 = vmul.f32 0.5, %v4461_v9 }
0x31af   :  { %v4463_v11 = vsub.f32 1.5, %v4462_v10 }
0x31b1   :  { %v4464_v13 = vmul.f32 %v6311_v7, %v4463_v11 }
0x31b3   :  { %v4468_v15 = vsel %vm4467_vm4, %v6311_v7, %v4464_v13 }
0x31b4   :  { %v4479_v21 = vmul.f32 %v4468_v15, %v4445_v56 }
0x31b6   :  { %v4484_v17 = vmul.f32 %v6037_v14, %v4479_v21 }
0x31b8   :  { %v7434_v18 = vadd.f32 %v6038_v16, %v4484_v17 }
0x31ba   :  { %4520 = vperm.xlu0 %5949, %v7434_v18   ;;  %4507 = vperm.xlu2 %5948, %v7434_v18  }
0x31bb   :  { %4495 = vperm.xlu1 %5947, %v7434_v18  }
0x31c2   :  { %5950 = vset.pattern.permute.xlu2 %v6405_v2  ;;  %5954 = vset.pattern.permute.xlu0 %v6406_v4 }
0x31c3   :  { %5951 = vset.pattern.permute.xlu1 %v6406_v4 }
0x31c8   :  { %v4454_v19 = vpop.xlane.xlu0 %4453 }
0x31c9   :  { %v4456_v20 = vmul.f32 %v4454_v19, %v6566_v41 }
0x31cb   :  { %v4458_v22 = vadd.f32 1e-05, %v4456_v20 }
0x31cd   :  { %6312 = vrsqrt.f32 %v4458_v22  ;;  %vm4475_vm6 = vweird.f32 %v4458_v22 }
0x31d3   :  { %v6313_v62 = vpop.eup %6312 }
0x31d4   :  { %v4470_v23 = vmul.f32 %v6313_v62, %v4458_v22  ;;  %vm4476_vm5 = vweird.f32 %v6313_v62 }
0x31d5   :  { %vm4477_vm7 = vmor %vm4475_vm6, %vm4476_vm5 }
0x31d6   :  { %v4471_v24 = vmul.f32 %v6313_v62, %v4470_v23 }
0x31d8   :  { %v4472_v25 = vmul.f32 0.5, %v4471_v24 }
0x31da   :  { %v4473_v26 = vsub.f32 1.5, %v4472_v25 }
0x31dc   :  { %v4474_v27 = vmul.f32 %v6313_v62, %v4473_v26 }
0x31de   :  { %v4478_v28 = vsel %vm4477_vm7, %v6313_v62, %v4474_v27 }
0x31df   :  { %v4480_v29 = vmul.f32 %v4478_v28, %v4446_v61 }
0x31e1   :  { %v4485_v0 = vmul.f32 %v6037_v14, %v4480_v29 }
0x31e3   :  { %v7443_v53 = vadd.f32 %v6038_v16, %v4485_v0 }
0x31e5   :  { %4500 = vperm.xlu2 %5950, %v7443_v53   ;;  %4511 = vperm.xlu1 %5951, %v7443_v53  }
0x31ed   :  { %5952 = vset.pattern.permute.xlu2 %v6404_v1  ;;  %5953 = vset.pattern.permute.xlu1 %v6405_v2 }
0x31ee   :  { %4524 = vperm.xlu2 %5952, %v7443_v53  }
0x3214   :  { %v4508_v34 = vpop.permute.xlu2 %4507 }
0x3215   :  { %v4515_v40 = vmul.f32 %v4514_v31, %v4508_v34 }
0x322c   :  { %v4521_v36 = vpop.permute.xlu0 %4520 }
0x322d   :  { %v4496_v38 = vpop.permute.xlu1 %4495  ;;  %v4528_v59 = vmul.f32 %v4527_v35, %v4521_v36 }
0x322e   :  { %v4504_v42 = vmul.f32 %v4503_v32, %v4496_v38 }
0x3230   :  { %v4517_v44 = vadd.f32 %v4515_v40, %v4504_v42 }
0x3232   :  { %v4530_v45 = vadd.f32 %v4528_v59, %v4517_v44 }
0x3234   :  { %v4537_v3 = vadd.f32 %v6039_v43, %v4530_v45 }
0x3236   :  { %4787 = vperm.xlu2 %5952, %v4537_v3   ;;  %4738 = vperm.xlu0 %5954, %v4537_v3  }
0x3237   :  { %4541 = vrot.lane.b32.xlu1 %v4537_v3, %s6407_s25 }
0x323e   :  { %5955 = vset.pattern.permute.xlu2 %v6406_v4 }
0x323f   :  { %4686 = vperm.xlu1 %5953, %v4537_v3   ;;  %v4501_v46 = vpop.permute.xlu2 %4500 }
0x3240   :  { %v4505_v48 = vmul.f32 %v4503_v32, %v4501_v46 }
0x3247   :  { %4611 = vrot.lane.b32.xlu1 %v4537_v3, %s6408_s26 }
0x3248   :  { %v4525_v39 = vpop.permute.xlu2 %4524 }
0x3249   :  { %v4529_v12 = vmul.f32 %v4527_v35, %v4525_v39 }
0x3257   :  { %v4512_v30 = vpop.permute.xlu1 %4511 }
0x3258   :  { %v4516_v49 = vmul.f32 %v4514_v31, %v4512_v30 }
0x325a   :  { %v4518_v51 = vadd.f32 %v4516_v49, %v4505_v48 }
0x325c   :  { %v4531_v52 = vadd.f32 %v4529_v12, %v4518_v51 }
0x325e   :  { %v4538_v54 = vadd.f32 %v6039_v43, %v4531_v52 }
0x3260   :  { %4690 = vperm.xlu1 %5953, %v4538_v54   ;;  %4543 = vrot.lane.b32.xlu2 %v4538_v54, %s6407_s25 }
0x3268   :  { %5956 = vset.pattern.permute.xlu1 %v6404_v1  ;;  %4742 = vperm.xlu2 %5955, %v4538_v54  }
0x3269   :  { %4791 = vperm.xlu1 %5956, %v4538_v54  }
0x3271   :  { %4613 = vrot.lane.b32.xlu1 %v4538_v54, %s6408_s26 }
0x3290   :  { %v4788_v56 = vpop.permute.xlu2 %4787 }
0x32a8   :  { %v4739_v58 = vpop.permute.xlu0 %4738 }
0x32a9   :  { %v4542_v55 = vpop.permute.xlu1 %4541 }
0x32aa   :  { %4547 = vxpose.xlu0.b32.start.end [1/1] (short) (narrow) %v4542_v55, 8 }
0x32b1   :  { %v4687_v57 = vpop.permute.xlu1 %4686 }
0x32b9   :  { %v4612_v61 = vpop.permute.xlu1 %4611 }
0x32ba   :  { %v4544_v37 = vpop.permute.xlu2 %4543 }
0x32bb   :  { %4579 = vxpose.xlu2.b32.start.end [1/1] (short) (narrow) %v4544_v37, 8 }
0x32c2   :  { %v4743_v60 = vpop.permute.xlu2 %4742 }
0x32d2   :  { %v4691_v15 = vpop.permute.xlu1 %4690 }
0x32db   :  { %v4792_v62 = vpop.permute.xlu1 %4791 }
0x32e3   :  { %v4614_v25 = vpop.permute.xlu1 %4613 }
0x331d   :  { %5957 = vset.pattern.permute.xlu2 %v6405_v2 }
0x334e   :  { %v4563_v33 = vpop.trf.xlu0 }
0x334f   :  { %v4693_v63 = vperm.slane %v4563_v33, 0  ;;  %v4745_v5 = vperm.slane %v4563_v33, 1  ;;  %v4794_v6 = vperm.slane %v4563_v33, 2 }
0x3351   :  { %v4796_v47 = vmul.f32 %v4794_v6, %v4788_v56  ;;  %v4747_v7 = vmul.f32 %v4745_v5, %v4739_v58  ;;  %v4695_v8 = vmul.f32 %v4693_v63, %v4687_v57 }
0x3353   :  { %v4798_v9 = vsel %vm255_vm0, %v4796_v47, -inf  ;;  %v4749_v10 = vsel %vm255_vm0, %v4747_v7, -inf  ;;  %v4697_v11 = vsel %vm255_vm0, %v4695_v8, -inf }
0x3354   :  { %4799 = vmax.xlane.f32.xlu2 %v4798_v9  ;;  %4750 = vmax.xlane.f32.xlu0 %v4749_v10  ;;  %v4595_v13 = vpop.trf.xlu2 }
0x3355   :  { %4698 = vmax.xlane.f32.xlu1 %v4697_v11  ;;  %v4694_v14 = vperm.slane %v4595_v13, 0  ;;  %v4746_v17 = vperm.slane %v4595_v13, 1  ;;  %v4795_v20 = vperm.slane %v4595_v13, 2 }
0x3357   :  { %v4696_v21 = vmul.f32 %v4694_v14, %v4691_v15  ;;  %v4748_v19 = vmul.f32 %v4746_v17, %v4743_v60  ;;  %v4797_v23 = vmul.f32 %v4795_v20, %v4792_v62 }
0x3359   :  { %v4700_v16 = vsel %vm255_vm0, %v4696_v21, -inf  ;;  %v4752_v22 = vsel %vm255_vm0, %v4748_v19, -inf  ;;  %v4801_v24 = vsel %vm255_vm0, %v4797_v23, -inf }
0x335d   :  { %4701 = vmax.xlane.f32.xlu1 %v4700_v16 }
0x3365   :  { %4753 = vmax.xlane.f32.xlu1 %v4752_v22  ;;  %v5795_v22 = vld [vmem:[%s7678_s3 + $0x20] sm:$0x7] }
0x336d   :  { %4802 = vmax.xlane.f32.xlu1 %v4801_v24  ;;  %v4729_v24 = vperm.slane %v5795_v22, 0 }
0x337d   :  { %4649 = vxpose.xlu0.b32.start.end [1/1] (short) (narrow) %v4614_v25, 8 }
0x33a7   :  { %4617 = vxpose.xlu1.b32.start.end [1/1] (short) (narrow) %v4612_v61, 8 }
0x33c7   :  { %v4751_v27 = vpop.xlane.xlu0 %4750  ;;  %v4800_v31 = vpop.xlane.xlu2 %4799 }
0x33c8   :  { %v4699_v26 = vpop.xlane.xlu1 %4698  ;;  %v4755_v0 = vsub.f32 %v4747_v7, %v4751_v27  ;;  %v4804_v34 = vsub.f32 %v4796_v47, %v4800_v31 }
0x33c9   :  { %v4703_v28 = vsub.f32 %v4695_v8, %v4699_v26 }
0x33ca   :  { %v4757_v50 = vmul.f32 1.442695, %v4755_v0  ;;  %v4806_v36 = vmul.f32 1.442695, %v4804_v34  ;;  %v6040_v0 = vld [vmem:[%s7679_s4 + $0x8] ss:$0 sm:$0xff] }
0x33cb   :  { %v4705_v29 = vmul.f32 1.442695, %v4703_v28  ;;  %v4781_v28 = vperm.slane %v5795_v22, 1 }
0x33cd   :  { %6314 = vpow2.f32 %v4705_v29 }
0x33ce   :  { %6316 = vpow2.f32 %v4757_v50 }
0x33cf   :  { %6318 = vpow2.f32 %v4806_v36 }
0x33d0   :  { %v4702_v43 = vpop.xlane.xlu1 %4701 }
0x33d1   :  { %v4704_v3 = vsub.f32 %v4696_v21, %v4702_v43 }
0x33d3   :  { %v6315_v32 = vpop.eup %6314  ;;  %v4707_v46 = vmul.f32 1.442695, %v4704_v3 }
0x33d4   :  { %v4709_v35 = vsel %vm255_vm0, %v6315_v32, 0.0  ;;  %v6317_v38 = vpop.eup %6316 }
0x33d5   :  { %4710 = vadd.xlane.f32.xlu2 %v4709_v35  ;;  %v4761_v40 = vsel %vm255_vm0, %v6317_v38, 0.0  ;;  %v6319_v42 = vpop.eup %6318  ;;  %6320 = vpow2.f32 %v4707_v46 }
0x33d6   :  { %v4810_v59 = vsel %vm255_vm0, %v6319_v42, 0.0 }
0x33d8   :  { %v4754_v44 = vpop.xlane.xlu1 %4753 }
0x33d9   :  { %v4756_v54 = vsub.f32 %v4748_v19, %v4754_v44 }
0x33db   :  { %v4759_v57 = vmul.f32 1.442695, %v4756_v54  ;;  %v6321_v58 = vpop.eup %6320 }
0x33dc   :  { %v4712_v61 = vsel %vm255_vm0, %v6321_v58, 0.0 }
0x33dd   :  { %4762 = vadd.xlane.f32.xlu2 %v4761_v40  ;;  %6322 = vpow2.f32 %v4759_v57 }
0x33e0   :  { %v4803_v45 = vpop.xlane.xlu1 %4802 }
0x33e1   :  { %v4805_v60 = vsub.f32 %v4797_v23, %v4803_v45 }
0x33e3   :  { %v4808_v33 = vmul.f32 1.442695, %v4805_v60  ;;  %v6323_v63 = vpop.eup %6322 }
0x33e4   :  { %v4764_v5 = vsel %vm255_vm0, %v6323_v63, 0.0 }
0x33e5   :  { %4811 = vadd.xlane.f32.xlu2 %v4810_v59  ;;  %6324 = vpow2.f32 %v4808_v33 }
0x33eb   :  { %v6325_v6 = vpop.eup %6324 }
0x33ec   :  { %v4813_v8 = vsel %vm255_vm0, %v6325_v6, 0.0 }
0x3421   :  { %v4665_v47 = vpop.trf.xlu0 }
0x3422   :  { %v4716_v7 = vperm.slane %v4665_v47, 0  ;;  %v4768_v10 = vperm.slane %v4665_v47, 1  ;;  %v4817_v14 = vperm.slane %v4665_v47, 2 }
0x3424   :  { %v4718_v9 = vmul.f32 %v6321_v58, %v4716_v7  ;;  %v4770_v13 = vmul.f32 %v6323_v63, %v4768_v10  ;;  %v4819_v21 = vmul.f32 %v6325_v6, %v4817_v14 }
0x3426   :  { %v4722_v11 = vsel %vm255_vm0, %v4718_v9, 0.0  ;;  %v4774_v15 = vsel %vm255_vm0, %v4770_v13, 0.0  ;;  %v4823_v16 = vsel %vm255_vm0, %v4819_v21, 0.0 }
0x3448   :  { %v4711_v17 = vpop.xlane.xlu2 %4710 }
0x3449   :  { %6326 = vrcp.f32 %v4711_v17 }
0x344b   :  { %v4633_v39 = vpop.trf.xlu1 }
0x344c   :  { %v4715_v30 = vperm.slane %v4633_v39, 0  ;;  %v4767_v48 = vperm.slane %v4633_v39, 1  ;;  %v4816_v49 = vperm.slane %v4633_v39, 2 }
0x344e   :  { %v4818_v12 = vmul.f32 %v6319_v42, %v4816_v49  ;;  %v4769_v51 = vmul.f32 %v6317_v38, %v4767_v48  ;;  %v4717_v52 = vmul.f32 %v6315_v32, %v4715_v30  ;;  %v4830_v32 = vperm.slane %v5795_v22, 2 }
0x344f   :  { %v6327_v62 = vpop.eup %6326 }
0x3450   :  { %v4820_v55 = vsel %vm255_vm0, %v4818_v12, 0.0  ;;  %v4771_v56 = vsel %vm255_vm0, %v4769_v51, 0.0  ;;  %v4719_v37 = vsel %vm255_vm0, %v4717_v52, 0.0  ;;  %v4763_v19 = vpop.xlane.xlu2 %4762 }
0x3451   :  { %4821 = vadd.xlane.f32.xlu1 %v4820_v55  ;;  %4772 = vadd.xlane.f32.xlu0 %v4771_v56  ;;  %6328 = vrcp.f32 %v4763_v19 }
0x3452   :  { %4720 = vadd.xlane.f32.xlu2 %v4719_v37 }
0x3457   :  { %v6329_v25 = vpop.eup %6328 }
0x3458   :  { %v4812_v20 = vpop.xlane.xlu2 %4811 }
0x3459   :  { %6330 = vrcp.f32 %v4812_v20 }
0x345a   :  { %4713 = vadd.xlane.f32.xlu2 %v4712_v61 }
0x345f   :  { %v6331_v31 = vpop.eup %6330 }
0x3462   :  { %4765 = vadd.xlane.f32.xlu2 %v4764_v5 }
0x346a   :  { %4814 = vadd.xlane.f32.xlu2 %v4813_v8 }
0x3472   :  { %4723 = vadd.xlane.f32.xlu2 %v4722_v11 }
0x347a   :  { %4775 = vadd.xlane.f32.xlu2 %v4774_v15 }
0x3482   :  { %4824 = vadd.xlane.f32.xlu2 %v4823_v16 }
0x34c4   :  { %v4773_v23 = vpop.xlane.xlu0 %4772  ;;  %v4822_v26 = vpop.xlane.xlu1 %4821 }
0x34c5   :  { %v4721_v27 = vpop.xlane.xlu2 %4720  ;;  %v4779_v29 = vmul.f32 %v6329_v25, %v4773_v23  ;;  %v4828_v34 = vmul.f32 %v6331_v31, %v4822_v26  ;;  %v6042_v25 = vld [vmem:[%s7681_s6 + $0x8] ss:$0 sm:$0xff] }
0x34c6   :  { %v4727_v50 = vmul.f32 %v6327_v62, %v4721_v27  ;;  %v6041_v62 = vld [vmem:[%s7680_s5 + $0x8] ss:$0 sm:$0xff] }
0x34c7   :  { %v4782_v36 = vmul.f32 %v4781_v28, %v4779_v29  ;;  %v4831_v40 = vmul.f32 %v4830_v32, %v4828_v34 }
0x34c8   :  { %v4730_v35 = vmul.f32 %v4729_v24, %v4727_v50 }
0x34ca   :  { %v4735_v38 = vadd.f32 %v6040_v0, %v4730_v35 }
0x34cc   :  { %v4784_v42 = vadd.f32 %v4782_v36, %v4735_v38 }
0x34cd   :  { %v4714_v59 = vpop.xlane.xlu2 %4713 }
0x34ce   :  { %v4833_v43 = vadd.f32 %v4831_v40, %v4784_v42  ;;  %6332 = vrcp.f32 %v4714_v59 }
0x34d0   :  { %v4835_v44 = vadd.f32 %v4833_v43, %v7434_v18  ;;  %v5804_v43 = vld [vmem:[%s7686_s11 + $0x118] sm:$0xff] }
0x34d1   :  { %4968 = vmatpush.msra.mxu0 %v5804_v43  ;;  %v6046_v43 = vld [vmem:[%s7683_s8 + $0x8] ss:$0 sm:$0xff] }
0x34d2   :  { %v4841_v45 = vsel %vm398_vm1, %v4835_v44, 0.0 }
0x34d3   :  { %4842 = vadd.xlane.f32.xlu2 %v4841_v45  ;;  %v5802_v45 = vld [vmem:[%s7686_s11 + $0x108] sm:$0xff] }
0x34d4   :  { %v6333_v30 = vpop.eup %6332 }
0x34d5   :  { %v4766_v3 = vpop.xlane.xlu2 %4765 }
0x34d6   :  { %6334 = vrcp.f32 %v4766_v3  ;;  %v5801_v3 = vld [vmem:[%s7686_s11 + $0x100] sm:$0xff] }
0x34dc   :  { %v6335_v12 = vpop.eup %6334 }
0x34dd   :  { %v4815_v46 = vpop.xlane.xlu2 %4814 }
0x34de   :  { %6336 = vrcp.f32 %v4815_v46 }
0x34e4   :  { %v6337_v55 = vpop.eup %6336 }
0x34e5   :  { %v4724_v39 = vpop.xlane.xlu2 %4723 }
0x34e6   :  { %v4728_v49 = vmul.f32 %v6333_v30, %v4724_v39  ;;  %v5799_v39 = vld [vmem:[%s7684_s9 + $0x20] sm:$0x7] }
0x34e7   :  { %v4918_v30 = vperm.slane %v5799_v39, 1 }
0x34e8   :  { %v4731_v52 = vmul.f32 %v4729_v24, %v4728_v49  ;;  %v4907_v49 = vperm.slane %v5799_v39, 0 }
0x34ea   :  { %v4736_v37 = vadd.f32 %v6040_v0, %v4731_v52 }
0x34ed   :  { %v4776_v48 = vpop.xlane.xlu2 %4775 }
0x34ee   :  { %v4780_v51 = vmul.f32 %v6335_v12, %v4776_v48 }
0x34f0   :  { %v4783_v54 = vmul.f32 %v4781_v28, %v4780_v51  ;;  %v4931_v51 = vperm.slane %v5799_v39, 2 }
0x34f2   :  { %v4785_v57 = vadd.f32 %v4783_v54, %v4736_v37 }
0x34f5   :  { %v4825_v56 = vpop.xlane.xlu2 %4824 }
0x34f6   :  { %v4829_v18 = vmul.f32 %v6337_v55, %v4825_v56  ;;  %v6043_v56 = vld [vmem:[%s7685_s10 + $0x8] ss:$0 sm:$0xff] }
0x34f8   :  { %v4832_v58 = vmul.f32 %v4830_v32, %v4829_v18 }
0x34fa   :  { %v4834_v60 = vadd.f32 %v4832_v58, %v4785_v57 }
0x34fc   :  { %v4836_v61 = vadd.f32 %v4834_v60, %v7443_v53 }
0x34fe   :  { %v4844_v33 = vsel %vm398_vm1, %v4836_v61, 0.0 }
0x34ff   :  { %4845 = vadd.xlane.f32.xlu2 %v4844_v33 }
0x3546   :  { %v4843_v63 = vpop.xlane.xlu2 %4842 }
0x3547   :  { %v4847_v5 = vmul.f32 %v4843_v63, %v6566_v41 }
0x3549   :  { %v4849_v6 = vsub.f32 %v4835_v44, %v4847_v5  ;;  %v5803_v44 = vld [vmem:[%s7686_s11 + $0x110] sm:$0xff] }
0x354a   :  { %4969 = vmatpush.msra.mxu0 %v5803_v44 }
0x354b   :  { %v4851_v47 = vmul.f32 %v4849_v6, %v4849_v6 }
0x354c   :  { %4970 = vmatpush.msra.mxu0 %v5802_v45 }
0x354d   :  { %v4853_v7 = vsel %vm398_vm1, %v4851_v47, 0.0 }
0x354e   :  { %4854 = vadd.xlane.f32.xlu2 %v4853_v7  ;;  %4971 = vmatpush.msra.mxu0 %v5801_v3 }
0x3572   :  { %v4846_v8 = vpop.xlane.xlu2 %4845 }
0x3573   :  { %v4848_v9 = vmul.f32 %v4846_v8, %v6566_v41 }
0x3575   :  { %v4850_v10 = vsub.f32 %v4836_v61, %v4848_v9 }
0x3577   :  { %v4852_v11 = vmul.f32 %v4850_v10, %v4850_v10 }
0x3579   :  { %v4856_v13 = vsel %vm398_vm1, %v4852_v11, 0.0 }
0x357a   :  { %4857 = vadd.xlane.f32.xlu2 %v4856_v13 }
0x35c1   :  { %v4855_v53 = vpop.xlane.xlu2 %4854 }
0x35c2   :  { %v4859_v14 = vmul.f32 %v4855_v53, %v6566_v41 }
0x35c4   :  { %v4861_v15 = vadd.f32 1e-05, %v4859_v14 }
0x35c6   :  { %6338 = vrsqrt.f32 %v4861_v15  ;;  %vm4869_vm10 = vweird.f32 %v4861_v15 }
0x35cc   :  { %v6339_v21 = vpop.eup %6338 }
0x35cd   :  { %v4864_v16 = vmul.f32 %v6339_v21, %v4861_v15  ;;  %vm4870_vm8 = vweird.f32 %v6339_v21 }
0x35ce   :  { %vm4871_vm11 = vmor %vm4869_vm10, %vm4870_vm8 }
0x35cf   :  { %v4865_v17 = vmul.f32 %v6339_v21, %v4864_v16 }
0x35d1   :  { %v4866_v19 = vmul.f32 0.5, %v4865_v17 }
0x35d3   :  { %v4867_v20 = vsub.f32 1.5, %v4866_v19 }
0x35d5   :  { %v4868_v22 = vmul.f32 %v6339_v21, %v4867_v20 }
0x35d7   :  { %v4872_v23 = vsel %vm4871_vm11, %v6339_v21, %v4868_v22 }
0x35d8   :  { %v4883_v24 = vmul.f32 %v4872_v23, %v4849_v6 }
0x35da   :  { %v4888_v26 = vmul.f32 %v6041_v62, %v4883_v24 }
0x35dc   :  { %v7502_v27 = vadd.f32 %v6042_v25, %v4888_v26 }
0x35de   :  { %4924 = vperm.xlu1 %5956, %v7502_v27   ;;  %4899 = vperm.xlu2 %5957, %v7502_v27  }
0x35e6   :  { %5958 = vset.pattern.permute.xlu2 %v6406_v4  ;;  %5961 = vset.pattern.permute.xlu1 %v6405_v2 }
0x35e7   :  { %4911 = vperm.xlu2 %5958, %v7502_v27  }
0x35ed   :  { %v4858_v28 = vpop.xlane.xlu2 %4857 }
0x35ee   :  { %v4860_v29 = vmul.f32 %v4858_v28, %v6566_v41 }
0x35ef   :  { %5959 = vset.pattern.permute.xlu2 %v6405_v2 }
0x35f0   :  { %v4862_v0 = vadd.f32 1e-05, %v4860_v29 }
0x35f2   :  { %6340 = vrsqrt.f32 %v4862_v0  ;;  %vm4879_vm13 = vweird.f32 %v4862_v0 }
0x35f8   :  { %v6341_v50 = vpop.eup %6340 }
0x35f9   :  { %v4874_v31 = vmul.f32 %v6341_v50, %v4862_v0  ;;  %vm4880_vm12 = vweird.f32 %v6341_v50 }
0x35fa   :  { %vm4881_vm14 = vmor %vm4879_vm13, %vm4880_vm12 }
0x35fb   :  { %v4875_v32 = vmul.f32 %v6341_v50, %v4874_v31 }
0x35fd   :  { %v4876_v34 = vmul.f32 0.5, %v4875_v32 }
0x35ff   :  { %v4877_v35 = vsub.f32 1.5, %v4876_v34 }
0x3601   :  { %v4878_v36 = vmul.f32 %v6341_v50, %v4877_v35 }
0x3603   :  { %v4882_v38 = vsel %vm4881_vm14, %v6341_v50, %v4878_v36 }
0x3604   :  { %v4884_v40 = vmul.f32 %v4882_v38, %v4850_v10  ;;  %v6044_v10 = vld [vmem:[%s7687_s12 + $0x8] ss:$0 sm:$0xff] }
0x3606   :  { %v4889_v42 = vmul.f32 %v6041_v62, %v4884_v40  ;;  %v6045_v40 = vld [vmem:[%s7682_s7 + $0x8] ss:$0 sm:$0xff] }
0x3608   :  { %v4894_v59 = vadd.f32 %v6042_v25, %v4889_v42 }
0x360a   :  { %4915 = vperm.xlu0 %5954, %v4894_v59   ;;  %4904 = vperm.xlu2 %5959, %v4894_v59  }
0x3612   :  { %5960 = vset.pattern.permute.xlu2 %v6404_v1 }
0x3613   :  { %4928 = vperm.xlu2 %5960, %v4894_v59  }
0x3638   :  { %v4900_v46 = vpop.permute.xlu2 %4899 }
0x3639   :  { %v4908_v52 = vmul.f32 %v4907_v49, %v4900_v46 }
0x3641   :  { %v4912_v48 = vpop.permute.xlu2 %4911 }
0x3642   :  { %v4919_v12 = vmul.f32 %v4918_v30, %v4912_v48 }
0x3644   :  { %v4921_v55 = vadd.f32 %v4919_v12, %v4908_v52 }
0x3650   :  { %v4925_v54 = vpop.permute.xlu1 %4924 }
0x3651   :  { %v4932_v37 = vmul.f32 %v4931_v51, %v4925_v54 }
0x3653   :  { %v4934_v18 = vadd.f32 %v4932_v37, %v4921_v55 }
0x3655   :  { %v4941_v57 = vadd.f32 %v6043_v56, %v4934_v18  ;;  %v5810_v18 = vld [vmem:[%s7676_s1 + $0x24] sm:$0x7] }
0x3657   :  { %v4943_v58 = vmax.f32 %v4941_v57, 0.0  ;;  %v5069_v57 = vperm.slane %v5810_v18, 1 }
0x3659   :  { %5805 = vmatmul.msk.f32.vlgmr.msra.gmra.mxu0 %vm512_vm9, %v4943_v58  ;;  %v5058_v58 = vperm.slane %v5810_v18, 0 }
0x3664   :  { %v4905_v60 = vpop.permute.xlu2 %4904 }
0x3665   :  { %v4909_v63 = vmul.f32 %v4907_v49, %v4905_v60  ;;  %v5082_v60 = vperm.slane %v5810_v18, 2 }
0x366d   :  { %v4929_v61 = vpop.permute.xlu2 %4928 }
0x366e   :  { %v4933_v6 = vmul.f32 %v4931_v51, %v4929_v61 }
0x367c   :  { %v4916_v33 = vpop.permute.xlu0 %4915 }
0x367d   :  { %v4920_v5 = vmul.f32 %v4918_v30, %v4916_v33 }
0x367f   :  { %v4922_v47 = vadd.f32 %v4920_v5, %v4909_v63 }
0x3681   :  { %v4935_v7 = vadd.f32 %v4933_v6, %v4922_v47 }
0x3683   :  { %v4942_v8 = vadd.f32 %v6043_v56, %v4935_v7  ;;  %v6047_v7 = vld [vmem:[%s7677_s2 + $0x9] ss:$0 sm:$0xff] }
0x3685   :  { %v4944_v9 = vmax.f32 %v4942_v8, 0.0 }
0x3687   :  { %5806 = vmatmul.msk.f32.gmra.mxu0 %vm512_vm9, %v4944_v9 }
0x36d6   :  { %v4973_v11 = vpop.f32.mrf.mxu0 }
0x36d7   :  { %v4984_v13 = vadd.f32 %v6044_v10, %v4973_v11 }
0x36d9   :  { %v4986_v53 = vadd.f32 %v4984_v13, %v7502_v27 }
0x36db   :  { %v4992_v14 = vsel %vm398_vm1, %v4986_v53, 0.0 }
0x36dc   :  { %4993 = vadd.xlane.f32.xlu2 %v4992_v14 }
0x3704   :  { %v4976_v15 = vpop.f32.mrf.mxu0 }
0x3705   :  { %v4985_v21 = vadd.f32 %v6044_v10, %v4976_v15 }
0x3707   :  { %v4987_v16 = vadd.f32 %v4985_v21, %v4894_v59 }
0x3709   :  { %v4995_v17 = vsel %vm398_vm1, %v4987_v16, 0.0 }
0x370a   :  { %4996 = vadd.xlane.f32.xlu1 %v4995_v17 }
0x374f   :  { %v4994_v19 = vpop.xlane.xlu2 %4993 }
0x3750   :  { %v4998_v20 = vmul.f32 %v4994_v19, %v6566_v41 }
0x3752   :  { %v5000_v22 = vsub.f32 %v4986_v53, %v4998_v20 }
0x3754   :  { %v5002_v62 = vmul.f32 %v5000_v22, %v5000_v22 }
0x3756   :  { %v5004_v23 = vsel %vm398_vm1, %v5002_v62, 0.0 }
0x3757   :  { %5005 = vadd.xlane.f32.xlu0 %v5004_v23 }
0x377d   :  { %v4997_v24 = vpop.xlane.xlu1 %4996 }
0x377e   :  { %v4999_v25 = vmul.f32 %v4997_v24, %v6566_v41 }
0x3780   :  { %v5001_v26 = vsub.f32 %v4987_v16, %v4999_v25 }
0x3782   :  { %v5003_v27 = vmul.f32 %v5001_v26, %v5001_v26 }
0x3784   :  { %v5007_v28 = vsel %vm398_vm1, %v5003_v27, 0.0 }
0x3785   :  { %5008 = vadd.xlane.f32.xlu2 %v5007_v28 }
0x37ca   :  { %v5006_v29 = vpop.xlane.xlu0 %5005 }
0x37cb   :  { %v5010_v0 = vmul.f32 %v5006_v29, %v6566_v41 }
0x37cd   :  { %v5012_v50 = vadd.f32 1e-05, %v5010_v0 }
0x37cf   :  { %6342 = vrsqrt.f32 %v5012_v50  ;;  %vm5020_vm2 = vweird.f32 %v5012_v50 }
0x37d5   :  { %v6343_v31 = vpop.eup %6342 }
0x37d6   :  { %v5015_v32 = vmul.f32 %v6343_v31, %v5012_v50  ;;  %vm5021_vm15 = vweird.f32 %v6343_v31 }
0x37d7   :  { %vm5022_vm3 = vmor %vm5020_vm2, %vm5021_vm15 }
0x37d8   :  { %v5016_v34 = vmul.f32 %v6343_v31, %v5015_v32 }
0x37da   :  { %v5017_v35 = vmul.f32 0.5, %v5016_v34 }
0x37dc   :  { %v5018_v36 = vsub.f32 1.5, %v5017_v35 }
0x37de   :  { %v5019_v38 = vmul.f32 %v6343_v31, %v5018_v36 }
0x37e0   :  { %v5023_v42 = vsel %vm5022_vm3, %v6343_v31, %v5019_v38  ;;  %vm5651_vm3 = vcmask 23559  }
0x37e1   :  { %v5034_v59 = vmul.f32 %v5023_v42, %v5000_v22 }
0x37e3   :  { %v5039_v44 = vmul.f32 %v6045_v40, %v5034_v59 }
0x37e5   :  { %v7549_v45 = vadd.f32 %v6046_v43, %v5039_v44 }
0x37e7   :  { %5075 = vperm.xlu2 %5960, %v7549_v45   ;;  %5062 = vperm.xlu0 %5954, %v7549_v45  }
0x37e8   :  { %5050 = vperm.xlu1 %5961, %v7549_v45  }
0x37ef   :  { %5962 = vset.pattern.permute.xlu0 %v6405_v2 }
0x37f0   :  { %5963 = vset.pattern.permute.xlu1 %v6406_v4 }
0x37f8   :  { %v5009_v3 = vpop.xlane.xlu2 %5008 }
0x37f9   :  { %v5011_v46 = vmul.f32 %v5009_v3, %v6566_v41 }
0x37fb   :  { %v5013_v39 = vadd.f32 1e-05, %v5011_v46 }
0x37fd   :  { %6344 = vrsqrt.f32 %v5013_v39  ;;  %vm5030_vm5 = vweird.f32 %v5013_v39 }
0x3803   :  { %v6345_v30 = vpop.eup %6344 }
0x3804   :  { %v5025_v48 = vmul.f32 %v6345_v30, %v5013_v39  ;;  %vm5031_vm4 = vweird.f32 %v6345_v30 }
0x3805   :  { %vm5032_vm6 = vmor %vm5030_vm5, %vm5031_vm4 }
0x3806   :  { %v5026_v49 = vmul.f32 %v6345_v30, %v5025_v48 }
0x3808   :  { %v5027_v12 = vmul.f32 0.5, %v5026_v49 }
0x380a   :  { %v5028_v51 = vsub.f32 1.5, %v5027_v12 }
0x380c   :  { %v5029_v52 = vmul.f32 %v6345_v30, %v5028_v51 }
0x380e   :  { %v5033_v54 = vsel %vm5032_vm6, %v6345_v30, %v5029_v52 }
0x380f   :  { %v5035_v55 = vmul.f32 %v5033_v54, %v5001_v26 }
0x3811   :  { %v5040_v56 = vmul.f32 %v6045_v40, %v5035_v55 }
0x3813   :  { %v7557_v37 = vadd.f32 %v6046_v43, %v5040_v56 }
0x3815   :  { %5079 = vperm.xlu2 %5960, %v7557_v37   ;;  %5066 = vperm.xlu1 %5963, %v7557_v37  }
0x3816   :  { %5055 = vperm.xlu0 %5962, %v7557_v37  }
0x3841   :  { %v5076_v33 = vpop.permute.xlu2 %5075 }
0x3842   :  { %v5083_v47 = vmul.f32 %v5082_v60, %v5076_v33 }
0x3859   :  { %v5063_v61 = vpop.permute.xlu0 %5062 }
0x385a   :  { %v5070_v63 = vmul.f32 %v5069_v57, %v5063_v61  ;;  %v5051_v5 = vpop.permute.xlu1 %5050 }
0x385b   :  { %v5059_v6 = vmul.f32 %v5058_v58, %v5051_v5 }
0x385d   :  { %v5072_v8 = vadd.f32 %v5070_v63, %v5059_v6 }
0x385f   :  { %v5085_v9 = vadd.f32 %v5083_v47, %v5072_v8 }
0x3861   :  { %v5092_v10 = vadd.f32 %v6047_v7, %v5085_v9 }
0x3863   :  { %5342 = vperm.xlu2 %5960, %v5092_v10   ;;  %5241 = vperm.xlu0 %5962, %v5092_v10  }
0x3864   :  { %5096 = vrot.lane.b32.xlu1 %v5092_v10, %s6407_s25 }
0x386b   :  { %5166 = vrot.lane.b32.xlu2 %v5092_v10, %s6408_s26 }
0x386c   :  { %5293 = vperm.xlu1 %5963, %v5092_v10  }
0x386f   :  { %v5080_v13 = vpop.permute.xlu2 %5079 }
0x3870   :  { %v5084_v21 = vmul.f32 %v5082_v60, %v5080_v13 }
0x3887   :  { %v5067_v11 = vpop.permute.xlu1 %5066 }
0x3888   :  { %v5071_v53 = vmul.f32 %v5069_v57, %v5067_v11  ;;  %v5056_v14 = vpop.permute.xlu0 %5055 }
0x3889   :  { %v5060_v15 = vmul.f32 %v5058_v58, %v5056_v14 }
0x388b   :  { %v5073_v16 = vadd.f32 %v5071_v53, %v5060_v15 }
0x388d   :  { %v5086_v17 = vadd.f32 %v5084_v21, %v5073_v16 }
0x388f   :  { %v5093_v19 = vadd.f32 %v6047_v7, %v5086_v17 }
0x3891   :  { %5297 = vperm.xlu1 %5963, %v5093_v19   ;;  %5245 = vperm.xlu0 %5962, %v5093_v19  }
0x3892   :  { %5098 = vrot.lane.b32.xlu2 %v5093_v19, %s6407_s25 }
0x389a   :  { %5346 = vperm.xlu2 %5960, %v5093_v19  }
0x38a2   :  { %5168 = vrot.lane.b32.xlu2 %v5093_v19, %s6408_s26 }
0x38bd   :  { %v5343_v22 = vpop.permute.xlu2 %5342 }
0x38c5   :  { %v5167_v62 = vpop.permute.xlu2 %5166 }
0x38d5   :  { %v5242_v24 = vpop.permute.xlu0 %5241 }
0x38d6   :  { %v5097_v20 = vpop.permute.xlu1 %5096 }
0x38d7   :  { %5102 = vxpose.xlu0.b32.start.end [1/1] (short) (narrow) %v5097_v20, 8 }
0x38de   :  { %v5294_v0 = vpop.permute.xlu1 %5293 }
0x38ec   :  { %v5099_v23 = vpop.permute.xlu2 %5098 }
0x38ed   :  { %5134 = vxpose.xlu1.b32.start.end [1/1] (short) (narrow) %v5099_v23, 8 }
0x38f4   :  { %v5347_v30 = vpop.permute.xlu2 %5346 }
0x38fc   :  { %v5169_v12 = vpop.permute.xlu2 %5168 }
0x3903   :  { %v5246_v25 = vpop.permute.xlu0 %5245  ;;  %v5298_v38 = vpop.permute.xlu1 %5297 }
0x3940   :  { %5964 = vset.pattern.permute.xlu1 %v6405_v2 }
0x397b   :  { %v5118_v26 = vpop.trf.xlu0 }
0x397c   :  { %v5248_v27 = vperm.slane %v5118_v26, 0  ;;  %v5300_v28 = vperm.slane %v5118_v26, 1  ;;  %v5349_v29 = vperm.slane %v5118_v26, 2 }
0x397e   :  { %v5302_v50 = vmul.f32 %v5300_v28, %v5294_v0  ;;  %v5250_v31 = vmul.f32 %v5248_v27, %v5242_v24  ;;  %v5351_v32 = vmul.f32 %v5349_v29, %v5343_v22 }
0x3980   :  { %v5304_v34 = vsel %vm255_vm0, %v5302_v50, -inf  ;;  %v5252_v35 = vsel %vm255_vm0, %v5250_v31, -inf  ;;  %v5353_v36 = vsel %vm255_vm0, %v5351_v32, -inf }
0x3981   :  { %5305 = vmax.xlane.f32.xlu0 %v5304_v34  ;;  %5253 = vmax.xlane.f32.xlu2 %v5252_v35 }
0x3982   :  { %5354 = vmax.xlane.f32.xlu1 %v5353_v36 }
0x3991   :  { %v5150_v40 = vpop.trf.xlu1 }
0x3992   :  { %v5249_v42 = vperm.slane %v5150_v40, 0  ;;  %v5301_v43 = vperm.slane %v5150_v40, 1  ;;  %v5350_v46 = vperm.slane %v5150_v40, 2 }
0x3994   :  { %v5251_v59 = vmul.f32 %v5249_v42, %v5246_v25  ;;  %v5303_v3 = vmul.f32 %v5301_v43, %v5298_v38  ;;  %v5352_v48 = vmul.f32 %v5350_v46, %v5347_v30  ;;  %v5812_v30 = vld [vmem:[%s7678_s3 + $0x24] sm:$0x7] }
0x3996   :  { %v5255_v44 = vsel %vm255_vm0, %v5251_v59, -inf  ;;  %v5307_v39 = vsel %vm255_vm0, %v5303_v3, -inf  ;;  %v5356_v49 = vsel %vm255_vm0, %v5352_v48, -inf }
0x3997   :  { %5256 = vmax.xlane.f32.xlu2 %v5255_v44 }
0x399f   :  { %5308 = vmax.xlane.f32.xlu2 %v5307_v39 }
0x39a7   :  { %5357 = vmax.xlane.f32.xlu2 %v5356_v49 }
0x39aa   :  { %5204 = vxpose.xlu0.b32.start.end [1/1] (short) (narrow) %v5169_v12, 8  ;;  %v5284_v12 = vperm.slane %v5812_v30, 0 }
0x39d0   :  { %5172 = vxpose.xlu2.b32.start.end [1/1] (short) (narrow) %v5167_v62, 8 }
0x39f4   :  { %v5254_v51 = vpop.xlane.xlu2 %5253  ;;  %v5306_v54 = vpop.xlane.xlu0 %5305 }
0x39f5   :  { %v5258_v52 = vsub.f32 %v5250_v31, %v5254_v51  ;;  %v5310_v56 = vsub.f32 %v5302_v50, %v5306_v54  ;;  %v5355_v57 = vpop.xlane.xlu1 %5354  ;;  %v5336_v54 = vperm.slane %v5812_v30, 1 }
0x39f6   :  { %v5359_v60 = vsub.f32 %v5351_v32, %v5355_v57 }
0x39f7   :  { %v5260_v55 = vmul.f32 1.442695, %v5258_v52  ;;  %v5312_v18 = vmul.f32 1.442695, %v5310_v56  ;;  %v6048_v56 = vld [vmem:[%s7679_s4 + $0x9] ss:$0 sm:$0xff] }
0x39f8   :  { %v5361_v33 = vmul.f32 1.442695, %v5359_v60  ;;  %s5660_s4 = sshll.u32 %s7690_s15, 4  ;;  %s5661_s4 = int_to_ptr.hbm [resolvable:$true] %s5660_s4 }
0x39f9   :  { %6346 = vpow2.f32 %v5260_v55 }
0x39fa   :  { %6348 = vpow2.f32 %v5312_v18 }
0x39fb   :  { %6350 = vpow2.f32 %v5361_v33 }
0x39ff   :  { %v6347_v58 = vpop.eup %6346 }
0x3a00   :  { %v5264_v61 = vsel %vm255_vm0, %v6347_v58, 0.0  ;;  %v6349_v63 = vpop.eup %6348 }
0x3a01   :  { %5265 = vadd.xlane.f32.xlu1 %v5264_v61  ;;  %v5316_v5 = vsel %vm255_vm0, %v6349_v63, 0.0  ;;  %v6351_v47 = vpop.eup %6350 }
0x3a02   :  { %v5365_v7 = vsel %vm255_vm0, %v6351_v47, 0.0 }
0x3a09   :  { %5317 = vadd.xlane.f32.xlu1 %v5316_v5 }
0x3a0a   :  { %v5257_v6 = vpop.xlane.xlu2 %5256 }
0x3a0b   :  { %v5259_v53 = vsub.f32 %v5251_v59, %v5257_v6 }
0x3a0d   :  { %v5262_v14 = vmul.f32 1.442695, %v5259_v53 }
0x3a11   :  { %5967 = vset.pattern.permute.xlu0 %v6406_v4  ;;  %5366 = vadd.xlane.f32.xlu1 %v5365_v7 }
0x3a12   :  { %v5309_v8 = vpop.xlane.xlu2 %5308 }
0x3a13   :  { %v5311_v9 = vsub.f32 %v5303_v3, %v5309_v8 }
0x3a15   :  { %v5314_v10 = vmul.f32 1.442695, %v5311_v9 }
0x3a17   :  { %6352 = vpow2.f32 %v5314_v10 }
0x3a18   :  { %6354 = vpow2.f32 %v5262_v14 }
0x3a1a   :  { %v5358_v16 = vpop.xlane.xlu2 %5357 }
0x3a1b   :  { %v5360_v24 = vsub.f32 %v5352_v48, %v5358_v16 }
0x3a1d   :  { %v6353_v11 = vpop.eup %6352  ;;  %v5363_v27 = vmul.f32 1.442695, %v5360_v24 }
0x3a1e   :  { %v5319_v13 = vsel %vm255_vm0, %v6353_v11, 0.0  ;;  %v6355_v15 = vpop.eup %6354 }
0x3a1f   :  { %5320 = vadd.xlane.f32.xlu0 %v5319_v13  ;;  %v5267_v21 = vsel %vm255_vm0, %v6355_v15, 0.0  ;;  %6356 = vpow2.f32 %v5363_v27 }
0x3a25   :  { %v6357_v0 = vpop.eup %6356 }
0x3a26   :  { %v5368_v32 = vsel %vm255_vm0, %v6357_v0, 0.0 }
0x3a41   :  { %5268 = vadd.xlane.f32.xlu2 %v5267_v21 }
0x3a4e   :  { %v5220_v50 = vpop.trf.xlu0 }
0x3a4f   :  { %v5271_v31 = vperm.slane %v5220_v50, 0  ;;  %v5323_v35 = vperm.slane %v5220_v50, 1  ;;  %v5372_v40 = vperm.slane %v5220_v50, 2 }
0x3a51   :  { %v5273_v34 = vmul.f32 %v6355_v15, %v5271_v31  ;;  %v5325_v38 = vmul.f32 %v6353_v11, %v5323_v35  ;;  %v5374_v59 = vmul.f32 %v6357_v0, %v5372_v40 }
0x3a53   :  { %v5277_v36 = vsel %vm255_vm0, %v5273_v34, 0.0  ;;  %v5329_v42 = vsel %vm255_vm0, %v5325_v38, 0.0  ;;  %v5378_v43 = vsel %vm255_vm0, %v5374_v59, 0.0 }
0x3a69   :  { %v5188_v17 = vpop.trf.xlu2 }
0x3a6a   :  { %v5270_v19 = vperm.slane %v5188_v17, 0  ;;  %v5322_v22 = vperm.slane %v5188_v17, 1  ;;  %v5371_v25 = vperm.slane %v5188_v17, 2 }
0x3a6c   :  { %v5272_v20 = vmul.f32 %v6347_v58, %v5270_v19  ;;  %v5324_v23 = vmul.f32 %v6349_v63, %v5322_v22  ;;  %v5373_v28 = vmul.f32 %v6351_v47, %v5371_v25  ;;  %v5385_v58 = vperm.slane %v5812_v30, 2  ;;  %v6049_v30 = vld [vmem:[%s7680_s5 + $0x9] ss:$0 sm:$0xff] }
0x3a6e   :  { %v5274_v62 = vsel %vm255_vm0, %v5272_v20, 0.0  ;;  %v5326_v26 = vsel %vm255_vm0, %v5324_v23, 0.0  ;;  %v5375_v29 = vsel %vm255_vm0, %v5373_v28, 0.0 }
0x3a6f   :  { %5275 = vadd.xlane.f32.xlu1 %v5274_v62 }
0x3a74   :  { %v5266_v44 = vpop.xlane.xlu1 %5265 }
0x3a75   :  { %6358 = vrcp.f32 %v5266_v44 }
0x3a77   :  { %5327 = vadd.xlane.f32.xlu1 %v5326_v26 }
0x3a7b   :  { %v6359_v48 = vpop.eup %6358 }
0x3a7c   :  { %v5318_v3 = vpop.xlane.xlu1 %5317 }
0x3a7d   :  { %6360 = vrcp.f32 %v5318_v3 }
0x3a7f   :  { %5376 = vadd.xlane.f32.xlu1 %v5375_v29 }
0x3a83   :  { %v6361_v52 = vpop.eup %6360 }
0x3a84   :  { %v5367_v46 = vpop.xlane.xlu1 %5366 }
0x3a85   :  { %6362 = vrcp.f32 %v5367_v46 }
0x3a87   :  { %5369 = vadd.xlane.f32.xlu1 %v5368_v32 }
0x3a8b   :  { %v6363_v60 = vpop.eup %6362 }
0x3a8f   :  { %5278 = vadd.xlane.f32.xlu1 %v5277_v36 }
0x3a92   :  { %v5321_v13 = vpop.xlane.xlu0 %5320 }
0x3a97   :  { %5330 = vadd.xlane.f32.xlu1 %v5329_v42 }
0x3a9f   :  { %5379 = vadd.xlane.f32.xlu1 %v5378_v43 }
0x3ab4   :  { %v5269_v10 = vpop.xlane.xlu2 %5268 }
0x3ab5   :  { %6364 = vrcp.f32 %v5269_v10  ;;  %v5818_v10 = vld [vmem:[%s7686_s11 + $0x120] sm:$0xff] }
0x3ab6   :  { %6366 = vrcp.f32 %v5321_v13 }
0x3abb   :  { %v6365_v53 = vpop.eup %6364 }
0x3abc   :  { %v6367_v21 = vpop.eup %6366 }
0x3ae2   :  { %v5276_v39 = vpop.xlane.xlu1 %5275 }
0x3ae3   :  { %v5282_v51 = vmul.f32 %v6359_v48, %v5276_v39 }
0x3ae5   :  { %v5285_v18 = vmul.f32 %v5284_v12, %v5282_v51 }
0x3ae7   :  { %v5290_v33 = vadd.f32 %v6048_v56, %v5285_v18 }
0x3aea   :  { %v5328_v49 = vpop.xlane.xlu1 %5327 }
0x3aeb   :  { %v5334_v55 = vmul.f32 %v6361_v52, %v5328_v49 }
0x3aed   :  { %v5337_v57 = vmul.f32 %v5336_v54, %v5334_v55 }
0x3aef   :  { %v5339_v5 = vadd.f32 %v5337_v57, %v5290_v33 }
0x3af2   :  { %v5377_v61 = vpop.xlane.xlu1 %5376 }
0x3af3   :  { %v5383_v63 = vmul.f32 %v6363_v60, %v5377_v61 }
0x3af5   :  { %v5386_v6 = vmul.f32 %v5385_v58, %v5383_v63 }
0x3af7   :  { %v5388_v47 = vadd.f32 %v5386_v6, %v5339_v5 }
0x3af9   :  { %v5390_v7 = vadd.f32 %v5388_v47, %v7549_v45 }
0x3afa   :  { %v5370_v8 = vpop.xlane.xlu1 %5369 }
0x3afb   :  { %v5396_v9 = vsel %vm398_vm1, %v5390_v7, 0.0  ;;  %6368 = vrcp.f32 %v5370_v8  ;;  %v5820_v8 = vld [vmem:[%s7686_s11 + $0x130] sm:$0xff] }
0x3afc   :  { %5397 = vadd.xlane.f32.xlu1 %v5396_v9  ;;  %v5819_v9 = vld [vmem:[%s7686_s11 + $0x128] sm:$0xff] }
0x3b01   :  { %v6369_v20 = vpop.eup %6368 }
0x3b02   :  { %v5279_v11 = vpop.xlane.xlu1 %5278 }
0x3b03   :  { %v5283_v15 = vmul.f32 %v6365_v53, %v5279_v11  ;;  %v5816_v11 = vld [vmem:[%s7684_s9 + $0x24] sm:$0x7] }
0x3b04   :  { %v5462_v13 = vperm.slane %v5816_v11, 0  ;;  %v5473_v53 = vperm.slane %v5816_v11, 1 }
0x3b05   :  { %v5286_v17 = vmul.f32 %v5284_v12, %v5283_v15  ;;  %v6050_v12 = vld [vmem:[%s7681_s6 + $0x9] ss:$0 sm:$0xff] }
0x3b07   :  { %v5291_v45 = vadd.f32 %v6048_v56, %v5286_v17 }
0x3b0a   :  { %v5331_v14 = vpop.xlane.xlu1 %5330 }
0x3b0b   :  { %v5335_v16 = vmul.f32 %v6367_v21, %v5331_v14  ;;  %v5486_v14 = vperm.slane %v5816_v11, 2 }
0x3b0d   :  { %v5338_v19 = vmul.f32 %v5336_v54, %v5335_v16 }
0x3b0f   :  { %v5340_v23 = vadd.f32 %v5338_v19, %v5291_v45 }
0x3b12   :  { %v5380_v22 = vpop.xlane.xlu1 %5379 }
0x3b13   :  { %v5384_v62 = vmul.f32 %v6369_v20, %v5380_v22  ;;  %v6051_v20 = vld [vmem:[%s7685_s10 + $0x9] ss:$0 sm:$0xff] }
0x3b15   :  { %v5387_v24 = vmul.f32 %v5385_v58, %v5384_v62 }
0x3b17   :  { %v5389_v25 = vadd.f32 %v5387_v24, %v5340_v23 }
0x3b19   :  { %v5391_v26 = vadd.f32 %v5389_v25, %v7557_v37 }
0x3b1b   :  { %v5399_v27 = vsel %vm398_vm1, %v5391_v26, 0.0 }
0x3b1c   :  { %5400 = vadd.xlane.f32.xlu1 %v5399_v27 }
0x3b6f   :  { %v5398_v28 = vpop.xlane.xlu1 %5397 }
0x3b70   :  { %v5402_v29 = vmul.f32 %v5398_v28, %v6566_v41 }
0x3b72   :  { %v5404_v0 = vsub.f32 %v5390_v7, %v5402_v29  ;;  %v5821_v7 = vld [vmem:[%s7686_s11 + $0x138] sm:$0xff] }
0x3b73   :  { %5523 = vmatpush.msra.mxu1 %v5821_v7 }
0x3b74   :  { %v5406_v50 = vmul.f32 %v5404_v0, %v5404_v0 }
0x3b75   :  { %5524 = vmatpush.msra.mxu1 %v5820_v8 }
0x3b76   :  { %v5408_v31 = vsel %vm398_vm1, %v5406_v50, 0.0 }
0x3b77   :  { %5409 = vadd.xlane.f32.xlu1 %v5408_v31  ;;  %5525 = vmatpush.msra.mxu1 %v5819_v9 }
0x3b79   :  { %5526 = vmatpush.msra.mxu1 %v5818_v10 }
0x3b8f   :  { %v5401_v32 = vpop.xlane.xlu1 %5400 }
0x3b90   :  { %v5403_v34 = vmul.f32 %v5401_v32, %v6566_v41 }
0x3b92   :  { %v5405_v35 = vsub.f32 %v5391_v26, %v5403_v34  ;;  %v6052_v34 = vld [vmem:[%s7687_s12 + $0x9] ss:$0 sm:$0xff] }
0x3b94   :  { %v5407_v36 = vmul.f32 %v5405_v35, %v5405_v35 }
0x3b96   :  { %v5411_v38 = vsel %vm398_vm1, %v5407_v36, 0.0 }
0x3b97   :  { %5412 = vadd.xlane.f32.xlu1 %v5411_v38 }
0x3bea   :  { %v5410_v37 = vpop.xlane.xlu1 %5409 }
0x3beb   :  { %v5414_v40 = vmul.f32 %v5410_v37, %v6566_v41 }
0x3bed   :  { %v5416_v42 = vadd.f32 1e-05, %v5414_v40 }
0x3bef   :  { %6370 = vrsqrt.f32 %v5416_v42  ;;  %vm5424_vm7 = vweird.f32 %v5416_v42 }
0x3bf5   :  { %v6371_v59 = vpop.eup %6370 }
0x3bf6   :  { %v5419_v43 = vmul.f32 %v6371_v59, %v5416_v42  ;;  %vm5425_vm0 = vweird.f32 %v6371_v59 }
0x3bf7   :  { %vm5426_vm8 = vmor %vm5424_vm7, %vm5425_vm0 }
0x3bf8   :  { %v5420_v44 = vmul.f32 %v6371_v59, %v5419_v43 }
0x3bfa   :  { %v5421_v3 = vmul.f32 0.5, %v5420_v44 }
0x3bfc   :  { %v5422_v46 = vsub.f32 1.5, %v5421_v3 }
0x3bfe   :  { %v5423_v39 = vmul.f32 %v6371_v59, %v5422_v46 }
0x3c00   :  { %v5427_v48 = vsel %vm5426_vm8, %v6371_v59, %v5423_v39 }
0x3c01   :  { %v5438_v49 = vmul.f32 %v5427_v48, %v5404_v0 }
0x3c03   :  { %v5443_v51 = vmul.f32 %v6049_v30, %v5438_v49 }
0x3c05   :  { %v7613_v52 = vadd.f32 %v6050_v12, %v5443_v51 }
0x3c07   :  { %5479 = vperm.xlu2 %5960, %v7613_v52   ;;  %5454 = vperm.xlu1 %5964, %v7613_v52  }
0x3c0a   :  { %v5413_v54 = vpop.xlane.xlu1 %5412 }
0x3c0b   :  { %v5415_v55 = vmul.f32 %v5413_v54, %v6566_v41 }
0x3c0d   :  { %v5417_v56 = vadd.f32 1e-05, %v5415_v55 }
0x3c0f   :  { %6372 = vrsqrt.f32 %v5417_v56  ;;  %5965 = vset.pattern.permute.xlu1 %v6406_v4  ;;  %5969 = vset.pattern.permute.xlu2 %v6405_v2  ;;  %vm5434_vm11 = vweird.f32 %v5417_v56 }
0x3c10   :  { %5466 = vperm.xlu1 %5965, %v7613_v52  }
0x3c15   :  { %v6373_v18 = vpop.eup %6372 }
0x3c16   :  { %v5429_v57 = vmul.f32 %v6373_v18, %v5417_v56  ;;  %vm5435_vm10 = vweird.f32 %v6373_v18 }
0x3c17   :  { %vm5436_vm12 = vmor %vm5434_vm11, %vm5435_vm10 }
0x3c18   :  { %v5430_v58 = vmul.f32 %v6373_v18, %v5429_v57  ;;  %5966 = vset.pattern.permute.xlu1 %v6405_v2 }
0x3c1a   :  { %v5431_v60 = vmul.f32 0.5, %v5430_v58 }
0x3c1c   :  { %v5432_v61 = vsub.f32 1.5, %v5431_v60 }
0x3c1e   :  { %v5433_v33 = vmul.f32 %v6373_v18, %v5432_v61 }
0x3c20   :  { %v5437_v63 = vsel %vm5436_vm12, %v6373_v18, %v5433_v33 }
0x3c21   :  { %v5439_v5 = vmul.f32 %v5437_v63, %v5405_v35  ;;  %v6053_v63 = vld [vmem:[%s7682_s7 + $0x9] ss:$0 sm:$0xff] }
0x3c23   :  { %v5444_v6 = vmul.f32 %v6049_v30, %v5439_v5 }
0x3c25   :  { %v5449_v47 = vadd.f32 %v6050_v12, %v5444_v6 }
0x3c27   :  { %5470 = vperm.xlu0 %5967, %v5449_v47   ;;  %5459 = vperm.xlu1 %5966, %v5449_v47  }
0x3c2f   :  { %5968 = vset.pattern.permute.xlu1 %v6404_v1 }
0x3c30   :  { %5483 = vperm.xlu1 %5968, %v5449_v47  }
0x3c38   :  { %5971 = vset.pattern.permute.xlu1 %v6405_v2 }
0x3c61   :  { %v5480_v15 = vpop.permute.xlu2 %5479 }
0x3c62   :  { %v5487_v19 = vmul.f32 %v5486_v14, %v5480_v15 }
0x3c79   :  { %v5455_v2 = vpop.permute.xlu1 %5454 }
0x3c7a   :  { %v5463_v16 = vmul.f32 %v5462_v13, %v5455_v2 }
0x3c82   :  { %v5467_v21 = vpop.permute.xlu1 %5466 }
0x3c83   :  { %v5474_v17 = vmul.f32 %v5473_v53, %v5467_v21 }
0x3c85   :  { %v5476_v22 = vadd.f32 %v5474_v17, %v5463_v16 }
0x3c87   :  { %v5489_v45 = vadd.f32 %v5487_v19, %v5476_v22  ;;  %v5601_v22 = vld [vmem:[%s7688_s13] sm:$0x7]  ;;  %s6410_s13 = smov [#allocation2]  }
0x3c88   :  { %s5658_s25 = sshll.u32 %s6410_s13, 4  ;;  %s5659_s25 = int_to_ptr.vmem [resolvable:$true] %s5658_s25 }
0x3c89   :  { %v5496_v62 = vadd.f32 %v6051_v20, %v5489_v45  ;;  %v5625_v45 = vrot.slane %v5601_v22, 2 }
0x3c8b   :  { %v5498_v23 = vmax.f32 %v5496_v62, 0.0  ;;  %v5613_v62 = vrot.slane %v5601_v22, 1 }
0x3c8d   :  { %5822 = vmatmul.msk.f32.vlgmr.msra.gmra.mxu1 %vm512_vm9, %v5498_v23  ;;  %v5639_v23 = vrot.slane %v5601_v22, 3 }
0x3c99   :  { %v5460_v24 = vpop.permute.xlu1 %5459  ;;  %v5471_v25 = vpop.permute.xlu0 %5470 }
0x3c9a   :  { %v5475_v26 = vmul.f32 %v5473_v53, %v5471_v25  ;;  %v5464_v27 = vmul.f32 %v5462_v13, %v5460_v24 }
0x3c9c   :  { %v5477_v29 = vadd.f32 %v5475_v26, %v5464_v27 }
0x3ca2   :  { %v5484_v28 = vpop.permute.xlu1 %5483 }
0x3ca3   :  { %v5488_v0 = vmul.f32 %v5486_v14, %v5484_v28 }
0x3ca5   :  { %v5490_v50 = vadd.f32 %v5488_v0, %v5477_v29 }
0x3ca7   :  { %v5497_v31 = vadd.f32 %v6051_v20, %v5490_v50 }
0x3ca9   :  { %v5499_v32 = vmax.f32 %v5497_v31, 0.0 }
0x3cab   :  { %5823 = vmatmul.msk.f32.gmra.mxu1 %vm512_vm9, %v5499_v32 }
0x3d0a   :  { %v5528_v35 = vpop.f32.mrf.mxu1 }
0x3d0b   :  { %v5539_v36 = vadd.f32 %v6052_v34, %v5528_v35 }
0x3d0d   :  { %v5541_v38 = vadd.f32 %v5539_v36, %v7613_v52 }
0x3d0f   :  { %v5547_v37 = vsel %vm398_vm1, %v5541_v38, 0.0 }
0x3d10   :  { %5548 = vadd.xlane.f32.xlu1 %v5547_v37 }
0x3d28   :  { %v5531_v40 = vpop.f32.mrf.mxu1 }
0x3d29   :  { %v5540_v42 = vadd.f32 %v6052_v34, %v5531_v40 }
0x3d2b   :  { %v5542_v59 = vadd.f32 %v5540_v42, %v5449_v47  ;;  %v6054_v47 = vld [vmem:[%s7683_s8 + $0x9] ss:$0 sm:$0xff] }
0x3d2d   :  { %v5550_v43 = vsel %vm398_vm1, %v5542_v59, 0.0 }
0x3d2e   :  { %5551 = vadd.xlane.f32.xlu2 %v5550_v43 }
0x3d83   :  { %v5549_v44 = vpop.xlane.xlu1 %5548 }
0x3d84   :  { %v5553_v3 = vmul.f32 %v5549_v44, %v6566_v41 }
0x3d86   :  { %v5555_v46 = vsub.f32 %v5541_v38, %v5553_v3 }
0x3d88   :  { %v5557_v39 = vmul.f32 %v5555_v46, %v5555_v46 }
0x3d8a   :  { %v5559_v30 = vsel %vm398_vm1, %v5557_v39, 0.0 }
0x3d8b   :  { %5560 = vadd.xlane.f32.xlu0 %v5559_v30 }
0x3da1   :  { %v5552_v48 = vpop.xlane.xlu2 %5551 }
0x3da2   :  { %v5554_v49 = vmul.f32 %v5552_v48, %v6566_v41 }
0x3da4   :  { %v5556_v12 = vsub.f32 %v5542_v59, %v5554_v49 }
0x3da6   :  { %v5558_v51 = vmul.f32 %v5556_v12, %v5556_v12 }
0x3da8   :  { %v5562_v52 = vsel %vm398_vm1, %v5558_v51, 0.0 }
0x3da9   :  { %5563 = vadd.xlane.f32.xlu1 %v5562_v52 }
0x3dfe   :  { %v5561_v54 = vpop.xlane.xlu0 %5560 }
0x3dff   :  { %v5565_v55 = vmul.f32 %v5561_v54, %v6566_v41 }
0x3e01   :  { %v5567_v56 = vadd.f32 1e-05, %v5565_v55 }
0x3e03   :  { %6374 = vrsqrt.f32 %v5567_v56  ;;  %vm5575_vm13 = vweird.f32 %v5567_v56 }
0x3e09   :  { %v6375_v18 = vpop.eup %6374 }
0x3e0a   :  { %v5570_v57 = vmul.f32 %v6375_v18, %v5567_v56  ;;  %vm5576_vm9 = vweird.f32 %v6375_v18 }
0x3e0b   :  { %vm5577_vm14 = vmor %vm5575_vm13, %vm5576_vm9 }
0x3e0c   :  { %v5571_v58 = vmul.f32 %v6375_v18, %v5570_v57 }
0x3e0e   :  { %v5572_v60 = vmul.f32 0.5, %v5571_v58 }
0x3e10   :  { %v5573_v61 = vsub.f32 1.5, %v5572_v60 }
0x3e12   :  { %v5574_v33 = vmul.f32 %v6375_v18, %v5573_v61 }
0x3e14   :  { %v5578_v5 = vsel %vm5577_vm14, %v6375_v18, %v5574_v33 }
0x3e15   :  { %v5589_v6 = vmul.f32 %v5578_v5, %v5555_v46 }
0x3e17   :  { %v5594_v7 = vmul.f32 %v6053_v63, %v5589_v6 }
0x3e19   :  { %v5599_v8 = vadd.f32 %v6054_v47, %v5594_v7 }
0x3e1b   :  { %5604 = vperm.xlu2 %5969, %v5599_v8  }
0x3e1c   :  { %v5564_v9 = vpop.xlane.xlu1 %5563 }
0x3e1d   :  { %v5566_v10 = vmul.f32 %v5564_v9, %v6566_v41 }
0x3e1f   :  { %v5568_v2 = vadd.f32 1e-05, %v5566_v10 }
0x3e21   :  { %6376 = vrsqrt.f32 %v5568_v2  ;;  %vm5585_vm15 = vweird.f32 %v5568_v2 }
0x3e23   :  { %5970 = vset.pattern.permute.xlu2 %v6406_v4 }
0x3e24   :  { %5618 = vperm.xlu2 %5970, %v5599_v8  }
0x3e27   :  { %v6377_v11 = vpop.eup %6376 }
0x3e28   :  { %v5580_v13 = vmul.f32 %v6377_v11, %v5568_v2  ;;  %vm5586_vm1 = vweird.f32 %v6377_v11 }
0x3e29   :  { %vm5587_vm2 = vmor %vm5585_vm15, %vm5586_vm1 }
0x3e2a   :  { %v5581_v53 = vmul.f32 %v6377_v11, %v5580_v13 }
0x3e2c   :  { %v5582_v14 = vmul.f32 0.5, %v5581_v53  ;;  %5973 = vset.pattern.permute.xlu2 %v6404_v1 }
0x3e2e   :  { %v5583_v15 = vsub.f32 1.5, %v5582_v14 }
0x3e30   :  { %v5584_v21 = vmul.f32 %v6377_v11, %v5583_v15 }
0x3e32   :  { %v5588_v16 = vsel %vm5587_vm2, %v6377_v11, %v5584_v21 }
0x3e33   :  { %v5590_v17 = vmul.f32 %v5588_v16, %v5556_v12 }
0x3e35   :  { %v5595_v19 = vmul.f32 %v6053_v63, %v5590_v17 }
0x3e37   :  { %v5600_v41 = vadd.f32 %v6054_v47, %v5595_v19 }
0x3e39   :  { %5636 = vperm.xlu2 %5973, %v5600_v41   ;;  %5622 = vperm.xlu0 %5967, %v5600_v41  }
0x3e3a   :  { %5609 = vperm.xlu1 %5971, %v5600_v41  }
0x3e41   :  { %5974 = vset.pattern.permute.xlu0 %v6404_v1 }
0x3e42   :  { %5972 = vset.pattern.permute.xlu1 %v6404_v1  ;;  %v6055_v1 = vld [vmem:[%s7689_s14] ss:$0 sm:$0xff]  ;;  %s6411_s14 = smov 16  }
0x3e43   :  { %5632 = vperm.xlu1 %5972, %v5599_v8  }
0x3e75   :  { %v5605_v4 = vpop.permute.xlu2 %5604 }
0x3e76   :  { %v5615_v34 = vmul.f32 %v5613_v62, %v5605_v4 }
0x3e7e   :  { %v5619_v20 = vpop.permute.xlu2 %5618 }
0x3e7f   :  { %v5627_v31 = vmul.f32 %v5625_v45, %v5619_v20 }
0x3e81   :  { %v5629_v36 = vadd.f32 %v5627_v31, %v5615_v34 }
0x3e93   :  { %v5637_v25 = vpop.permute.xlu2 %5636 }
0x3e94   :  { %v5642_v29 = vmul.f32 %v5639_v23, %v5637_v25 }
0x3eab   :  { %v5623_v24 = vpop.permute.xlu0 %5622 }
0x3eac   :  { %v5628_v26 = vmul.f32 %v5625_v45, %v5623_v24  ;;  %v5610_v27 = vpop.permute.xlu1 %5609 }
0x3ead   :  { %v5616_v28 = vmul.f32 %v5613_v62, %v5610_v27 }
0x3eaf   :  { %v5630_v0 = vadd.f32 %v5628_v26, %v5616_v28 }
0x3eb1   :  { %v5644_v50 = vadd.f32 %v5642_v29, %v5630_v0 }
0x3eb3   :  { %v5650_v32 = vadd.f32 %v6055_v1, %v5644_v50 }
0x3eb5   :  { %5653 = vst.msk [vmem:[#allocation2 - $0x6] sm:$0x80] %vm5651_vm3, %v5650_v32  ;;  %v5633_v35 = vpop.permute.xlu1 %5632 }
0x3eb6   :  { %v5641_v38 = vmul.f32 %v5639_v23, %v5633_v35 }
0x3eb8   :  { %v5643_v37 = vadd.f32 %v5641_v38, %v5629_v36 }
0x3eba   :  { %v5649_v40 = vadd.f32 %v6055_v1, %v5643_v37 }
0x3ebc   :  { %5652 = vst.msk [vmem:[#allocation2 - $0x7] sm:$0x80] %vm5651_vm3, %v5649_v40 }
0x3ebd   :  { %5666 = dma.vmem_to_hbm [thread:$0]  %s5659_s25, 32, %s5661_s4, [#allocation3], %s6411_s14, %s6411_s14, %s6412_s16  }
0x3ebe   :  { %6402 = dma.done.wait [#allocation3], 32  }
0x3ebf   :  { %6403 = vsyncadd [#allocation3], 4294967264 }
0x3ec0   :  { %5671 = vsyncpa [#allocation3], 1 }

</bundles_post_ra>
